<compile_context>
chip_gen: v7x
topology: tpu7x:2x2x1
jax: 0.10.0
libtpu: 0.0.40
codegen_flags: <defaults>
</compile_context>

<pallas_src>
import functools

import jax
import jax.numpy as jnp
import numpy as np
from jax import lax
from jax.experimental import pallas as pl
from jax.experimental.pallas import tpu as pltpu

FEATURE_DIM = 1536  # fixed by nn.Linear(1536, 1536) in the module
_LANE = 128
_D_CHUNK = 512      # feature-axis chunk for the reduction (1536 = 3 * 512)


def _round_up(x, m):
    return ((x + m - 1) // m) * m


def _const_spec(shape):
    """VMEM-resident constant: constant index_map, single-buffered if supported."""
    idx_map = lambda i: tuple(0 for _ in shape)
    try:
        return pl.BlockSpec(shape, idx_map, pipeline_mode=pl.Buffered(1))
    except (TypeError, AttributeError, ValueError):
        return pl.BlockSpec(shape, idx_map)


def fkd_kernel(*refs, dist_func, project):
    """One batch tile: optional bf16 projection matmul + chunked per-row distance.

    refs = (t_ref, s_ref[, wT_ref, b_ref], dis_ref)
      t_ref, s_ref : (TM, D)
      wT_ref       : (D, D)   pre-transposed Linear weight, bf16
      b_ref        : (1, D)   f32 bias
      dis_ref      : (1, TM)  lane-dense per-row distances for this tile
    """
    if project:
        t_ref, s_ref, w_ref, b_ref, dis_ref = refs
    else:
        t_ref, s_ref, dis_ref = refs

    tm, d = t_ref.shape

    if project:
        # torch Linear: y = x @ W^T + b.  W is already transposed in the wrapper,
        # both operands are bf16 (fast MXU path), accumulation is f32.
        s_proj = lax.dot_general(
            s_ref[...].astype(jnp.bfloat16), w_ref[...],
            dimension_numbers=(((1,), (0,)), ((), ())),
            preferred_element_type=jnp.float32,
        ) + b_ref[...]
    else:
        s_proj = None

    chunks = [(off, min(_D_CHUNK, d - off)) for off in range(0, d, _D_CHUNK)]

    def get_chunk(off, sz):
        t_c = t_ref[:, off:off + sz].astype(jnp.float32)
        if project:
            s_c = s_proj[:, off:off + sz]
        else:
            s_c = s_ref[:, off:off + sz].astype(jnp.float32)
        return t_c, s_c

    if dist_func in ("mse", "norm"):
        acc = jnp.zeros((tm,), jnp.float32)
        for off, sz in chunks:
            t_c, s_c = get_chunk(off, sz)
            diff = t_c - s_c
            acc = acc + jnp.sum(diff * diff, axis=1)
        dis = acc / d if dist_func == "mse" else jnp.sqrt(acc)
    elif dist_func == "cos":
        eps = 1e-8
        acc_dot = jnp.zeros((tm,), jnp.float32)
        acc_tt = jnp.zeros((tm,), jnp.float32)
        acc_ss = jnp.zeros((tm,), jnp.float32)
        for off, sz in chunks:
            t_c, s_c = get_chunk(off, sz)
            acc_dot = acc_dot + jnp.sum(t_c * s_c, axis=1)
            acc_tt = acc_tt + jnp.sum(t_c * t_c, axis=1)
            acc_ss = acc_ss + jnp.sum(s_c * s_c, axis=1)
        tn = jnp.maximum(jnp.sqrt(acc_tt), eps)
        sn = jnp.maximum(jnp.sqrt(acc_ss), eps)
        dis = 1.0 - acc_dot / (tn * sn)
    else:
        raise NotImplementedError(dist_func)

    # Lane-dense store: per-row results along the 128-lane axis (TM % 128 == 0).
    dis_ref[...] = dis.reshape(1, -1)


def fkd_forward(t_rep, s_rep, weight=None, bias=None, *, dist_func="mse",
                project=True, block_rows=512, vmem_limit_bytes=48 << 20):
    """Returns (dis_mean [scalar], dis [N]) matching FKD.forward.

    block_rows / vmem_limit_bytes defaults are safe on v5e/v6e/v7x; on v5e/v6e
    (128 MiB VMEM) use block_rows=1024-2048 with vmem_limit_bytes ~96 MiB.
    """
    n, d = t_rep.shape

    # Tile size: multiple of 128 so the lane-dense dis output is unmasked.
    tm = min(_round_up(block_rows, _LANE), _round_up(n, _LANE))
    num_tiles = pl.cdiv(n, tm)
    # v7x megacore: keep the 'parallel' tile count balanced across the 2 TCs.
    if num_tiles > 1 and num_tiles % 2 == 1:
        num_tiles += 1
    n_pad = num_tiles * tm
    if n_pad != n:
        pad = ((0, n_pad - n), (0, 0))
        t_rep = jnp.pad(t_rep, pad)
        s_rep = jnp.pad(s_rep, pad)

    row_spec = pl.BlockSpec((tm, d), lambda i: (i, 0))
    args = [t_rep, s_rep]
    in_specs = [row_spec, row_spec]
    if project:
        assert weight is not None and bias is not None
        # One-time wrapper-side transpose + bf16 cast of the projector weight:
        # kernel contracts with plain (((1,),(0,))) on the bf16 MXU path.
        w_t = jnp.transpose(weight).astype(jnp.bfloat16)
        b2 = bias.reshape(1, d).astype(jnp.float32)
        args += [w_t, b2]
        in_specs += [_const_spec((d, d)), _const_spec((1, d))]

    kernel = functools.partial(fkd_kernel, dist_func=dist_func, project=project)
    dis2d = pl.pallas_call(
        kernel,
        grid=(num_tiles,),
        out_shape=jax.ShapeDtypeStruct((num_tiles, tm), jnp.float32),
        in_specs=in_specs,
        out_specs=pl.BlockSpec((1, tm), lambda i: (i, 0)),
        compiler_params=pltpu.CompilerParams(
            dimension_semantics=("parallel",),   # independent rows -> megacore
            vmem_limit_bytes=vmem_limit_bytes,
        ),
    )(*args)

    dis = dis2d.reshape(-1)[:n]          # drop batch padding
    return jnp.mean(dis), dis            # global mean reduced in the wrapper


def _reference(t, s, w, b, dist_func, project):
    t = t.astype(jnp.float32)
    s = s.astype(jnp.float32)
    if project:
        s = s @ w.T.astype(jnp.float32) + b.astype(jnp.float32)
    if dist_func == "mse":
        dis = jnp.sum((t - s) ** 2, axis=1) / t.shape[1]
    elif dist_func == "norm":
        dis = jnp.sqrt(jnp.sum((t - s) ** 2, axis=1))
    else:  # cos
        eps = 1e-8
        dot = jnp.sum(t * s, axis=1)
        tn = jnp.sqrt(jnp.sum(t * t, axis=1))
        sn = jnp.sqrt(jnp.sum(s * s, axis=1))
        dis = 1.0 - dot / (jnp.maximum(tn, eps) * jnp.maximum(sn, eps))
    return jnp.mean(dis), dis


if __name__ == "__main__":
    key = jax.random.PRNGKey(0)
    k_t, k_s = jax.random.split(key)

    # Deterministic parameter init matching nn.init.eye_ / nn.init.zeros_.
    weight = jnp.eye(FEATURE_DIM, dtype=jnp.float32)
    bias = jnp.zeros((FEATURE_DIM,), dtype=jnp.float32)

    # bf16 matmul operands vs. f32 torch reference -> loosen tolerances slightly.
    RTOL, ATOL = 2e-2, 2e-3

    # --- small batch (single tile) -------------------------------------------
    batch = 8
    t_rep = jax.random.normal(k_t, (batch, FEATURE_DIM), dtype=jnp.float32)
    s_rep = jax.random.normal(k_s, (batch, FEATURE_DIM), dtype=jnp.float32)

    for dist_func in ("mse", "norm", "cos"):
        mean_out, dis_out = fkd_forward(
            t_rep, s_rep, weight, bias, dist_func=dist_func, project=True)
        jax.block_until_ready((mean_out, dis_out))
        ref_mean, ref_dis = _reference(t_rep, s_rep, weight, bias, dist_func, True)
        np.testing.assert_allclose(np.asarray(dis_out), np.asarray(ref_dis),
                                   rtol=RTOL, atol=ATOL)
        np.testing.assert_allclose(np.asarray(mean_out), np.asarray(ref_mean),
                                   rtol=RTOL, atol=ATOL)

    # No-projector path (args.project = False) -- pure f32 streaming.
    mean_np, dis_np = fkd_forward(t_rep, s_rep, dist_func="mse", project=False)
    jax.block_until_ready((mean_np, dis_np))
    ref_mean_np, ref_dis_np = _reference(t_rep, s_rep, weight, bias, "mse", False)
    np.testing.assert_allclose(np.asarray(dis_np), np.asarray(ref_dis_np),
                               rtol=1e-4, atol=1e-4)
    np.testing.assert_allclose(np.asarray(mean_np), np.asarray(ref_mean_np),
                               rtol=1e-4, atol=1e-4)

    # --- multi-tile + padding path (grid, even-tile balance, lane-dense out) ---
    batch2 = 300  # with block_rows=128 -> 3 tiles, bumped to 4 for TC balance
    k_t2, k_s2 = jax.random.split(jax.random.PRNGKey(1))
    t2 = jax.random.normal(k_t2, (batch2, FEATURE_DIM), dtype=jnp.float32)
    s2 = jax.random.normal(k_s2, (batch2, FEATURE_DIM), dtype=jnp.float32)
    for dist_func in ("mse", "cos"):
        mean_out, dis_out = fkd_forward(
            t2, s2, weight, bias, dist_func=dist_func, project=True, block_rows=128)
        jax.block_until_ready((mean_out, dis_out))
        ref_mean, ref_dis = _reference(t2, s2, weight, bias, dist_func, True)
        np.testing.assert_allclose(np.asarray(dis_out), np.asarray(ref_dis),
                                   rtol=RTOL, atol=ATOL)
        np.testing.assert_allclose(np.asarray(mean_out), np.asarray(ref_mean),
                                   rtol=RTOL, atol=ATOL)

    print("KERNEL_OK")
</pallas_src>

<mosaic_0001>
module attributes {stable_mosaic.version = 11 : i64} {
  func.func @fkd_kernel(%arg0: i32, %arg1: memref<128x1536xf32, #tpu.memory_space<vmem>>, %arg2: memref<128x1536xf32, #tpu.memory_space<vmem>>, %arg3: memref<1536x1536xbf16, #tpu.memory_space<vmem>>, %arg4: memref<1x1536xf32, #tpu.memory_space<vmem>>, %arg5: memref<1x128xf32, #tpu.memory_space<vmem>>) attributes {dimension_semantics = [#tpu.dimension_semantics<parallel>], iteration_bounds = array<i64: 1>, scalar_prefetch = 0 : i64, scratch_operands = 0 : i64, tpu.core_type = #tpu.core_type<tc>, window_params = [{transform_indices = @transform_0, window_bounds = array<i64: 128, 1536>}, {transform_indices = @transform_1, window_bounds = array<i64: 128, 1536>}, {pipeline_mode = #tpu.pipeline_mode<synchronous>, transform_indices = @transform_2, window_bounds = array<i64: 1536, 1536>}, {pipeline_mode = #tpu.pipeline_mode<synchronous>, transform_indices = @transform_3, window_bounds = array<i64: 1, 1536>}, {transform_indices = @transform_4, window_bounds = array<i64: 1, 128>}]} {
    %c0 = arith.constant 0 : index
    %c0_0 = arith.constant 0 : index
    %0 = vector.load %arg2[%c0, %c0_0] : memref<128x1536xf32, #tpu.memory_space<vmem>>, vector<128x1536xf32>
    %1 = arith.truncf %0 : vector<128x1536xf32> to vector<128x1536xbf16>
    %c0_1 = arith.constant 0 : index
    %c0_2 = arith.constant 0 : index
    %2 = vector.load %arg3[%c0_1, %c0_2] : memref<1536x1536xbf16, #tpu.memory_space<vmem>>, vector<1536x1536xbf16>
    %cst = arith.constant dense<0.000000e+00> : vector<128x1536xf32>
    %3 = tpu.matmul %1, %2, %cst {dimension_numbers = #tpu.dot_dimension_numbers<[1], [0], [0], [1], [0, 0, 1, 1], [], []>} : vector<128x1536xbf16>, vector<1536x1536xbf16>, vector<128x1536xf32> -> vector<128x1536xf32>
    %c0_3 = arith.constant 0 : index
    %c0_4 = arith.constant 0 : index
    %4 = vector.load %arg4[%c0_3, %c0_4] : memref<1x1536xf32, #tpu.memory_space<vmem>>, vector<1x1536xf32>
    %5 = vector.broadcast %4 : vector<1x1536xf32> to vector<128x1536xf32>
    %6 = arith.addf %3, %5 : vector<128x1536xf32>
    %cst_5 = arith.constant 0.000000e+00 : f32
    %7 = vector.broadcast %cst_5 : f32 to vector<128xf32>
    %c0_6 = arith.constant 0 : index
    %c0_7 = arith.constant 0 : index
    %8 = vector.load %arg1[%c0_6, %c0_7] : memref<128x1536xf32, #tpu.memory_space<vmem>>, vector<128x512xf32>
    %9 = vector.extract_strided_slice %6 {offsets = [0, 0], sizes = [128, 512], strides = [1, 1]} : vector<128x1536xf32> to vector<128x512xf32>
    %10 = arith.subf %8, %9 : vector<128x512xf32>
    %11 = arith.mulf %10, %10 : vector<128x512xf32>
    %cst_8 = arith.constant dense<0.000000e+00> : vector<128xf32>
    %12 = vector.multi_reduction <add>, %11, %cst_8 [1] : vector<128x512xf32> to vector<128xf32>
    %13 = arith.addf %7, %12 : vector<128xf32>
    %c0_9 = arith.constant 0 : index
    %c512 = arith.constant 512 : index
    %14 = vector.load %arg1[%c0_9, %c512] : memref<128x1536xf32, #tpu.memory_space<vmem>>, vector<128x512xf32>
    %15 = vector.extract_strided_slice %6 {offsets = [0, 512], sizes = [128, 512], strides = [1, 1]} : vector<128x1536xf32> to vector<128x512xf32>
    %16 = arith.subf %14, %15 : vector<128x512xf32>
    %17 = arith.mulf %16, %16 : vector<128x512xf32>
    %cst_10 = arith.constant dense<0.000000e+00> : vector<128xf32>
    %18 = vector.multi_reduction <add>, %17, %cst_10 [1] : vector<128x512xf32> to vector<128xf32>
    %19 = arith.addf %13, %18 : vector<128xf32>
    %c0_11 = arith.constant 0 : index
    %c1024 = arith.constant 1024 : index
    %20 = vector.load %arg1[%c0_11, %c1024] : memref<128x1536xf32, #tpu.memory_space<vmem>>, vector<128x512xf32>
    %21 = vector.extract_strided_slice %6 {offsets = [0, 1024], sizes = [128, 512], strides = [1, 1]} : vector<128x1536xf32> to vector<128x512xf32>
    %22 = arith.subf %20, %21 : vector<128x512xf32>
    %23 = arith.mulf %22, %22 : vector<128x512xf32>
    %cst_12 = arith.constant dense<0.000000e+00> : vector<128xf32>
    %24 = vector.multi_reduction <add>, %23, %cst_12 [1] : vector<128x512xf32> to vector<128xf32>
    %25 = arith.addf %19, %24 : vector<128xf32>
    %cst_13 = arith.constant 1.536000e+03 : f32
    %26 = vector.broadcast %cst_13 : f32 to vector<128xf32>
    %27 = arith.divf %25, %26 : vector<128xf32>
    %28 = vector.shape_cast %27 : vector<128xf32> to vector<1x128xf32>
    %c0_14 = arith.constant 0 : index
    %c0_15 = arith.constant 0 : index
    %29 = vector.load %arg5[%c0_14, %c0_15] : memref<1x128xf32, #tpu.memory_space<vmem>>, vector<1x128xf32>
    tpu.vector_store %arg5[%c0_14, %c0_15], %28 {strides = array<i32>} : memref<1x128xf32, #tpu.memory_space<vmem>>, vector<1x128xf32>,
    return
  }
  func.func @transform_0(%arg0: i32) -> (i32, i32) {
    %c0_i32 = arith.constant 0 : i32
    %c0_i32_0 = arith.constant 0 : i32
    return %arg0, %c0_i32 : i32, i32
  }
  func.func @transform_1(%arg0: i32) -> (i32, i32) {
    %c0_i32 = arith.constant 0 : i32
    %c0_i32_0 = arith.constant 0 : i32
    return %arg0, %c0_i32 : i32, i32
  }
  func.func @transform_2(%arg0: i32) -> (i32, i32) {
    %c0_i32 = arith.constant 0 : i32
    %c0_i32_0 = arith.constant 0 : i32
    %c0_i32_1 = arith.constant 0 : i32
    return %c0_i32, %c0_i32_0 : i32, i32
  }
  func.func @transform_3(%arg0: i32) -> (i32, i32) {
    %c0_i32 = arith.constant 0 : i32
    %c0_i32_0 = arith.constant 0 : i32
    %c0_i32_1 = arith.constant 0 : i32
    return %c0_i32, %c0_i32_0 : i32, i32
  }
  func.func @transform_4(%arg0: i32) -> (i32, i32) {
    %c0_i32 = arith.constant 0 : i32
    %c0_i32_0 = arith.constant 0 : i32
    return %arg0, %c0_i32 : i32, i32
  }
}

</mosaic_0001>

<bundles_post_ra>
// kernel: tpu_custom_call.1
= control target key start
LH: loop header
LB: loop body
LE: loop exit
PB: predicated region body
PF: predicated region fallthrough
CT: control target
= control target key end

     0   :  { %9 = vsyncpa [#allocation3], 0  ;;  %s17938_s0 = inlined_call_operand.hbm [shape: f32[128,1536], index: 0, kind: input, shape index: {}]   ;;  %s17939_s1 = inlined_call_operand.hbm [shape: f32[128,1536], index: 1, kind: input, shape index: {}]   ;;  %s17940_s2 = inlined_call_operand.hbm [shape: bf16[1536,1536], index: 2, kind: input, shape index: {}]   ;;  %s17941_s3 = inlined_call_operand.hbm [shape: f32[1,1536], index: 3, kind: input, shape index: {}]   ;;  %s17942_s4 = inlined_call_operand.hbm [shape: f32[1,128], index: 4, kind: output, shape index: {}]  }
   0x1   :  { %10 = vsyncpa [#allocation6], 0 }
   0x2   :  { %11 = vsyncpa [#allocation9], 0 }
   0x3   :  { %12 = vsyncpa [#allocation4], 0  ;;  %s16590_s15 = smov [#allocation5]   ;;  %s16591_s17 = smov [#allocation2]  }
   0x4   :  { %s30_s16 = sshll.u32 %s16590_s15, 4  ;;  %s18_s18 = sshll.u32 %s16591_s17, 4  ;;  %s31_s16 = int_to_ptr.vmem [resolvable:$true] %s30_s16  ;;  %s16624_s18 = int_to_ptr.vmem [resolvable:$true] %s18_s18 }
   0x5   :  { %s16472_s21 = scalar_lea.hbm %s17939_s1, 24576 }
   0x6   :  { %p16473_p0 = scmp.ne.s32.totalorder %s17939_s1, %s16472_s21  ;;  %p16476_p1 = scmp.lt.u32.totalorder %s16472_s21, %s17939_s1 }
   0x8   :  { %p16478_p2 = pnand %p16476_p1, %p16473_p0 }
   0xa   :  { %16481 = shalt.err (!%p16478_p2)
}
   0xb   :  { %s16482_s26 = scalar_lea.vmem %s31_s16, 24576  ;;  %p16487_p4 = scmp.lt.s32.totalorder %s31_s16, %s31_s16 }
   0xc   :  { %p16483_p3 = scmp.ne.s32.totalorder %s31_s16, %s16482_s26  ;;  %p16488_p5 = scmp.lt.s32.totalorder %s16482_s26, %s16482_s26 }
   0xe   :  { %p16489_p6 = por %p16488_p5, %p16487_p4 }
  0x10   :  { %p16490_p7 = pnand %p16489_p6, %p16483_p3 }
  0x12   :  { %16493 = shalt.err (!%p16490_p7)
}
  0x13   :  { %s16592_s27 = smov 1536   ;;  %s16593_s28 = smov 96  }
  0x14   :  { %36 = dma.hbm_to_vmem [thread:$0]  %s17939_s1, 24576, %s31_s16, [#allocation6], %s16592_s27, %s16592_s27, %s16593_s28  }
  0x15   :  { %s16494_s7 = scalar_lea.hbm %s17938_s0, 24576 }
  0x16   :  { %p16495_p8 = scmp.ne.s32.totalorder %s17938_s0, %s16494_s7  ;;  %p16498_p9 = scmp.lt.u32.totalorder %s16494_s7, %s17938_s0 }
  0x18   :  { %p16500_p10 = pnand %p16498_p9, %p16495_p8 }
  0x1a   :  { %16503 = shalt.err (!%p16500_p10)
}
  0x1b   :  { %s16504_s12 = scalar_lea.vmem %s16624_s18, 24576  ;;  %p16509_p12 = scmp.lt.s32.totalorder %s16624_s18, %s16624_s18 }
  0x1c   :  { %p16505_p11 = scmp.ne.s32.totalorder %s16624_s18, %s16504_s12  ;;  %p16510_p13 = scmp.lt.s32.totalorder %s16504_s12, %s16504_s12 }
  0x1e   :  { %p16511_p0 = por %p16510_p13, %p16509_p12 }
  0x20   :  { %p16512_p1 = pnand %p16511_p0, %p16505_p11 }
  0x22   :  { %16515 = shalt.err (!%p16512_p1)
}
  0x23   :  { %24 = dma.hbm_to_vmem [thread:$0]  %s17938_s0, 24576, %s16624_s18, [#allocation3], %s16592_s27, %s16592_s27, %s16593_s28  }
  0x24   :  { %s16594_s14 = smov [#allocation7]   ;;  %s16516_s19 = scalar_lea.hbm %s17940_s2, 147456 }
  0x25   :  { %s42_s15 = sshll.u32 %s16594_s14, 4  ;;  %p16517_p2 = scmp.ne.s32.totalorder %s17940_s2, %s16516_s19  ;;  %s43_s15 = int_to_ptr.vmem [resolvable:$true] %s42_s15 }
  0x26   :  { %p16520_p3 = scmp.lt.u32.totalorder %s16516_s19, %s17940_s2 }
  0x28   :  { %p16522_p4 = pnand %p16520_p3, %p16517_p2 }
  0x2a   :  { %16525 = shalt.err (!%p16522_p4)
}
  0x2b   :  { %s16526_s24 = scalar_lea.vmem %s43_s15, 147456  ;;  %p16531_p6 = scmp.lt.s32.totalorder %s43_s15, %s43_s15 }
  0x2c   :  { %p16527_p5 = scmp.ne.s32.totalorder %s43_s15, %s16526_s24  ;;  %p16532_p7 = scmp.lt.s32.totalorder %s16526_s24, %s16526_s24 }
  0x2e   :  { %p16533_p8 = por %p16532_p7, %p16531_p6 }
  0x30   :  { %p16534_p9 = pnand %p16533_p8, %p16527_p5 }
  0x32   :  { %16537 = shalt.err (!%p16534_p9)
}
  0x33   :  { %s16595_s0 = smov 768   ;;  %s16596_s18 = smov 48  }
  0x34   :  { %48 = dma.hbm_to_vmem [thread:$0]  %s17940_s2, 147456, %s43_s15, [#allocation6], %s16595_s0, %s16595_s0, %s16596_s18  }
  0x35   :  { %s16597_s27 = smov [#allocation8]   ;;  %s16538_s5 = scalar_lea.hbm %s17941_s3, 192 }
  0x36   :  { %s55_s28 = sshll.u32 %s16597_s27, 4  ;;  %p16539_p10 = scmp.ne.s32.totalorder %s17941_s3, %s16538_s5  ;;  %s56_s28 = int_to_ptr.vmem [resolvable:$true] %s55_s28 }
  0x37   :  { %p16542_p11 = scmp.lt.u32.totalorder %s16538_s5, %s17941_s3 }
  0x39   :  { %p16544_p12 = pnand %p16542_p11, %p16539_p10 }
  0x3b   :  { %16547 = shalt.err (!%p16544_p12)
}
  0x3c   :  { %s16548_s10 = scalar_lea.vmem %s56_s28, 192  ;;  %p16553_p0 = scmp.lt.s32.totalorder %s56_s28, %s56_s28 }
  0x3d   :  { %p16549_p13 = scmp.ne.s32.totalorder %s56_s28, %s16548_s10  ;;  %p16554_p1 = scmp.lt.s32.totalorder %s16548_s10, %s16548_s10 }
  0x3f   :  { %p16555_p2 = por %p16554_p1, %p16553_p0 }
  0x41   :  { %p16556_p3 = pnand %p16555_p2, %p16549_p13 }
  0x43   :  { %16559 = shalt.err (!%p16556_p3)
}
  0x44   :  { %58 = dma.hbm_to_vmem [thread:$0]  %s17941_s3, 192, %s56_s28, [#allocation9]  }
  0x45   :  { %16582 = dma.done.wait [#allocation3], 24576  }
  0x46   :  { %16583 = vsyncadd [#allocation3], 4294942720 }
  0x47   :  { %16584 = dma.done.wait [#allocation6], 172032  }
  0x48   :  { %16585 = vsyncadd [#allocation6], 4294795264 }
  0x49   :  { %16586 = dma.done.wait [#allocation9], 192  }
  0x4a   :  { %16587 = vsyncadd [#allocation9], 4294967104  ;;  %v14743_v0 = vld [vmem:[#allocation7 + $0x4] ss:$48 sps:$4 sm:$0xff]   ;;  %v14745_v1 = vld [vmem:[#allocation7 + $0xc] ss:$48 sps:$4 sm:$0xff]  }
  0x4b   :  { %7335 = vmatprep.subr.bf16.mxu0 %v14743_v0  ;;  %v14747_v2 = vld [vmem:[#allocation7] ss:$48 sps:$4 sm:$0xff]   ;;  %v14748_v3 = vld [vmem:[#allocation7 + $0x8] ss:$48 sps:$4 sm:$0xff]   ;;  %8013 = vmatprep.subr.bf16.mxu1 %v14745_v1  ;;  %v14749_v4 = vld [vmem:[#allocation7 + $0x64] ss:$48 sps:$4 sm:$0xff]  }
  0x4c   :  { %7336 = vmatpush1.bf16.msra.mxu0 %v14747_v2  ;;  %8014 = vmatpush1.bf16.msra.mxu1 %v14748_v3  ;;  %v14751_v5 = vld [vmem:[#allocation7 + $0x6c] ss:$48 sps:$4 sm:$0xff]   ;;  %v14753_v6 = vld [vmem:[#allocation7 + $0x60] ss:$48 sps:$4 sm:$0xff]   ;;  %v14754_v7 = vld [vmem:[#allocation7 + $0x68] ss:$48 sps:$4 sm:$0xff]  }
  0x4d   :  { %7337 = vmatprep.subr.bf16.mxu0 %v14749_v4  ;;  %8015 = vmatprep.subr.bf16.mxu1 %v14751_v5  ;;  %v14755_v8 = vld [vmem:[#allocation7 + $0xc4] ss:$48 sps:$4 sm:$0xff]   ;;  %v14757_v9 = vld [vmem:[#allocation7 + $0xcc] ss:$48 sps:$4 sm:$0xff]   ;;  %v14759_v10 = vld [vmem:[#allocation7 + $0xc0] ss:$48 sps:$4 sm:$0xff]  }
  0x4e   :  { %v14760_v11 = vld [vmem:[#allocation7 + $0xc8] ss:$48 sps:$4 sm:$0xff]   ;;  %v14761_v12 = vld [vmem:[#allocation7 + $0x124] ss:$48 sps:$4 sm:$0xff]   ;;  %v14763_v13 = vld [vmem:[#allocation7 + $0x12c] ss:$48 sps:$4 sm:$0xff]  }
  0x4f   :  { %v14765_v14 = vld [vmem:[#allocation7 + $0x120] ss:$48 sps:$4 sm:$0xff]   ;;  %v14766_v15 = vld [vmem:[#allocation7 + $0x128] ss:$48 sps:$4 sm:$0xff]   ;;  %v14767_v16 = vld [vmem:[#allocation7 + $0x184] ss:$48 sps:$4 sm:$0xff]  }
  0x50   :  { %7338 = vmatpush1.bf16.msra.mxu0 %v14753_v6  ;;  %8016 = vmatpush1.bf16.msra.mxu1 %v14754_v7  ;;  %v14769_v17 = vld [vmem:[#allocation7 + $0x18c] ss:$48 sps:$4 sm:$0xff]   ;;  %v14771_v18 = vld [vmem:[#allocation7 + $0x180] ss:$48 sps:$4 sm:$0xff]   ;;  %v14772_v19 = vld [vmem:[#allocation7 + $0x188] ss:$48 sps:$4 sm:$0xff]  }
  0x51   :  { %7339 = vmatprep.subr.bf16.mxu0 %v14755_v8  ;;  %8017 = vmatprep.subr.bf16.mxu1 %v14757_v9  ;;  %v14773_v20 = vld [vmem:[#allocation7 + $0x1e4] ss:$48 sps:$4 sm:$0xff]   ;;  %v14775_v21 = vld [vmem:[#allocation7 + $0x1ec] ss:$48 sps:$4 sm:$0xff]   ;;  %v14777_v22 = vld [vmem:[#allocation7 + $0x1e0] ss:$48 sps:$4 sm:$0xff]  }
  0x52   :  { %v14778_v23 = vld [vmem:[#allocation7 + $0x1e8] ss:$48 sps:$4 sm:$0xff]   ;;  %v14779_v24 = vld [vmem:[#allocation7 + $0x244] ss:$48 sps:$4 sm:$0xff]   ;;  %v14781_v25 = vld [vmem:[#allocation7 + $0x24c] ss:$48 sps:$4 sm:$0xff]  }
  0x53   :  { %v14783_v26 = vld [vmem:[#allocation7 + $0x240] ss:$48 sps:$4 sm:$0xff]   ;;  %v14784_v27 = vld [vmem:[#allocation7 + $0x248] ss:$48 sps:$4 sm:$0xff]   ;;  %v14785_v28 = vld [vmem:[#allocation7 + $0x2a4] ss:$48 sps:$4 sm:$0xff]  }
  0x54   :  { %7340 = vmatpush1.bf16.msra.mxu0 %v14759_v10  ;;  %8018 = vmatpush1.bf16.msra.mxu1 %v14760_v11  ;;  %v14787_v29 = vld [vmem:[#allocation7 + $0x2ac] ss:$48 sps:$4 sm:$0xff]   ;;  %v14789_v30 = vld [vmem:[#allocation7 + $0x2a0] ss:$48 sps:$4 sm:$0xff]   ;;  %v14790_v31 = vld [vmem:[#allocation7 + $0x2a8] ss:$48 sps:$4 sm:$0xff]  }
  0x55   :  { %7341 = vmatprep.subr.bf16.mxu0 %v14761_v12  ;;  %8019 = vmatprep.subr.bf16.mxu1 %v14763_v13  ;;  %v14791_v32 = vld [vmem:[#allocation7 + $0x304] ss:$48 sps:$4 sm:$0xff]   ;;  %v14793_v33 = vld [vmem:[#allocation7 + $0x30c] ss:$48 sps:$4 sm:$0xff]   ;;  %v14795_v34 = vld [vmem:[#allocation7 + $0x300] ss:$48 sps:$4 sm:$0xff]  }
  0x56   :  { %v14796_v35 = vld [vmem:[#allocation7 + $0x308] ss:$48 sps:$4 sm:$0xff]   ;;  %v14797_v36 = vld [vmem:[#allocation7 + $0x364] ss:$48 sps:$4 sm:$0xff]   ;;  %v14799_v37 = vld [vmem:[#allocation7 + $0x36c] ss:$48 sps:$4 sm:$0xff]  }
  0x57   :  { %v14801_v38 = vld [vmem:[#allocation7 + $0x360] ss:$48 sps:$4 sm:$0xff]   ;;  %v14802_v39 = vld [vmem:[#allocation7 + $0x368] ss:$48 sps:$4 sm:$0xff]   ;;  %v14803_v40 = vld [vmem:[#allocation7 + $0x3c4] ss:$48 sps:$4 sm:$0xff]  }
  0x58   :  { %7342 = vmatpush1.bf16.msra.mxu0 %v14765_v14  ;;  %8020 = vmatpush1.bf16.msra.mxu1 %v14766_v15  ;;  %v14805_v41 = vld [vmem:[#allocation7 + $0x3cc] ss:$48 sps:$4 sm:$0xff]   ;;  %v14807_v42 = vld [vmem:[#allocation7 + $0x3c0] ss:$48 sps:$4 sm:$0xff]   ;;  %v14808_v43 = vld [vmem:[#allocation7 + $0x3c8] ss:$48 sps:$4 sm:$0xff]  }
  0x59   :  { %7343 = vmatprep.subr.bf16.mxu0 %v14767_v16  ;;  %8021 = vmatprep.subr.bf16.mxu1 %v14769_v17  ;;  %v14809_v44 = vld [vmem:[#allocation7 + $0x424] ss:$48 sps:$4 sm:$0xff]   ;;  %v14811_v45 = vld [vmem:[#allocation7 + $0x42c] ss:$48 sps:$4 sm:$0xff]   ;;  %v14813_v47 = vld [vmem:[#allocation7 + $0x420] ss:$48 sps:$4 sm:$0xff]  }
  0x5a   :  { %v72_v46 = vld [vmem:[#allocation5 + $0x8] sm:$0xff]  ;;  %v14815_v50 = vld [vmem:[#allocation7 + $0x484] ss:$48 sps:$4 sm:$0xff]   ;;  %v14819_v53 = vld [vmem:[#allocation7 + $0x480] ss:$48 sps:$4 sm:$0xff]   ;;  %vm12311_vm0 = vcmask 130112  }
  0x5b   :  { %v14814_v48 = vld [vmem:[#allocation7 + $0x428] ss:$48 sps:$4 sm:$0xff]   ;;  %v14817_v52 = vld [vmem:[#allocation7 + $0x48c] ss:$48 sps:$4 sm:$0xff]   ;;  %v14821_v55 = vld [vmem:[#allocation7 + $0x4e4] ss:$48 sps:$4 sm:$0xff]  }
  0x5c   :  { %7344 = vmatpush1.bf16.msra.mxu0 %v14771_v18  ;;  %8022 = vmatpush1.bf16.msra.mxu1 %v14772_v19  ;;  %v84_v49 = vld [vmem:[#allocation5 + $0x68] sm:$0xff]  ;;  %v14825_v57 = vld [vmem:[#allocation7 + $0x4e0] ss:$48 sps:$4 sm:$0xff]   ;;  %v14827_v59 = vld [vmem:[#allocation7 + $0x544] ss:$48 sps:$4 sm:$0xff]   ;;  %vm12318_vm1 = vcmask 195712  }
  0x5d   :  { %7345 = vmatprep.subr.bf16.mxu0 %v14773_v20  ;;  %8023 = vmatprep.subr.bf16.mxu1 %v14775_v21  ;;  %v16679_v51 = vpack.c.bf16 %v84_v49, %v72_v46  ;;  %v14820_v54 = vld [vmem:[#allocation7 + $0x488] ss:$48 sps:$4 sm:$0xff]   ;;  %v14823_v56 = vld [vmem:[#allocation7 + $0x4ec] ss:$48 sps:$4 sm:$0xff]   ;;  %v14831_v61 = vld [vmem:[#allocation7 + $0x540] ss:$48 sps:$4 sm:$0xff]  }
  0x5e   :  { %v14826_v58 = vld [vmem:[#allocation7 + $0x4e8] ss:$48 sps:$4 sm:$0xff]   ;;  %v14829_v60 = vld [vmem:[#allocation7 + $0x54c] ss:$48 sps:$4 sm:$0xff]   ;;  %v14833_v63 = vld [vmem:[#allocation7 + $0x5a4] ss:$48 sps:$4 sm:$0xff]  }
  0x5f   :  { %7367 = vmatprep.mubr.bf16.mxu0 %v16679_v51  ;;  %8045 = vmatprep.mubr.bf16.mxu1 %v16679_v51  ;;  %v14832_v62 = vld [vmem:[#allocation7 + $0x548] ss:$48 sps:$4 sm:$0xff]   ;;  %v14835_v0 = vld [vmem:[#allocation7 + $0x5ac] ss:$48 sps:$4 sm:$0xff]   ;;  %v14837_v1 = vld [vmem:[#allocation7 + $0x5a0] ss:$48 sps:$4 sm:$0xff]  }
  0x60   :  { %7346 = vmatpush1.bf16.msra.mxu0 %v14777_v22  ;;  %8024 = vmatpush1.bf16.msra.mxu1 %v14778_v23  ;;  %v14838_v2 = vld [vmem:[#allocation7 + $0x5a8] ss:$48 sps:$4 sm:$0xff]   ;;  %v71_v3 = vld [vmem:[#allocation5] sm:$0xff]  ;;  %v14844_v6 = vld [vmem:[#allocation7 + $0x60c] ss:$48 sps:$4 sm:$0xff]   ;;  %vm12325_vm2 = vcmask 261312  }
  0x61   :  { %7347 = vmatprep.subr.bf16.mxu0 %v14779_v24  ;;  %8025 = vmatprep.subr.bf16.mxu1 %v14781_v25  ;;  %v83_v4 = vld [vmem:[#allocation5 + $0x60] sm:$0xff]  ;;  %v14842_v9 = vld [vmem:[#allocation7 + $0x608] ss:$48 sps:$4 sm:$0xff]   ;;  %v14850_v13 = vld [vmem:[#allocation7 + $0x66c] ss:$48 sps:$4 sm:$0xff]   ;;  %vm12332_vm3 = vcmask 326912  }
  0x62   :  { %v14841_v5 = vld [vmem:[#allocation7 + $0x604] ss:$48 sps:$4 sm:$0xff]   ;;  %v14839_v7 = vld [vmem:[#allocation7 + $0x600] ss:$48 sps:$4 sm:$0xff]   ;;  %v16683_v8 = vpack.c.bf16 %v83_v4, %v71_v3  ;;  %v96_v10 = vld [vmem:[#allocation5 + $0xc8] sm:$0xff]  ;;  %vm12339_vm4 = vcmask 392512  }
  0x63   :  { %v108_v11 = vld [vmem:[#allocation5 + $0x128] sm:$0xff]  ;;  %v14847_v12 = vld [vmem:[#allocation7 + $0x664] ss:$48 sps:$4 sm:$0xff]   ;;  %v14845_v14 = vld [vmem:[#allocation7 + $0x660] ss:$48 sps:$4 sm:$0xff]   ;;  %vm12346_vm5 = vcmask 458112  }
  0x64   :  { %7348 = vmatpush1.bf16.msra.mxu0 %v14783_v26  ;;  %8026 = vmatpush1.bf16.msra.mxu1 %v14784_v27  ;;  %v16685_v15 = vpack.c.bf16 %v108_v11, %v96_v10  ;;  %v14848_v16 = vld [vmem:[#allocation7 + $0x668] ss:$48 sps:$4 sm:$0xff]   ;;  %v95_v17 = vld [vmem:[#allocation5 + $0xc0] sm:$0xff]  ;;  %v14856_v20 = vld [vmem:[#allocation7 + $0x6cc] ss:$48 sps:$4 sm:$0xff]   ;;  %vm12353_vm6 = vcmask 523712  }
  0x65   :  { %7349 = vmatprep.subr.bf16.mxu0 %v14785_v28  ;;  %8027 = vmatprep.subr.bf16.mxu1 %v14787_v29  ;;  %v107_v18 = vld [vmem:[#allocation5 + $0x120] sm:$0xff]  ;;  %v14854_v22 = vld [vmem:[#allocation7 + $0x6c8] ss:$48 sps:$4 sm:$0xff]   ;;  %v14862_v27 = vld [vmem:[#allocation7 + $0x72c] ss:$48 sps:$4 sm:$0xff]   ;;  %vm12360_vm7 = vcmask 589312  }
  0x66   :  { %v14853_v19 = vld [vmem:[#allocation7 + $0x6c4] ss:$48 sps:$4 sm:$0xff]   ;;  %v14851_v21 = vld [vmem:[#allocation7 + $0x6c0] ss:$48 sps:$4 sm:$0xff]   ;;  %v16691_v23 = vpack.c.bf16 %v107_v18, %v95_v17  ;;  %v120_v24 = vld [vmem:[#allocation5 + $0x188] sm:$0xff]  ;;  %vm12367_vm8 = vcmask 654912  }
  0x67   :  { %v132_v25 = vld [vmem:[#allocation5 + $0x1e8] sm:$0xff]  ;;  %v14859_v26 = vld [vmem:[#allocation7 + $0x724] ss:$48 sps:$4 sm:$0xff]   ;;  %v14857_v29 = vld [vmem:[#allocation7 + $0x720] ss:$48 sps:$4 sm:$0xff]   ;;  %vm12374_vm9 = vcmask 720512  }
  0x68   :  { %7350 = vmatpush1.bf16.msra.mxu0 %v14789_v30  ;;  %8028 = vmatpush1.bf16.msra.mxu1 %v14790_v31  ;;  %v16693_v28 = vpack.c.bf16 %v132_v25, %v120_v24  ;;  %v14860_v30 = vld [vmem:[#allocation7 + $0x728] ss:$48 sps:$4 sm:$0xff]   ;;  %v119_v31 = vld [vmem:[#allocation5 + $0x180] sm:$0xff]  ;;  %vm12381_vm10 = vcmask 786112   ;;  %vm12388_vm11 = vcmask 851712   ;;  %vm12395_vm12 = vcmask 917312  }
  0x69   :  { %7351 = vmatprep.subr.bf16.mxu0 %v14791_v32  ;;  %8029 = vmatprep.subr.bf16.mxu1 %v14793_v33  ;;  %v131_v32 = vld [vmem:[#allocation5 + $0x1e0] sm:$0xff]  ;;  %v14890_v4 = vld [vmem:[#allocation7 + $0x908] ss:$48 sps:$4 sm:$0xff]   ;;  %vm12402_vm13 = vcmask 982912   ;;  %s16598_s3 = smov [#allocation10]   ;;  %vm12409_vm14 = vcmask 1048512  }
  0x6a   :  { %v14865_v33 = vld [vmem:[#allocation7 + $0x784] ss:$48 sps:$4 sm:$0xff]   ;;  %v14875_v49 = vld [vmem:[#allocation7 + $0x840] ss:$48 sps:$4 sm:$0xff]   ;;  %v14902_v18 = vld [vmem:[#allocation7 + $0x9c8] ss:$48 sps:$4 sm:$0xff]  }
  0x6b   :  { %v155_v46 = vld [vmem:[#allocation5 + $0x2a0] sm:$0xff]  ;;  %s12419_s12 = sshll.u32 %s16598_s3, 4  ;;  %s12420_s12 = int_to_ptr.vmem [resolvable:$true] %s12419_s12 }
  0x6c   :  { %7352 = vmatpush1.bf16.msra.mxu0 %v14795_v34  ;;  %8030 = vmatpush1.bf16.msra.mxu1 %v14796_v35  ;;  %v14868_v34 = vld [vmem:[#allocation7 + $0x78c] ss:$48 sps:$4 sm:$0xff]   ;;  %v14863_v35 = vld [vmem:[#allocation7 + $0x780] ss:$48 sps:$4 sm:$0xff]   ;;  %s16560_s1 = scalar_lea.vmem %s12420_s12, 16  ;;  %s16564_s13 = scalar_lea.vmem %s12420_s12, 32 }
  0x6d   :  { %7353 = vmatprep.subr.bf16.mxu0 %v14797_v36  ;;  %8031 = vmatprep.subr.bf16.mxu1 %v14799_v37  ;;  %v14866_v36 = vld [vmem:[#allocation7 + $0x788] ss:$48 sps:$4 sm:$0xff]   ;;  %v16699_v37 = vpack.c.bf16 %v131_v32, %v119_v31  ;;  %v14887_v3 = vld [vmem:[#allocation7 + $0x900] ss:$48 sps:$4 sm:$0xff]   ;;  %v14916_v31 = vld [vmem:[#allocation7 + $0xa8c] ss:$48 sps:$4 sm:$0xff]   ;;  %p16561_p4 = scmp.ne.s32.totalorder %s12420_s12, %s16560_s1  ;;  %p16565_p5 = scmp.lt.s32.totalorder %s12420_s12, %s12420_s12 }
  0x6e   :  { %v191_v11 = vld [vmem:[#allocation5 + $0x3c0] sm:$0xff]  ;;  %p16566_p6 = scmp.lt.s32.totalorder %s16564_s13, %s16560_s1 }
  0x6f   :  { %v14905_v24 = vld [vmem:[#allocation7 + $0xa20] ss:$48 sps:$4 sm:$0xff]  }
  0x70   :  { %7354 = vmatpush1.bf16.msra.mxu0 %v14801_v38  ;;  %8032 = vmatpush1.bf16.msra.mxu1 %v14802_v39  ;;  %v144_v38 = vld [vmem:[#allocation5 + $0x248] sm:$0xff]  ;;  %v14911_v32 = vld [vmem:[#allocation7 + $0xa80] ss:$48 sps:$4 sm:$0xff]   ;;  %p16567_p7 = por %p16566_p6, %p16565_p5 }
  0x71   :  { %7355 = vmatprep.subr.bf16.mxu0 %v14803_v40  ;;  %8033 = vmatprep.subr.bf16.mxu1 %v14805_v41  ;;  %v156_v39 = vld [vmem:[#allocation5 + $0x2a8] sm:$0xff]  ;;  %v14871_v40 = vld [vmem:[#allocation7 + $0x7e4] ss:$48 sps:$4 sm:$0xff]  }
  0x72   :  { %v14874_v41 = vld [vmem:[#allocation7 + $0x7ec] ss:$48 sps:$4 sm:$0xff]   ;;  %p16568_p8 = pnand %p16567_p7, %p16561_p4 }
  0x74   :  { %7356 = vmatpush1.bf16.msra.mxu0 %v14807_v42  ;;  %8034 = vmatpush1.bf16.msra.mxu1 %v14808_v43  ;;  %v14869_v42 = vld [vmem:[#allocation7 + $0x7e0] ss:$48 sps:$4 sm:$0xff]   ;;  %v16701_v43 = vpack.c.bf16 %v156_v39, %v144_v38  ;;  %v14919_v38 = vld [vmem:[#allocation7 + $0xae4] ss:$48 sps:$4 sm:$0xff]   ;;  %v14922_v39 = vld [vmem:[#allocation7 + $0xaec] ss:$48 sps:$4 sm:$0xff]  }
  0x75   :  { %7357 = vmatprep.subr.bf16.mxu0 %v14809_v44  ;;  %8035 = vmatprep.subr.bf16.mxu1 %v14811_v45  ;;  %v14872_v44 = vld [vmem:[#allocation7 + $0x7e8] ss:$48 sps:$4 sm:$0xff]   ;;  %v143_v45 = vld [vmem:[#allocation5 + $0x240] sm:$0xff] }
  0x78   :  { %7358 = vmatpush1.bf16.msra.mxu0 %v14813_v47  ;;  %8036 = vmatpush1.bf16.msra.mxu1 %v14814_v48  ;;  %v14877_v47 = vld [vmem:[#allocation7 + $0x844] ss:$48 sps:$4 sm:$0xff]   ;;  %v14880_v48 = vld [vmem:[#allocation7 + $0x84c] ss:$48 sps:$4 sm:$0xff]  }
  0x79   :  { %7359 = vmatprep.subr.bf16.mxu0 %v14815_v50  ;;  %8037 = vmatprep.subr.bf16.mxu1 %v14817_v52  ;;  %v16707_v50 = vpack.c.bf16 %v155_v46, %v143_v45  ;;  %v168_v52 = vld [vmem:[#allocation5 + $0x308] sm:$0xff]  ;;  %v251_v45 = vld [vmem:[#allocation5 + $0x5a0] sm:$0xff] }
  0x7a   :  { %v14925_v46 = vld [vmem:[#allocation7 + $0xb44] ss:$48 sps:$4 sm:$0xff]  }
  0x7c   :  { %7360 = vmatpush1.bf16.msra.mxu0 %v14819_v53  ;;  %8038 = vmatpush1.bf16.msra.mxu1 %v14820_v54  ;;  %v180_v53 = vld [vmem:[#allocation5 + $0x368] sm:$0xff] }
  0x7d   :  { %7361 = vmatprep.subr.bf16.mxu0 %v14821_v55  ;;  %8039 = vmatprep.subr.bf16.mxu1 %v14823_v56  ;;  %v14878_v54 = vld [vmem:[#allocation7 + $0x848] ss:$48 sps:$4 sm:$0xff]   ;;  %v14883_v55 = vld [vmem:[#allocation7 + $0x8a4] ss:$48 sps:$4 sm:$0xff]   ;;  %v14886_v56 = vld [vmem:[#allocation7 + $0x8ac] ss:$48 sps:$4 sm:$0xff]  }
  0x80   :  { %7362 = vmatpush1.bf16.msra.mxu0 %v14825_v57  ;;  %8040 = vmatpush1.bf16.msra.mxu1 %v14826_v58  ;;  %v14881_v57 = vld [vmem:[#allocation7 + $0x8a0] ss:$48 sps:$4 sm:$0xff]   ;;  %v14884_v58 = vld [vmem:[#allocation7 + $0x8a8] ss:$48 sps:$4 sm:$0xff]  }
  0x81   :  { %7363 = vmatprep.subr.bf16.mxu0 %v14827_v59  ;;  %8041 = vmatprep.subr.bf16.mxu1 %v14829_v60  ;;  %v16709_v59 = vpack.c.bf16 %v180_v53, %v168_v52  ;;  %v167_v60 = vld [vmem:[#allocation5 + $0x300] sm:$0xff]  ;;  %v74_v53 = vld [vmem:[#allocation5 + $0x18] sm:$0xff] }
  0x84   :  { %7364 = vmatpush1.bf16.msra.mxu0 %v14831_v61  ;;  %8042 = vmatpush1.bf16.msra.mxu1 %v14832_v62  ;;  %v179_v61 = vld [vmem:[#allocation5 + $0x360] sm:$0xff] }
  0x85   :  { %7365 = vmatprep.subr.bf16.mxu0 %v14833_v63  ;;  %8043 = vmatprep.subr.bf16.mxu1 %v14835_v0  ;;  %v14889_v62 = vld [vmem:[#allocation7 + $0x904] ss:$48 sps:$4 sm:$0xff]   ;;  %v14892_v63 = vld [vmem:[#allocation7 + $0x90c] ss:$48 sps:$4 sm:$0xff]   ;;  %v16715_v0 = vpack.c.bf16 %v179_v61, %v167_v60  ;;  %v14932_v60 = vld [vmem:[#allocation7 + $0xba8] ss:$48 sps:$4 sm:$0xff]  }
  0x86   :  { %v73_v61 = vld [vmem:[#allocation5 + $0x10] sm:$0xff] }
  0x88   :  { %7366 = vmatpush1.bf16.msra.mxu0 %v14837_v1  ;;  %8044 = vmatpush1.bf16.msra.mxu1 %v14838_v2  ;;  %v192_v1 = vld [vmem:[#allocation5 + $0x3c8] sm:$0xff] }
  0x89   :  { %7448 = vmatprep.subr.bf16.mxu0 %v14841_v5  ;;  %8126 = vmatprep.subr.bf16.mxu1 %v14844_v6  ;;  %v204_v2 = vld [vmem:[#allocation5 + $0x428] sm:$0xff]  ;;  %v14895_v5 = vld [vmem:[#allocation7 + $0x964] ss:$48 sps:$4 sm:$0xff]  }
  0x8a   :  { %v14898_v6 = vld [vmem:[#allocation7 + $0x96c] ss:$48 sps:$4 sm:$0xff]   ;;  %v16717_v10 = vpack.c.bf16 %v204_v2, %v192_v1  ;;  %v14935_v2 = vld [vmem:[#allocation7 + $0xc00] ss:$48 sps:$4 sm:$0xff]  }
  0x8b   :  { %7368 = vmatmul.mubr.bf16.vlgmr.msra.gmra.mrb[0].mxu0 %v16683_v8  ;;  %8046 = vmatmul.mubr.bf16.vlgmr.msra.gmra.mrb[0].mxu1 %v16683_v8  ;;  %v14940_v1 = vld [vmem:[#allocation7 + $0xc0c] ss:$48 sps:$4 sm:$0xff]  }
  0x8c   :  { %7449 = vmatpush1.bf16.msra.mxu0 %v14839_v7  ;;  %8127 = vmatpush1.bf16.msra.mxu1 %v14842_v9  ;;  %v14893_v7 = vld [vmem:[#allocation7 + $0x960] ss:$48 sps:$4 sm:$0xff]   ;;  %v14896_v9 = vld [vmem:[#allocation7 + $0x968] ss:$48 sps:$4 sm:$0xff]  }
  0x8d   :  { %7450 = vmatprep.subr.bf16.mxu0 %v14847_v12  ;;  %8128 = vmatprep.subr.bf16.mxu1 %v14850_v13  ;;  %v203_v12 = vld [vmem:[#allocation5 + $0x420] sm:$0xff] }
  0x8e   :  { %7377 = vmatprep.mubr.bf16.mxu0 %v16685_v15  ;;  %8055 = vmatprep.mubr.bf16.mxu1 %v16685_v15  ;;  %v14901_v13 = vld [vmem:[#allocation7 + $0x9c4] ss:$48 sps:$4 sm:$0xff]   ;;  %v16723_v17 = vpack.c.bf16 %v203_v12, %v191_v11  ;;  %v14941_v11 = vld [vmem:[#allocation7 + $0xc60] ss:$48 sps:$4 sm:$0xff]   ;;  %v14944_v12 = vld [vmem:[#allocation7 + $0xc68] ss:$48 sps:$4 sm:$0xff]  }
  0x90   :  { %7451 = vmatpush1.bf16.msra.mxu0 %v14845_v14  ;;  %8129 = vmatpush1.bf16.msra.mxu1 %v14848_v16  ;;  %v14904_v14 = vld [vmem:[#allocation7 + $0x9cc] ss:$48 sps:$4 sm:$0xff]   ;;  %v14899_v16 = vld [vmem:[#allocation7 + $0x9c0] ss:$48 sps:$4 sm:$0xff]  }
  0x91   :  { %7452 = vmatprep.subr.bf16.mxu0 %v14853_v19  ;;  %8130 = vmatprep.subr.bf16.mxu1 %v14856_v20  ;;  %v216_v19 = vld [vmem:[#allocation5 + $0x488] sm:$0xff] }
  0x92   :  { %v228_v20 = vld [vmem:[#allocation5 + $0x4e8] sm:$0xff] }
  0x93   :  { %7378 = vmatmul.mubr.bf16.gmra.mrb[4].mxu0 %v16691_v23  ;;  %8056 = vmatmul.mubr.bf16.gmra.mrb[4].mxu1 %v16691_v23  ;;  %v16725_v25 = vpack.c.bf16 %v228_v20, %v216_v19  ;;  %v14952_v19 = vld [vmem:[#allocation7 + $0xccc] ss:$48 sps:$4 sm:$0xff]  }
  0x94   :  { %7453 = vmatpush1.bf16.msra.mxu0 %v14851_v21  ;;  %8131 = vmatpush1.bf16.msra.mxu1 %v14854_v22  ;;  %v14907_v21 = vld [vmem:[#allocation7 + $0xa24] ss:$48 sps:$4 sm:$0xff]   ;;  %v14910_v22 = vld [vmem:[#allocation7 + $0xa2c] ss:$48 sps:$4 sm:$0xff]  }
  0x95   :  { %7454 = vmatprep.subr.bf16.mxu0 %v14859_v26  ;;  %8132 = vmatprep.subr.bf16.mxu1 %v14862_v27  ;;  %v14908_v26 = vld [vmem:[#allocation7 + $0xa28] ss:$48 sps:$4 sm:$0xff]   ;;  %v215_v27 = vld [vmem:[#allocation5 + $0x480] sm:$0xff] }
  0x96   :  { %7387 = vmatprep.mubr.bf16.mxu0 %v16693_v28  ;;  %8065 = vmatprep.mubr.bf16.mxu1 %v16693_v28 }
  0x98   :  { %7455 = vmatpush1.bf16.msra.mxu0 %v14857_v29  ;;  %8133 = vmatpush1.bf16.msra.mxu1 %v14860_v30  ;;  %v227_v29 = vld [vmem:[#allocation5 + $0x4e0] sm:$0xff] }
  0x99   :  { %7456 = vmatprep.subr.bf16.mxu0 %v14865_v33  ;;  %8134 = vmatprep.subr.bf16.mxu1 %v14868_v34  ;;  %v14913_v30 = vld [vmem:[#allocation7 + $0xa84] ss:$48 sps:$4 sm:$0xff]   ;;  %v14914_v33 = vld [vmem:[#allocation7 + $0xa88] ss:$48 sps:$4 sm:$0xff]   ;;  %v16731_v34 = vpack.c.bf16 %v227_v29, %v215_v27  ;;  %v14958_v29 = vld [vmem:[#allocation7 + $0xd2c] ss:$48 sps:$4 sm:$0xff]  }
  0x9a   :  { %v14955_v27 = vld [vmem:[#allocation7 + $0xd24] ss:$48 sps:$4 sm:$0xff]  }
  0x9b   :  { %7388 = vmatmul.mubr.bf16.gmra.mrb[8].mxu0 %v16699_v37  ;;  %8066 = vmatmul.mubr.bf16.gmra.mrb[8].mxu1 %v16699_v37 }
  0x9c   :  { %7457 = vmatpush1.bf16.msra.mxu0 %v14863_v35  ;;  %8135 = vmatpush1.bf16.msra.mxu1 %v14866_v36  ;;  %v240_v35 = vld [vmem:[#allocation5 + $0x548] sm:$0xff] }
  0x9d   :  { %7458 = vmatprep.subr.bf16.mxu0 %v14871_v40  ;;  %8136 = vmatprep.subr.bf16.mxu1 %v14874_v41  ;;  %v252_v36 = vld [vmem:[#allocation5 + $0x5a8] sm:$0xff]  ;;  %v14917_v41 = vld [vmem:[#allocation7 + $0xae0] ss:$48 sps:$4 sm:$0xff]  }
  0x9e   :  { %7397 = vmatprep.mubr.bf16.mxu0 %v16701_v43  ;;  %8075 = vmatprep.mubr.bf16.mxu1 %v16701_v43  ;;  %v16733_v40 = vpack.c.bf16 %v252_v36, %v240_v35  ;;  %v133_v35 = vld [vmem:[#allocation5 + $0x1f0] sm:$0xff] }
  0x9f   :  { %v14961_v36 = vld [vmem:[#allocation7 + $0xd84] ss:$48 sps:$4 sm:$0xff]  }
  0xa0   :  { %7459 = vmatpush1.bf16.msra.mxu0 %v14869_v42  ;;  %8137 = vmatpush1.bf16.msra.mxu1 %v14872_v44  ;;  %18139 = vst [vmem:[#allocation15_spill] sm:$0xff] %v16733_v40  ;;  %v14920_v42 = vld [vmem:[#allocation7 + $0xae8] ss:$48 sps:$4 sm:$0xff]   ;;  %v239_v44 = vld [vmem:[#allocation5 + $0x540] sm:$0xff] }
  0xa1   :  { %7460 = vmatprep.subr.bf16.mxu0 %v14877_v47  ;;  %8138 = vmatprep.subr.bf16.mxu1 %v14880_v48  ;;  %v14928_v47 = vld [vmem:[#allocation7 + $0xb4c] ss:$48 sps:$4 sm:$0xff]   ;;  %v14923_v48 = vld [vmem:[#allocation7 + $0xb40] ss:$48 sps:$4 sm:$0xff]   ;;  %v16739_v52 = vpack.c.bf16 %v251_v45, %v239_v44 }
  0xa2   :  { %v146_v44 = vld [vmem:[#allocation5 + $0x258] sm:$0xff] }
  0xa3   :  { %7398 = vmatmul.mubr.bf16.gmra.mrb[12].mxu0 %v16707_v50  ;;  %8076 = vmatmul.mubr.bf16.gmra.mrb[12].mxu1 %v16707_v50  ;;  %18140 = vst [vmem:[#allocation16_spill] sm:$0xff] %v16739_v52  ;;  %v158_v45 = vld [vmem:[#allocation5 + $0x2b8] sm:$0xff] }
  0xa4   :  { %7461 = vmatpush1.bf16.msra.mxu0 %v14875_v49  ;;  %8139 = vmatpush1.bf16.msra.mxu1 %v14878_v54  ;;  %v14926_v49 = vld [vmem:[#allocation7 + $0xb48] ss:$48 sps:$4 sm:$0xff]  }
  0xa5   :  { %7462 = vmatprep.subr.bf16.mxu0 %v14883_v55  ;;  %8140 = vmatprep.subr.bf16.mxu1 %v14886_v56  ;;  %v86_v54 = vld [vmem:[#allocation5 + $0x78] sm:$0xff]  ;;  %v14931_v55 = vld [vmem:[#allocation7 + $0xba4] ss:$48 sps:$4 sm:$0xff]  }
  0xa6   :  { %7407 = vmatprep.mubr.bf16.mxu0 %v16709_v59  ;;  %8085 = vmatprep.mubr.bf16.mxu1 %v16709_v59  ;;  %v14934_v56 = vld [vmem:[#allocation7 + $0xbac] ss:$48 sps:$4 sm:$0xff]  }
  0xa8   :  { %7463 = vmatpush1.bf16.msra.mxu0 %v14881_v57  ;;  %8141 = vmatpush1.bf16.msra.mxu1 %v14884_v58  ;;  %v14929_v57 = vld [vmem:[#allocation7 + $0xba0] ss:$48 sps:$4 sm:$0xff]   ;;  %v16741_v58 = vpack.c.bf16 %v86_v54, %v74_v53  ;;  %v14968_v53 = vld [vmem:[#allocation7 + $0xde8] ss:$48 sps:$4 sm:$0xff]  }
  0xa9   :  { %7464 = vmatprep.subr.bf16.mxu0 %v14889_v62  ;;  %8142 = vmatprep.subr.bf16.mxu1 %v14892_v63  ;;  %v85_v62 = vld [vmem:[#allocation5 + $0x70] sm:$0xff] }
  0xaa   :  { %18141 = vst [vmem:[#allocation17_spill] sm:$0xff] %v16741_v58  ;;  %v14937_v63 = vld [vmem:[#allocation7 + $0xc04] ss:$48 sps:$4 sm:$0xff]  }
  0xab   :  { %7408 = vmatmul.mubr.bf16.gmra.mrb[16].mxu0 %v16715_v0  ;;  %8086 = vmatmul.mubr.bf16.gmra.mrb[16].mxu1 %v16715_v0  ;;  %v145_v54 = vld [vmem:[#allocation5 + $0x250] sm:$0xff] }
  0xac   :  { %7465 = vmatpush1.bf16.msra.mxu0 %v14887_v3  ;;  %8143 = vmatpush1.bf16.msra.mxu1 %v14890_v4  ;;  %v16747_v3 = vpack.c.bf16 %v85_v62, %v73_v61  ;;  %v98_v4 = vld [vmem:[#allocation5 + $0xd8] sm:$0xff] }
  0xad   :  { %7466 = vmatprep.subr.bf16.mxu0 %v14895_v5  ;;  %8144 = vmatprep.subr.bf16.mxu1 %v14898_v6  ;;  %v110_v5 = vld [vmem:[#allocation5 + $0x138] sm:$0xff] }
  0xae   :  { %7417 = vmatprep.mubr.bf16.mxu0 %v16717_v10  ;;  %8095 = vmatprep.mubr.bf16.mxu1 %v16717_v10  ;;  %18142 = vst [vmem:[#allocation18_spill] sm:$0xff] %v16747_v3  ;;  %v14938_v6 = vld [vmem:[#allocation7 + $0xc08] ss:$48 sps:$4 sm:$0xff]  }
  0xaf   :  { %v14974_v61 = vld [vmem:[#allocation7 + $0xe48] ss:$48 sps:$4 sm:$0xff]  }
  0xb0   :  { %7467 = vmatpush1.bf16.msra.mxu0 %v14893_v7  ;;  %8145 = vmatpush1.bf16.msra.mxu1 %v14896_v9  ;;  %v14943_v7 = vld [vmem:[#allocation7 + $0xc64] ss:$48 sps:$4 sm:$0xff]   ;;  %v14946_v9 = vld [vmem:[#allocation7 + $0xc6c] ss:$48 sps:$4 sm:$0xff]  }
  0xb1   :  { %7468 = vmatprep.subr.bf16.mxu0 %v14901_v13  ;;  %8146 = vmatprep.subr.bf16.mxu1 %v14904_v14  ;;  %v16749_v13 = vpack.c.bf16 %v110_v5, %v98_v4  ;;  %v97_v14 = vld [vmem:[#allocation5 + $0xd0] sm:$0xff]  ;;  %v14982_v4 = vld [vmem:[#allocation7 + $0xeac] ss:$48 sps:$4 sm:$0xff]  }
  0xb3   :  { %7418 = vmatmul.mubr.bf16.gmra.mrb[20].mxu0 %v16723_v17  ;;  %8096 = vmatmul.mubr.bf16.gmra.mrb[20].mxu1 %v16723_v17  ;;  %18143 = vst [vmem:[#allocation19_spill] sm:$0xff] %v16749_v13 }
  0xb4   :  { %7469 = vmatpush1.bf16.msra.mxu0 %v14899_v16  ;;  %8147 = vmatpush1.bf16.msra.mxu1 %v14902_v18  ;;  %v109_v16 = vld [vmem:[#allocation5 + $0x130] sm:$0xff] }
  0xb5   :  { %7470 = vmatprep.subr.bf16.mxu0 %v14907_v21  ;;  %8148 = vmatprep.subr.bf16.mxu1 %v14910_v22  ;;  %v14949_v18 = vld [vmem:[#allocation7 + $0xcc4] ss:$48 sps:$4 sm:$0xff]   ;;  %v16755_v20 = vpack.c.bf16 %v109_v16, %v97_v14  ;;  %v122_v21 = vld [vmem:[#allocation5 + $0x198] sm:$0xff]  ;;  %v14983_v16 = vld [vmem:[#allocation7 + $0xf00] ss:$48 sps:$4 sm:$0xff]  }
  0xb6   :  { %7427 = vmatprep.mubr.bf16.mxu0 %v16725_v25  ;;  %8105 = vmatprep.mubr.bf16.mxu1 %v16725_v25  ;;  %v134_v22 = vld [vmem:[#allocation5 + $0x1f8] sm:$0xff] }
  0xb7   :  { %18144 = vst [vmem:[#allocation20_spill] sm:$0xff] %v16755_v20  ;;  %v14988_v14 = vld [vmem:[#allocation7 + $0xf0c] ss:$48 sps:$4 sm:$0xff]  }
  0xb8   :  { %7471 = vmatpush1.bf16.msra.mxu0 %v14905_v24  ;;  %8149 = vmatpush1.bf16.msra.mxu1 %v14908_v26  ;;  %v14947_v24 = vld [vmem:[#allocation7 + $0xcc0] ss:$48 sps:$4 sm:$0xff]   ;;  %v14950_v26 = vld [vmem:[#allocation7 + $0xcc8] ss:$48 sps:$4 sm:$0xff]  }
  0xb9   :  { %7472 = vmatprep.subr.bf16.mxu0 %v14913_v30  ;;  %8150 = vmatprep.subr.bf16.mxu1 %v14916_v31  ;;  %v14953_v30 = vld [vmem:[#allocation7 + $0xd20] ss:$48 sps:$4 sm:$0xff]   ;;  %v14956_v31 = vld [vmem:[#allocation7 + $0xd28] ss:$48 sps:$4 sm:$0xff]  }
  0xbb   :  { %7428 = vmatmul.mubr.bf16.gmra.mrb[24].mxu0 %v16731_v34  ;;  %8106 = vmatmul.mubr.bf16.gmra.mrb[24].mxu1 %v16731_v34 }
  0xbc   :  { %7473 = vmatpush1.bf16.msra.mxu0 %v14911_v32  ;;  %8151 = vmatpush1.bf16.msra.mxu1 %v14914_v33  ;;  %v16757_v32 = vpack.c.bf16 %v134_v22, %v122_v21  ;;  %v121_v33 = vld [vmem:[#allocation5 + $0x190] sm:$0xff]  ;;  %v194_v21 = vld [vmem:[#allocation5 + $0x3d8] sm:$0xff] }
  0xbd   :  { %7474 = vmatprep.subr.bf16.mxu0 %v14919_v38  ;;  %8152 = vmatprep.subr.bf16.mxu1 %v14922_v39  ;;  %v14964_v38 = vld [vmem:[#allocation7 + $0xd8c] ss:$48 sps:$4 sm:$0xff]   ;;  %v14959_v39 = vld [vmem:[#allocation7 + $0xd80] ss:$48 sps:$4 sm:$0xff]  }
  0xbe   :  { %7437 = vmatprep.mubr.bf16.mxu0 %v16733_v40  ;;  %8115 = vmatprep.mubr.bf16.mxu1 %v16733_v40  ;;  %18145 = vst [vmem:[#allocation21_spill] sm:$0xff] %v16757_v32  ;;  %v206_v22 = vld [vmem:[#allocation5 + $0x438] sm:$0xff] }
  0xc0   :  { %7475 = vmatpush1.bf16.msra.mxu0 %v14917_v41  ;;  %8153 = vmatpush1.bf16.msra.mxu1 %v14920_v42  ;;  %v16763_v41 = vpack.c.bf16 %v133_v35, %v121_v33  ;;  %v14962_v42 = vld [vmem:[#allocation7 + $0xd88] ss:$48 sps:$4 sm:$0xff]   ;;  %v205_v33 = vld [vmem:[#allocation5 + $0x430] sm:$0xff] }
  0xc1   :  { %7476 = vmatprep.subr.bf16.mxu0 %v14925_v46  ;;  %8154 = vmatprep.subr.bf16.mxu1 %v14928_v47  ;;  %v14967_v46 = vld [vmem:[#allocation7 + $0xde4] ss:$48 sps:$4 sm:$0xff]   ;;  %v14970_v47 = vld [vmem:[#allocation7 + $0xdec] ss:$48 sps:$4 sm:$0xff]  }
  0xc2   :  { %18146 = vst [vmem:[#allocation22_spill] sm:$0xff] %v16763_v41  ;;  %v14997_v35 = vld [vmem:[#allocation7 + $0xfc4] ss:$48 sps:$4 sm:$0xff]  }
  0xc3   :  { %7438 = vmatmul.mubr.bf16.gmra.mrb[28].mxu0 %v16739_v52  ;;  %8116 = vmatmul.mubr.bf16.gmra.mrb[28].mxu1 %v16739_v52 }
  0xc4   :  { %7477 = vmatpush1.bf16.msra.mxu0 %v14923_v48  ;;  %8155 = vmatpush1.bf16.msra.mxu1 %v14926_v49  ;;  %v14965_v48 = vld [vmem:[#allocation7 + $0xde0] ss:$48 sps:$4 sm:$0xff]   ;;  %v16765_v49 = vpack.c.bf16 %v158_v45, %v146_v44  ;;  %v230_v44 = vld [vmem:[#allocation5 + $0x4f8] sm:$0xff] }
  0xc5   :  { %7478 = vmatprep.subr.bf16.mxu0 %v14931_v55  ;;  %8156 = vmatprep.subr.bf16.mxu1 %v14934_v56  ;;  %v157_v55 = vld [vmem:[#allocation5 + $0x2b0] sm:$0xff]  ;;  %v14998_v45 = vld [vmem:[#allocation7 + $0xfc8] ss:$48 sps:$4 sm:$0xff]  }
  0xc6   :  { %7480 = vmatprep.mubr.bf16.mxu0 %v16741_v58  ;;  %8158 = vmatprep.mubr.bf16.mxu1 %v16741_v58  ;;  %18147 = vst [vmem:[#allocation23_spill] sm:$0xff] %v16765_v49  ;;  %v14973_v56 = vld [vmem:[#allocation7 + $0xe44] ss:$48 sps:$4 sm:$0xff]   ;;  %v16771_v62 = vpack.c.bf16 %v157_v55, %v145_v54 }
  0xc7   :  { %v217_v55 = vld [vmem:[#allocation5 + $0x490] sm:$0xff] }
  0xc8   :  { %7479 = vmatpush1.bf16.msra.mxu0 %v14929_v57  ;;  %8157 = vmatpush1.bf16.msra.mxu1 %v14932_v60  ;;  %v14976_v57 = vld [vmem:[#allocation7 + $0xe4c] ss:$48 sps:$4 sm:$0xff]   ;;  %v14971_v60 = vld [vmem:[#allocation7 + $0xe40] ss:$48 sps:$4 sm:$0xff]   ;;  %18148 = vst [vmem:[#allocation24_spill] sm:$0xff] %v16771_v62 }
  0xc9   :  { %7561 = vmatprep.subr.bf16.mxu0 %v14937_v63  ;;  %8239 = vmatprep.subr.bf16.mxu1 %v14940_v1  ;;  %v170_v63 = vld [vmem:[#allocation5 + $0x318] sm:$0xff] }
  0xca   :  { %v182_v1 = vld [vmem:[#allocation5 + $0x378] sm:$0xff] }
  0xcb   :  { %7481 = vmatmul.mubr.bf16.vlgmr.msra.gmra.mrb[0].mxu0 %v16747_v3  ;;  %8159 = vmatmul.mubr.bf16.vlgmr.msra.gmra.mrb[0].mxu1 %v16747_v3  ;;  %v16773_v5 = vpack.c.bf16 %v182_v1, %v170_v63  ;;  %v242_v63 = vld [vmem:[#allocation5 + $0x558] sm:$0xff] }
  0xcc   :  { %7562 = vmatpush1.bf16.msra.mxu0 %v14935_v2  ;;  %8240 = vmatpush1.bf16.msra.mxu1 %v14938_v6  ;;  %v14979_v2 = vld [vmem:[#allocation7 + $0xea4] ss:$48 sps:$4 sm:$0xff]   ;;  %v14977_v6 = vld [vmem:[#allocation7 + $0xea0] ss:$48 sps:$4 sm:$0xff]   ;;  %v254_v1 = vld [vmem:[#allocation5 + $0x5b8] sm:$0xff] }
  0xcd   :  { %7563 = vmatprep.subr.bf16.mxu0 %v14943_v7  ;;  %8241 = vmatprep.subr.bf16.mxu1 %v14946_v9  ;;  %18149 = vst [vmem:[#allocation25_spill] sm:$0xff] %v16773_v5  ;;  %v14980_v7 = vld [vmem:[#allocation7 + $0xea8] ss:$48 sps:$4 sm:$0xff]   ;;  %v169_v9 = vld [vmem:[#allocation5 + $0x310] sm:$0xff] }
  0xce   :  { %7490 = vmatprep.mubr.bf16.mxu0 %v16749_v13  ;;  %8168 = vmatprep.mubr.bf16.mxu1 %v16749_v13 }
  0xd0   :  { %7564 = vmatpush1.bf16.msra.mxu0 %v14941_v11  ;;  %8242 = vmatpush1.bf16.msra.mxu1 %v14944_v12  ;;  %v181_v11 = vld [vmem:[#allocation5 + $0x370] sm:$0xff] }
  0xd1   :  { %7565 = vmatprep.subr.bf16.mxu0 %v14949_v18  ;;  %8243 = vmatprep.subr.bf16.mxu1 %v14952_v19  ;;  %v14985_v12 = vld [vmem:[#allocation7 + $0xf04] ss:$48 sps:$4 sm:$0xff]   ;;  %v14986_v18 = vld [vmem:[#allocation7 + $0xf08] ss:$48 sps:$4 sm:$0xff]   ;;  %v16779_v19 = vpack.c.bf16 %v181_v11, %v169_v9  ;;  %v15013_v9 = vld [vmem:[#allocation7 + $0x10e0] ss:$48 sps:$4 sm:$0xff]  }
  0xd2   :  { %v15016_v11 = vld [vmem:[#allocation7 + $0x10e8] ss:$48 sps:$4 sm:$0xff]  }
  0xd3   :  { %7491 = vmatmul.mubr.bf16.gmra.mrb[4].mxu0 %v16755_v20  ;;  %8169 = vmatmul.mubr.bf16.gmra.mrb[4].mxu1 %v16755_v20  ;;  %18150 = vst [vmem:[#allocation26_spill] sm:$0xff] %v16779_v19 }
  0xd4   :  { %7566 = vmatpush1.bf16.msra.mxu0 %v14947_v24  ;;  %8244 = vmatpush1.bf16.msra.mxu1 %v14950_v26  ;;  %v14991_v24 = vld [vmem:[#allocation7 + $0xf64] ss:$48 sps:$4 sm:$0xff]   ;;  %v14994_v26 = vld [vmem:[#allocation7 + $0xf6c] ss:$48 sps:$4 sm:$0xff]  }
  0xd5   :  { %7567 = vmatprep.subr.bf16.mxu0 %v14955_v27  ;;  %8245 = vmatprep.subr.bf16.mxu1 %v14958_v29  ;;  %v14989_v27 = vld [vmem:[#allocation7 + $0xf60] ss:$48 sps:$4 sm:$0xff]   ;;  %v16781_v29 = vpack.c.bf16 %v206_v22, %v194_v21  ;;  %v15024_v21 = vld [vmem:[#allocation7 + $0x114c] ss:$48 sps:$4 sm:$0xff]  }
  0xd6   :  { %7500 = vmatprep.mubr.bf16.mxu0 %v16757_v32  ;;  %8178 = vmatprep.mubr.bf16.mxu1 %v16757_v32  ;;  %v15019_v22 = vld [vmem:[#allocation7 + $0x1140] ss:$48 sps:$4 sm:$0xff]  }
  0xd7   :  { %18151 = vst [vmem:[#allocation27_spill] sm:$0xff] %v16781_v29 }
  0xd8   :  { %7568 = vmatpush1.bf16.msra.mxu0 %v14953_v30  ;;  %8246 = vmatpush1.bf16.msra.mxu1 %v14956_v31  ;;  %v14992_v30 = vld [vmem:[#allocation7 + $0xf68] ss:$48 sps:$4 sm:$0xff]   ;;  %v193_v31 = vld [vmem:[#allocation5 + $0x3d0] sm:$0xff] }
  0xd9   :  { %7569 = vmatprep.subr.bf16.mxu0 %v14961_v36  ;;  %8247 = vmatprep.subr.bf16.mxu1 %v14964_v38  ;;  %v15000_v36 = vld [vmem:[#allocation7 + $0xfcc] ss:$48 sps:$4 sm:$0xff]   ;;  %v14995_v38 = vld [vmem:[#allocation7 + $0xfc0] ss:$48 sps:$4 sm:$0xff]  }
  0xdb   :  { %7501 = vmatmul.mubr.bf16.gmra.mrb[8].mxu0 %v16763_v41  ;;  %8179 = vmatmul.mubr.bf16.gmra.mrb[8].mxu1 %v16763_v41 }
  0xdc   :  { %7570 = vmatpush1.bf16.msra.mxu0 %v14959_v39  ;;  %8248 = vmatpush1.bf16.msra.mxu1 %v14962_v42  ;;  %v16787_v39 = vpack.c.bf16 %v205_v33, %v193_v31  ;;  %v218_v42 = vld [vmem:[#allocation5 + $0x498] sm:$0xff]  ;;  %v15027_v31 = vld [vmem:[#allocation7 + $0x11a4] ss:$48 sps:$4 sm:$0xff]  }
  0xdd   :  { %7571 = vmatprep.subr.bf16.mxu0 %v14967_v46  ;;  %8249 = vmatprep.subr.bf16.mxu1 %v14970_v47  ;;  %v15003_v46 = vld [vmem:[#allocation7 + $0x1024] ss:$48 sps:$4 sm:$0xff]   ;;  %v15006_v47 = vld [vmem:[#allocation7 + $0x102c] ss:$48 sps:$4 sm:$0xff]   ;;  %v16789_v54 = vpack.c.bf16 %v230_v44, %v218_v42 }
  0xde   :  { %7510 = vmatprep.mubr.bf16.mxu0 %v16765_v49  ;;  %8188 = vmatprep.mubr.bf16.mxu1 %v16765_v49  ;;  %18152 = vst [vmem:[#allocation28_spill] sm:$0xff] %v16787_v39  ;;  %v15030_v33 = vld [vmem:[#allocation7 + $0x11ac] ss:$48 sps:$4 sm:$0xff]   ;;  %v75_v42 = vld [vmem:[#allocation5 + $0x20] sm:$0xff] }
  0xdf   :  { %18153 = vst [vmem:[#allocation29_spill] sm:$0xff] %v16789_v54  ;;  %v87_v44 = vld [vmem:[#allocation5 + $0x80] sm:$0xff] }
  0xe0   :  { %7572 = vmatpush1.bf16.msra.mxu0 %v14965_v48  ;;  %8250 = vmatpush1.bf16.msra.mxu1 %v14968_v53  ;;  %v15001_v48 = vld [vmem:[#allocation7 + $0x1020] ss:$48 sps:$4 sm:$0xff]   ;;  %v15004_v53 = vld [vmem:[#allocation7 + $0x1028] ss:$48 sps:$4 sm:$0xff]  }
  0xe1   :  { %7573 = vmatprep.subr.bf16.mxu0 %v14973_v56  ;;  %8251 = vmatprep.subr.bf16.mxu1 %v14976_v57  ;;  %v229_v56 = vld [vmem:[#allocation5 + $0x4f0] sm:$0xff] }
  0xe2   :  { %v15009_v57 = vld [vmem:[#allocation7 + $0x1084] ss:$48 sps:$4 sm:$0xff]  }
  0xe3   :  { %7511 = vmatmul.mubr.bf16.gmra.mrb[12].mxu0 %v16771_v62  ;;  %8189 = vmatmul.mubr.bf16.gmra.mrb[12].mxu1 %v16771_v62 }
  0xe4   :  { %7574 = vmatpush1.bf16.msra.mxu0 %v14971_v60  ;;  %8252 = vmatpush1.bf16.msra.mxu1 %v14974_v61  ;;  %v15012_v60 = vld [vmem:[#allocation7 + $0x108c] ss:$48 sps:$4 sm:$0xff]   ;;  %v16795_v61 = vpack.c.bf16 %v229_v56, %v217_v55 }
  0xe5   :  { %7575 = vmatprep.subr.bf16.mxu0 %v14979_v2  ;;  %8253 = vmatprep.subr.bf16.mxu1 %v14982_v4  ;;  %v15007_v2 = vld [vmem:[#allocation7 + $0x1080] ss:$48 sps:$4 sm:$0xff]   ;;  %v15010_v4 = vld [vmem:[#allocation7 + $0x1088] ss:$48 sps:$4 sm:$0xff]  }
  0xe6   :  { %7520 = vmatprep.mubr.bf16.mxu0 %v16773_v5  ;;  %8198 = vmatprep.mubr.bf16.mxu1 %v16773_v5  ;;  %18154 = vst [vmem:[#allocation30_spill] sm:$0xff] %v16795_v61  ;;  %v100_v55 = vld [vmem:[#allocation5 + $0xe8] sm:$0xff] }
  0xe7   :  { %v112_v56 = vld [vmem:[#allocation5 + $0x148] sm:$0xff] }
  0xe8   :  { %7576 = vmatpush1.bf16.msra.mxu0 %v14977_v6  ;;  %8254 = vmatpush1.bf16.msra.mxu1 %v14980_v7  ;;  %v15015_v6 = vld [vmem:[#allocation7 + $0x10e4] ss:$48 sps:$4 sm:$0xff]   ;;  %v15018_v7 = vld [vmem:[#allocation7 + $0x10ec] ss:$48 sps:$4 sm:$0xff]  }
  0xe9   :  { %7577 = vmatprep.subr.bf16.mxu0 %v14985_v12  ;;  %8255 = vmatprep.subr.bf16.mxu1 %v14988_v14  ;;  %v16797_v12 = vpack.c.bf16 %v254_v1, %v242_v63  ;;  %v241_v14 = vld [vmem:[#allocation5 + $0x550] sm:$0xff]  ;;  %v16813_v63 = vpack.c.bf16 %v112_v56, %v100_v55  ;;  %v15066_v56 = vld [vmem:[#allocation7 + $0x13ec] ss:$48 sps:$4 sm:$0xff]  }
  0xea   :  { %v15037_v1 = vld [vmem:[#allocation7 + $0x1260] ss:$48 sps:$4 sm:$0xff]   ;;  %v15063_v55 = vld [vmem:[#allocation7 + $0x13e4] ss:$48 sps:$4 sm:$0xff]  }
  0xeb   :  { %7521 = vmatmul.mubr.bf16.gmra.mrb[16].mxu0 %v16779_v19  ;;  %8199 = vmatmul.mubr.bf16.gmra.mrb[16].mxu1 %v16779_v19  ;;  %18155 = vst [vmem:[#allocation31_spill] sm:$0xff] %v16797_v12  ;;  %18159 = vst [vmem:[#allocation35_spill] sm:$0xff] %v16813_v63 }
  0xec   :  { %7578 = vmatpush1.bf16.msra.mxu0 %v14983_v16  ;;  %8256 = vmatpush1.bf16.msra.mxu1 %v14986_v18  ;;  %v253_v16 = vld [vmem:[#allocation5 + $0x5b0] sm:$0xff] }
  0xed   :  { %7579 = vmatprep.subr.bf16.mxu0 %v14991_v24  ;;  %8257 = vmatprep.subr.bf16.mxu1 %v14994_v26  ;;  %v15021_v18 = vld [vmem:[#allocation7 + $0x1144] ss:$48 sps:$4 sm:$0xff]   ;;  %v16803_v24 = vpack.c.bf16 %v253_v16, %v241_v14  ;;  %v15022_v26 = vld [vmem:[#allocation7 + $0x1148] ss:$48 sps:$4 sm:$0xff]  }
  0xee   :  { %7530 = vmatprep.mubr.bf16.mxu0 %v16781_v29  ;;  %8208 = vmatprep.mubr.bf16.mxu1 %v16781_v29  ;;  %v15046_v14 = vld [vmem:[#allocation7 + $0x12c8] ss:$48 sps:$4 sm:$0xff]  }
  0xef   :  { %18156 = vst [vmem:[#allocation32_spill] sm:$0xff] %v16803_v24 }
  0xf0   :  { %7580 = vmatpush1.bf16.msra.mxu0 %v14989_v27  ;;  %8258 = vmatpush1.bf16.msra.mxu1 %v14992_v30  ;;  %v76_v27 = vld [vmem:[#allocation5 + $0x28] sm:$0xff] }
  0xf1   :  { %7581 = vmatprep.subr.bf16.mxu0 %v14997_v35  ;;  %8259 = vmatprep.subr.bf16.mxu1 %v15000_v36  ;;  %v88_v30 = vld [vmem:[#allocation5 + $0x88] sm:$0xff]  ;;  %v15025_v35 = vld [vmem:[#allocation7 + $0x11a0] ss:$48 sps:$4 sm:$0xff]  }
  0xf2   :  { %v16805_v36 = vpack.c.bf16 %v88_v30, %v76_v27  ;;  %v15049_v27 = vld [vmem:[#allocation7 + $0x1320] ss:$48 sps:$4 sm:$0xff]  }
  0xf3   :  { %7531 = vmatmul.mubr.bf16.gmra.mrb[20].mxu0 %v16787_v39  ;;  %8209 = vmatmul.mubr.bf16.gmra.mrb[20].mxu1 %v16787_v39 }
  0xf4   :  { %7582 = vmatpush1.bf16.msra.mxu0 %v14995_v38  ;;  %8260 = vmatpush1.bf16.msra.mxu1 %v14998_v45  ;;  %18157 = vst [vmem:[#allocation33_spill] sm:$0xff] %v16805_v36  ;;  %v15028_v38 = vld [vmem:[#allocation7 + $0x11a8] ss:$48 sps:$4 sm:$0xff]   ;;  %v15033_v45 = vld [vmem:[#allocation7 + $0x1204] ss:$48 sps:$4 sm:$0xff]  }
  0xf5   :  { %7583 = vmatprep.subr.bf16.mxu0 %v15003_v46  ;;  %8261 = vmatprep.subr.bf16.mxu1 %v15006_v47  ;;  %v15036_v46 = vld [vmem:[#allocation7 + $0x120c] ss:$48 sps:$4 sm:$0xff]   ;;  %v15031_v47 = vld [vmem:[#allocation7 + $0x1200] ss:$48 sps:$4 sm:$0xff]  }
  0xf6   :  { %7540 = vmatprep.mubr.bf16.mxu0 %v16789_v54  ;;  %8218 = vmatprep.mubr.bf16.mxu1 %v16789_v54 }
  0xf8   :  { %7584 = vmatpush1.bf16.msra.mxu0 %v15001_v48  ;;  %8262 = vmatpush1.bf16.msra.mxu1 %v15004_v53  ;;  %v15034_v48 = vld [vmem:[#allocation7 + $0x1208] ss:$48 sps:$4 sm:$0xff]   ;;  %v16811_v53 = vpack.c.bf16 %v87_v44, %v75_v42  ;;  %v15060_v42 = vld [vmem:[#allocation7 + $0x138c] ss:$48 sps:$4 sm:$0xff]   ;;  %v15055_v44 = vld [vmem:[#allocation7 + $0x1380] ss:$48 sps:$4 sm:$0xff]  }
  0xf9   :  { %7585 = vmatprep.subr.bf16.mxu0 %v15009_v57  ;;  %8263 = vmatprep.subr.bf16.mxu1 %v15012_v60  ;;  %v15039_v57 = vld [vmem:[#allocation7 + $0x1264] ss:$48 sps:$4 sm:$0xff]   ;;  %v15042_v60 = vld [vmem:[#allocation7 + $0x126c] ss:$48 sps:$4 sm:$0xff]  }
  0xfa   :  { %18158 = vst [vmem:[#allocation34_spill] sm:$0xff] %v16811_v53 }
  0xfb   :  { %7541 = vmatmul.mubr.bf16.gmra.mrb[24].mxu0 %v16795_v61  ;;  %8219 = vmatmul.mubr.bf16.gmra.mrb[24].mxu1 %v16795_v61 }
  0xfc   :  { %7586 = vmatpush1.bf16.msra.mxu0 %v15007_v2  ;;  %8264 = vmatpush1.bf16.msra.mxu1 %v15010_v4  ;;  %v15040_v2 = vld [vmem:[#allocation7 + $0x1268] ss:$48 sps:$4 sm:$0xff]   ;;  %v99_v4 = vld [vmem:[#allocation5 + $0xe0] sm:$0xff] }
  0xfd   :  { %7587 = vmatprep.subr.bf16.mxu0 %v15015_v6  ;;  %8265 = vmatprep.subr.bf16.mxu1 %v15018_v7  ;;  %v111_v6 = vld [vmem:[#allocation5 + $0x140] sm:$0xff] }
  0xfe   :  { %7550 = vmatprep.mubr.bf16.mxu0 %v16797_v12  ;;  %8228 = vmatprep.mubr.bf16.mxu1 %v16797_v12  ;;  %v15045_v7 = vld [vmem:[#allocation7 + $0x12c4] ss:$48 sps:$4 sm:$0xff]   ;;  %v16819_v16 = vpack.c.bf16 %v111_v6, %v99_v4 }
  0xff   :  { %v159_v4 = vld [vmem:[#allocation5 + $0x2c0] sm:$0xff] }
 0x100   :  { %7588 = vmatpush1.bf16.msra.mxu0 %v15013_v9  ;;  %8266 = vmatpush1.bf16.msra.mxu1 %v15016_v11  ;;  %v15048_v9 = vld [vmem:[#allocation7 + $0x12cc] ss:$48 sps:$4 sm:$0xff]   ;;  %v15043_v11 = vld [vmem:[#allocation7 + $0x12c0] ss:$48 sps:$4 sm:$0xff]   ;;  %18160 = vst [vmem:[#allocation36_spill] sm:$0xff] %v16819_v16 }
 0x101   :  { %7589 = vmatprep.subr.bf16.mxu0 %v15021_v18  ;;  %8267 = vmatprep.subr.bf16.mxu1 %v15024_v21  ;;  %v124_v18 = vld [vmem:[#allocation5 + $0x1a8] sm:$0xff]  ;;  %v15069_v6 = vld [vmem:[#allocation7 + $0x1444] ss:$48 sps:$4 sm:$0xff]  }
 0x102   :  { %v136_v21 = vld [vmem:[#allocation5 + $0x208] sm:$0xff] }
 0x103   :  { %7551 = vmatmul.mubr.bf16.gmra.mrb[28].mxu0 %v16803_v24  ;;  %8229 = vmatmul.mubr.bf16.gmra.mrb[28].mxu1 %v16803_v24  ;;  %v16821_v30 = vpack.c.bf16 %v136_v21, %v124_v18  ;;  %v15067_v18 = vld [vmem:[#allocation7 + $0x1440] ss:$48 sps:$4 sm:$0xff]   ;;  %v15070_v21 = vld [vmem:[#allocation7 + $0x1448] ss:$48 sps:$4 sm:$0xff]  }
 0x104   :  { %7590 = vmatpush1.bf16.msra.mxu0 %v15019_v22  ;;  %8268 = vmatpush1.bf16.msra.mxu1 %v15022_v26  ;;  %v15051_v22 = vld [vmem:[#allocation7 + $0x1324] ss:$48 sps:$4 sm:$0xff]   ;;  %v15054_v26 = vld [vmem:[#allocation7 + $0x132c] ss:$48 sps:$4 sm:$0xff]  }
 0x105   :  { %7591 = vmatprep.subr.bf16.mxu0 %v15027_v31  ;;  %8269 = vmatprep.subr.bf16.mxu1 %v15030_v33  ;;  %18161 = vst [vmem:[#allocation37_spill] sm:$0xff] %v16821_v30  ;;  %v15052_v31 = vld [vmem:[#allocation7 + $0x1328] ss:$48 sps:$4 sm:$0xff]   ;;  %v123_v33 = vld [vmem:[#allocation5 + $0x1a0] sm:$0xff] }
 0x106   :  { %7593 = vmatprep.mubr.bf16.mxu0 %v16805_v36  ;;  %8271 = vmatprep.mubr.bf16.mxu1 %v16805_v36 }
 0x108   :  { %7592 = vmatpush1.bf16.msra.mxu0 %v15025_v35  ;;  %8270 = vmatpush1.bf16.msra.mxu1 %v15028_v38  ;;  %v135_v35 = vld [vmem:[#allocation5 + $0x200] sm:$0xff] }
 0x109   :  { %7674 = vmatprep.subr.bf16.mxu0 %v15033_v45  ;;  %8352 = vmatprep.subr.bf16.mxu1 %v15036_v46  ;;  %v15057_v38 = vld [vmem:[#allocation7 + $0x1384] ss:$48 sps:$4 sm:$0xff]   ;;  %v16827_v45 = vpack.c.bf16 %v135_v35, %v123_v33  ;;  %v148_v46 = vld [vmem:[#allocation5 + $0x268] sm:$0xff] }
 0x10a   :  { %v171_v35 = vld [vmem:[#allocation5 + $0x320] sm:$0xff] }
 0x10b   :  { %7594 = vmatmul.mubr.bf16.vlgmr.msra.gmra.mrb[0].mxu0 %v16811_v53  ;;  %8272 = vmatmul.mubr.bf16.vlgmr.msra.gmra.mrb[0].mxu1 %v16811_v53  ;;  %18162 = vst [vmem:[#allocation38_spill] sm:$0xff] %v16827_v45 }
 0x10c   :  { %7675 = vmatpush1.bf16.msra.mxu0 %v15031_v47  ;;  %8353 = vmatpush1.bf16.msra.mxu1 %v15034_v48  ;;  %v160_v47 = vld [vmem:[#allocation5 + $0x2c8] sm:$0xff] }
 0x10d   :  { %7676 = vmatprep.subr.bf16.mxu0 %v15039_v57  ;;  %8354 = vmatprep.subr.bf16.mxu1 %v15042_v60  ;;  %v15058_v48 = vld [vmem:[#allocation7 + $0x1388] ss:$48 sps:$4 sm:$0xff]   ;;  %v15061_v57 = vld [vmem:[#allocation7 + $0x13e0] ss:$48 sps:$4 sm:$0xff]  }
 0x10e   :  { %7603 = vmatprep.mubr.bf16.mxu0 %v16813_v63  ;;  %8281 = vmatprep.mubr.bf16.mxu1 %v16813_v63  ;;  %v15064_v60 = vld [vmem:[#allocation7 + $0x13e8] ss:$48 sps:$4 sm:$0xff]  }
 0x110   :  { %7677 = vmatpush1.bf16.msra.mxu0 %v15037_v1  ;;  %8355 = vmatpush1.bf16.msra.mxu1 %v15040_v2  ;;  %v16829_v1 = vpack.c.bf16 %v160_v47, %v148_v46  ;;  %v147_v2 = vld [vmem:[#allocation5 + $0x260] sm:$0xff] }
 0x111   :  { %7678 = vmatprep.subr.bf16.mxu0 %v15045_v7  ;;  %8356 = vmatprep.subr.bf16.mxu1 %v15048_v9  ;;  %v15072_v7 = vld [vmem:[#allocation7 + $0x144c] ss:$48 sps:$4 sm:$0xff]   ;;  %v16835_v9 = vpack.c.bf16 %v159_v4, %v147_v2  ;;  %v15079_v46 = vld [vmem:[#allocation7 + $0x1500] ss:$48 sps:$4 sm:$0xff]  }
 0x112   :  { %18163 = vst [vmem:[#allocation39_spill] sm:$0xff] %v16829_v1  ;;  %v15085_v2 = vld [vmem:[#allocation7 + $0x1560] ss:$48 sps:$4 sm:$0xff]  }
 0x113   :  { %7604 = vmatmul.mubr.bf16.gmra.mrb[4].mxu0 %v16819_v16  ;;  %8282 = vmatmul.mubr.bf16.gmra.mrb[4].mxu1 %v16819_v16  ;;  %18164 = vst [vmem:[#allocation40_spill] sm:$0xff] %v16835_v9 }
 0x114   :  { %7679 = vmatpush1.bf16.msra.mxu0 %v15043_v11  ;;  %8357 = vmatpush1.bf16.msra.mxu1 %v15046_v14  ;;  %v172_v11 = vld [vmem:[#allocation5 + $0x328] sm:$0xff] }
 0x115   :  { %7680 = vmatprep.subr.bf16.mxu0 %v15051_v22  ;;  %8358 = vmatprep.subr.bf16.mxu1 %v15054_v26  ;;  %v184_v14 = vld [vmem:[#allocation5 + $0x388] sm:$0xff]  ;;  %v15075_v22 = vld [vmem:[#allocation7 + $0x14a4] ss:$48 sps:$4 sm:$0xff]  }
 0x116   :  { %7613 = vmatprep.mubr.bf16.mxu0 %v16821_v30  ;;  %8291 = vmatprep.mubr.bf16.mxu1 %v16821_v30  ;;  %v15078_v26 = vld [vmem:[#allocation7 + $0x14ac] ss:$48 sps:$4 sm:$0xff]   ;;  %v16837_v33 = vpack.c.bf16 %v184_v14, %v172_v11  ;;  %v207_v11 = vld [vmem:[#allocation5 + $0x440] sm:$0xff] }
 0x117   :  { %v15093_v14 = vld [vmem:[#allocation7 + $0x15c4] ss:$48 sps:$4 sm:$0xff]  }
 0x118   :  { %7681 = vmatpush1.bf16.msra.mxu0 %v15049_v27  ;;  %8359 = vmatpush1.bf16.msra.mxu1 %v15052_v31  ;;  %v15073_v27 = vld [vmem:[#allocation7 + $0x14a0] ss:$48 sps:$4 sm:$0xff]   ;;  %v15076_v31 = vld [vmem:[#allocation7 + $0x14a8] ss:$48 sps:$4 sm:$0xff]   ;;  %18165 = vst [vmem:[#allocation41_spill] sm:$0xff] %v16837_v33 }
 0x119   :  { %7682 = vmatprep.subr.bf16.mxu0 %v15057_v38  ;;  %8360 = vmatprep.subr.bf16.mxu1 %v15060_v42  ;;  %v183_v38 = vld [vmem:[#allocation5 + $0x380] sm:$0xff] }
 0x11a   :  { %v15081_v42 = vld [vmem:[#allocation7 + $0x1504] ss:$48 sps:$4 sm:$0xff]   ;;  %v16843_v47 = vpack.c.bf16 %v183_v38, %v171_v35  ;;  %v15102_v38 = vld [vmem:[#allocation7 + $0x162c] ss:$48 sps:$4 sm:$0xff]  }
 0x11b   :  { %7614 = vmatmul.mubr.bf16.gmra.mrb[8].mxu0 %v16827_v45  ;;  %8292 = vmatmul.mubr.bf16.gmra.mrb[8].mxu1 %v16827_v45  ;;  %v15099_v35 = vld [vmem:[#allocation7 + $0x1624] ss:$48 sps:$4 sm:$0xff]  }
 0x11c   :  { %7683 = vmatpush1.bf16.msra.mxu0 %v15055_v44  ;;  %8361 = vmatpush1.bf16.msra.mxu1 %v15058_v48  ;;  %v15084_v44 = vld [vmem:[#allocation7 + $0x150c] ss:$48 sps:$4 sm:$0xff]   ;;  %18166 = vst [vmem:[#allocation42_spill] sm:$0xff] %v16843_v47  ;;  %v15082_v48 = vld [vmem:[#allocation7 + $0x1508] ss:$48 sps:$4 sm:$0xff]  }
 0x11d   :  { %7684 = vmatprep.subr.bf16.mxu0 %v15063_v55  ;;  %8362 = vmatprep.subr.bf16.mxu1 %v15066_v56  ;;  %v196_v55 = vld [vmem:[#allocation5 + $0x3e8] sm:$0xff] }
 0x11e   :  { %7623 = vmatprep.mubr.bf16.mxu0 %v16829_v1  ;;  %8301 = vmatprep.mubr.bf16.mxu1 %v16829_v1  ;;  %v208_v56 = vld [vmem:[#allocation5 + $0x448] sm:$0xff] }
 0x11f   :  { %v16845_v4 = vpack.c.bf16 %v208_v56, %v196_v55  ;;  %v231_v55 = vld [vmem:[#allocation5 + $0x500] sm:$0xff] }
 0x120   :  { %7685 = vmatpush1.bf16.msra.mxu0 %v15061_v57  ;;  %8363 = vmatpush1.bf16.msra.mxu1 %v15064_v60  ;;  %v15087_v57 = vld [vmem:[#allocation7 + $0x1564] ss:$48 sps:$4 sm:$0xff]   ;;  %v15090_v60 = vld [vmem:[#allocation7 + $0x156c] ss:$48 sps:$4 sm:$0xff]  }
 0x121   :  { %7686 = vmatprep.subr.bf16.mxu0 %v15069_v6  ;;  %8364 = vmatprep.subr.bf16.mxu1 %v15072_v7  ;;  %18167 = vst [vmem:[#allocation43_spill] sm:$0xff] %v16845_v4  ;;  %v15088_v6 = vld [vmem:[#allocation7 + $0x1568] ss:$48 sps:$4 sm:$0xff]   ;;  %v195_v7 = vld [vmem:[#allocation5 + $0x3e0] sm:$0xff] }
 0x122   :  { %v15105_v56 = vld [vmem:[#allocation7 + $0x1684] ss:$48 sps:$4 sm:$0xff]  }
 0x123   :  { %7624 = vmatmul.mubr.bf16.gmra.mrb[12].mxu0 %v16835_v9  ;;  %8302 = vmatmul.mubr.bf16.gmra.mrb[12].mxu1 %v16835_v9 }
 0x124   :  { %7687 = vmatpush1.bf16.msra.mxu0 %v15067_v18  ;;  %8365 = vmatpush1.bf16.msra.mxu1 %v15070_v21  ;;  %v15096_v18 = vld [vmem:[#allocation7 + $0x15cc] ss:$48 sps:$4 sm:$0xff]   ;;  %v15091_v21 = vld [vmem:[#allocation7 + $0x15c0] ss:$48 sps:$4 sm:$0xff]  }
 0x125   :  { %7688 = vmatprep.subr.bf16.mxu0 %v15075_v22  ;;  %8366 = vmatprep.subr.bf16.mxu1 %v15078_v26  ;;  %v15094_v22 = vld [vmem:[#allocation7 + $0x15c8] ss:$48 sps:$4 sm:$0xff]   ;;  %v16851_v26 = vpack.c.bf16 %v207_v11, %v195_v7 }
 0x126   :  { %7633 = vmatprep.mubr.bf16.mxu0 %v16837_v33  ;;  %8311 = vmatprep.mubr.bf16.mxu1 %v16837_v33  ;;  %v244_v7 = vld [vmem:[#allocation5 + $0x568] sm:$0xff] }
 0x127   :  { %18168 = vst [vmem:[#allocation44_spill] sm:$0xff] %v16851_v26  ;;  %v256_v11 = vld [vmem:[#allocation5 + $0x5c8] sm:$0xff] }
 0x128   :  { %7689 = vmatpush1.bf16.msra.mxu0 %v15073_v27  ;;  %8367 = vmatpush1.bf16.msra.mxu1 %v15076_v31  ;;  %v220_v27 = vld [vmem:[#allocation5 + $0x4a8] sm:$0xff] }
 0x129   :  { %7690 = vmatprep.subr.bf16.mxu0 %v15081_v42  ;;  %8368 = vmatprep.subr.bf16.mxu1 %v15084_v44  ;;  %v232_v31 = vld [vmem:[#allocation5 + $0x508] sm:$0xff]  ;;  %v15097_v44 = vld [vmem:[#allocation7 + $0x1620] ss:$48 sps:$4 sm:$0xff]  }
 0x12a   :  { %v16853_v42 = vpack.c.bf16 %v232_v31, %v220_v27  ;;  %v15112_v27 = vld [vmem:[#allocation7 + $0x16e8] ss:$48 sps:$4 sm:$0xff]   ;;  %v243_v31 = vld [vmem:[#allocation5 + $0x560] sm:$0xff] }
 0x12b   :  { %7634 = vmatmul.mubr.bf16.gmra.mrb[16].mxu0 %v16843_v47  ;;  %8312 = vmatmul.mubr.bf16.gmra.mrb[16].mxu1 %v16843_v47 }
 0x12c   :  { %7691 = vmatpush1.bf16.msra.mxu0 %v15079_v46  ;;  %8369 = vmatpush1.bf16.msra.mxu1 %v15082_v48  ;;  %18169 = vst [vmem:[#allocation45_spill] sm:$0xff] %v16853_v42  ;;  %v15100_v46 = vld [vmem:[#allocation7 + $0x1628] ss:$48 sps:$4 sm:$0xff]   ;;  %v219_v48 = vld [vmem:[#allocation5 + $0x4a0] sm:$0xff] }
 0x12d   :  { %7692 = vmatprep.subr.bf16.mxu0 %v15087_v57  ;;  %8370 = vmatprep.subr.bf16.mxu1 %v15090_v60  ;;  %v15108_v57 = vld [vmem:[#allocation7 + $0x168c] ss:$48 sps:$4 sm:$0xff]   ;;  %v15103_v60 = vld [vmem:[#allocation7 + $0x1680] ss:$48 sps:$4 sm:$0xff]  }
 0x12e   :  { %7643 = vmatprep.mubr.bf16.mxu0 %v16845_v4  ;;  %8321 = vmatprep.mubr.bf16.mxu1 %v16845_v4 }
 0x130   :  { %7693 = vmatpush1.bf16.msra.mxu0 %v15085_v2  ;;  %8371 = vmatpush1.bf16.msra.mxu1 %v15088_v6  ;;  %v15106_v2 = vld [vmem:[#allocation7 + $0x1688] ss:$48 sps:$4 sm:$0xff]   ;;  %v16859_v6 = vpack.c.bf16 %v231_v55, %v219_v48 }
 0x131   :  { %7694 = vmatprep.subr.bf16.mxu0 %v15093_v14  ;;  %8372 = vmatprep.subr.bf16.mxu1 %v15096_v18  ;;  %v15111_v14 = vld [vmem:[#allocation7 + $0x16e4] ss:$48 sps:$4 sm:$0xff]   ;;  %v15114_v18 = vld [vmem:[#allocation7 + $0x16ec] ss:$48 sps:$4 sm:$0xff]  }
 0x132   :  { %18170 = vst [vmem:[#allocation46_spill] sm:$0xff] %v16859_v6  ;;  %v78_v55 = vld [vmem:[#allocation5 + $0x38] sm:$0xff] }
 0x133   :  { %7644 = vmatmul.mubr.bf16.gmra.mrb[20].mxu0 %v16851_v26  ;;  %8322 = vmatmul.mubr.bf16.gmra.mrb[20].mxu1 %v16851_v26 }
 0x134   :  { %7695 = vmatpush1.bf16.msra.mxu0 %v15091_v21  ;;  %8373 = vmatpush1.bf16.msra.mxu1 %v15094_v22  ;;  %v15109_v21 = vld [vmem:[#allocation7 + $0x16e0] ss:$48 sps:$4 sm:$0xff]   ;;  %v16861_v22 = vpack.c.bf16 %v256_v11, %v244_v7  ;;  %v15124_v11 = vld [vmem:[#allocation7 + $0x17a8] ss:$48 sps:$4 sm:$0xff]  }
 0x135   :  { %7696 = vmatprep.subr.bf16.mxu0 %v15099_v35  ;;  %8374 = vmatprep.subr.bf16.mxu1 %v15102_v38  ;;  %v255_v35 = vld [vmem:[#allocation5 + $0x5c0] sm:$0xff] }
 0x136   :  { %7653 = vmatprep.mubr.bf16.mxu0 %v16853_v42  ;;  %8331 = vmatprep.mubr.bf16.mxu1 %v16853_v42  ;;  %18171 = vst [vmem:[#allocation47_spill] sm:$0xff] %v16861_v22  ;;  %v15117_v38 = vld [vmem:[#allocation7 + $0x1744] ss:$48 sps:$4 sm:$0xff]   ;;  %v16867_v48 = vpack.c.bf16 %v255_v35, %v243_v31  ;;  %v15121_v7 = vld [vmem:[#allocation7 + $0x17a0] ss:$48 sps:$4 sm:$0xff]  }
 0x137   :  { %v89_v31 = vld [vmem:[#allocation5 + $0x90] sm:$0xff] }
 0x138   :  { %7697 = vmatpush1.bf16.msra.mxu0 %v15097_v44  ;;  %8375 = vmatpush1.bf16.msra.mxu1 %v15100_v46  ;;  %v15120_v44 = vld [vmem:[#allocation7 + $0x174c] ss:$48 sps:$4 sm:$0xff]   ;;  %v15115_v46 = vld [vmem:[#allocation7 + $0x1740] ss:$48 sps:$4 sm:$0xff]   ;;  %18172 = vst [vmem:[#allocation48_spill] sm:$0xff] %v16867_v48 }
 0x139   :  { %7698 = vmatprep.subr.bf16.mxu0 %v15105_v56  ;;  %8376 = vmatprep.subr.bf16.mxu1 %v15108_v57  ;;  %v90_v56 = vld [vmem:[#allocation5 + $0x98] sm:$0xff]  ;;  %v15129_v35 = vld [vmem:[#allocation7 + $0x1804] ss:$48 sps:$4 sm:$0xff]  }
 0x13a   :  { %v15118_v57 = vld [vmem:[#allocation7 + $0x1748] ss:$48 sps:$4 sm:$0xff]  }
 0x13b   :  { %7654 = vmatmul.mubr.bf16.gmra.mrb[24].mxu0 %v16859_v6  ;;  %8332 = vmatmul.mubr.bf16.gmra.mrb[24].mxu1 %v16859_v6 }
 0x13c   :  { %7699 = vmatpush1.bf16.msra.mxu0 %v15103_v60  ;;  %8377 = vmatpush1.bf16.msra.mxu1 %v15106_v2  ;;  %v15123_v60 = vld [vmem:[#allocation7 + $0x17a4] ss:$48 sps:$4 sm:$0xff]   ;;  %v15126_v2 = vld [vmem:[#allocation7 + $0x17ac] ss:$48 sps:$4 sm:$0xff]  }
 0x13d   :  { %7700 = vmatprep.subr.bf16.mxu0 %v15111_v14  ;;  %8378 = vmatprep.subr.bf16.mxu1 %v15114_v18  ;;  %v16869_v14 = vpack.c.bf16 %v90_v56, %v78_v55  ;;  %v77_v18 = vld [vmem:[#allocation5 + $0x30] sm:$0xff]  ;;  %v15130_v56 = vld [vmem:[#allocation7 + $0x1808] ss:$48 sps:$4 sm:$0xff]  }
 0x13e   :  { %7663 = vmatprep.mubr.bf16.mxu0 %v16861_v22  ;;  %8341 = vmatprep.mubr.bf16.mxu1 %v16861_v22  ;;  %v15127_v55 = vld [vmem:[#allocation7 + $0x1800] ss:$48 sps:$4 sm:$0xff]  }
 0x13f   :  { %18173 = vst [vmem:[#allocation49_spill] sm:$0xff] %v16869_v14  ;;  %v185_v22 = vld [vmem:[#allocation5 + $0x390] sm:$0xff] }
 0x140   :  { %7701 = vmatpush1.bf16.msra.mxu0 %v15109_v21  ;;  %8379 = vmatpush1.bf16.msra.mxu1 %v15112_v27  ;;  %v15132_v21 = vld [vmem:[#allocation7 + $0x180c] ss:$48 sps:$4 sm:$0xff]   ;;  %v16875_v27 = vpack.c.bf16 %v89_v31, %v77_v18  ;;  %v101_v18 = vld [vmem:[#allocation5 + $0xf0] sm:$0xff] }
 0x141   :  { %7702 = vmatprep.subr.bf16.mxu0 %v15117_v38  ;;  %8380 = vmatprep.subr.bf16.mxu1 %v15120_v44  ;;  %v102_v38 = vld [vmem:[#allocation5 + $0xf8] sm:$0xff]  ;;  %v113_v31 = vld [vmem:[#allocation5 + $0x150] sm:$0xff] }
 0x142   :  { %18174 = vst [vmem:[#allocation50_spill] sm:$0xff] %v16875_v27  ;;  %v114_v44 = vld [vmem:[#allocation5 + $0x158] sm:$0xff] }
 0x143   :  { %7664 = vmatmul.mubr.bf16.gmra.mrb[28].mxu0 %v16867_v48  ;;  %8342 = vmatmul.mubr.bf16.gmra.mrb[28].mxu1 %v16867_v48  ;;  %v15135_v48 = vld [vmem:[#allocation7 + $0x1864] ss:$48 sps:$4 sm:$0xff]  }
 0x144   :  { %7703 = vmatpush1.bf16.msra.mxu0 %v15115_v46  ;;  %8381 = vmatpush1.bf16.msra.mxu1 %v15118_v57  ;;  %v15138_v46 = vld [vmem:[#allocation7 + $0x186c] ss:$48 sps:$4 sm:$0xff]   ;;  %v15133_v57 = vld [vmem:[#allocation7 + $0x1860] ss:$48 sps:$4 sm:$0xff]  }
 0x145   :  { %7704 = vmatprep.subr.bf16.mxu0 %v15123_v60  ;;  %8382 = vmatprep.subr.bf16.mxu1 %v15126_v2  ;;  %v15136_v60 = vld [vmem:[#allocation7 + $0x1868] ss:$48 sps:$4 sm:$0xff]   ;;  %v16877_v2 = vpack.c.bf16 %v114_v44, %v102_v38 }
 0x146   :  { %7706 = vmatprep.mubr.bf16.mxu0 %v16869_v14  ;;  %8384 = vmatprep.mubr.bf16.mxu1 %v16869_v14  ;;  %v15142_v38 = vld [vmem:[#allocation7 + $0x18c8] ss:$48 sps:$4 sm:$0xff]  }
 0x147   :  { %18175 = vst [vmem:[#allocation51_spill] sm:$0xff] %v16877_v2  ;;  %v126_v44 = vld [vmem:[#allocation5 + $0x1b8] sm:$0xff] }
 0x148   :  { %7705 = vmatpush1.bf16.msra.mxu0 %v15121_v7  ;;  %8383 = vmatpush1.bf16.msra.mxu1 %v15124_v11  ;;  %v15141_v7 = vld [vmem:[#allocation7 + $0x18c4] ss:$48 sps:$4 sm:$0xff]   ;;  %v15144_v11 = vld [vmem:[#allocation7 + $0x18cc] ss:$48 sps:$4 sm:$0xff]  }
 0x149   :  { %7787 = vmatprep.subr.bf16.mxu0 %v15129_v35  ;;  %8465 = vmatprep.subr.bf16.mxu1 %v15132_v21  ;;  %v15139_v35 = vld [vmem:[#allocation7 + $0x18c0] ss:$48 sps:$4 sm:$0xff]   ;;  %v16883_v21 = vpack.c.bf16 %v113_v31, %v101_v18  ;;  %v138_v14 = vld [vmem:[#allocation5 + $0x218] sm:$0xff] }
 0x14a   :  { %v137_v18 = vld [vmem:[#allocation5 + $0x210] sm:$0xff] }
 0x14b   :  { %7707 = vmatmul.mubr.bf16.vlgmr.msra.gmra.mrb[0].mxu0 %v16875_v27  ;;  %8385 = vmatmul.mubr.bf16.vlgmr.msra.gmra.mrb[0].mxu1 %v16875_v27  ;;  %18176 = vst [vmem:[#allocation52_spill] sm:$0xff] %v16883_v21  ;;  %v15147_v27 = vld [vmem:[#allocation7 + $0x1924] ss:$48 sps:$4 sm:$0xff]   ;;  %v15151_v31 = vld [vmem:[#allocation7 + $0x1980] ss:$48 sps:$4 sm:$0xff]  }
 0x14c   :  { %7788 = vmatpush1.bf16.msra.mxu0 %v15127_v55  ;;  %8466 = vmatpush1.bf16.msra.mxu1 %v15130_v56  ;;  %v15150_v55 = vld [vmem:[#allocation7 + $0x192c] ss:$48 sps:$4 sm:$0xff]   ;;  %v15145_v56 = vld [vmem:[#allocation7 + $0x1920] ss:$48 sps:$4 sm:$0xff]  }
 0x14d   :  { %7789 = vmatprep.subr.bf16.mxu0 %v15135_v48  ;;  %8467 = vmatprep.subr.bf16.mxu1 %v15138_v46  ;;  %v16885_v48 = vpack.c.bf16 %v138_v14, %v126_v44  ;;  %v15148_v46 = vld [vmem:[#allocation7 + $0x1928] ss:$48 sps:$4 sm:$0xff]  }
 0x14e   :  { %7716 = vmatprep.mubr.bf16.mxu0 %v16877_v2  ;;  %8394 = vmatprep.mubr.bf16.mxu1 %v16877_v2  ;;  %v125_v2 = vld [vmem:[#allocation5 + $0x1b0] sm:$0xff]  ;;  %v15154_v14 = vld [vmem:[#allocation7 + $0x1988] ss:$48 sps:$4 sm:$0xff]  }
 0x14f   :  { %18177 = vst [vmem:[#allocation53_spill] sm:$0xff] %v16885_v48  ;;  %v162_v44 = vld [vmem:[#allocation5 + $0x2d8] sm:$0xff] }
 0x150   :  { %7790 = vmatpush1.bf16.msra.mxu0 %v15133_v57  ;;  %8468 = vmatpush1.bf16.msra.mxu1 %v15136_v60  ;;  %v15153_v57 = vld [vmem:[#allocation7 + $0x1984] ss:$48 sps:$4 sm:$0xff]   ;;  %v15156_v60 = vld [vmem:[#allocation7 + $0x198c] ss:$48 sps:$4 sm:$0xff]  }
 0x151   :  { %7791 = vmatprep.subr.bf16.mxu0 %v15141_v7  ;;  %8469 = vmatprep.subr.bf16.mxu1 %v15144_v11  ;;  %v16891_v7 = vpack.c.bf16 %v137_v18, %v125_v2  ;;  %v150_v11 = vld [vmem:[#allocation5 + $0x278] sm:$0xff]  ;;  %v149_v2 = vld [vmem:[#allocation5 + $0x270] sm:$0xff] }
 0x152   :  { %v161_v18 = vld [vmem:[#allocation5 + $0x2d0] sm:$0xff] }
 0x153   :  { %7717 = vmatmul.mubr.bf16.gmra.mrb[4].mxu0 %v16883_v21  ;;  %8395 = vmatmul.mubr.bf16.gmra.mrb[4].mxu1 %v16883_v21  ;;  %18178 = vst [vmem:[#allocation54_spill] sm:$0xff] %v16891_v7  ;;  %v15159_v21 = vld [vmem:[#allocation7 + $0x19e4] ss:$48 sps:$4 sm:$0xff]  }
 0x154   :  { %7792 = vmatpush1.bf16.msra.mxu0 %v15139_v35  ;;  %8470 = vmatpush1.bf16.msra.mxu1 %v15142_v38  ;;  %v15162_v35 = vld [vmem:[#allocation7 + $0x19ec] ss:$48 sps:$4 sm:$0xff]   ;;  %v15157_v38 = vld [vmem:[#allocation7 + $0x19e0] ss:$48 sps:$4 sm:$0xff]  }
 0x155   :  { %7793 = vmatprep.subr.bf16.mxu0 %v15147_v27  ;;  %8471 = vmatprep.subr.bf16.mxu1 %v15150_v55  ;;  %v16893_v27 = vpack.c.bf16 %v162_v44, %v150_v11  ;;  %v15160_v55 = vld [vmem:[#allocation7 + $0x19e8] ss:$48 sps:$4 sm:$0xff]  }
 0x156   :  { %7726 = vmatprep.mubr.bf16.mxu0 %v16885_v48  ;;  %8404 = vmatprep.mubr.bf16.mxu1 %v16885_v48  ;;  %v15165_v48 = vld [vmem:[#allocation7 + $0x1a44] ss:$48 sps:$4 sm:$0xff]   ;;  %v174_v11 = vld [vmem:[#allocation5 + $0x338] sm:$0xff] }
 0x157   :  { %18179 = vst [vmem:[#allocation55_spill] sm:$0xff] %v16893_v27  ;;  %v186_v44 = vld [vmem:[#allocation5 + $0x398] sm:$0xff] }
 0x158   :  { %7794 = vmatpush1.bf16.msra.mxu0 %v15145_v56  ;;  %8472 = vmatpush1.bf16.msra.mxu1 %v15148_v46  ;;  %v15168_v56 = vld [vmem:[#allocation7 + $0x1a4c] ss:$48 sps:$4 sm:$0xff]   ;;  %v15163_v46 = vld [vmem:[#allocation7 + $0x1a40] ss:$48 sps:$4 sm:$0xff]  }
 0x159   :  { %7795 = vmatprep.subr.bf16.mxu0 %v15153_v57  ;;  %8473 = vmatprep.subr.bf16.mxu1 %v15156_v60  ;;  %v15166_v57 = vld [vmem:[#allocation7 + $0x1a48] ss:$48 sps:$4 sm:$0xff]   ;;  %v16899_v60 = vpack.c.bf16 %v161_v18, %v149_v2  ;;  %v15177_v2 = vld [vmem:[#allocation7 + $0x1b04] ss:$48 sps:$4 sm:$0xff]  }
 0x15a   :  { %v198_v18 = vld [vmem:[#allocation5 + $0x3f8] sm:$0xff] }
 0x15b   :  { %7727 = vmatmul.mubr.bf16.gmra.mrb[8].mxu0 %v16891_v7  ;;  %8405 = vmatmul.mubr.bf16.gmra.mrb[8].mxu1 %v16891_v7  ;;  %18180 = vst [vmem:[#allocation56_spill] sm:$0xff] %v16899_v60  ;;  %v15169_v7 = vld [vmem:[#allocation7 + $0x1aa0] ss:$48 sps:$4 sm:$0xff]  }
 0x15c   :  { %7796 = vmatpush1.bf16.msra.mxu0 %v15151_v31  ;;  %8474 = vmatpush1.bf16.msra.mxu1 %v15154_v14  ;;  %v15171_v31 = vld [vmem:[#allocation7 + $0x1aa4] ss:$48 sps:$4 sm:$0xff]   ;;  %v15174_v14 = vld [vmem:[#allocation7 + $0x1aac] ss:$48 sps:$4 sm:$0xff]  }
 0x15d   :  { %7797 = vmatprep.subr.bf16.mxu0 %v15159_v21  ;;  %8475 = vmatprep.subr.bf16.mxu1 %v15162_v35  ;;  %v16901_v21 = vpack.c.bf16 %v186_v44, %v174_v11  ;;  %v15172_v35 = vld [vmem:[#allocation7 + $0x1aa8] ss:$48 sps:$4 sm:$0xff]   ;;  %v15181_v44 = vld [vmem:[#allocation7 + $0x1b60] ss:$48 sps:$4 sm:$0xff]  }
 0x15e   :  { %7736 = vmatprep.mubr.bf16.mxu0 %v16893_v27  ;;  %8414 = vmatprep.mubr.bf16.mxu1 %v16893_v27  ;;  %v173_v27 = vld [vmem:[#allocation5 + $0x330] sm:$0xff]  ;;  %v15178_v11 = vld [vmem:[#allocation7 + $0x1b08] ss:$48 sps:$4 sm:$0xff]  }
 0x15f   :  { %18181 = vst [vmem:[#allocation57_spill] sm:$0xff] %v16901_v21 }
 0x160   :  { %7798 = vmatpush1.bf16.msra.mxu0 %v15157_v38  ;;  %8476 = vmatpush1.bf16.msra.mxu1 %v15160_v55  ;;  %v15180_v38 = vld [vmem:[#allocation7 + $0x1b0c] ss:$48 sps:$4 sm:$0xff]   ;;  %v16907_v55 = vpack.c.bf16 %v185_v22, %v173_v27  ;;  %v209_v22 = vld [vmem:[#allocation5 + $0x450] sm:$0xff] }
 0x161   :  { %7799 = vmatprep.subr.bf16.mxu0 %v15165_v48  ;;  %8477 = vmatprep.subr.bf16.mxu1 %v15168_v56  ;;  %v15175_v48 = vld [vmem:[#allocation7 + $0x1b00] ss:$48 sps:$4 sm:$0xff]   ;;  %v210_v56 = vld [vmem:[#allocation5 + $0x458] sm:$0xff]  ;;  %v15189_v27 = vld [vmem:[#allocation7 + $0x1bc4] ss:$48 sps:$4 sm:$0xff]  }
 0x162   :  { %18182 = vst [vmem:[#allocation58_spill] sm:$0xff] %v16907_v55 }
 0x163   :  { %7737 = vmatmul.mubr.bf16.gmra.mrb[12].mxu0 %v16899_v60  ;;  %8415 = vmatmul.mubr.bf16.gmra.mrb[12].mxu1 %v16899_v60  ;;  %v115_v60 = vld [vmem:[#allocation5 + $0x160] sm:$0xff] }
 0x164   :  { %7800 = vmatpush1.bf16.msra.mxu0 %v15163_v46  ;;  %8478 = vmatpush1.bf16.msra.mxu1 %v15166_v57  ;;  %v15183_v46 = vld [vmem:[#allocation7 + $0x1b64] ss:$48 sps:$4 sm:$0xff]   ;;  %v15186_v57 = vld [vmem:[#allocation7 + $0x1b6c] ss:$48 sps:$4 sm:$0xff]  }
 0x165   :  { %7801 = vmatprep.subr.bf16.mxu0 %v15171_v31  ;;  %8479 = vmatprep.subr.bf16.mxu1 %v15174_v14  ;;  %v15184_v31 = vld [vmem:[#allocation7 + $0x1b68] ss:$48 sps:$4 sm:$0xff]   ;;  %v16909_v14 = vpack.c.bf16 %v210_v56, %v198_v18  ;;  %v15187_v18 = vld [vmem:[#allocation7 + $0x1bc0] ss:$48 sps:$4 sm:$0xff]  }
 0x166   :  { %7746 = vmatprep.mubr.bf16.mxu0 %v16901_v21  ;;  %8424 = vmatprep.mubr.bf16.mxu1 %v16901_v21  ;;  %v197_v21 = vld [vmem:[#allocation5 + $0x3f0] sm:$0xff]  ;;  %v15190_v56 = vld [vmem:[#allocation7 + $0x1bc8] ss:$48 sps:$4 sm:$0xff]  }
 0x167   :  { %18183 = vst [vmem:[#allocation59_spill] sm:$0xff] %v16909_v14 }
 0x168   :  { %7802 = vmatpush1.bf16.msra.mxu0 %v15169_v7  ;;  %8480 = vmatpush1.bf16.msra.mxu1 %v15172_v35  ;;  %v15192_v7 = vld [vmem:[#allocation7 + $0x1bcc] ss:$48 sps:$4 sm:$0xff]   ;;  %v16915_v35 = vpack.c.bf16 %v209_v22, %v197_v21  ;;  %v221_v21 = vld [vmem:[#allocation5 + $0x4b0] sm:$0xff] }
 0x169   :  { %7803 = vmatprep.subr.bf16.mxu0 %v15177_v2  ;;  %8481 = vmatprep.subr.bf16.mxu1 %v15180_v38  ;;  %v222_v2 = vld [vmem:[#allocation5 + $0x4b8] sm:$0xff]  ;;  %v233_v22 = vld [vmem:[#allocation5 + $0x510] sm:$0xff] }
 0x16a   :  { %18184 = vst [vmem:[#allocation60_spill] sm:$0xff] %v16915_v35  ;;  %v234_v38 = vld [vmem:[#allocation5 + $0x518] sm:$0xff] }
 0x16b   :  { %7747 = vmatmul.mubr.bf16.gmra.mrb[16].mxu0 %v16907_v55  ;;  %8425 = vmatmul.mubr.bf16.gmra.mrb[16].mxu1 %v16907_v55  ;;  %v15195_v55 = vld [vmem:[#allocation7 + $0x1c24] ss:$48 sps:$4 sm:$0xff]  }
 0x16c   :  { %7804 = vmatpush1.bf16.msra.mxu0 %v15175_v48  ;;  %8482 = vmatpush1.bf16.msra.mxu1 %v15178_v11  ;;  %v15198_v48 = vld [vmem:[#allocation7 + $0x1c2c] ss:$48 sps:$4 sm:$0xff]   ;;  %v15193_v11 = vld [vmem:[#allocation7 + $0x1c20] ss:$48 sps:$4 sm:$0xff]  }
 0x16d   :  { %7805 = vmatprep.subr.bf16.mxu0 %v15183_v46  ;;  %8483 = vmatprep.subr.bf16.mxu1 %v15186_v57  ;;  %v15196_v46 = vld [vmem:[#allocation7 + $0x1c28] ss:$48 sps:$4 sm:$0xff]   ;;  %v16917_v57 = vpack.c.bf16 %v234_v38, %v222_v2 }
 0x16e   :  { %7756 = vmatprep.mubr.bf16.mxu0 %v16909_v14  ;;  %8434 = vmatprep.mubr.bf16.mxu1 %v16909_v14  ;;  %v15202_v2 = vld [vmem:[#allocation7 + $0x1c88] ss:$48 sps:$4 sm:$0xff]  }
 0x16f   :  { %18185 = vst [vmem:[#allocation61_spill] sm:$0xff] %v16917_v57  ;;  %v246_v38 = vld [vmem:[#allocation5 + $0x578] sm:$0xff] }
 0x170   :  { %7806 = vmatpush1.bf16.msra.mxu0 %v15181_v44  ;;  %8484 = vmatpush1.bf16.msra.mxu1 %v15184_v31  ;;  %v15201_v44 = vld [vmem:[#allocation7 + $0x1c84] ss:$48 sps:$4 sm:$0xff]   ;;  %v15204_v31 = vld [vmem:[#allocation7 + $0x1c8c] ss:$48 sps:$4 sm:$0xff]  }
 0x171   :  { %7807 = vmatprep.subr.bf16.mxu0 %v15189_v27  ;;  %8485 = vmatprep.subr.bf16.mxu1 %v15192_v7  ;;  %v15199_v27 = vld [vmem:[#allocation7 + $0x1c80] ss:$48 sps:$4 sm:$0xff]   ;;  %v16923_v7 = vpack.c.bf16 %v233_v22, %v221_v21  ;;  %v258_v14 = vld [vmem:[#allocation5 + $0x5d8] sm:$0xff] }
 0x172   :  { %v257_v21 = vld [vmem:[#allocation5 + $0x5d0] sm:$0xff] }
 0x173   :  { %7757 = vmatmul.mubr.bf16.gmra.mrb[20].mxu0 %v16915_v35  ;;  %8435 = vmatmul.mubr.bf16.gmra.mrb[20].mxu1 %v16915_v35  ;;  %18186 = vst [vmem:[#allocation62_spill] sm:$0xff] %v16923_v7  ;;  %v15207_v35 = vld [vmem:[#allocation7 + $0x1ce4] ss:$48 sps:$4 sm:$0xff]   ;;  %v15211_v22 = vld [vmem:[#allocation7 + $0x1d40] ss:$48 sps:$4 sm:$0xff]  }
 0x174   :  { %7808 = vmatpush1.bf16.msra.mxu0 %v15187_v18  ;;  %8486 = vmatpush1.bf16.msra.mxu1 %v15190_v56  ;;  %v15210_v18 = vld [vmem:[#allocation7 + $0x1cec] ss:$48 sps:$4 sm:$0xff]   ;;  %v15205_v56 = vld [vmem:[#allocation7 + $0x1ce0] ss:$48 sps:$4 sm:$0xff]  }
 0x175   :  { %7809 = vmatprep.subr.bf16.mxu0 %v15195_v55  ;;  %8487 = vmatprep.subr.bf16.mxu1 %v15198_v48  ;;  %v16925_v55 = vpack.c.bf16 %v258_v14, %v246_v38  ;;  %v15208_v48 = vld [vmem:[#allocation7 + $0x1ce8] ss:$48 sps:$4 sm:$0xff]  }
 0x176   :  { %7766 = vmatprep.mubr.bf16.mxu0 %v16917_v57  ;;  %8444 = vmatprep.mubr.bf16.mxu1 %v16917_v57  ;;  %v245_v57 = vld [vmem:[#allocation5 + $0x570] sm:$0xff]  ;;  %v15214_v14 = vld [vmem:[#allocation7 + $0x1d48] ss:$48 sps:$4 sm:$0xff]  }
 0x177   :  { %18187 = vst [vmem:[#allocation63_spill] sm:$0xff] %v16925_v55  ;;  %v92_v38 = vld [vmem:[#allocation5 + $0xa8] sm:$0xff] }
 0x178   :  { %7810 = vmatpush1.bf16.msra.mxu0 %v15193_v11  ;;  %8488 = vmatpush1.bf16.msra.mxu1 %v15196_v46  ;;  %v15213_v11 = vld [vmem:[#allocation7 + $0x1d44] ss:$48 sps:$4 sm:$0xff]   ;;  %v15216_v46 = vld [vmem:[#allocation7 + $0x1d4c] ss:$48 sps:$4 sm:$0xff]  }
 0x179   :  { %7811 = vmatprep.subr.bf16.mxu0 %v15201_v44  ;;  %8489 = vmatprep.subr.bf16.mxu1 %v15204_v31  ;;  %v16931_v44 = vpack.c.bf16 %v257_v21, %v245_v57  ;;  %v80_v31 = vld [vmem:[#allocation5 + $0x48] sm:$0xff]  ;;  %v79_v57 = vld [vmem:[#allocation5 + $0x40] sm:$0xff] }
 0x17a   :  { %v91_v21 = vld [vmem:[#allocation5 + $0xa0] sm:$0xff] }
 0x17b   :  { %7767 = vmatmul.mubr.bf16.gmra.mrb[24].mxu0 %v16923_v7  ;;  %8445 = vmatmul.mubr.bf16.gmra.mrb[24].mxu1 %v16923_v7  ;;  %18188 = vst [vmem:[#allocation64_spill] sm:$0xff] %v16931_v44  ;;  %v15219_v7 = vld [vmem:[#allocation7 + $0x1da4] ss:$48 sps:$4 sm:$0xff]  }
 0x17c   :  { %7812 = vmatpush1.bf16.msra.mxu0 %v15199_v27  ;;  %8490 = vmatpush1.bf16.msra.mxu1 %v15202_v2  ;;  %v15222_v27 = vld [vmem:[#allocation7 + $0x1dac] ss:$48 sps:$4 sm:$0xff]   ;;  %v15217_v2 = vld [vmem:[#allocation7 + $0x1da0] ss:$48 sps:$4 sm:$0xff]  }
 0x17d   :  { %7813 = vmatprep.subr.bf16.mxu0 %v15207_v35  ;;  %8491 = vmatprep.subr.bf16.mxu1 %v15210_v18  ;;  %v16933_v35 = vpack.c.bf16 %v92_v38, %v80_v31  ;;  %v15220_v18 = vld [vmem:[#allocation7 + $0x1da8] ss:$48 sps:$4 sm:$0xff]  }
 0x17e   :  { %7776 = vmatprep.mubr.bf16.mxu0 %v16925_v55  ;;  %8454 = vmatprep.mubr.bf16.mxu1 %v16925_v55  ;;  %v15225_v55 = vld [vmem:[#allocation7 + $0x1e04] ss:$48 sps:$4 sm:$0xff]   ;;  %v104_v31 = vld [vmem:[#allocation5 + $0x108] sm:$0xff] }
 0x17f   :  { %18189 = vst [vmem:[#allocation65_spill] sm:$0xff] %v16933_v35  ;;  %v116_v38 = vld [vmem:[#allocation5 + $0x168] sm:$0xff] }
 0x180   :  { %7814 = vmatpush1.bf16.msra.mxu0 %v15205_v56  ;;  %8492 = vmatpush1.bf16.msra.mxu1 %v15208_v48  ;;  %v15228_v56 = vld [vmem:[#allocation7 + $0x1e0c] ss:$48 sps:$4 sm:$0xff]   ;;  %v15223_v48 = vld [vmem:[#allocation7 + $0x1e00] ss:$48 sps:$4 sm:$0xff]  }
 0x181   :  { %7815 = vmatprep.subr.bf16.mxu0 %v15213_v11  ;;  %8493 = vmatprep.subr.bf16.mxu1 %v15216_v46  ;;  %v15226_v11 = vld [vmem:[#allocation7 + $0x1e08] ss:$48 sps:$4 sm:$0xff]   ;;  %v16939_v46 = vpack.c.bf16 %v91_v21, %v79_v57  ;;  %v15237_v57 = vld [vmem:[#allocation7 + $0x1ec4] ss:$48 sps:$4 sm:$0xff]  }
 0x182   :  { %v128_v21 = vld [vmem:[#allocation5 + $0x1c8] sm:$0xff] }
 0x183   :  { %7777 = vmatmul.mubr.bf16.gmra.mrb[28].mxu0 %v16931_v44  ;;  %8455 = vmatmul.mubr.bf16.gmra.mrb[28].mxu1 %v16931_v44  ;;  %18190 = vst [vmem:[#allocation66_spill] sm:$0xff] %v16939_v46  ;;  %v15229_v44 = vld [vmem:[#allocation7 + $0x1e60] ss:$48 sps:$4 sm:$0xff]  }
 0x184   :  { %7816 = vmatpush1.bf16.msra.mxu0 %v15211_v22  ;;  %8494 = vmatpush1.bf16.msra.mxu1 %v15214_v14  ;;  %v15231_v22 = vld [vmem:[#allocation7 + $0x1e64] ss:$48 sps:$4 sm:$0xff]   ;;  %v15234_v14 = vld [vmem:[#allocation7 + $0x1e6c] ss:$48 sps:$4 sm:$0xff]  }
 0x185   :  { %7817 = vmatprep.subr.bf16.mxu0 %v15219_v7  ;;  %8495 = vmatprep.subr.bf16.mxu1 %v15222_v27  ;;  %v16941_v7 = vpack.c.bf16 %v116_v38, %v104_v31  ;;  %v15232_v27 = vld [vmem:[#allocation7 + $0x1e68] ss:$48 sps:$4 sm:$0xff]   ;;  %v15241_v38 = vld [vmem:[#allocation7 + $0x1f20] ss:$48 sps:$4 sm:$0xff]  }
 0x186   :  { %7819 = vmatprep.mubr.bf16.mxu0 %v16933_v35  ;;  %8497 = vmatprep.mubr.bf16.mxu1 %v16933_v35  ;;  %v103_v35 = vld [vmem:[#allocation5 + $0x100] sm:$0xff]  ;;  %v15238_v31 = vld [vmem:[#allocation7 + $0x1ec8] ss:$48 sps:$4 sm:$0xff]  }
 0x187   :  { %18191 = vst [vmem:[#allocation67_spill] sm:$0xff] %v16941_v7 }
 0x188   :  { %7818 = vmatpush1.bf16.msra.mxu0 %v15217_v2  ;;  %8496 = vmatpush1.bf16.msra.mxu1 %v15220_v18  ;;  %v15240_v2 = vld [vmem:[#allocation7 + $0x1ecc] ss:$48 sps:$4 sm:$0xff]   ;;  %v16947_v18 = vpack.c.bf16 %v115_v60, %v103_v35  ;;  %v139_v60 = vld [vmem:[#allocation5 + $0x220] sm:$0xff] }
 0x189   :  { %7900 = vmatprep.subr.bf16.mxu0 %v15225_v55  ;;  %8578 = vmatprep.subr.bf16.mxu1 %v15228_v56  ;;  %v15235_v55 = vld [vmem:[#allocation7 + $0x1ec0] ss:$48 sps:$4 sm:$0xff]   ;;  %v140_v56 = vld [vmem:[#allocation5 + $0x228] sm:$0xff]  ;;  %v15249_v35 = vld [vmem:[#allocation7 + $0x1f84] ss:$48 sps:$4 sm:$0xff]  }
 0x18a   :  { %18192 = vst [vmem:[#allocation68_spill] sm:$0xff] %v16947_v18 }
 0x18b   :  { %7820 = vmatmul.mubr.bf16.vlgmr.msra.gmra.mrb[0].mxu0 %v16939_v46  ;;  %8498 = vmatmul.mubr.bf16.vlgmr.msra.gmra.mrb[0].mxu1 %v16939_v46  ;;  %v235_v46 = vld [vmem:[#allocation5 + $0x520] sm:$0xff] }
 0x18c   :  { %7901 = vmatpush1.bf16.msra.mxu0 %v15223_v48  ;;  %8579 = vmatpush1.bf16.msra.mxu1 %v15226_v11  ;;  %v15243_v48 = vld [vmem:[#allocation7 + $0x1f24] ss:$48 sps:$4 sm:$0xff]   ;;  %v15246_v11 = vld [vmem:[#allocation7 + $0x1f2c] ss:$48 sps:$4 sm:$0xff]  }
 0x18d   :  { %7902 = vmatprep.subr.bf16.mxu0 %v15231_v22  ;;  %8580 = vmatprep.subr.bf16.mxu1 %v15234_v14  ;;  %v15244_v22 = vld [vmem:[#allocation7 + $0x1f28] ss:$48 sps:$4 sm:$0xff]   ;;  %v16949_v14 = vpack.c.bf16 %v140_v56, %v128_v21  ;;  %v15247_v21 = vld [vmem:[#allocation7 + $0x1f80] ss:$48 sps:$4 sm:$0xff]  }
 0x18e   :  { %7829 = vmatprep.mubr.bf16.mxu0 %v16941_v7  ;;  %8507 = vmatprep.mubr.bf16.mxu1 %v16941_v7  ;;  %v127_v7 = vld [vmem:[#allocation5 + $0x1c0] sm:$0xff]  ;;  %v15250_v56 = vld [vmem:[#allocation7 + $0x1f88] ss:$48 sps:$4 sm:$0xff]  }
 0x18f   :  { %18193 = vst [vmem:[#allocation69_spill] sm:$0xff] %v16949_v14 }
 0x190   :  { %7903 = vmatpush1.bf16.msra.mxu0 %v15229_v44  ;;  %8581 = vmatpush1.bf16.msra.mxu1 %v15232_v27  ;;  %v15252_v44 = vld [vmem:[#allocation7 + $0x1f8c] ss:$48 sps:$4 sm:$0xff]   ;;  %v16955_v27 = vpack.c.bf16 %v139_v60, %v127_v7  ;;  %v151_v7 = vld [vmem:[#allocation5 + $0x280] sm:$0xff] }
 0x191   :  { %7904 = vmatprep.subr.bf16.mxu0 %v15237_v57  ;;  %8582 = vmatprep.subr.bf16.mxu1 %v15240_v2  ;;  %v152_v57 = vld [vmem:[#allocation5 + $0x288] sm:$0xff]  ;;  %v163_v60 = vld [vmem:[#allocation5 + $0x2e0] sm:$0xff] }
 0x192   :  { %18194 = vst [vmem:[#allocation70_spill] sm:$0xff] %v16955_v27  ;;  %v164_v2 = vld [vmem:[#allocation5 + $0x2e8] sm:$0xff] }
 0x193   :  { %7830 = vmatmul.mubr.bf16.gmra.mrb[4].mxu0 %v16947_v18  ;;  %8508 = vmatmul.mubr.bf16.gmra.mrb[4].mxu1 %v16947_v18  ;;  %v15255_v18 = vld [vmem:[#allocation7 + $0x1fe4] ss:$48 sps:$4 sm:$0xff]  }
 0x194   :  { %7905 = vmatpush1.bf16.msra.mxu0 %v15235_v55  ;;  %8583 = vmatpush1.bf16.msra.mxu1 %v15238_v31  ;;  %v15258_v55 = vld [vmem:[#allocation7 + $0x1fec] ss:$48 sps:$4 sm:$0xff]   ;;  %v15253_v31 = vld [vmem:[#allocation7 + $0x1fe0] ss:$48 sps:$4 sm:$0xff]  }
 0x195   :  { %7906 = vmatprep.subr.bf16.mxu0 %v15243_v48  ;;  %8584 = vmatprep.subr.bf16.mxu1 %v15246_v11  ;;  %v15256_v48 = vld [vmem:[#allocation7 + $0x1fe8] ss:$48 sps:$4 sm:$0xff]   ;;  %v16957_v11 = vpack.c.bf16 %v164_v2, %v152_v57 }
 0x196   :  { %7839 = vmatprep.mubr.bf16.mxu0 %v16949_v14  ;;  %8517 = vmatprep.mubr.bf16.mxu1 %v16949_v14  ;;  %v15262_v57 = vld [vmem:[#allocation7 + $0x2048] ss:$48 sps:$4 sm:$0xff]  }
 0x197   :  { %18195 = vst [vmem:[#allocation71_spill] sm:$0xff] %v16957_v11  ;;  %v176_v2 = vld [vmem:[#allocation5 + $0x348] sm:$0xff] }
 0x198   :  { %7907 = vmatpush1.bf16.msra.mxu0 %v15241_v38  ;;  %8585 = vmatpush1.bf16.msra.mxu1 %v15244_v22  ;;  %v15261_v38 = vld [vmem:[#allocation7 + $0x2044] ss:$48 sps:$4 sm:$0xff]   ;;  %v15264_v22 = vld [vmem:[#allocation7 + $0x204c] ss:$48 sps:$4 sm:$0xff]  }
 0x199   :  { %7908 = vmatprep.subr.bf16.mxu0 %v15249_v35  ;;  %8586 = vmatprep.subr.bf16.mxu1 %v15252_v44  ;;  %v15259_v35 = vld [vmem:[#allocation7 + $0x2040] ss:$48 sps:$4 sm:$0xff]   ;;  %v16963_v44 = vpack.c.bf16 %v163_v60, %v151_v7  ;;  %v188_v14 = vld [vmem:[#allocation5 + $0x3a8] sm:$0xff] }
 0x19a   :  { %v187_v7 = vld [vmem:[#allocation5 + $0x3a0] sm:$0xff] }
 0x19b   :  { %7840 = vmatmul.mubr.bf16.gmra.mrb[8].mxu0 %v16955_v27  ;;  %8518 = vmatmul.mubr.bf16.gmra.mrb[8].mxu1 %v16955_v27  ;;  %18196 = vst [vmem:[#allocation72_spill] sm:$0xff] %v16963_v44  ;;  %v15267_v27 = vld [vmem:[#allocation7 + $0x20a4] ss:$48 sps:$4 sm:$0xff]   ;;  %v15271_v60 = vld [vmem:[#allocation7 + $0x2100] ss:$48 sps:$4 sm:$0xff]  }
 0x19c   :  { %7909 = vmatpush1.bf16.msra.mxu0 %v15247_v21  ;;  %8587 = vmatpush1.bf16.msra.mxu1 %v15250_v56  ;;  %v15270_v21 = vld [vmem:[#allocation7 + $0x20ac] ss:$48 sps:$4 sm:$0xff]   ;;  %v15265_v56 = vld [vmem:[#allocation7 + $0x20a0] ss:$48 sps:$4 sm:$0xff]  }
 0x19d   :  { %7910 = vmatprep.subr.bf16.mxu0 %v15255_v18  ;;  %8588 = vmatprep.subr.bf16.mxu1 %v15258_v55  ;;  %v16965_v18 = vpack.c.bf16 %v188_v14, %v176_v2  ;;  %v15268_v55 = vld [vmem:[#allocation7 + $0x20a8] ss:$48 sps:$4 sm:$0xff]  }
 0x19e   :  { %7849 = vmatprep.mubr.bf16.mxu0 %v16957_v11  ;;  %8527 = vmatprep.mubr.bf16.mxu1 %v16957_v11  ;;  %v175_v11 = vld [vmem:[#allocation5 + $0x340] sm:$0xff]  ;;  %v15274_v14 = vld [vmem:[#allocation7 + $0x2108] ss:$48 sps:$4 sm:$0xff]  }
 0x19f   :  { %18197 = vst [vmem:[#allocation73_spill] sm:$0xff] %v16965_v18  ;;  %v212_v2 = vld [vmem:[#allocation5 + $0x468] sm:$0xff] }
 0x1a0   :  { %7911 = vmatpush1.bf16.msra.mxu0 %v15253_v31  ;;  %8589 = vmatpush1.bf16.msra.mxu1 %v15256_v48  ;;  %v15273_v31 = vld [vmem:[#allocation7 + $0x2104] ss:$48 sps:$4 sm:$0xff]   ;;  %v15276_v48 = vld [vmem:[#allocation7 + $0x210c] ss:$48 sps:$4 sm:$0xff]  }
 0x1a1   :  { %7912 = vmatprep.subr.bf16.mxu0 %v15261_v38  ;;  %8590 = vmatprep.subr.bf16.mxu1 %v15264_v22  ;;  %v16971_v38 = vpack.c.bf16 %v187_v7, %v175_v11  ;;  %v200_v22 = vld [vmem:[#allocation5 + $0x408] sm:$0xff]  ;;  %v199_v11 = vld [vmem:[#allocation5 + $0x400] sm:$0xff] }
 0x1a2   :  { %v211_v7 = vld [vmem:[#allocation5 + $0x460] sm:$0xff] }
 0x1a3   :  { %7850 = vmatmul.mubr.bf16.gmra.mrb[12].mxu0 %v16963_v44  ;;  %8528 = vmatmul.mubr.bf16.gmra.mrb[12].mxu1 %v16963_v44  ;;  %18198 = vst [vmem:[#allocation74_spill] sm:$0xff] %v16971_v38  ;;  %v15279_v44 = vld [vmem:[#allocation7 + $0x2164] ss:$48 sps:$4 sm:$0xff]  }
 0x1a4   :  { %7913 = vmatpush1.bf16.msra.mxu0 %v15259_v35  ;;  %8591 = vmatpush1.bf16.msra.mxu1 %v15262_v57  ;;  %v15282_v35 = vld [vmem:[#allocation7 + $0x216c] ss:$48 sps:$4 sm:$0xff]   ;;  %v15277_v57 = vld [vmem:[#allocation7 + $0x2160] ss:$48 sps:$4 sm:$0xff]  }
 0x1a5   :  { %7914 = vmatprep.subr.bf16.mxu0 %v15267_v27  ;;  %8592 = vmatprep.subr.bf16.mxu1 %v15270_v21  ;;  %v16973_v27 = vpack.c.bf16 %v212_v2, %v200_v22  ;;  %v15280_v21 = vld [vmem:[#allocation7 + $0x2168] ss:$48 sps:$4 sm:$0xff]  }
 0x1a6   :  { %7859 = vmatprep.mubr.bf16.mxu0 %v16965_v18  ;;  %8537 = vmatprep.mubr.bf16.mxu1 %v16965_v18  ;;  %v15285_v18 = vld [vmem:[#allocation7 + $0x21c4] ss:$48 sps:$4 sm:$0xff]   ;;  %v224_v22 = vld [vmem:[#allocation5 + $0x4c8] sm:$0xff] }
 0x1a7   :  { %18199 = vst [vmem:[#allocation75_spill] sm:$0xff] %v16973_v27  ;;  %v236_v2 = vld [vmem:[#allocation5 + $0x528] sm:$0xff] }
 0x1a8   :  { %7915 = vmatpush1.bf16.msra.mxu0 %v15265_v56  ;;  %8593 = vmatpush1.bf16.msra.mxu1 %v15268_v55  ;;  %v15288_v56 = vld [vmem:[#allocation7 + $0x21cc] ss:$48 sps:$4 sm:$0xff]   ;;  %v15283_v55 = vld [vmem:[#allocation7 + $0x21c0] ss:$48 sps:$4 sm:$0xff]  }
 0x1a9   :  { %7916 = vmatprep.subr.bf16.mxu0 %v15273_v31  ;;  %8594 = vmatprep.subr.bf16.mxu1 %v15276_v48  ;;  %v15286_v31 = vld [vmem:[#allocation7 + $0x21c8] ss:$48 sps:$4 sm:$0xff]   ;;  %v16979_v48 = vpack.c.bf16 %v211_v7, %v199_v11  ;;  %v15297_v11 = vld [vmem:[#allocation7 + $0x2284] ss:$48 sps:$4 sm:$0xff]  }
 0x1ab   :  { %7860 = vmatmul.mubr.bf16.gmra.mrb[16].mxu0 %v16971_v38  ;;  %8538 = vmatmul.mubr.bf16.gmra.mrb[16].mxu1 %v16971_v38  ;;  %18200 = vst [vmem:[#allocation76_spill] sm:$0xff] %v16979_v48  ;;  %v15289_v38 = vld [vmem:[#allocation7 + $0x2220] ss:$48 sps:$4 sm:$0xff]  }
 0x1ac   :  { %7917 = vmatpush1.bf16.msra.mxu0 %v15271_v60  ;;  %8595 = vmatpush1.bf16.msra.mxu1 %v15274_v14  ;;  %v15291_v60 = vld [vmem:[#allocation7 + $0x2224] ss:$48 sps:$4 sm:$0xff]   ;;  %v15294_v14 = vld [vmem:[#allocation7 + $0x222c] ss:$48 sps:$4 sm:$0xff]  }
 0x1ad   :  { %7918 = vmatprep.subr.bf16.mxu0 %v15279_v44  ;;  %8596 = vmatprep.subr.bf16.mxu1 %v15282_v35  ;;  %v15292_v44 = vld [vmem:[#allocation7 + $0x2228] ss:$48 sps:$4 sm:$0xff]   ;;  %v16981_v35 = vpack.c.bf16 %v236_v2, %v224_v22  ;;  %v15303_v2 = vld [vmem:[#allocation7 + $0x22e4] ss:$48 sps:$4 sm:$0xff]  }
 0x1ae   :  { %7869 = vmatprep.mubr.bf16.mxu0 %v16973_v27  ;;  %8547 = vmatprep.mubr.bf16.mxu1 %v16973_v27  ;;  %v223_v27 = vld [vmem:[#allocation5 + $0x4c0] sm:$0xff]  ;;  %v260_v22 = vld [vmem:[#allocation5 + $0x5e8] sm:$0xff] }
 0x1af   :  { %18201 = vst [vmem:[#allocation77_spill] sm:$0xff] %v16981_v35  ;;  %v16987_v7 = vpack.c.bf16 %v235_v46, %v223_v27  ;;  %v15309_v46 = vld [vmem:[#allocation7 + $0x2344] ss:$48 sps:$4 sm:$0xff]   ;;  %v15307_v27 = vld [vmem:[#allocation7 + $0x2340] ss:$48 sps:$4 sm:$0xff]  }
 0x1b0   :  { %7919 = vmatpush1.bf16.msra.mxu0 %v15277_v57  ;;  %8597 = vmatpush1.bf16.msra.mxu1 %v15280_v21  ;;  %v15300_v57 = vld [vmem:[#allocation7 + $0x228c] ss:$48 sps:$4 sm:$0xff]   ;;  %v15298_v21 = vld [vmem:[#allocation7 + $0x2288] ss:$48 sps:$4 sm:$0xff]  }
 0x1b1   :  { %7920 = vmatprep.subr.bf16.mxu0 %v15285_v18  ;;  %8598 = vmatprep.subr.bf16.mxu1 %v15288_v56  ;;  %v15295_v18 = vld [vmem:[#allocation7 + $0x2280] ss:$48 sps:$4 sm:$0xff]   ;;  %18202 = vst [vmem:[#allocation78_spill] sm:$0xff] %v16987_v7  ;;  %v248_v56 = vld [vmem:[#allocation5 + $0x588] sm:$0xff] }
 0x1b3   :  { %7870 = vmatmul.mubr.bf16.gmra.mrb[20].mxu0 %v16979_v48  ;;  %8548 = vmatmul.mubr.bf16.gmra.mrb[20].mxu1 %v16979_v48  ;;  %v259_v48 = vld [vmem:[#allocation5 + $0x5e0] sm:$0xff] }
 0x1b4   :  { %7921 = vmatpush1.bf16.msra.mxu0 %v15283_v55  ;;  %8599 = vmatpush1.bf16.msra.mxu1 %v15286_v31  ;;  %v15306_v55 = vld [vmem:[#allocation7 + $0x22ec] ss:$48 sps:$4 sm:$0xff]   ;;  %v15301_v31 = vld [vmem:[#allocation7 + $0x22e0] ss:$48 sps:$4 sm:$0xff]  }
 0x1b5   :  { %7922 = vmatprep.subr.bf16.mxu0 %v15291_v60  ;;  %8600 = vmatprep.subr.bf16.mxu1 %v15294_v14  ;;  %v15304_v60 = vld [vmem:[#allocation7 + $0x22e8] ss:$48 sps:$4 sm:$0xff]   ;;  %v16989_v14 = vpack.c.bf16 %v260_v22, %v248_v56  ;;  %v15315_v22 = vld [vmem:[#allocation7 + $0x23a4] ss:$48 sps:$4 sm:$0xff]  }
 0x1b6   :  { %7879 = vmatprep.mubr.bf16.mxu0 %v16981_v35  ;;  %8557 = vmatprep.mubr.bf16.mxu1 %v16981_v35  ;;  %v247_v35 = vld [vmem:[#allocation5 + $0x580] sm:$0xff]  ;;  %v94_v56 = vld [vmem:[#allocation5 + $0xb8] sm:$0xff] }
 0x1b7   :  { %18203 = vst [vmem:[#allocation79_spill] sm:$0xff] %v16989_v14 }
 0x1b8   :  { %7923 = vmatpush1.bf16.msra.mxu0 %v15289_v38  ;;  %8601 = vmatpush1.bf16.msra.mxu1 %v15292_v44  ;;  %v15312_v38 = vld [vmem:[#allocation7 + $0x234c] ss:$48 sps:$4 sm:$0xff]   ;;  %v15310_v44 = vld [vmem:[#allocation7 + $0x2348] ss:$48 sps:$4 sm:$0xff]  }
 0x1b9   :  { %7924 = vmatprep.subr.bf16.mxu0 %v15297_v11  ;;  %8602 = vmatprep.subr.bf16.mxu1 %v15300_v57  ;;  %v16995_v11 = vpack.c.bf16 %v259_v48, %v247_v35  ;;  %v82_v57 = vld [vmem:[#allocation5 + $0x58] sm:$0xff]  ;;  %v15321_v48 = vld [vmem:[#allocation7 + $0x14] ss:$48 sps:$4 sm:$0xff]  }
 0x1ba   :  { %v15324_v35 = vld [vmem:[#allocation7 + $0x1c] ss:$48 sps:$4 sm:$0xff]  }
 0x1bb   :  { %7880 = vmatmul.mubr.bf16.gmra.mrb[24].mxu0 %v16987_v7  ;;  %8558 = vmatmul.mubr.bf16.gmra.mrb[24].mxu1 %v16987_v7  ;;  %18204 = vst [vmem:[#allocation80_spill] sm:$0xff] %v16995_v11  ;;  %v93_v7 = vld [vmem:[#allocation5 + $0xb0] sm:$0xff] }
 0x1bc   :  { %7925 = vmatpush1.bf16.msra.mxu0 %v15295_v18  ;;  %8603 = vmatpush1.bf16.msra.mxu1 %v15298_v21  ;;  %v15318_v18 = vld [vmem:[#allocation7 + $0x23ac] ss:$48 sps:$4 sm:$0xff]   ;;  %v15313_v21 = vld [vmem:[#allocation7 + $0x23a0] ss:$48 sps:$4 sm:$0xff]  }
 0x1bd   :  { %7926 = vmatprep.subr.bf16.mxu0 %v15303_v2  ;;  %8604 = vmatprep.subr.bf16.mxu1 %v15306_v55  ;;  %v15316_v2 = vld [vmem:[#allocation7 + $0x23a8] ss:$48 sps:$4 sm:$0xff]   ;;  %v16997_v55 = vpack.c.bf16 %v94_v56, %v82_v57  ;;  %v15327_v56 = vld [vmem:[#allocation7 + $0x74] ss:$48 sps:$4 sm:$0xff]  }
 0x1be   :  { %7889 = vmatprep.mubr.bf16.mxu0 %v16989_v14  ;;  %8567 = vmatprep.mubr.bf16.mxu1 %v16989_v14  ;;  %v81_v14 = vld [vmem:[#allocation5 + $0x50] sm:$0xff]  ;;  %v118_v57 = vld [vmem:[#allocation5 + $0x178] sm:$0xff] }
 0x1bf   :  { %18205 = vst [vmem:[#allocation81_spill] sm:$0xff] %v16997_v55 }
 0x1c0   :  { %7927 = vmatpush1.bf16.msra.mxu0 %v15301_v31  ;;  %8605 = vmatpush1.bf16.msra.mxu1 %v15304_v60  ;;  %v15319_v31 = vld [vmem:[#allocation7 + $0x10] ss:$48 sps:$4 sm:$0xff]   ;;  %v15322_v60 = vld [vmem:[#allocation7 + $0x18] ss:$48 sps:$4 sm:$0xff]  }
 0x1c1   :  { %7928 = vmatprep.subr.bf16.mxu0 %v15309_v46  ;;  %8606 = vmatprep.subr.bf16.mxu1 %v15312_v38  ;;  %v17003_v46 = vpack.c.bf16 %v93_v7, %v81_v14  ;;  %v106_v38 = vld [vmem:[#allocation5 + $0x118] sm:$0xff]  ;;  %v15333_v7 = vld [vmem:[#allocation7 + $0xd4] ss:$48 sps:$4 sm:$0xff]  }
 0x1c2   :  { %v15336_v14 = vld [vmem:[#allocation7 + $0xdc] ss:$48 sps:$4 sm:$0xff]  }
 0x1c3   :  { %7890 = vmatmul.mubr.bf16.gmra.mrb[28].mxu0 %v16995_v11  ;;  %8568 = vmatmul.mubr.bf16.gmra.mrb[28].mxu1 %v16995_v11  ;;  %18206 = vst [vmem:[#allocation82_spill] sm:$0xff] %v17003_v46  ;;  %v117_v11 = vld [vmem:[#allocation5 + $0x170] sm:$0xff] }
 0x1c4   :  { %7929 = vmatpush1.bf16.msra.mxu0 %v15307_v27  ;;  %8607 = vmatpush1.bf16.msra.mxu1 %v15310_v44  ;;  %v15330_v27 = vld [vmem:[#allocation7 + $0x7c] ss:$48 sps:$4 sm:$0xff]   ;;  %v15325_v44 = vld [vmem:[#allocation7 + $0x70] ss:$48 sps:$4 sm:$0xff]  }
 0x1c5   :  { %7930 = vmatprep.subr.bf16.mxu0 %v15315_v22  ;;  %8608 = vmatprep.subr.bf16.mxu1 %v15318_v18  ;;  %v15328_v22 = vld [vmem:[#allocation7 + $0x78] ss:$48 sps:$4 sm:$0xff]   ;;  %v17005_v18 = vpack.c.bf16 %v118_v57, %v106_v38  ;;  %v15339_v57 = vld [vmem:[#allocation7 + $0x134] ss:$48 sps:$4 sm:$0xff]  }
 0x1c6   :  { %7932 = vmatprep.mubr.bf16.mxu0 %v16997_v55  ;;  %8610 = vmatprep.mubr.bf16.mxu1 %v16997_v55  ;;  %v105_v55 = vld [vmem:[#allocation5 + $0x110] sm:$0xff]  ;;  %v142_v38 = vld [vmem:[#allocation5 + $0x238] sm:$0xff] }
 0x1c7   :  { %18207 = vst [vmem:[#allocation83_spill] sm:$0xff] %v17005_v18 }
 0x1c8   :  { %7931 = vmatpush1.bf16.msra.mxu0 %v15313_v21  ;;  %8609 = vmatpush1.bf16.msra.mxu1 %v15316_v2  ;;  %v15331_v21 = vld [vmem:[#allocation7 + $0xd0] ss:$48 sps:$4 sm:$0xff]   ;;  %v15334_v2 = vld [vmem:[#allocation7 + $0xd8] ss:$48 sps:$4 sm:$0xff]  }
 0x1c9   :  { %8691 = vmatprep.subr.bf16.mxu0 %v15321_v48  ;;  %9369 = vmatprep.subr.bf16.mxu1 %v15324_v35  ;;  %v17011_v48 = vpack.c.bf16 %v117_v11, %v105_v55  ;;  %v130_v35 = vld [vmem:[#allocation5 + $0x1d8] sm:$0xff]  ;;  %v15345_v11 = vld [vmem:[#allocation7 + $0x194] ss:$48 sps:$4 sm:$0xff]  }
 0x1ca   :  { %v15348_v55 = vld [vmem:[#allocation7 + $0x19c] ss:$48 sps:$4 sm:$0xff]  }
 0x1cb   :  { %7933 = vmatmul.mubr.bf16.vlgmr.msra.gmra.mrb[0].mxu0 %v17003_v46  ;;  %8611 = vmatmul.mubr.bf16.vlgmr.msra.gmra.mrb[0].mxu1 %v17003_v46  ;;  %18208 = vst [vmem:[#allocation84_spill] sm:$0xff] %v17011_v48  ;;  %v141_v46 = vld [vmem:[#allocation5 + $0x230] sm:$0xff] }
 0x1cc   :  { %8692 = vmatpush1.bf16.msra.mxu0 %v15319_v31  ;;  %9370 = vmatpush1.bf16.msra.mxu1 %v15322_v60  ;;  %v15342_v31 = vld [vmem:[#allocation7 + $0x13c] ss:$48 sps:$4 sm:$0xff]   ;;  %v15337_v60 = vld [vmem:[#allocation7 + $0x130] ss:$48 sps:$4 sm:$0xff]  }
 0x1cd   :  { %8693 = vmatprep.subr.bf16.mxu0 %v15327_v56  ;;  %9371 = vmatprep.subr.bf16.mxu1 %v15330_v27  ;;  %v15340_v56 = vld [vmem:[#allocation7 + $0x138] ss:$48 sps:$4 sm:$0xff]   ;;  %v17013_v27 = vpack.c.bf16 %v142_v38, %v130_v35  ;;  %v15351_v38 = vld [vmem:[#allocation7 + $0x1f4] ss:$48 sps:$4 sm:$0xff]  }
 0x1ce   :  { %7942 = vmatprep.mubr.bf16.mxu0 %v17005_v18  ;;  %8620 = vmatprep.mubr.bf16.mxu1 %v17005_v18  ;;  %v129_v18 = vld [vmem:[#allocation5 + $0x1d0] sm:$0xff]  ;;  %v166_v35 = vld [vmem:[#allocation5 + $0x2f8] sm:$0xff] }
 0x1cf   :  { %18209 = vst [vmem:[#allocation85_spill] sm:$0xff] %v17013_v27 }
 0x1d0   :  { %8694 = vmatpush1.bf16.msra.mxu0 %v15325_v44  ;;  %9372 = vmatpush1.bf16.msra.mxu1 %v15328_v22  ;;  %v15343_v44 = vld [vmem:[#allocation7 + $0x190] ss:$48 sps:$4 sm:$0xff]   ;;  %v15346_v22 = vld [vmem:[#allocation7 + $0x198] ss:$48 sps:$4 sm:$0xff]  }
 0x1d1   :  { %8695 = vmatprep.subr.bf16.mxu0 %v15333_v7  ;;  %9373 = vmatprep.subr.bf16.mxu1 %v15336_v14  ;;  %v17019_v7 = vpack.c.bf16 %v141_v46, %v129_v18  ;;  %v154_v14 = vld [vmem:[#allocation5 + $0x298] sm:$0xff]  ;;  %v15357_v46 = vld [vmem:[#allocation7 + $0x254] ss:$48 sps:$4 sm:$0xff]  }
 0x1d2   :  { %v15360_v18 = vld [vmem:[#allocation7 + $0x25c] ss:$48 sps:$4 sm:$0xff]  }
 0x1d3   :  { %7943 = vmatmul.mubr.bf16.gmra.mrb[4].mxu0 %v17011_v48  ;;  %8621 = vmatmul.mubr.bf16.gmra.mrb[4].mxu1 %v17011_v48  ;;  %18210 = vst [vmem:[#allocation86_spill] sm:$0xff] %v17019_v7  ;;  %v165_v48 = vld [vmem:[#allocation5 + $0x2f0] sm:$0xff] }
 0x1d4   :  { %8696 = vmatpush1.bf16.msra.mxu0 %v15331_v21  ;;  %9374 = vmatpush1.bf16.msra.mxu1 %v15334_v2  ;;  %v15354_v21 = vld [vmem:[#allocation7 + $0x1fc] ss:$48 sps:$4 sm:$0xff]   ;;  %v15349_v2 = vld [vmem:[#allocation7 + $0x1f0] ss:$48 sps:$4 sm:$0xff]  }
 0x1d5   :  { %8697 = vmatprep.subr.bf16.mxu0 %v15339_v57  ;;  %9375 = vmatprep.subr.bf16.mxu1 %v15342_v31  ;;  %v15352_v57 = vld [vmem:[#allocation7 + $0x1f8] ss:$48 sps:$4 sm:$0xff]   ;;  %v17021_v31 = vpack.c.bf16 %v166_v35, %v154_v14  ;;  %v15363_v35 = vld [vmem:[#allocation7 + $0x2b4] ss:$48 sps:$4 sm:$0xff]  }
 0x1d6   :  { %7952 = vmatprep.mubr.bf16.mxu0 %v17013_v27  ;;  %8630 = vmatprep.mubr.bf16.mxu1 %v17013_v27  ;;  %v153_v27 = vld [vmem:[#allocation5 + $0x290] sm:$0xff]  ;;  %v190_v14 = vld [vmem:[#allocation5 + $0x3b8] sm:$0xff] }
 0x1d7   :  { %18211 = vst [vmem:[#allocation87_spill] sm:$0xff] %v17021_v31 }
 0x1d8   :  { %8698 = vmatpush1.bf16.msra.mxu0 %v15337_v60  ;;  %9376 = vmatpush1.bf16.msra.mxu1 %v15340_v56  ;;  %v15355_v60 = vld [vmem:[#allocation7 + $0x250] ss:$48 sps:$4 sm:$0xff]   ;;  %v15358_v56 = vld [vmem:[#allocation7 + $0x258] ss:$48 sps:$4 sm:$0xff]  }
 0x1d9   :  { %8699 = vmatprep.subr.bf16.mxu0 %v15345_v11  ;;  %9377 = vmatprep.subr.bf16.mxu1 %v15348_v55  ;;  %v17027_v11 = vpack.c.bf16 %v165_v48, %v153_v27  ;;  %v178_v55 = vld [vmem:[#allocation5 + $0x358] sm:$0xff]  ;;  %v15369_v48 = vld [vmem:[#allocation7 + $0x314] ss:$48 sps:$4 sm:$0xff]  }
 0x1da   :  { %v15372_v27 = vld [vmem:[#allocation7 + $0x31c] ss:$48 sps:$4 sm:$0xff]  }
 0x1db   :  { %7953 = vmatmul.mubr.bf16.gmra.mrb[8].mxu0 %v17019_v7  ;;  %8631 = vmatmul.mubr.bf16.gmra.mrb[8].mxu1 %v17019_v7  ;;  %18212 = vst [vmem:[#allocation88_spill] sm:$0xff] %v17027_v11  ;;  %v189_v7 = vld [vmem:[#allocation5 + $0x3b0] sm:$0xff] }
 0x1dc   :  { %8700 = vmatpush1.bf16.msra.mxu0 %v15343_v44  ;;  %9378 = vmatpush1.bf16.msra.mxu1 %v15346_v22  ;;  %v15366_v44 = vld [vmem:[#allocation7 + $0x2bc] ss:$48 sps:$4 sm:$0xff]   ;;  %v15361_v22 = vld [vmem:[#allocation7 + $0x2b0] ss:$48 sps:$4 sm:$0xff]  }
 0x1dd   :  { %8701 = vmatprep.subr.bf16.mxu0 %v15351_v38  ;;  %9379 = vmatprep.subr.bf16.mxu1 %v15354_v21  ;;  %v15364_v38 = vld [vmem:[#allocation7 + $0x2b8] ss:$48 sps:$4 sm:$0xff]   ;;  %v17029_v21 = vpack.c.bf16 %v190_v14, %v178_v55  ;;  %v15375_v14 = vld [vmem:[#allocation7 + $0x374] ss:$48 sps:$4 sm:$0xff]  }
 0x1de   :  { %7962 = vmatprep.mubr.bf16.mxu0 %v17021_v31  ;;  %8640 = vmatprep.mubr.bf16.mxu1 %v17021_v31  ;;  %v177_v31 = vld [vmem:[#allocation5 + $0x350] sm:$0xff]  ;;  %v214_v55 = vld [vmem:[#allocation5 + $0x478] sm:$0xff] }
 0x1df   :  { %18213 = vst [vmem:[#allocation89_spill] sm:$0xff] %v17029_v21 }
 0x1e0   :  { %8702 = vmatpush1.bf16.msra.mxu0 %v15349_v2  ;;  %9380 = vmatpush1.bf16.msra.mxu1 %v15352_v57  ;;  %v15367_v2 = vld [vmem:[#allocation7 + $0x310] ss:$48 sps:$4 sm:$0xff]   ;;  %v15370_v57 = vld [vmem:[#allocation7 + $0x318] ss:$48 sps:$4 sm:$0xff]  }
 0x1e1   :  { %8703 = vmatprep.subr.bf16.mxu0 %v15357_v46  ;;  %9381 = vmatprep.subr.bf16.mxu1 %v15360_v18  ;;  %v17035_v46 = vpack.c.bf16 %v189_v7, %v177_v31  ;;  %v202_v18 = vld [vmem:[#allocation5 + $0x418] sm:$0xff]  ;;  %v15381_v7 = vld [vmem:[#allocation7 + $0x3d4] ss:$48 sps:$4 sm:$0xff]  }
 0x1e2   :  { %v15384_v31 = vld [vmem:[#allocation7 + $0x3dc] ss:$48 sps:$4 sm:$0xff]  }
 0x1e3   :  { %7963 = vmatmul.mubr.bf16.gmra.mrb[12].mxu0 %v17027_v11  ;;  %8641 = vmatmul.mubr.bf16.gmra.mrb[12].mxu1 %v17027_v11  ;;  %18214 = vst [vmem:[#allocation90_spill] sm:$0xff] %v17035_v46  ;;  %v213_v11 = vld [vmem:[#allocation5 + $0x470] sm:$0xff] }
 0x1e4   :  { %8704 = vmatpush1.bf16.msra.mxu0 %v15355_v60  ;;  %9382 = vmatpush1.bf16.msra.mxu1 %v15358_v56  ;;  %v15378_v60 = vld [vmem:[#allocation7 + $0x37c] ss:$48 sps:$4 sm:$0xff]   ;;  %v15373_v56 = vld [vmem:[#allocation7 + $0x370] ss:$48 sps:$4 sm:$0xff]  }
 0x1e5   :  { %8705 = vmatprep.subr.bf16.mxu0 %v15363_v35  ;;  %9383 = vmatprep.subr.bf16.mxu1 %v15366_v44  ;;  %v15376_v35 = vld [vmem:[#allocation7 + $0x378] ss:$48 sps:$4 sm:$0xff]   ;;  %v17037_v44 = vpack.c.bf16 %v214_v55, %v202_v18  ;;  %v15387_v55 = vld [vmem:[#allocation7 + $0x434] ss:$48 sps:$4 sm:$0xff]  }
 0x1e6   :  { %7972 = vmatprep.mubr.bf16.mxu0 %v17029_v21  ;;  %8650 = vmatprep.mubr.bf16.mxu1 %v17029_v21  ;;  %v201_v21 = vld [vmem:[#allocation5 + $0x410] sm:$0xff]  ;;  %v238_v18 = vld [vmem:[#allocation5 + $0x538] sm:$0xff] }
 0x1e7   :  { %18215 = vst [vmem:[#allocation91_spill] sm:$0xff] %v17037_v44 }
 0x1e8   :  { %8706 = vmatpush1.bf16.msra.mxu0 %v15361_v22  ;;  %9384 = vmatpush1.bf16.msra.mxu1 %v15364_v38  ;;  %v15379_v22 = vld [vmem:[#allocation7 + $0x3d0] ss:$48 sps:$4 sm:$0xff]   ;;  %v15382_v38 = vld [vmem:[#allocation7 + $0x3d8] ss:$48 sps:$4 sm:$0xff]  }
 0x1e9   :  { %8707 = vmatprep.subr.bf16.mxu0 %v15369_v48  ;;  %9385 = vmatprep.subr.bf16.mxu1 %v15372_v27  ;;  %v17043_v48 = vpack.c.bf16 %v213_v11, %v201_v21  ;;  %v226_v27 = vld [vmem:[#allocation5 + $0x4d8] sm:$0xff]  ;;  %v15393_v11 = vld [vmem:[#allocation7 + $0x494] ss:$48 sps:$4 sm:$0xff]  }
 0x1ea   :  { %v15396_v21 = vld [vmem:[#allocation7 + $0x49c] ss:$48 sps:$4 sm:$0xff]  }
 0x1eb   :  { %7973 = vmatmul.mubr.bf16.gmra.mrb[16].mxu0 %v17035_v46  ;;  %8651 = vmatmul.mubr.bf16.gmra.mrb[16].mxu1 %v17035_v46  ;;  %18216 = vst [vmem:[#allocation92_spill] sm:$0xff] %v17043_v48  ;;  %v237_v46 = vld [vmem:[#allocation5 + $0x530] sm:$0xff] }
 0x1ec   :  { %8708 = vmatpush1.bf16.msra.mxu0 %v15367_v2  ;;  %9386 = vmatpush1.bf16.msra.mxu1 %v15370_v57  ;;  %v15390_v2 = vld [vmem:[#allocation7 + $0x43c] ss:$48 sps:$4 sm:$0xff]   ;;  %v15385_v57 = vld [vmem:[#allocation7 + $0x430] ss:$48 sps:$4 sm:$0xff]  }
 0x1ed   :  { %8709 = vmatprep.subr.bf16.mxu0 %v15375_v14  ;;  %9387 = vmatprep.subr.bf16.mxu1 %v15378_v60  ;;  %v15388_v14 = vld [vmem:[#allocation7 + $0x438] ss:$48 sps:$4 sm:$0xff]   ;;  %v17045_v60 = vpack.c.bf16 %v238_v18, %v226_v27  ;;  %v15399_v18 = vld [vmem:[#allocation7 + $0x4f4] ss:$48 sps:$4 sm:$0xff]  }
 0x1ee   :  { %7982 = vmatprep.mubr.bf16.mxu0 %v17037_v44  ;;  %8660 = vmatprep.mubr.bf16.mxu1 %v17037_v44  ;;  %v225_v44 = vld [vmem:[#allocation5 + $0x4d0] sm:$0xff]  ;;  %v262_v27 = vld [vmem:[#allocation5 + $0x5f8] sm:$0xff] }
 0x1ef   :  { %18217 = vst [vmem:[#allocation93_spill] sm:$0xff] %v17045_v60 }
 0x1f0   :  { %8710 = vmatpush1.bf16.msra.mxu0 %v15373_v56  ;;  %9388 = vmatpush1.bf16.msra.mxu1 %v15376_v35  ;;  %v15391_v56 = vld [vmem:[#allocation7 + $0x490] ss:$48 sps:$4 sm:$0xff]   ;;  %v15394_v35 = vld [vmem:[#allocation7 + $0x498] ss:$48 sps:$4 sm:$0xff]  }
 0x1f1   :  { %8711 = vmatprep.subr.bf16.mxu0 %v15381_v7  ;;  %9389 = vmatprep.subr.bf16.mxu1 %v15384_v31  ;;  %v17051_v7 = vpack.c.bf16 %v237_v46, %v225_v44  ;;  %v250_v31 = vld [vmem:[#allocation5 + $0x598] sm:$0xff]  ;;  %v15405_v46 = vld [vmem:[#allocation7 + $0x554] ss:$48 sps:$4 sm:$0xff]  }
 0x1f2   :  { %v15408_v44 = vld [vmem:[#allocation7 + $0x55c] ss:$48 sps:$4 sm:$0xff]  }
 0x1f3   :  { %7983 = vmatmul.mubr.bf16.gmra.mrb[20].mxu0 %v17043_v48  ;;  %8661 = vmatmul.mubr.bf16.gmra.mrb[20].mxu1 %v17043_v48  ;;  %18218 = vst [vmem:[#allocation94_spill] sm:$0xff] %v17051_v7  ;;  %v261_v48 = vld [vmem:[#allocation5 + $0x5f0] sm:$0xff] }
 0x1f4   :  { %8712 = vmatpush1.bf16.msra.mxu0 %v15379_v22  ;;  %9390 = vmatpush1.bf16.msra.mxu1 %v15382_v38  ;;  %v15402_v22 = vld [vmem:[#allocation7 + $0x4fc] ss:$48 sps:$4 sm:$0xff]   ;;  %v15397_v38 = vld [vmem:[#allocation7 + $0x4f0] ss:$48 sps:$4 sm:$0xff]  }
 0x1f5   :  { %8713 = vmatprep.subr.bf16.mxu0 %v15387_v55  ;;  %9391 = vmatprep.subr.bf16.mxu1 %v15390_v2  ;;  %v15400_v55 = vld [vmem:[#allocation7 + $0x4f8] ss:$48 sps:$4 sm:$0xff]   ;;  %v17053_v2 = vpack.c.bf16 %v262_v27, %v250_v31  ;;  %v15414_v31 = vld [vmem:[#allocation7 + $0x5bc] ss:$48 sps:$4 sm:$0xff]   ;;  %v15417_v27 = vld [vmem:[#allocation7 + $0x614] ss:$48 sps:$4 sm:$0xff]  }
 0x1f6   :  { %7992 = vmatprep.mubr.bf16.mxu0 %v17045_v60  ;;  %8670 = vmatprep.mubr.bf16.mxu1 %v17045_v60  ;;  %v249_v60 = vld [vmem:[#allocation5 + $0x590] sm:$0xff] }
 0x1f7   :  { %18219 = vst [vmem:[#allocation95_spill] sm:$0xff] %v17053_v2 }
 0x1f8   :  { %8714 = vmatpush1.bf16.msra.mxu0 %v15385_v57  ;;  %9392 = vmatpush1.bf16.msra.mxu1 %v15388_v14  ;;  %v17059_v57 = vpack.c.bf16 %v261_v48, %v249_v60  ;;  %v15403_v14 = vld [vmem:[#allocation7 + $0x550] ss:$48 sps:$4 sm:$0xff]   ;;  %v15420_v48 = vld [vmem:[#allocation7 + $0x61c] ss:$48 sps:$4 sm:$0xff]  }
 0x1f9   :  { %8715 = vmatprep.subr.bf16.mxu0 %v15393_v11  ;;  %9393 = vmatprep.subr.bf16.mxu1 %v15396_v21  ;;  %v15406_v11 = vld [vmem:[#allocation7 + $0x558] ss:$48 sps:$4 sm:$0xff]   ;;  %v15411_v21 = vld [vmem:[#allocation7 + $0x5b4] ss:$48 sps:$4 sm:$0xff]   ;;  %v15415_v60 = vld [vmem:[#allocation7 + $0x610] ss:$48 sps:$4 sm:$0xff]  }
 0x1fa   :  { %18220 = vst [vmem:[#allocation96_spill] sm:$0xff] %v17059_v57 }
 0x1fb   :  { %7993 = vmatmul.mubr.bf16.gmra.mrb[24].mxu0 %v17051_v7  ;;  %8671 = vmatmul.mubr.bf16.gmra.mrb[24].mxu1 %v17051_v7 }
 0x1fc   :  { %8716 = vmatpush1.bf16.msra.mxu0 %v15391_v56  ;;  %9394 = vmatpush1.bf16.msra.mxu1 %v15394_v35  ;;  %v15409_v56 = vld [vmem:[#allocation7 + $0x5b0] ss:$48 sps:$4 sm:$0xff]   ;;  %v15412_v35 = vld [vmem:[#allocation7 + $0x5b8] ss:$48 sps:$4 sm:$0xff]  }
 0x1fd   :  { %8717 = vmatprep.subr.bf16.mxu0 %v15399_v18  ;;  %9395 = vmatprep.subr.bf16.mxu1 %v15402_v22  ;;  %v15418_v18 = vld [vmem:[#allocation7 + $0x618] ss:$48 sps:$4 sm:$0xff]   ;;  %v15423_v22 = vld [vmem:[#allocation7 + $0x674] ss:$48 sps:$4 sm:$0xff]  }
 0x1fe   :  { %8002 = vmatprep.mubr.bf16.mxu0 %v17053_v2  ;;  %8680 = vmatprep.mubr.bf16.mxu1 %v17053_v2 }
 0x200   :  { %8718 = vmatpush1.bf16.msra.mxu0 %v15397_v38  ;;  %9396 = vmatpush1.bf16.msra.mxu1 %v15400_v55  ;;  %v15426_v38 = vld [vmem:[#allocation7 + $0x67c] ss:$48 sps:$4 sm:$0xff]   ;;  %v15421_v55 = vld [vmem:[#allocation7 + $0x670] ss:$48 sps:$4 sm:$0xff]  }
 0x201   :  { %8719 = vmatprep.subr.bf16.mxu0 %v15405_v46  ;;  %9397 = vmatprep.subr.bf16.mxu1 %v15408_v44  ;;  %v15424_v46 = vld [vmem:[#allocation7 + $0x678] ss:$48 sps:$4 sm:$0xff]   ;;  %v15429_v44 = vld [vmem:[#allocation7 + $0x6d4] ss:$48 sps:$4 sm:$0xff]  }
 0x203   :  { %8003 = vmatmul.mubr.bf16.gmra.mrb[28].mxu0 %v17059_v57  ;;  %8681 = vmatmul.mubr.bf16.gmra.mrb[28].mxu1 %v17059_v57 }
 0x204   :  { %8720 = vmatpush1.bf16.msra.mxu0 %v15403_v14  ;;  %9398 = vmatpush1.bf16.msra.mxu1 %v15406_v11  ;;  %v15432_v14 = vld [vmem:[#allocation7 + $0x6dc] ss:$48 sps:$4 sm:$0xff]   ;;  %v15427_v11 = vld [vmem:[#allocation7 + $0x6d0] ss:$48 sps:$4 sm:$0xff]  }
 0x205   :  { %8721 = vmatprep.subr.bf16.mxu0 %v15411_v21  ;;  %9399 = vmatprep.subr.bf16.mxu1 %v15414_v31  ;;  %v15430_v21 = vld [vmem:[#allocation7 + $0x6d8] ss:$48 sps:$4 sm:$0xff]   ;;  %v15435_v31 = vld [vmem:[#allocation7 + $0x734] ss:$48 sps:$4 sm:$0xff]  }
 0x206   :  { %8723 = vmatprep.mubr.bf16.mxu0 %v16679_v51  ;;  %9401 = vmatprep.mubr.bf16.mxu1 %v16679_v51 }
 0x208   :  { %8722 = vmatpush1.bf16.msra.mxu0 %v15409_v56  ;;  %9400 = vmatpush1.bf16.msra.mxu1 %v15412_v35  ;;  %v15438_v56 = vld [vmem:[#allocation7 + $0x73c] ss:$48 sps:$4 sm:$0xff]   ;;  %v15433_v35 = vld [vmem:[#allocation7 + $0x730] ss:$48 sps:$4 sm:$0xff]  }
 0x209   :  { %8804 = vmatprep.subr.bf16.mxu0 %v15417_v27  ;;  %9482 = vmatprep.subr.bf16.mxu1 %v15420_v48  ;;  %v15436_v27 = vld [vmem:[#allocation7 + $0x738] ss:$48 sps:$4 sm:$0xff]   ;;  %v15441_v48 = vld [vmem:[#allocation7 + $0x794] ss:$48 sps:$4 sm:$0xff]  }
 0x20b   :  { %8724 = vmatmul.mubr.bf16.vlgmr.msra.gmra.mrb[32].mxu0 %v16683_v8  ;;  %9402 = vmatmul.mubr.bf16.vlgmr.msra.gmra.mrb[32].mxu1 %v16683_v8 }
 0x20c   :  { %8805 = vmatpush1.bf16.msra.mxu0 %v15415_v60  ;;  %9483 = vmatpush1.bf16.msra.mxu1 %v15418_v18  ;;  %v15444_v60 = vld [vmem:[#allocation7 + $0x79c] ss:$48 sps:$4 sm:$0xff]   ;;  %v15439_v18 = vld [vmem:[#allocation7 + $0x790] ss:$48 sps:$4 sm:$0xff]  }
 0x20d   :  { %8806 = vmatprep.subr.bf16.mxu0 %v15423_v22  ;;  %9484 = vmatprep.subr.bf16.mxu1 %v15426_v38  ;;  %v15442_v22 = vld [vmem:[#allocation7 + $0x798] ss:$48 sps:$4 sm:$0xff]   ;;  %v15447_v38 = vld [vmem:[#allocation7 + $0x7f4] ss:$48 sps:$4 sm:$0xff]  }
 0x20e   :  { %8733 = vmatprep.mubr.bf16.mxu0 %v16685_v15  ;;  %9411 = vmatprep.mubr.bf16.mxu1 %v16685_v15 }
 0x210   :  { %8807 = vmatpush1.bf16.msra.mxu0 %v15421_v55  ;;  %9485 = vmatpush1.bf16.msra.mxu1 %v15424_v46  ;;  %v15450_v55 = vld [vmem:[#allocation7 + $0x7fc] ss:$48 sps:$4 sm:$0xff]   ;;  %v15445_v46 = vld [vmem:[#allocation7 + $0x7f0] ss:$48 sps:$4 sm:$0xff]  }
 0x211   :  { %8808 = vmatprep.subr.bf16.mxu0 %v15429_v44  ;;  %9486 = vmatprep.subr.bf16.mxu1 %v15432_v14  ;;  %v15448_v44 = vld [vmem:[#allocation7 + $0x7f8] ss:$48 sps:$4 sm:$0xff]   ;;  %v15453_v14 = vld [vmem:[#allocation7 + $0x854] ss:$48 sps:$4 sm:$0xff]  }
 0x213   :  { %8734 = vmatmul.mubr.bf16.gmra.mrb[36].mxu0 %v16691_v23  ;;  %9412 = vmatmul.mubr.bf16.gmra.mrb[36].mxu1 %v16691_v23 }
 0x214   :  { %8809 = vmatpush1.bf16.msra.mxu0 %v15427_v11  ;;  %9487 = vmatpush1.bf16.msra.mxu1 %v15430_v21  ;;  %v15456_v11 = vld [vmem:[#allocation7 + $0x85c] ss:$48 sps:$4 sm:$0xff]   ;;  %v15451_v21 = vld [vmem:[#allocation7 + $0x850] ss:$48 sps:$4 sm:$0xff]  }
 0x215   :  { %8810 = vmatprep.subr.bf16.mxu0 %v15435_v31  ;;  %9488 = vmatprep.subr.bf16.mxu1 %v15438_v56  ;;  %v15454_v31 = vld [vmem:[#allocation7 + $0x858] ss:$48 sps:$4 sm:$0xff]   ;;  %v15459_v56 = vld [vmem:[#allocation7 + $0x8b4] ss:$48 sps:$4 sm:$0xff]  }
 0x216   :  { %8743 = vmatprep.mubr.bf16.mxu0 %v16693_v28  ;;  %9421 = vmatprep.mubr.bf16.mxu1 %v16693_v28 }
 0x218   :  { %8811 = vmatpush1.bf16.msra.mxu0 %v15433_v35  ;;  %9489 = vmatpush1.bf16.msra.mxu1 %v15436_v27  ;;  %v15462_v35 = vld [vmem:[#allocation7 + $0x8bc] ss:$48 sps:$4 sm:$0xff]   ;;  %v15457_v27 = vld [vmem:[#allocation7 + $0x8b0] ss:$48 sps:$4 sm:$0xff]  }
 0x219   :  { %8812 = vmatprep.subr.bf16.mxu0 %v15441_v48  ;;  %9490 = vmatprep.subr.bf16.mxu1 %v15444_v60  ;;  %v15460_v48 = vld [vmem:[#allocation7 + $0x8b8] ss:$48 sps:$4 sm:$0xff]   ;;  %v15465_v60 = vld [vmem:[#allocation7 + $0x914] ss:$48 sps:$4 sm:$0xff]  }
 0x21b   :  { %8744 = vmatmul.mubr.bf16.gmra.mrb[40].mxu0 %v16699_v37  ;;  %9422 = vmatmul.mubr.bf16.gmra.mrb[40].mxu1 %v16699_v37 }
 0x21c   :  { %8813 = vmatpush1.bf16.msra.mxu0 %v15439_v18  ;;  %9491 = vmatpush1.bf16.msra.mxu1 %v15442_v22  ;;  %v15468_v18 = vld [vmem:[#allocation7 + $0x91c] ss:$48 sps:$4 sm:$0xff]   ;;  %v15463_v22 = vld [vmem:[#allocation7 + $0x910] ss:$48 sps:$4 sm:$0xff]  }
 0x21d   :  { %8814 = vmatprep.subr.bf16.mxu0 %v15447_v38  ;;  %9492 = vmatprep.subr.bf16.mxu1 %v15450_v55  ;;  %v15466_v38 = vld [vmem:[#allocation7 + $0x918] ss:$48 sps:$4 sm:$0xff]   ;;  %v15471_v55 = vld [vmem:[#allocation7 + $0x974] ss:$48 sps:$4 sm:$0xff]  }
 0x21e   :  { %8753 = vmatprep.mubr.bf16.mxu0 %v16701_v43  ;;  %9431 = vmatprep.mubr.bf16.mxu1 %v16701_v43 }
 0x220   :  { %8815 = vmatpush1.bf16.msra.mxu0 %v15445_v46  ;;  %9493 = vmatpush1.bf16.msra.mxu1 %v15448_v44  ;;  %v15474_v46 = vld [vmem:[#allocation7 + $0x97c] ss:$48 sps:$4 sm:$0xff]   ;;  %v15469_v44 = vld [vmem:[#allocation7 + $0x970] ss:$48 sps:$4 sm:$0xff]  }
 0x221   :  { %8816 = vmatprep.subr.bf16.mxu0 %v15453_v14  ;;  %9494 = vmatprep.subr.bf16.mxu1 %v15456_v11  ;;  %v15472_v14 = vld [vmem:[#allocation7 + $0x978] ss:$48 sps:$4 sm:$0xff]   ;;  %v15477_v11 = vld [vmem:[#allocation7 + $0x9d4] ss:$48 sps:$4 sm:$0xff]  }
 0x223   :  { %8754 = vmatmul.mubr.bf16.gmra.mrb[44].mxu0 %v16707_v50  ;;  %9432 = vmatmul.mubr.bf16.gmra.mrb[44].mxu1 %v16707_v50 }
 0x224   :  { %8817 = vmatpush1.bf16.msra.mxu0 %v15451_v21  ;;  %9495 = vmatpush1.bf16.msra.mxu1 %v15454_v31  ;;  %v15480_v21 = vld [vmem:[#allocation7 + $0x9dc] ss:$48 sps:$4 sm:$0xff]   ;;  %v15475_v31 = vld [vmem:[#allocation7 + $0x9d0] ss:$48 sps:$4 sm:$0xff]  }
 0x225   :  { %8818 = vmatprep.subr.bf16.mxu0 %v15459_v56  ;;  %9496 = vmatprep.subr.bf16.mxu1 %v15462_v35  ;;  %v15478_v56 = vld [vmem:[#allocation7 + $0x9d8] ss:$48 sps:$4 sm:$0xff]   ;;  %v15483_v35 = vld [vmem:[#allocation7 + $0xa34] ss:$48 sps:$4 sm:$0xff]  }
 0x226   :  { %8763 = vmatprep.mubr.bf16.mxu0 %v16709_v59  ;;  %9441 = vmatprep.mubr.bf16.mxu1 %v16709_v59 }
 0x228   :  { %8819 = vmatpush1.bf16.msra.mxu0 %v15457_v27  ;;  %9497 = vmatpush1.bf16.msra.mxu1 %v15460_v48  ;;  %v15486_v27 = vld [vmem:[#allocation7 + $0xa3c] ss:$48 sps:$4 sm:$0xff]   ;;  %v15481_v48 = vld [vmem:[#allocation7 + $0xa30] ss:$48 sps:$4 sm:$0xff]  }
 0x229   :  { %8820 = vmatprep.subr.bf16.mxu0 %v15465_v60  ;;  %9498 = vmatprep.subr.bf16.mxu1 %v15468_v18  ;;  %v15484_v60 = vld [vmem:[#allocation7 + $0xa38] ss:$48 sps:$4 sm:$0xff]   ;;  %v15489_v18 = vld [vmem:[#allocation7 + $0xa94] ss:$48 sps:$4 sm:$0xff]  }
 0x22b   :  { %8764 = vmatmul.mubr.bf16.gmra.mrb[48].mxu0 %v16715_v0  ;;  %9442 = vmatmul.mubr.bf16.gmra.mrb[48].mxu1 %v16715_v0 }
 0x22c   :  { %8821 = vmatpush1.bf16.msra.mxu0 %v15463_v22  ;;  %9499 = vmatpush1.bf16.msra.mxu1 %v15466_v38  ;;  %v15492_v22 = vld [vmem:[#allocation7 + $0xa9c] ss:$48 sps:$4 sm:$0xff]   ;;  %v15487_v38 = vld [vmem:[#allocation7 + $0xa90] ss:$48 sps:$4 sm:$0xff]  }
 0x22d   :  { %8822 = vmatprep.subr.bf16.mxu0 %v15471_v55  ;;  %9500 = vmatprep.subr.bf16.mxu1 %v15474_v46  ;;  %v15490_v55 = vld [vmem:[#allocation7 + $0xa98] ss:$48 sps:$4 sm:$0xff]   ;;  %v15495_v46 = vld [vmem:[#allocation7 + $0xaf4] ss:$48 sps:$4 sm:$0xff]  }
 0x22e   :  { %8773 = vmatprep.mubr.bf16.mxu0 %v16717_v10  ;;  %9451 = vmatprep.mubr.bf16.mxu1 %v16717_v10 }
 0x230   :  { %8823 = vmatpush1.bf16.msra.mxu0 %v15469_v44  ;;  %9501 = vmatpush1.bf16.msra.mxu1 %v15472_v14  ;;  %v15498_v44 = vld [vmem:[#allocation7 + $0xafc] ss:$48 sps:$4 sm:$0xff]   ;;  %v15493_v14 = vld [vmem:[#allocation7 + $0xaf0] ss:$48 sps:$4 sm:$0xff]  }
 0x231   :  { %8824 = vmatprep.subr.bf16.mxu0 %v15477_v11  ;;  %9502 = vmatprep.subr.bf16.mxu1 %v15480_v21  ;;  %v15496_v11 = vld [vmem:[#allocation7 + $0xaf8] ss:$48 sps:$4 sm:$0xff]   ;;  %v15501_v21 = vld [vmem:[#allocation7 + $0xb54] ss:$48 sps:$4 sm:$0xff]  }
 0x233   :  { %8774 = vmatmul.mubr.bf16.gmra.mrb[52].mxu0 %v16723_v17  ;;  %9452 = vmatmul.mubr.bf16.gmra.mrb[52].mxu1 %v16723_v17 }
 0x234   :  { %8825 = vmatpush1.bf16.msra.mxu0 %v15475_v31  ;;  %9503 = vmatpush1.bf16.msra.mxu1 %v15478_v56  ;;  %v15504_v31 = vld [vmem:[#allocation7 + $0xb5c] ss:$48 sps:$4 sm:$0xff]   ;;  %v15499_v56 = vld [vmem:[#allocation7 + $0xb50] ss:$48 sps:$4 sm:$0xff]  }
 0x235   :  { %8826 = vmatprep.subr.bf16.mxu0 %v15483_v35  ;;  %9504 = vmatprep.subr.bf16.mxu1 %v15486_v27  ;;  %v15502_v35 = vld [vmem:[#allocation7 + $0xb58] ss:$48 sps:$4 sm:$0xff]   ;;  %v15507_v27 = vld [vmem:[#allocation7 + $0xbb4] ss:$48 sps:$4 sm:$0xff]  }
 0x236   :  { %8783 = vmatprep.mubr.bf16.mxu0 %v16725_v25  ;;  %9461 = vmatprep.mubr.bf16.mxu1 %v16725_v25 }
 0x238   :  { %8827 = vmatpush1.bf16.msra.mxu0 %v15481_v48  ;;  %9505 = vmatpush1.bf16.msra.mxu1 %v15484_v60  ;;  %v15510_v48 = vld [vmem:[#allocation7 + $0xbbc] ss:$48 sps:$4 sm:$0xff]   ;;  %v15505_v60 = vld [vmem:[#allocation7 + $0xbb0] ss:$48 sps:$4 sm:$0xff]  }
 0x239   :  { %8828 = vmatprep.subr.bf16.mxu0 %v15489_v18  ;;  %9506 = vmatprep.subr.bf16.mxu1 %v15492_v22  ;;  %v15508_v18 = vld [vmem:[#allocation7 + $0xbb8] ss:$48 sps:$4 sm:$0xff]   ;;  %v15513_v22 = vld [vmem:[#allocation7 + $0xc14] ss:$48 sps:$4 sm:$0xff]  }
 0x23b   :  { %8784 = vmatmul.mubr.bf16.gmra.mrb[56].mxu0 %v16731_v34  ;;  %9462 = vmatmul.mubr.bf16.gmra.mrb[56].mxu1 %v16731_v34 }
 0x23c   :  { %8829 = vmatpush1.bf16.msra.mxu0 %v15487_v38  ;;  %9507 = vmatpush1.bf16.msra.mxu1 %v15490_v55  ;;  %v15516_v38 = vld [vmem:[#allocation7 + $0xc1c] ss:$48 sps:$4 sm:$0xff]   ;;  %v15511_v55 = vld [vmem:[#allocation7 + $0xc10] ss:$48 sps:$4 sm:$0xff]  }
 0x23d   :  { %8830 = vmatprep.subr.bf16.mxu0 %v15495_v46  ;;  %9508 = vmatprep.subr.bf16.mxu1 %v15498_v44  ;;  %v15514_v46 = vld [vmem:[#allocation7 + $0xc18] ss:$48 sps:$4 sm:$0xff]   ;;  %v15519_v44 = vld [vmem:[#allocation7 + $0xc74] ss:$48 sps:$4 sm:$0xff]  }
 0x23e   :  { %8793 = vmatprep.mubr.bf16.mxu0 %v16733_v40  ;;  %9471 = vmatprep.mubr.bf16.mxu1 %v16733_v40 }
 0x240   :  { %8831 = vmatpush1.bf16.msra.mxu0 %v15493_v14  ;;  %9509 = vmatpush1.bf16.msra.mxu1 %v15496_v11  ;;  %v15522_v14 = vld [vmem:[#allocation7 + $0xc7c] ss:$48 sps:$4 sm:$0xff]   ;;  %v15517_v11 = vld [vmem:[#allocation7 + $0xc70] ss:$48 sps:$4 sm:$0xff]  }
 0x241   :  { %8832 = vmatprep.subr.bf16.mxu0 %v15501_v21  ;;  %9510 = vmatprep.subr.bf16.mxu1 %v15504_v31  ;;  %v15520_v21 = vld [vmem:[#allocation7 + $0xc78] ss:$48 sps:$4 sm:$0xff]   ;;  %v15525_v31 = vld [vmem:[#allocation7 + $0xcd4] ss:$48 sps:$4 sm:$0xff]  }
 0x243   :  { %8794 = vmatmul.mubr.bf16.gmra.mrb[60].mxu0 %v16739_v52  ;;  %9472 = vmatmul.mubr.bf16.gmra.mrb[60].mxu1 %v16739_v52 }
 0x244   :  { %8833 = vmatpush1.bf16.msra.mxu0 %v15499_v56  ;;  %9511 = vmatpush1.bf16.msra.mxu1 %v15502_v35  ;;  %v15528_v56 = vld [vmem:[#allocation7 + $0xcdc] ss:$48 sps:$4 sm:$0xff]   ;;  %v15523_v35 = vld [vmem:[#allocation7 + $0xcd0] ss:$48 sps:$4 sm:$0xff]  }
 0x245   :  { %8834 = vmatprep.subr.bf16.mxu0 %v15507_v27  ;;  %9512 = vmatprep.subr.bf16.mxu1 %v15510_v48  ;;  %v15526_v27 = vld [vmem:[#allocation7 + $0xcd8] ss:$48 sps:$4 sm:$0xff]   ;;  %v15531_v48 = vld [vmem:[#allocation7 + $0xd34] ss:$48 sps:$4 sm:$0xff]  }
 0x246   :  { %8836 = vmatprep.mubr.bf16.mxu0 %v16741_v58  ;;  %9514 = vmatprep.mubr.bf16.mxu1 %v16741_v58 }
 0x248   :  { %8835 = vmatpush1.bf16.msra.mxu0 %v15505_v60  ;;  %9513 = vmatpush1.bf16.msra.mxu1 %v15508_v18  ;;  %v15534_v60 = vld [vmem:[#allocation7 + $0xd3c] ss:$48 sps:$4 sm:$0xff]   ;;  %v15529_v18 = vld [vmem:[#allocation7 + $0xd30] ss:$48 sps:$4 sm:$0xff]  }
 0x249   :  { %8917 = vmatprep.subr.bf16.mxu0 %v15513_v22  ;;  %9595 = vmatprep.subr.bf16.mxu1 %v15516_v38  ;;  %v15532_v22 = vld [vmem:[#allocation7 + $0xd38] ss:$48 sps:$4 sm:$0xff]   ;;  %v15537_v38 = vld [vmem:[#allocation7 + $0xd94] ss:$48 sps:$4 sm:$0xff]  }
 0x24b   :  { %8837 = vmatmul.mubr.bf16.vlgmr.msra.gmra.mrb[32].mxu0 %v16747_v3  ;;  %9515 = vmatmul.mubr.bf16.vlgmr.msra.gmra.mrb[32].mxu1 %v16747_v3 }
 0x24c   :  { %8918 = vmatpush1.bf16.msra.mxu0 %v15511_v55  ;;  %9596 = vmatpush1.bf16.msra.mxu1 %v15514_v46  ;;  %v15540_v55 = vld [vmem:[#allocation7 + $0xd9c] ss:$48 sps:$4 sm:$0xff]   ;;  %v15535_v46 = vld [vmem:[#allocation7 + $0xd90] ss:$48 sps:$4 sm:$0xff]  }
 0x24d   :  { %8919 = vmatprep.subr.bf16.mxu0 %v15519_v44  ;;  %9597 = vmatprep.subr.bf16.mxu1 %v15522_v14  ;;  %v15538_v44 = vld [vmem:[#allocation7 + $0xd98] ss:$48 sps:$4 sm:$0xff]   ;;  %v15543_v14 = vld [vmem:[#allocation7 + $0xdf4] ss:$48 sps:$4 sm:$0xff]  }
 0x24e   :  { %8846 = vmatprep.mubr.bf16.mxu0 %v16749_v13  ;;  %9524 = vmatprep.mubr.bf16.mxu1 %v16749_v13 }
 0x250   :  { %8920 = vmatpush1.bf16.msra.mxu0 %v15517_v11  ;;  %9598 = vmatpush1.bf16.msra.mxu1 %v15520_v21  ;;  %v15546_v11 = vld [vmem:[#allocation7 + $0xdfc] ss:$48 sps:$4 sm:$0xff]   ;;  %v15541_v21 = vld [vmem:[#allocation7 + $0xdf0] ss:$48 sps:$4 sm:$0xff]  }
 0x251   :  { %8921 = vmatprep.subr.bf16.mxu0 %v15525_v31  ;;  %9599 = vmatprep.subr.bf16.mxu1 %v15528_v56  ;;  %v15544_v31 = vld [vmem:[#allocation7 + $0xdf8] ss:$48 sps:$4 sm:$0xff]   ;;  %v15549_v56 = vld [vmem:[#allocation7 + $0xe54] ss:$48 sps:$4 sm:$0xff]  }
 0x253   :  { %8847 = vmatmul.mubr.bf16.gmra.mrb[36].mxu0 %v16755_v20  ;;  %9525 = vmatmul.mubr.bf16.gmra.mrb[36].mxu1 %v16755_v20 }
 0x254   :  { %8922 = vmatpush1.bf16.msra.mxu0 %v15523_v35  ;;  %9600 = vmatpush1.bf16.msra.mxu1 %v15526_v27  ;;  %v15552_v35 = vld [vmem:[#allocation7 + $0xe5c] ss:$48 sps:$4 sm:$0xff]   ;;  %v15547_v27 = vld [vmem:[#allocation7 + $0xe50] ss:$48 sps:$4 sm:$0xff]  }
 0x255   :  { %8923 = vmatprep.subr.bf16.mxu0 %v15531_v48  ;;  %9601 = vmatprep.subr.bf16.mxu1 %v15534_v60  ;;  %v15550_v48 = vld [vmem:[#allocation7 + $0xe58] ss:$48 sps:$4 sm:$0xff]   ;;  %v15555_v60 = vld [vmem:[#allocation7 + $0xeb4] ss:$48 sps:$4 sm:$0xff]  }
 0x256   :  { %8856 = vmatprep.mubr.bf16.mxu0 %v16757_v32  ;;  %9534 = vmatprep.mubr.bf16.mxu1 %v16757_v32  ;;  %v11406_v32 = vld [vmem:[#allocation2 + $0x18] sm:$0xff] }
 0x258   :  { %8924 = vmatpush1.bf16.msra.mxu0 %v15529_v18  ;;  %9602 = vmatpush1.bf16.msra.mxu1 %v15532_v22  ;;  %v15558_v18 = vld [vmem:[#allocation7 + $0xebc] ss:$48 sps:$4 sm:$0xff]   ;;  %v15553_v22 = vld [vmem:[#allocation7 + $0xeb0] ss:$48 sps:$4 sm:$0xff]  }
 0x259   :  { %8925 = vmatprep.subr.bf16.mxu0 %v15537_v38  ;;  %9603 = vmatprep.subr.bf16.mxu1 %v15540_v55  ;;  %v15556_v38 = vld [vmem:[#allocation7 + $0xeb8] ss:$48 sps:$4 sm:$0xff]   ;;  %v15561_v55 = vld [vmem:[#allocation7 + $0xf14] ss:$48 sps:$4 sm:$0xff]  }
 0x25b   :  { %8857 = vmatmul.mubr.bf16.gmra.mrb[40].mxu0 %v16763_v41  ;;  %9535 = vmatmul.mubr.bf16.gmra.mrb[40].mxu1 %v16763_v41 }
 0x25c   :  { %8926 = vmatpush1.bf16.msra.mxu0 %v15535_v46  ;;  %9604 = vmatpush1.bf16.msra.mxu1 %v15538_v44  ;;  %v15564_v46 = vld [vmem:[#allocation7 + $0xf1c] ss:$48 sps:$4 sm:$0xff]   ;;  %v15559_v44 = vld [vmem:[#allocation7 + $0xf10] ss:$48 sps:$4 sm:$0xff]  }
 0x25d   :  { %8927 = vmatprep.subr.bf16.mxu0 %v15543_v14  ;;  %9605 = vmatprep.subr.bf16.mxu1 %v15546_v11  ;;  %v15562_v14 = vld [vmem:[#allocation7 + $0xf18] ss:$48 sps:$4 sm:$0xff]   ;;  %v15567_v11 = vld [vmem:[#allocation7 + $0xf74] ss:$48 sps:$4 sm:$0xff]  }
 0x25e   :  { %8866 = vmatprep.mubr.bf16.mxu0 %v16765_v49  ;;  %9544 = vmatprep.mubr.bf16.mxu1 %v16765_v49 }
 0x260   :  { %8928 = vmatpush1.bf16.msra.mxu0 %v15541_v21  ;;  %9606 = vmatpush1.bf16.msra.mxu1 %v15544_v31  ;;  %v15570_v21 = vld [vmem:[#allocation7 + $0xf7c] ss:$48 sps:$4 sm:$0xff]   ;;  %v15565_v31 = vld [vmem:[#allocation7 + $0xf70] ss:$48 sps:$4 sm:$0xff]  }
 0x261   :  { %8929 = vmatprep.subr.bf16.mxu0 %v15549_v56  ;;  %9607 = vmatprep.subr.bf16.mxu1 %v15552_v35  ;;  %v15568_v56 = vld [vmem:[#allocation7 + $0xf78] ss:$48 sps:$4 sm:$0xff]   ;;  %v15573_v35 = vld [vmem:[#allocation7 + $0xfd4] ss:$48 sps:$4 sm:$0xff]  }
 0x263   :  { %8867 = vmatmul.mubr.bf16.gmra.mrb[44].mxu0 %v16771_v62  ;;  %9545 = vmatmul.mubr.bf16.gmra.mrb[44].mxu1 %v16771_v62 }
 0x264   :  { %8930 = vmatpush1.bf16.msra.mxu0 %v15547_v27  ;;  %9608 = vmatpush1.bf16.msra.mxu1 %v15550_v48  ;;  %v15576_v27 = vld [vmem:[#allocation7 + $0xfdc] ss:$48 sps:$4 sm:$0xff]   ;;  %v15571_v48 = vld [vmem:[#allocation7 + $0xfd0] ss:$48 sps:$4 sm:$0xff]  }
 0x265   :  { %8931 = vmatprep.subr.bf16.mxu0 %v15555_v60  ;;  %9609 = vmatprep.subr.bf16.mxu1 %v15558_v18  ;;  %v15574_v60 = vld [vmem:[#allocation7 + $0xfd8] ss:$48 sps:$4 sm:$0xff]   ;;  %v15579_v18 = vld [vmem:[#allocation7 + $0x1034] ss:$48 sps:$4 sm:$0xff]  }
 0x266   :  { %8876 = vmatprep.mubr.bf16.mxu0 %v16773_v5  ;;  %9554 = vmatprep.mubr.bf16.mxu1 %v16773_v5 }
 0x268   :  { %8932 = vmatpush1.bf16.msra.mxu0 %v15553_v22  ;;  %9610 = vmatpush1.bf16.msra.mxu1 %v15556_v38  ;;  %v15582_v22 = vld [vmem:[#allocation7 + $0x103c] ss:$48 sps:$4 sm:$0xff]   ;;  %v15577_v38 = vld [vmem:[#allocation7 + $0x1030] ss:$48 sps:$4 sm:$0xff]  }
 0x269   :  { %8933 = vmatprep.subr.bf16.mxu0 %v15561_v55  ;;  %9611 = vmatprep.subr.bf16.mxu1 %v15564_v46  ;;  %v15580_v55 = vld [vmem:[#allocation7 + $0x1038] ss:$48 sps:$4 sm:$0xff]   ;;  %v15585_v46 = vld [vmem:[#allocation7 + $0x1094] ss:$48 sps:$4 sm:$0xff]  }
 0x26b   :  { %8877 = vmatmul.mubr.bf16.gmra.mrb[48].mxu0 %v16779_v19  ;;  %9555 = vmatmul.mubr.bf16.gmra.mrb[48].mxu1 %v16779_v19 }
 0x26c   :  { %8934 = vmatpush1.bf16.msra.mxu0 %v15559_v44  ;;  %9612 = vmatpush1.bf16.msra.mxu1 %v15562_v14  ;;  %v15588_v44 = vld [vmem:[#allocation7 + $0x109c] ss:$48 sps:$4 sm:$0xff]   ;;  %v15583_v14 = vld [vmem:[#allocation7 + $0x1090] ss:$48 sps:$4 sm:$0xff]  }
 0x26d   :  { %8935 = vmatprep.subr.bf16.mxu0 %v15567_v11  ;;  %9613 = vmatprep.subr.bf16.mxu1 %v15570_v21  ;;  %v15586_v11 = vld [vmem:[#allocation7 + $0x1098] ss:$48 sps:$4 sm:$0xff]   ;;  %v15591_v21 = vld [vmem:[#allocation7 + $0x10f4] ss:$48 sps:$4 sm:$0xff]  }
 0x26e   :  { %8886 = vmatprep.mubr.bf16.mxu0 %v16781_v29  ;;  %9564 = vmatprep.mubr.bf16.mxu1 %v16781_v29 }
 0x270   :  { %8936 = vmatpush1.bf16.msra.mxu0 %v15565_v31  ;;  %9614 = vmatpush1.bf16.msra.mxu1 %v15568_v56  ;;  %v15594_v31 = vld [vmem:[#allocation7 + $0x10fc] ss:$48 sps:$4 sm:$0xff]   ;;  %v15589_v56 = vld [vmem:[#allocation7 + $0x10f0] ss:$48 sps:$4 sm:$0xff]  }
 0x271   :  { %8937 = vmatprep.subr.bf16.mxu0 %v15573_v35  ;;  %9615 = vmatprep.subr.bf16.mxu1 %v15576_v27  ;;  %v15592_v35 = vld [vmem:[#allocation7 + $0x10f8] ss:$48 sps:$4 sm:$0xff]   ;;  %v15597_v27 = vld [vmem:[#allocation7 + $0x1154] ss:$48 sps:$4 sm:$0xff]  }
 0x273   :  { %8887 = vmatmul.mubr.bf16.gmra.mrb[52].mxu0 %v16787_v39  ;;  %9565 = vmatmul.mubr.bf16.gmra.mrb[52].mxu1 %v16787_v39 }
 0x274   :  { %8938 = vmatpush1.bf16.msra.mxu0 %v15571_v48  ;;  %9616 = vmatpush1.bf16.msra.mxu1 %v15574_v60  ;;  %v15600_v48 = vld [vmem:[#allocation7 + $0x115c] ss:$48 sps:$4 sm:$0xff]   ;;  %v15595_v60 = vld [vmem:[#allocation7 + $0x1150] ss:$48 sps:$4 sm:$0xff]  }
 0x275   :  { %8939 = vmatprep.subr.bf16.mxu0 %v15579_v18  ;;  %9617 = vmatprep.subr.bf16.mxu1 %v15582_v22  ;;  %v15598_v18 = vld [vmem:[#allocation7 + $0x1158] ss:$48 sps:$4 sm:$0xff]   ;;  %v15603_v22 = vld [vmem:[#allocation7 + $0x11b4] ss:$48 sps:$4 sm:$0xff]  }
 0x276   :  { %8896 = vmatprep.mubr.bf16.mxu0 %v16789_v54  ;;  %9574 = vmatprep.mubr.bf16.mxu1 %v16789_v54 }
 0x278   :  { %8940 = vmatpush1.bf16.msra.mxu0 %v15577_v38  ;;  %9618 = vmatpush1.bf16.msra.mxu1 %v15580_v55  ;;  %v15606_v38 = vld [vmem:[#allocation7 + $0x11bc] ss:$48 sps:$4 sm:$0xff]   ;;  %v15601_v55 = vld [vmem:[#allocation7 + $0x11b0] ss:$48 sps:$4 sm:$0xff]  }
 0x279   :  { %8941 = vmatprep.subr.bf16.mxu0 %v15585_v46  ;;  %9619 = vmatprep.subr.bf16.mxu1 %v15588_v44  ;;  %v15604_v46 = vld [vmem:[#allocation7 + $0x11b8] ss:$48 sps:$4 sm:$0xff]   ;;  %v15609_v44 = vld [vmem:[#allocation7 + $0x1214] ss:$48 sps:$4 sm:$0xff]  }
 0x27b   :  { %8897 = vmatmul.mubr.bf16.gmra.mrb[56].mxu0 %v16795_v61  ;;  %9575 = vmatmul.mubr.bf16.gmra.mrb[56].mxu1 %v16795_v61 }
 0x27c   :  { %8942 = vmatpush1.bf16.msra.mxu0 %v15583_v14  ;;  %9620 = vmatpush1.bf16.msra.mxu1 %v15586_v11  ;;  %v15612_v14 = vld [vmem:[#allocation7 + $0x121c] ss:$48 sps:$4 sm:$0xff]   ;;  %v15607_v11 = vld [vmem:[#allocation7 + $0x1210] ss:$48 sps:$4 sm:$0xff]  }
 0x27d   :  { %8943 = vmatprep.subr.bf16.mxu0 %v15591_v21  ;;  %9621 = vmatprep.subr.bf16.mxu1 %v15594_v31  ;;  %v15610_v21 = vld [vmem:[#allocation7 + $0x1218] ss:$48 sps:$4 sm:$0xff]   ;;  %v15615_v31 = vld [vmem:[#allocation7 + $0x1274] ss:$48 sps:$4 sm:$0xff]  }
 0x27e   :  { %8906 = vmatprep.mubr.bf16.mxu0 %v16797_v12  ;;  %9584 = vmatprep.mubr.bf16.mxu1 %v16797_v12 }
 0x280   :  { %8944 = vmatpush1.bf16.msra.mxu0 %v15589_v56  ;;  %9622 = vmatpush1.bf16.msra.mxu1 %v15592_v35  ;;  %v15618_v56 = vld [vmem:[#allocation7 + $0x127c] ss:$48 sps:$4 sm:$0xff]   ;;  %v15613_v35 = vld [vmem:[#allocation7 + $0x1270] ss:$48 sps:$4 sm:$0xff]  }
 0x281   :  { %8945 = vmatprep.subr.bf16.mxu0 %v15597_v27  ;;  %9623 = vmatprep.subr.bf16.mxu1 %v15600_v48  ;;  %v15616_v27 = vld [vmem:[#allocation7 + $0x1278] ss:$48 sps:$4 sm:$0xff]   ;;  %v15621_v48 = vld [vmem:[#allocation7 + $0x12d4] ss:$48 sps:$4 sm:$0xff]  }
 0x283   :  { %8907 = vmatmul.mubr.bf16.gmra.mrb[60].mxu0 %v16803_v24  ;;  %9585 = vmatmul.mubr.bf16.gmra.mrb[60].mxu1 %v16803_v24 }
 0x284   :  { %8946 = vmatpush1.bf16.msra.mxu0 %v15595_v60  ;;  %9624 = vmatpush1.bf16.msra.mxu1 %v15598_v18  ;;  %v15624_v60 = vld [vmem:[#allocation7 + $0x12dc] ss:$48 sps:$4 sm:$0xff]   ;;  %v15619_v18 = vld [vmem:[#allocation7 + $0x12d0] ss:$48 sps:$4 sm:$0xff]  }
 0x285   :  { %8947 = vmatprep.subr.bf16.mxu0 %v15603_v22  ;;  %9625 = vmatprep.subr.bf16.mxu1 %v15606_v38  ;;  %v15622_v22 = vld [vmem:[#allocation7 + $0x12d8] ss:$48 sps:$4 sm:$0xff]   ;;  %v15627_v38 = vld [vmem:[#allocation7 + $0x1334] ss:$48 sps:$4 sm:$0xff]  }
 0x286   :  { %8949 = vmatprep.mubr.bf16.mxu0 %v16805_v36  ;;  %9627 = vmatprep.mubr.bf16.mxu1 %v16805_v36 }
 0x288   :  { %8948 = vmatpush1.bf16.msra.mxu0 %v15601_v55  ;;  %9626 = vmatpush1.bf16.msra.mxu1 %v15604_v46  ;;  %v15630_v55 = vld [vmem:[#allocation7 + $0x133c] ss:$48 sps:$4 sm:$0xff]   ;;  %v18037_v46 = vlaneseq }
 0x289   :  { %9030 = vmatprep.subr.bf16.mxu0 %v15609_v44  ;;  %9708 = vmatprep.subr.bf16.mxu1 %v15612_v14  ;;  %v15625_v14 = vld [vmem:[#allocation7 + $0x1330] ss:$48 sps:$4 sm:$0xff]  }
 0x28a   :  { %v17136_v44 = vshrl.u32 %v18037_v46, 7  ;;  %v15639_v46 = vld [vmem:[#allocation7 + $0x13f4] ss:$48 sps:$4 sm:$0xff]  }
 0x28b   :  { %8950 = vmatmul.mubr.bf16.vlgmr.msra.gmra.mrb[32].mxu0 %v16811_v53  ;;  %9628 = vmatmul.mubr.bf16.vlgmr.msra.gmra.mrb[32].mxu1 %v16811_v53 }
 0x28c   :  { %9031 = vmatpush1.bf16.msra.mxu0 %v15607_v11  ;;  %9709 = vmatpush1.bf16.msra.mxu1 %v15610_v21  ;;  %18221 = vst [vmem:[#allocation97_spill] sm:$0xff] %v17136_v44  ;;  %v15628_v11 = vld [vmem:[#allocation7 + $0x1338] ss:$48 sps:$4 sm:$0xff]   ;;  %v15633_v21 = vld [vmem:[#allocation7 + $0x1394] ss:$48 sps:$4 sm:$0xff]  }
 0x28d   :  { %9032 = vmatprep.subr.bf16.mxu0 %v15615_v31  ;;  %9710 = vmatprep.subr.bf16.mxu1 %v15618_v56  ;;  %v15636_v31 = vld [vmem:[#allocation7 + $0x139c] ss:$48 sps:$4 sm:$0xff]   ;;  %v15631_v56 = vld [vmem:[#allocation7 + $0x1390] ss:$48 sps:$4 sm:$0xff]  }
 0x28e   :  { %8959 = vmatprep.mubr.bf16.mxu0 %v16813_v63  ;;  %9637 = vmatprep.mubr.bf16.mxu1 %v16813_v63  ;;  %v18222_v63 = vsub.s32 3, %v17136_v44 }
 0x290   :  { %9033 = vmatpush1.bf16.msra.mxu0 %v15613_v35  ;;  %9711 = vmatpush1.bf16.msra.mxu1 %v15616_v27  ;;  %v15634_v35 = vld [vmem:[#allocation7 + $0x1398] ss:$48 sps:$4 sm:$0xff]   ;;  %v1511_v27 = vld [vmem:[#allocation8] sm:$0xff] }
 0x291   :  { %9034 = vmatprep.subr.bf16.mxu0 %v15621_v48  ;;  %9712 = vmatprep.subr.bf16.mxu1 %v15624_v60  ;;  %v18046_v48 = vsub.s32 0, %v17136_v44  ;;  %v18047_v60 = vsub.s32 2, %v17136_v44 }
 0x293   :  { %8960 = vmatmul.mubr.bf16.gmra.mrb[36].mxu0 %v16819_v16  ;;  %9638 = vmatmul.mubr.bf16.gmra.mrb[36].mxu1 %v16819_v16  ;;  %v11405_v16 = vld [vmem:[#allocation2 + $0x10] sm:$0xff] }
 0x294   :  { %9035 = vmatpush1.bf16.msra.mxu0 %v15619_v18  ;;  %9713 = vmatpush1.bf16.msra.mxu1 %v15622_v22  ;;  %v15642_v18 = vld [vmem:[#allocation7 + $0x13fc] ss:$48 sps:$4 sm:$0xff]   ;;  %v18052_v22 = vsub.s32 1, %v17136_v44 }
 0x295   :  { %9036 = vmatprep.subr.bf16.mxu0 %v15627_v38  ;;  %9714 = vmatprep.subr.bf16.mxu1 %v15630_v55  ;;  %v17148_v55 = vrot.slane %v1511_v27, %v18046_v48  ;;  %v15645_v38 = vld [vmem:[#allocation7 + $0x1454] ss:$48 sps:$4 sm:$0xff]   ;;  %v17160_v48 = vrot.slane %v1511_v27, %v18222_v63  ;;  %v11408_v63 = vld [vmem:[#allocation2 + $0x68] sm:$0xff] }
 0x296   :  { %8969 = vmatprep.mubr.bf16.mxu0 %v16821_v30  ;;  %9647 = vmatprep.mubr.bf16.mxu1 %v16821_v30  ;;  %v17152_v30 = vrot.slane %v1511_v27, %v18047_v60  ;;  %v15648_v60 = vld [vmem:[#allocation7 + $0x145c] ss:$48 sps:$4 sm:$0xff]  }
 0x298   :  { %9037 = vmatpush1.bf16.msra.mxu0 %v15625_v14  ;;  %9715 = vmatpush1.bf16.msra.mxu1 %v15628_v11  ;;  %v15637_v14 = vld [vmem:[#allocation7 + $0x13f0] ss:$48 sps:$4 sm:$0xff]  }
 0x299   :  { %9038 = vmatprep.subr.bf16.mxu0 %v15633_v21  ;;  %9716 = vmatprep.subr.bf16.mxu1 %v15636_v31  ;;  %v11403_v11 = vld [vmem:[#allocation2] sm:$0xff]  ;;  %v17156_v21 = vrot.slane %v1511_v27, %v18052_v22  ;;  %v15640_v31 = vld [vmem:[#allocation7 + $0x13f8] ss:$48 sps:$4 sm:$0xff]  }
 0x29a   :  { %v15643_v22 = vld [vmem:[#allocation7 + $0x1450] ss:$48 sps:$4 sm:$0xff]   ;;  %v15646_v27 = vld [vmem:[#allocation7 + $0x1458] ss:$48 sps:$4 sm:$0xff]  }
 0x29b   :  { %8970 = vmatmul.mubr.bf16.gmra.mrb[40].mxu0 %v16827_v45  ;;  %9648 = vmatmul.mubr.bf16.gmra.mrb[40].mxu1 %v16827_v45  ;;  %v11404_v45 = vld [vmem:[#allocation2 + $0x8] sm:$0xff] }
 0x29c   :  { %9039 = vmatpush1.bf16.msra.mxu0 %v15631_v56  ;;  %9717 = vmatpush1.bf16.msra.mxu1 %v15634_v35  ;;  %v11407_v56 = vld [vmem:[#allocation2 + $0x60] sm:$0xff]  ;;  %v11409_v35 = vld [vmem:[#allocation2 + $0x70] sm:$0xff] }
 0x29d   :  { %9040 = vmatprep.subr.bf16.mxu0 %v15639_v46  ;;  %9718 = vmatprep.subr.bf16.mxu1 %v15642_v18  ;;  %v15651_v46 = vld [vmem:[#allocation7 + $0x14b4] ss:$48 sps:$4 sm:$0xff]  }
 0x29e   :  { %v7934_v53 = vpop.f32.mrb[0].mxu0  ;;  %v8612_v36 = vpop.f32.mrb[0].mxu1  ;;  %8979 = vmatprep.mubr.bf16.mxu0 %v16829_v1  ;;  %9657 = vmatprep.mubr.bf16.mxu1 %v16829_v1 }
 0x29f   :  { %v13582_v24 = vadd.f32 %v7934_v53, %v17148_v55  ;;  %v13614_v12 = vadd.f32 %v8612_v36, %v17152_v30  ;;  %v7936_v61 = vpop.f32.mrb[1].mxu0  ;;  %v8614_v44 = vpop.f32.mrb[1].mxu1 }
 0x2a0   :  { %v13583_v18 = vadd.f32 %v7936_v61, %v17156_v21  ;;  %v7938_v54 = vpop.f32.mrb[2].mxu0  ;;  %v8616_v39 = vpop.f32.mrb[2].mxu1  ;;  %9041 = vmatpush1.bf16.msra.mxu0 %v15637_v14  ;;  %9719 = vmatpush1.bf16.msra.mxu1 %v15640_v31  ;;  %v13615_v19 = vadd.f32 %v8614_v44, %v17160_v48  ;;  %v15654_v61 = vld [vmem:[#allocation7 + $0x14bc] ss:$48 sps:$4 sm:$0xff]  }
 0x2a1   :  { %v11467_v29 = vsub.f32 %v11403_v11, %v13582_v24  ;;  %v13584_v1 = vadd.f32 %v7938_v54, %v17148_v55  ;;  %v13616_v53 = vadd.f32 %v8616_v39, %v17152_v30  ;;  %v7940_v5 = vpop.f32.mrb[3].mxu0  ;;  %v8618_v36 = vpop.f32.mrb[3].mxu1  ;;  %9042 = vmatprep.subr.bf16.mxu0 %v15645_v38  ;;  %v11469_v62 = vsub.f32 %v11405_v16, %v13614_v12  ;;  %v11410_v44 = vld [vmem:[#allocation2 + $0x78] sm:$0xff]  ;;  %v15649_v54 = vld [vmem:[#allocation7 + $0x14b0] ss:$48 sps:$4 sm:$0xff]  }
 0x2a2   :  { %v11468_v49 = vsub.f32 %v11404_v45, %v13583_v18  ;;  %v13585_v41 = vadd.f32 %v7940_v5, %v17156_v21  ;;  %9720 = vmatprep.subr.bf16.mxu1 %v15648_v60  ;;  %v13617_v24 = vadd.f32 %v8618_v36, %v17160_v48  ;;  %v11411_v12 = vld [vmem:[#allocation2 + $0xc0] sm:$0xff]  ;;  %v11413_v16 = vld [vmem:[#allocation2 + $0xd0] sm:$0xff]  ;;  %v15652_v5 = vld [vmem:[#allocation7 + $0x14b8] ss:$48 sps:$4 sm:$0xff]   ;;  %v11470_v38 = vsub.f32 %v11406_v32, %v13615_v19 }
 0x2a3   :  { %v11531_v20 = vmul.f32 %v11467_v29, %v11467_v29  ;;  %v11471_v14 = vsub.f32 %v11407_v56, %v13584_v1  ;;  %v11473_v31 = vsub.f32 %v11409_v35, %v13616_v53  ;;  %8980 = vmatmul.mubr.bf16.gmra.mrb[44].mxu0 %v16835_v9  ;;  %9658 = vmatmul.mubr.bf16.gmra.mrb[44].mxu1 %v16835_v9  ;;  %v11412_v60 = vld [vmem:[#allocation2 + $0xc8] sm:$0xff]  ;;  %v11414_v29 = vld [vmem:[#allocation2 + $0xd8] sm:$0xff]  ;;  %v15657_v1 = vld [vmem:[#allocation7 + $0x1514] ss:$48 sps:$4 sm:$0xff]  }
 0x2a4   :  { %v11532_v39 = vmul.f32 %v11468_v49, %v11468_v49  ;;  %v11472_v11 = vsub.f32 %v11408_v63, %v13585_v41  ;;  %9043 = vmatpush1.bf16.msra.mxu0 %v15643_v22  ;;  %9721 = vmatpush1.bf16.msra.mxu1 %v15646_v27  ;;  %v11533_v56 = vmul.f32 %v11469_v62, %v11469_v62  ;;  %v11415_v49 = vld [vmem:[#allocation2 + $0x120] sm:$0xff]  ;;  %v11417_v9 = vld [vmem:[#allocation2 + $0x130] sm:$0xff]  ;;  %v11416_v32 = vld [vmem:[#allocation2 + $0x128] sm:$0xff] }
 0x2a5   :  { %v11535_v45 = vmul.f32 %v11471_v14, %v11471_v14  ;;  %9044 = vmatprep.subr.bf16.mxu0 %v15651_v46  ;;  %9722 = vmatprep.subr.bf16.mxu1 %v15654_v61  ;;  %v17175_v22 = vmul.f32 %v11473_v31, %v11473_v31  ;;  %v11474_v63 = vsub.f32 %v11410_v44, %v13617_v24  ;;  %v15655_v62 = vld [vmem:[#allocation7 + $0x1510] ss:$48 sps:$4 sm:$0xff]   ;;  %v15660_v19 = vld [vmem:[#allocation7 + $0x151c] ss:$48 sps:$4 sm:$0xff]  }
 0x2a6   :  { %v11536_v35 = vmul.f32 %v11472_v11, %v11472_v11  ;;  %v7944_v18 = vpop.f32.mrb[4].mxu0  ;;  %v8622_v53 = vpop.f32.mrb[4].mxu1  ;;  %8989 = vmatprep.mubr.bf16.mxu0 %v16837_v33  ;;  %v11595_v41 = vadd.f32 %v11532_v39, %v11531_v20  ;;  %9667 = vmatprep.mubr.bf16.mxu1 %v16837_v33 }
 0x2a7   :  { %v13586_v36 = vadd.f32 %v7944_v18, %v17148_v55  ;;  %v13618_v27 = vadd.f32 %v8622_v53, %v17152_v30  ;;  %v7946_v14 = vpop.f32.mrb[5].mxu0  ;;  %v8624_v46 = vpop.f32.mrb[5].mxu1 }
 0x2a8   :  { %v11600_v61 = vadd.f32 %v11536_v35, %v11535_v45  ;;  %v13587_v11 = vadd.f32 %v7946_v14, %v17156_v21  ;;  %v13619_v20 = vadd.f32 %v8624_v46, %v17160_v48  ;;  %v7948_v31 = vpop.f32.mrb[6].mxu0  ;;  %v8626_v39 = vpop.f32.mrb[6].mxu1  ;;  %9045 = vmatpush1.bf16.msra.mxu0 %v15649_v54  ;;  %v11596_v24 = vadd.f32 %v11595_v41, %v11533_v56  ;;  %v15658_v14 = vld [vmem:[#allocation7 + $0x1518] ss:$48 sps:$4 sm:$0xff]   ;;  %v15663_v46 = vld [vmem:[#allocation7 + $0x1574] ss:$48 sps:$4 sm:$0xff]  }
 0x2a9   :  { %v11475_v44 = vsub.f32 %v11411_v12, %v13586_v36  ;;  %v11477_v18 = vsub.f32 %v11413_v16, %v13618_v27  ;;  %v13588_v53 = vadd.f32 %v7948_v31, %v17148_v55  ;;  %v13620_v13 = vadd.f32 %v8626_v39, %v17152_v30  ;;  %9723 = vmatpush1.bf16.msra.mxu1 %v15652_v5  ;;  %v7950_v3 = vpop.f32.mrb[7].mxu0  ;;  %v8628_v33 = vpop.f32.mrb[7].mxu1  ;;  %v11418_v16 = vld [vmem:[#allocation2 + $0x138] sm:$0xff]  ;;  %v11420_v31 = vld [vmem:[#allocation2 + $0x188] sm:$0xff] }
 0x2aa   :  { %v11476_v58 = vsub.f32 %v11412_v60, %v13587_v11  ;;  %v11478_v52 = vsub.f32 %v11414_v29, %v13619_v20  ;;  %v13589_v45 = vadd.f32 %v7950_v3, %v17156_v21  ;;  %v13621_v35 = vadd.f32 %v8628_v33, %v17160_v48  ;;  %9046 = vmatprep.subr.bf16.mxu0 %v15657_v1  ;;  %v15666_v36 = vld [vmem:[#allocation7 + $0x157c] ss:$48 sps:$4 sm:$0xff]   ;;  %v11419_v3 = vld [vmem:[#allocation2 + $0x180] sm:$0xff]  ;;  %v11421_v33 = vld [vmem:[#allocation2 + $0x190] sm:$0xff] }
 0x2ab   :  { %v11538_v54 = vmul.f32 %v11474_v63, %v11474_v63  ;;  %v11539_v56 = vmul.f32 %v11475_v44, %v11475_v44  ;;  %v11479_v12 = vsub.f32 %v11415_v49, %v13588_v53  ;;  %8990 = vmatmul.mubr.bf16.gmra.mrb[48].mxu0 %v16843_v47  ;;  %v11534_v41 = vmul.f32 %v11470_v38, %v11470_v38  ;;  %v15661_v1 = vld [vmem:[#allocation7 + $0x1570] ss:$48 sps:$4 sm:$0xff]   ;;  %v15664_v11 = vld [vmem:[#allocation7 + $0x1578] ss:$48 sps:$4 sm:$0xff]  }
 0x2ac   :  { %v17187_v5 = vmul.f32 %v11477_v18, %v11477_v18  ;;  %v11540_v27 = vmul.f32 %v11476_v58, %v11476_v58  ;;  %v11481_v60 = vsub.f32 %v11417_v9, %v13620_v13  ;;  %v11480_v29 = vsub.f32 %v11416_v32, %v13589_v45  ;;  %9668 = vmatmul.mubr.bf16.gmra.mrb[48].mxu1 %v16843_v47  ;;  %v11422_v38 = vld [vmem:[#allocation2 + $0x198] sm:$0xff]  ;;  %v11423_v9 = vld [vmem:[#allocation2 + $0x1e0] sm:$0xff] }
 0x2ad   :  { %v17190_v20 = vmul.f32 %v11478_v52, %v11478_v52  ;;  %v11543_v63 = vmul.f32 %v11479_v12, %v11479_v12  ;;  %9724 = vmatprep.subr.bf16.mxu1 %v15660_v19  ;;  %9047 = vmatpush1.bf16.msra.mxu0 %v15655_v62  ;;  %v11597_v49 = vadd.f32 %v11596_v24, %v11534_v41  ;;  %v11425_v62 = vld [vmem:[#allocation2 + $0x1f0] sm:$0xff] }
 0x2ae   :  { %v11605_v39 = vadd.f32 %v11540_v27, %v11539_v56  ;;  %v11544_v44 = vmul.f32 %v11480_v29, %v11480_v29  ;;  %v11482_v18 = vsub.f32 %v11418_v16, %v13621_v35  ;;  %9725 = vmatpush1.bf16.msra.mxu1 %v15658_v14  ;;  %v7954_v58 = vpop.f32.mrb[8].mxu0  ;;  %v8632_v13 = vpop.f32.mrb[8].mxu1  ;;  %9048 = vmatprep.subr.bf16.mxu0 %v15663_v46  ;;  %v15669_v24 = vld [vmem:[#allocation7 + $0x15d4] ss:$48 sps:$4 sm:$0xff]   ;;  %v11424_v16 = vld [vmem:[#allocation2 + $0x1e8] sm:$0xff] }
 0x2af   :  { %11598 = vadd.xlane.f32.xlu0 %v11597_v49  ;;  %v13590_v32 = vadd.f32 %v7954_v58, %v17148_v55  ;;  %v13622_v52 = vadd.f32 %v8632_v13, %v17152_v30  ;;  %v7956_v53 = vpop.f32.mrb[9].mxu0  ;;  %v8634_v45 = vpop.f32.mrb[9].mxu1  ;;  %9726 = vmatprep.subr.bf16.mxu1 %v15666_v36  ;;  %v11601_v19 = vadd.f32 %v11600_v61, %v17175_v22  ;;  %v15667_v13 = vld [vmem:[#allocation7 + $0x15d0] ss:$48 sps:$4 sm:$0xff]  }
 0x2b0   :  { %v11610_v56 = vadd.f32 %v11544_v44, %v11543_v63  ;;  %v13591_v35 = vadd.f32 %v7956_v53, %v17156_v21  ;;  %v13623_v14 = vadd.f32 %v8634_v45, %v17160_v48  ;;  %v7958_v12 = vpop.f32.mrb[10].mxu0  ;;  %v8636_v46 = vpop.f32.mrb[10].mxu1  ;;  %8999 = vmatprep.mubr.bf16.mxu0 %v16845_v4  ;;  %9677 = vmatprep.mubr.bf16.mxu1 %v16845_v4  ;;  %v15672_v53 = vld [vmem:[#allocation7 + $0x15dc] ss:$48 sps:$4 sm:$0xff]  }
 0x2b1   :  { %v11483_v41 = vsub.f32 %v11419_v3, %v13590_v32  ;;  %v11485_v27 = vsub.f32 %v11421_v33, %v13622_v52  ;;  %v13592_v36 = vadd.f32 %v7958_v12, %v17148_v55  ;;  %v13624_v29 = vadd.f32 %v8636_v46, %v17152_v30  ;;  %9049 = vmatpush1.bf16.msra.mxu0 %v15661_v1  ;;  %v7960_v22 = vpop.f32.mrb[11].mxu0  ;;  %v8638_v61 = vpop.f32.mrb[11].mxu1  ;;  %v15670_v33 = vld [vmem:[#allocation7 + $0x15d8] ss:$48 sps:$4 sm:$0xff]   ;;  %v15675_v32 = vld [vmem:[#allocation7 + $0x1634] ss:$48 sps:$4 sm:$0xff]  }
 0x2b2   :  { %v11484_v63 = vsub.f32 %v11420_v31, %v13591_v35  ;;  %v11486_v49 = vsub.f32 %v11422_v38, %v13623_v14  ;;  %9727 = vmatpush1.bf16.msra.mxu1 %v15664_v11  ;;  %v11602_v44 = vadd.f32 %v11601_v19, %v11538_v54  ;;  %v13593_v58 = vadd.f32 %v7960_v22, %v17156_v21  ;;  %v11427_v54 = vld [vmem:[#allocation2 + $0x240] sm:$0xff]  ;;  %v11429_v11 = vld [vmem:[#allocation2 + $0x250] sm:$0xff]  ;;  %v15678_v19 = vld [vmem:[#allocation7 + $0x163c] ss:$48 sps:$4 sm:$0xff]  }
 0x2b3   :  { %v11545_v45 = vmul.f32 %v11481_v60, %v11481_v60  ;;  %v11546_v47 = vmul.f32 %v11482_v18, %v11482_v18  ;;  %v11547_v4 = vmul.f32 %v11483_v41, %v11483_v41  ;;  %v11487_v3 = vsub.f32 %v11423_v9, %v13592_v36  ;;  %9000 = vmatmul.mubr.bf16.gmra.mrb[52].mxu0 %v16851_v26  ;;  %v15673_v38 = vld [vmem:[#allocation7 + $0x1630] ss:$48 sps:$4 sm:$0xff]   ;;  %v11428_v9 = vld [vmem:[#allocation2 + $0x248] sm:$0xff]  ;;  %v11430_v14 = vld [vmem:[#allocation2 + $0x258] sm:$0xff] }
 0x2b4   :  { %v17203_v52 = vmul.f32 %v11485_v27, %v11485_v27  ;;  %v11548_v1 = vmul.f32 %v11484_v63, %v11484_v63  ;;  %v17205_v12 = vmul.f32 %v11486_v49, %v11486_v49  ;;  %v11489_v31 = vsub.f32 %v11425_v62, %v13624_v29  ;;  %11603 = vadd.xlane.f32.xlu0 %v11602_v44  ;;  %v15676_v46 = vld [vmem:[#allocation7 + $0x1638] ss:$48 sps:$4 sm:$0xff]   ;;  %v11431_v29 = vld [vmem:[#allocation2 + $0x2a0] sm:$0xff]  ;;  %v11433_v63 = vld [vmem:[#allocation2 + $0x2b0] sm:$0xff] }
 0x2b5   :  { %v11488_v35 = vsub.f32 %v11424_v16, %v13593_v58  ;;  %v17208_v60 = vadd.f32 %v8638_v61, %v17160_v48  ;;  %9050 = vmatprep.subr.bf16.mxu0 %v15669_v24  ;;  %9678 = vmatmul.mubr.bf16.gmra.mrb[52].mxu1 %v16851_v26  ;;  %v11606_v18 = vadd.f32 %v11605_v39, %v17187_v5 }
 0x2b6   :  { %v11615_v41 = vadd.f32 %v11548_v1, %v11547_v4  ;;  %v17212_v27 = vmul.f32 %v11487_v3, %v11487_v3  ;;  %9728 = vmatprep.subr.bf16.mxu1 %v15672_v53  ;;  %9051 = vmatpush1.bf16.msra.mxu0 %v15667_v13  ;;  %v7964_v62 = vpop.f32.mrb[12].mxu0  ;;  %v8642_v36 = vpop.f32.mrb[12].mxu1  ;;  %v11611_v16 = vadd.f32 %v11610_v56, %v11545_v45  ;;  %v11432_v4 = vld [vmem:[#allocation2 + $0x2a8] sm:$0xff] }
 0x2b7   :  { %9729 = vmatpush1.bf16.msra.mxu1 %v15670_v33  ;;  %v11607_v22 = vadd.f32 %v11606_v18, %v17190_v20  ;;  %v13594_v24 = vadd.f32 %v7964_v62, %v17148_v55  ;;  %v13626_v61 = vadd.f32 %v8642_v36, %v17152_v30  ;;  %v7966_v5 = vpop.f32.mrb[13].mxu0  ;;  %v8644_v39 = vpop.f32.mrb[13].mxu1  ;;  %9052 = vmatprep.subr.bf16.mxu0 %v15675_v32  ;;  %v15681_v20 = vld [vmem:[#allocation7 + $0x1694] ss:$48 sps:$4 sm:$0xff]  }
 0x2b8   :  { %v13595_v49 = vadd.f32 %v7966_v5, %v17156_v21  ;;  %v13627_v44 = vadd.f32 %v8644_v39, %v17160_v48  ;;  %9730 = vmatprep.subr.bf16.mxu1 %v15678_v19  ;;  %v7968_v58 = vpop.f32.mrb[14].mxu0  ;;  %v8646_v13 = vpop.f32.mrb[14].mxu1  ;;  %v11612_v56 = vadd.f32 %v11611_v16, %v11546_v47  ;;  %9009 = vmatprep.mubr.bf16.mxu0 %v16853_v42  ;;  %v11434_v47 = vld [vmem:[#allocation2 + $0x2b8] sm:$0xff] }
 0x2b9   :  { %11608 = vadd.xlane.f32.xlu0 %v11607_v22  ;;  %v11491_v53 = vsub.f32 %v11427_v54, %v13594_v24  ;;  %v11493_v45 = vsub.f32 %v11429_v11, %v13626_v61  ;;  %v13596_v3 = vadd.f32 %v7968_v58, %v17148_v55  ;;  %v13628_v33 = vadd.f32 %v8646_v13, %v17152_v30  ;;  %v7970_v32 = vpop.f32.mrb[15].mxu0  ;;  %v8648_v1 = vpop.f32.mrb[15].mxu1  ;;  %v15684_v16 = vld [vmem:[#allocation7 + $0x169c] ss:$48 sps:$4 sm:$0xff]   ;;  %v15679_v11 = vld [vmem:[#allocation7 + $0x1690] ss:$48 sps:$4 sm:$0xff]  }
 0x2ba   :  { %v11492_v18 = vsub.f32 %v11428_v9, %v13595_v49  ;;  %v11494_v62 = vsub.f32 %v11430_v14, %v13627_v44  ;;  %9053 = vmatpush1.bf16.msra.mxu0 %v15673_v38  ;;  %v13597_v19 = vadd.f32 %v7970_v32, %v17156_v21  ;;  %v13629_v36 = vadd.f32 %v8648_v1, %v17160_v48  ;;  %v15682_v24 = vld [vmem:[#allocation7 + $0x1698] ss:$48 sps:$4 sm:$0xff]   ;;  %v11435_v38 = vld [vmem:[#allocation2 + $0x300] sm:$0xff]  ;;  %v11437_v49 = vld [vmem:[#allocation2 + $0x310] sm:$0xff] }
 0x2bb   :  { %v11553_v5 = vmul.f32 %v11489_v31, %v11489_v31  ;;  %v11552_v39 = vmul.f32 %v11488_v35, %v11488_v35  ;;  %v11555_v22 = vmul.f32 %v11491_v53, %v11491_v53  ;;  %v11495_v54 = vsub.f32 %v11431_v29, %v13596_v3  ;;  %9731 = vmatpush1.bf16.msra.mxu1 %v15676_v46  ;;  %v11426_v61 = vld [vmem:[#allocation2 + $0x1f8] sm:$0xff]  ;;  %v15687_v44 = vld [vmem:[#allocation7 + $0x16f4] ss:$48 sps:$4 sm:$0xff]   ;;  %v11436_v46 = vld [vmem:[#allocation2 + $0x308] sm:$0xff] }
 0x2bc   :  { %v17224_v58 = vmul.f32 %v11493_v45, %v11493_v45  ;;  %v11556_v13 = vmul.f32 %v11492_v18, %v11492_v18  ;;  %v11497_v9 = vsub.f32 %v11433_v63, %v13628_v33  ;;  %v11496_v14 = vsub.f32 %v11432_v4, %v13597_v19  ;;  %9687 = vmatprep.mubr.bf16.mxu1 %v16853_v42  ;;  %v15685_v29 = vld [vmem:[#allocation7 + $0x16f0] ss:$48 sps:$4 sm:$0xff]   ;;  %v15690_v53 = vld [vmem:[#allocation7 + $0x16fc] ss:$48 sps:$4 sm:$0xff]   ;;  %v15688_v1 = vld [vmem:[#allocation7 + $0x16f8] ss:$48 sps:$4 sm:$0xff]  }
 0x2bd   :  { %v17227_v32 = vmul.f32 %v11494_v62, %v11494_v62  ;;  %v11559_v31 = vmul.f32 %v11495_v54, %v11495_v54  ;;  %11613 = vadd.xlane.f32.xlu0 %v11612_v56  ;;  %9010 = vmatmul.mubr.bf16.gmra.mrb[56].mxu0 %v16859_v6  ;;  %v11616_v35 = vadd.f32 %v11615_v41, %v17203_v52  ;;  %v11439_v19 = vld [vmem:[#allocation2 + $0x360] sm:$0xff] }
 0x2be   :  { %v17231_v45 = vadd.f32 %v11556_v13, %v11555_v22  ;;  %v11560_v63 = vmul.f32 %v11496_v14, %v11496_v14  ;;  %v11498_v4 = vsub.f32 %v11434_v47, %v13629_v36  ;;  %9054 = vmatprep.subr.bf16.mxu0 %v15681_v20  ;;  %9688 = vmatmul.mubr.bf16.gmra.mrb[56].mxu1 %v16859_v6  ;;  %v7974_v3 = vpop.f32.mrb[16].mxu0  ;;  %v8652_v33 = vpop.f32.mrb[16].mxu1 }
 0x2bf   :  { %9732 = vmatprep.subr.bf16.mxu1 %v15684_v16  ;;  %9055 = vmatpush1.bf16.msra.mxu0 %v15679_v11  ;;  %v11617_v56 = vadd.f32 %v11616_v35, %v17205_v12  ;;  %v13598_v18 = vadd.f32 %v7974_v3, %v17148_v55  ;;  %v13630_v52 = vadd.f32 %v8652_v33, %v17152_v30  ;;  %v7976_v41 = vpop.f32.mrb[17].mxu0  ;;  %v8654_v62 = vpop.f32.mrb[17].mxu1  ;;  %v11438_v16 = vld [vmem:[#allocation2 + $0x318] sm:$0xff] }
 0x2c0   :  { %v17237_v22 = vadd.f32 %v11560_v63, %v11559_v31  ;;  %9733 = vmatpush1.bf16.msra.mxu1 %v15682_v24  ;;  %v11490_v20 = vsub.f32 %v11426_v61, %v17208_v60  ;;  %v11620_v36 = vadd.f32 %v11552_v39, %v17212_v27  ;;  %v13599_v47 = vadd.f32 %v7976_v41, %v17156_v21  ;;  %v7978_v54 = vpop.f32.mrb[18].mxu0  ;;  %v8656_v11 = vpop.f32.mrb[18].mxu1  ;;  %v11441_v27 = vld [vmem:[#allocation2 + $0x370] sm:$0xff]  ;;  %v11440_v39 = vld [vmem:[#allocation2 + $0x368] sm:$0xff]  ;;  %v11442_v61 = vld [vmem:[#allocation2 + $0x378] sm:$0xff] }
 0x2c1   :  { %11618 = vadd.xlane.f32.xlu0 %v11617_v56  ;;  %v11499_v12 = vsub.f32 %v11435_v38, %v13598_v18  ;;  %v11501_v13 = vsub.f32 %v11437_v49, %v13630_v52  ;;  %v13631_v14 = vadd.f32 %v8654_v62, %v17160_v48  ;;  %9056 = vmatprep.subr.bf16.mxu0 %v15687_v44  ;;  %v7980_v35 = vpop.f32.mrb[19].mxu0  ;;  %v8658_v3 = vpop.f32.mrb[19].mxu1  ;;  %v15691_v49 = vld [vmem:[#allocation7 + $0x1750] ss:$48 sps:$4 sm:$0xff]   ;;  %v15693_v56 = vld [vmem:[#allocation7 + $0x1754] ss:$48 sps:$4 sm:$0xff]  }
 0x2c2   :  { %v11554_v31 = vmul.f32 %v11490_v20, %v11490_v20  ;;  %v11621_v63 = vadd.f32 %v11620_v36, %v11553_v5  ;;  %v11500_v24 = vsub.f32 %v11436_v46, %v13599_v47  ;;  %9734 = vmatprep.subr.bf16.mxu1 %v15690_v53  ;;  %v13600_v60 = vadd.f32 %v7978_v54, %v17148_v55  ;;  %v15694_v46 = vld [vmem:[#allocation7 + $0x1758] ss:$48 sps:$4 sm:$0xff]   ;;  %v15696_v53 = vld [vmem:[#allocation7 + $0x175c] ss:$48 sps:$4 sm:$0xff]   ;;  %v15699_v62 = vld [vmem:[#allocation7 + $0x17b4] ss:$48 sps:$4 sm:$0xff]  }
 0x2c3   :  { %v11561_v33 = vmul.f32 %v11497_v9, %v11497_v9  ;;  %v11562_v41 = vmul.f32 %v11498_v4, %v11498_v4  ;;  %v11563_v6 = vmul.f32 %v11499_v12, %v11499_v12  ;;  %v13632_v38 = vadd.f32 %v8656_v11, %v17152_v30  ;;  %9057 = vmatpush1.bf16.msra.mxu0 %v15685_v29  ;;  %v18223_v4 = vld [vmem:[#allocation47_spill] sm:$0xff]  ;;  %v11443_v29 = vld [vmem:[#allocation2 + $0x3c0] sm:$0xff]  ;;  %v18224_v12 = vld [vmem:[#allocation48_spill] sm:$0xff] }
 0x2c4   :  { %v11622_v44 = vadd.f32 %v11621_v63, %v11554_v31  ;;  %v11564_v18 = vmul.f32 %v11500_v24, %v11500_v24  ;;  %v11503_v52 = vsub.f32 %v11439_v19, %v13600_v60  ;;  %9735 = vmatpush1.bf16.msra.mxu1 %v15688_v1  ;;  %v13601_v5 = vadd.f32 %v7980_v35, %v17156_v21  ;;  %v11445_v47 = vld [vmem:[#allocation2 + $0x3d0] sm:$0xff]  ;;  %v15702_v54 = vld [vmem:[#allocation7 + $0x17bc] ss:$48 sps:$4 sm:$0xff]  }
 0x2c5   :  { %v17246_v20 = vmul.f32 %v11501_v13, %v11501_v13  ;;  %v11502_v36 = vsub.f32 %v11438_v16, %v13631_v14  ;;  %v13633_v9 = vadd.f32 %v8658_v3, %v17160_v48  ;;  %9019 = vmatprep.mubr.bf16.mxu0 %v18223_v4  ;;  %9697 = vmatprep.mubr.bf16.mxu1 %v18223_v4  ;;  %v11444_v31 = vld [vmem:[#allocation2 + $0x3c8] sm:$0xff]  ;;  %v15697_v16 = vld [vmem:[#allocation7 + $0x17b0] ss:$48 sps:$4 sm:$0xff]  }
 0x2c6   :  { %11623 = vadd.xlane.f32.xlu1 %v11622_v44  ;;  %v17251_v19 = vadd.f32 %v11564_v18, %v11563_v6  ;;  %v11567_v1 = vmul.f32 %v11503_v52, %v11503_v52  ;;  %v11504_v11 = vsub.f32 %v11440_v39, %v13601_v5  ;;  %9020 = vmatmul.mubr.bf16.gmra.mrb[60].mxu0 %v18224_v12  ;;  %v7984_v35 = vpop.f32.mrb[20].mxu0  ;;  %v8662_v13 = vpop.f32.mrb[20].mxu1  ;;  %v15700_v6 = vld [vmem:[#allocation7 + $0x17b8] ss:$48 sps:$4 sm:$0xff]  }
 0x2c7   :  { %v11505_v14 = vsub.f32 %v11441_v27, %v13632_v38  ;;  %v11506_v3 = vsub.f32 %v11442_v61, %v13633_v9  ;;  %9058 = vmatprep.subr.bf16.mxu0 %v15693_v56  ;;  %9698 = vmatmul.mubr.bf16.gmra.mrb[60].mxu1 %v18224_v12  ;;  %v11626_v63 = vadd.f32 %v17231_v45, %v17224_v58  ;;  %v7986_v24 = vpop.f32.mrb[21].mxu0  ;;  %v8664_v60 = vpop.f32.mrb[21].mxu1  ;;  %v11446_v45 = vld [vmem:[#allocation2 + $0x3d8] sm:$0xff] }
 0x2c8   :  { %v11568_v44 = vmul.f32 %v11504_v11, %v11504_v11  ;;  %9736 = vmatprep.subr.bf16.mxu1 %v15696_v53  ;;  %9059 = vmatpush1.bf16.msra.mxu0 %v15691_v49  ;;  %v13602_v39 = vadd.f32 %v7984_v35, %v17148_v55  ;;  %v13634_v18 = vadd.f32 %v8662_v13, %v17152_v30  ;;  %v7988_v52 = vpop.f32.mrb[22].mxu0  ;;  %v8666_v5 = vpop.f32.mrb[22].mxu1  ;;  %v11447_v13 = vld [vmem:[#allocation2 + $0x420] sm:$0xff] }
 0x2c9   :  { %v17259_v27 = vmul.f32 %v11502_v36, %v11502_v36  ;;  %9737 = vmatpush1.bf16.msra.mxu1 %v15694_v46  ;;  %v11627_v61 = vadd.f32 %v11626_v63, %v17227_v32  ;;  %v11631_v38 = vadd.f32 %v17237_v22, %v11561_v33  ;;  %v13603_v58 = vadd.f32 %v7986_v24, %v17156_v21  ;;  %v7990_v56 = vpop.f32.mrb[23].mxu0  ;;  %v8668_v9 = vpop.f32.mrb[23].mxu1  ;;  %v11448_v36 = vld [vmem:[#allocation2 + $0x428] sm:$0xff]  ;;  %v11449_v22 = vld [vmem:[#allocation2 + $0x430] sm:$0xff]  ;;  %v11450_v33 = vld [vmem:[#allocation2 + $0x438] sm:$0xff] }
 0x2ca   :  { %v17264_v53 = vadd.f32 %v11568_v44, %v11567_v1  ;;  %v11507_v49 = vsub.f32 %v11443_v29, %v13602_v39  ;;  %v11509_v11 = vsub.f32 %v11445_v47, %v13634_v18  ;;  %v13635_v35 = vadd.f32 %v8664_v60, %v17160_v48  ;;  %9060 = vmatprep.subr.bf16.mxu0 %v15699_v62  ;;  %v15703_v63 = vld [vmem:[#allocation7 + $0x1810] ss:$48 sps:$4 sm:$0xff]   ;;  %v15705_v24 = vld [vmem:[#allocation7 + $0x1814] ss:$48 sps:$4 sm:$0xff]   ;;  %v15706_v47 = vld [vmem:[#allocation7 + $0x1818] ss:$48 sps:$4 sm:$0xff]  }
 0x2cb   :  { %11628 = vadd.xlane.f32.xlu0 %v11627_v61  ;;  %v11632_v46 = vadd.f32 %v11631_v38, %v11562_v41  ;;  %v11508_v12 = vsub.f32 %v11444_v31, %v13603_v58  ;;  %9738 = vmatprep.subr.bf16.mxu1 %v15702_v54  ;;  %v13604_v32 = vadd.f32 %v7988_v52, %v17148_v55  ;;  %v15708_v62 = vld [vmem:[#allocation7 + $0x181c] ss:$48 sps:$4 sm:$0xff]   ;;  %v15711_v60 = vld [vmem:[#allocation7 + $0x1874] ss:$48 sps:$4 sm:$0xff]  }
 0x2cc   :  { %v11569_v4 = vmul.f32 %v11505_v14, %v11505_v14  ;;  %v11570_v1 = vmul.f32 %v11506_v3, %v11506_v3  ;;  %v11571_v44 = vmul.f32 %v11507_v49, %v11507_v49  ;;  %v13636_v29 = vadd.f32 %v8666_v5, %v17152_v30  ;;  %9061 = vmatpush1.bf16.msra.mxu0 %v15697_v16  ;;  %v15714_v31 = vld [vmem:[#allocation7 + $0x187c] ss:$48 sps:$4 sm:$0xff]   ;;  %v11451_v5 = vld [vmem:[#allocation2 + $0x480] sm:$0xff]  ;;  %v11453_v38 = vld [vmem:[#allocation2 + $0x490] sm:$0xff] }
 0x2cd   :  { %11633 = vadd.xlane.f32.xlu1 %v11632_v46  ;;  %v11572_v39 = vmul.f32 %v11508_v12, %v11508_v12  ;;  %v11511_v41 = vsub.f32 %v11447_v13, %v13604_v32  ;;  %9739 = vmatpush1.bf16.msra.mxu1 %v15700_v6  ;;  %v13605_v54 = vadd.f32 %v7990_v56, %v17156_v21  ;;  %v18225_v3 = vld [vmem:[#allocation49_spill] sm:$0xff]  ;;  %v18226_v49 = vld [vmem:[#allocation50_spill] sm:$0xff] }
 0x2ce   :  { %v17270_v18 = vmul.f32 %v11509_v11, %v11509_v11  ;;  %v11510_v52 = vsub.f32 %v11446_v45, %v13635_v35  ;;  %v13637_v14 = vadd.f32 %v8668_v9, %v17160_v48  ;;  %9062 = vmatprep.mubr.bf16.mxu0 %v18225_v3  ;;  %9740 = vmatprep.mubr.bf16.mxu1 %v18225_v3  ;;  %v7994_v16 = vpop.f32.mrb[24].mxu0  ;;  %v8672_v61 = vpop.f32.mrb[24].mxu1  ;;  %v11452_v11 = vld [vmem:[#allocation2 + $0x488] sm:$0xff]  ;;  %v15709_v35 = vld [vmem:[#allocation7 + $0x1870] ss:$48 sps:$4 sm:$0xff]  }
 0x2cf   :  { %v17275_v58 = vadd.f32 %v11572_v39, %v11571_v44  ;;  %v11575_v12 = vmul.f32 %v11511_v41, %v11511_v41  ;;  %v11512_v6 = vsub.f32 %v11448_v36, %v13605_v54  ;;  %9063 = vmatmul.mubr.bf16.vlgmr.msra.gmra.mrb[32].mxu0 %v18226_v49  ;;  %9143 = vmatprep.subr.bf16.mxu0 %v15705_v24  ;;  %v7996_v56 = vpop.f32.mrb[25].mxu0  ;;  %v8674_v45 = vpop.f32.mrb[25].mxu1  ;;  %v15712_v9 = vld [vmem:[#allocation7 + $0x1878] ss:$48 sps:$4 sm:$0xff]  }
 0x2d0   :  { %v11513_v13 = vsub.f32 %v11449_v22, %v13636_v29  ;;  %v11514_v46 = vsub.f32 %v11450_v33, %v13637_v14  ;;  %9741 = vmatmul.mubr.bf16.vlgmr.msra.gmra.mrb[32].mxu1 %v18226_v49  ;;  %9821 = vmatprep.subr.bf16.mxu1 %v15708_v62  ;;  %v11636_v32 = vadd.f32 %v17251_v19, %v17246_v20  ;;  %v7998_v44 = vpop.f32.mrb[26].mxu0  ;;  %v8676_v39 = vpop.f32.mrb[26].mxu1  ;;  %v11454_v62 = vld [vmem:[#allocation2 + $0x498] sm:$0xff] }
 0x2d1   :  { %v11576_v41 = vmul.f32 %v11512_v6, %v11512_v6  ;;  %9144 = vmatpush1.bf16.msra.mxu0 %v15703_v63  ;;  %9822 = vmatpush1.bf16.msra.mxu1 %v15706_v47  ;;  %v13606_v36 = vadd.f32 %v7994_v16, %v17148_v55  ;;  %v13638_v24 = vadd.f32 %v8672_v61, %v17152_v30  ;;  %v8000_v54 = vpop.f32.mrb[27].mxu0  ;;  %v8678_v3 = vpop.f32.mrb[27].mxu1  ;;  %v11455_v47 = vld [vmem:[#allocation2 + $0x4e0] sm:$0xff]  ;;  %v11457_v16 = vld [vmem:[#allocation2 + $0x4f0] sm:$0xff]  ;;  %v11456_v61 = vld [vmem:[#allocation2 + $0x4e8] sm:$0xff] }
 0x2d2   :  { %v11574_v42 = vmul.f32 %v11510_v52, %v11510_v52  ;;  %v11637_v22 = vadd.f32 %v11636_v32, %v17259_v27  ;;  %v11641_v33 = vadd.f32 %v17264_v53, %v11569_v4  ;;  %v13607_v29 = vadd.f32 %v7996_v56, %v17156_v21  ;;  %9145 = vmatprep.subr.bf16.mxu0 %v15711_v60  ;;  %v11458_v53 = vld [vmem:[#allocation2 + $0x4f8] sm:$0xff]  ;;  %v15715_v56 = vld [vmem:[#allocation7 + $0x18d0] ss:$48 sps:$4 sm:$0xff]   ;;  %v15717_v32 = vld [vmem:[#allocation7 + $0x18d4] ss:$48 sps:$4 sm:$0xff]  }
 0x2d3   :  { %v11650_v20 = vadd.f32 %v11576_v41, %v11575_v12  ;;  %v11515_v19 = vsub.f32 %v11451_v5, %v13606_v36  ;;  %v11517_v14 = vsub.f32 %v11453_v38, %v13638_v24  ;;  %v13639_v63 = vadd.f32 %v8674_v45, %v17160_v48  ;;  %9823 = vmatprep.subr.bf16.mxu1 %v15714_v31  ;;  %v15718_v38 = vld [vmem:[#allocation7 + $0x18d8] ss:$48 sps:$4 sm:$0xff]   ;;  %v15720_v31 = vld [vmem:[#allocation7 + $0x18dc] ss:$48 sps:$4 sm:$0xff]   ;;  %v11459_v36 = vld [vmem:[#allocation2 + $0x540] sm:$0xff] }
 0x2d4   :  { %11638 = vadd.xlane.f32.xlu0 %v11637_v22  ;;  %v11642_v6 = vadd.f32 %v11641_v33, %v11570_v1  ;;  %v11516_v52 = vsub.f32 %v11452_v11, %v13607_v29  ;;  %v13608_v27 = vadd.f32 %v7998_v44, %v17148_v55  ;;  %v13640_v4 = vadd.f32 %v8676_v39, %v17152_v30  ;;  %v15723_v24 = vld [vmem:[#allocation7 + $0x1934] ss:$48 sps:$4 sm:$0xff]  }
 0x2d5   :  { %v11577_v60 = vmul.f32 %v11513_v13, %v11513_v13  ;;  %v11578_v12 = vmul.f32 %v11514_v46, %v11514_v46  ;;  %v11579_v5 = vmul.f32 %v11515_v19, %v11515_v19  ;;  %9146 = vmatpush1.bf16.msra.mxu0 %v15709_v35  ;;  %9824 = vmatpush1.bf16.msra.mxu1 %v15712_v9  ;;  %v18227_v46 = vld [vmem:[#allocation51_spill] sm:$0xff] }
 0x2d6   :  { %v17289_v45 = vmul.f32 %v11517_v14, %v11517_v14  ;;  %11643 = vadd.xlane.f32.xlu1 %v11642_v6  ;;  %v11580_v41 = vmul.f32 %v11516_v52, %v11516_v52  ;;  %v11519_v1 = vsub.f32 %v11455_v47, %v13608_v27  ;;  %v13609_v11 = vadd.f32 %v8000_v54, %v17156_v21  ;;  %v8004_v44 = vpop.f32.mrb[28].mxu0  ;;  %v8682_v39 = vpop.f32.mrb[28].mxu1  ;;  %v11461_v9 = vld [vmem:[#allocation2 + $0x550] sm:$0xff]  ;;  %v15726_v19 = vld [vmem:[#allocation7 + $0x193c] ss:$48 sps:$4 sm:$0xff]  }
 0x2d7   :  { %v11518_v22 = vsub.f32 %v11454_v62, %v13639_v63  ;;  %v13641_v13 = vadd.f32 %v8678_v3, %v17160_v48  ;;  %9072 = vmatprep.mubr.bf16.mxu0 %v18227_v46  ;;  %9750 = vmatprep.mubr.bf16.mxu1 %v18227_v46  ;;  %v11646_v35 = vadd.f32 %v17275_v58, %v17270_v18  ;;  %v8006_v33 = vpop.f32.mrb[29].mxu0  ;;  %v8684_v29 = vpop.f32.mrb[29].mxu1  ;;  %v18228_v52 = vld [vmem:[#allocation52_spill] sm:$0xff]  ;;  %v11460_v62 = vld [vmem:[#allocation2 + $0x548] sm:$0xff]  ;;  %v15721_v63 = vld [vmem:[#allocation7 + $0x1930] ss:$48 sps:$4 sm:$0xff]  }
 0x2d8   :  { %v11655_v14 = vadd.f32 %v11580_v41, %v11579_v5  ;;  %v11583_v54 = vmul.f32 %v11519_v1, %v11519_v1  ;;  %v11521_v47 = vsub.f32 %v11457_v16, %v13640_v4  ;;  %v11520_v6 = vsub.f32 %v11456_v61, %v13609_v11  ;;  %9073 = vmatmul.mubr.bf16.gmra.mrb[36].mxu0 %v18228_v52  ;;  %v8008_v3 = vpop.f32.mrb[30].mxu0  ;;  %v8686_v27 = vpop.f32.mrb[30].mxu1  ;;  %v15724_v41 = vld [vmem:[#allocation7 + $0x1938] ss:$48 sps:$4 sm:$0xff]   ;;  %v11463_v1 = vld [vmem:[#allocation2 + $0x5a0] sm:$0xff] }
 0x2d9   :  { %v11522_v49 = vsub.f32 %v11458_v53, %v13641_v13  ;;  %9147 = vmatprep.subr.bf16.mxu0 %v15717_v32  ;;  %9751 = vmatmul.mubr.bf16.gmra.mrb[36].mxu1 %v18228_v52  ;;  %v11647_v46 = vadd.f32 %v11646_v35, %v11574_v42  ;;  %v13610_v18 = vadd.f32 %v8004_v44, %v17148_v55  ;;  %v8010_v58 = vpop.f32.mrb[31].mxu0  ;;  %v8688_v26 = vpop.f32.mrb[31].mxu1  ;;  %v11462_v32 = vld [vmem:[#allocation2 + $0x558] sm:$0xff] }
 0x2da   :  { %v11584_v40 = vmul.f32 %v11520_v6, %v11520_v6  ;;  %9825 = vmatprep.subr.bf16.mxu1 %v15720_v31  ;;  %9148 = vmatpush1.bf16.msra.mxu0 %v15715_v56  ;;  %v13642_v16 = vadd.f32 %v8682_v39, %v17152_v30  ;;  %v11651_v61 = vadd.f32 %v11650_v20, %v11577_v60  ;;  %v11465_v31 = vld [vmem:[#allocation2 + $0x5b0] sm:$0xff]  ;;  %v11464_v56 = vld [vmem:[#allocation2 + $0x5a8] sm:$0xff]  ;;  %v11466_v35 = vld [vmem:[#allocation2 + $0x5b8] sm:$0xff] }
 0x2db   :  { %v11582_v4 = vmul.f32 %v11518_v22, %v11518_v22  ;;  %9826 = vmatpush1.bf16.msra.mxu1 %v15718_v38  ;;  %11648 = vadd.xlane.f32.xlu0 %v11647_v46  ;;  %v11523_v5 = vsub.f32 %v11459_v36, %v13610_v18  ;;  %v13611_v53 = vadd.f32 %v8006_v33, %v17156_v21  ;;  %v15727_v36 = vld [vmem:[#allocation7 + $0x1990] ss:$48 sps:$4 sm:$0xff]   ;;  %v15729_v22 = vld [vmem:[#allocation7 + $0x1994] ss:$48 sps:$4 sm:$0xff]   ;;  %v15732_v46 = vld [vmem:[#allocation7 + $0x199c] ss:$48 sps:$4 sm:$0xff]  }
 0x2dc   :  { %v11660_v42 = vadd.f32 %v11584_v40, %v11583_v54  ;;  %v11525_v11 = vsub.f32 %v11461_v9, %v13642_v16  ;;  %v11652_v44 = vadd.f32 %v11651_v61, %v11578_v12  ;;  %v13643_v13 = vadd.f32 %v8684_v29, %v17160_v48  ;;  %9149 = vmatprep.subr.bf16.mxu0 %v15723_v24  ;;  %v15730_v24 = vld [vmem:[#allocation7 + $0x1998] ss:$48 sps:$4 sm:$0xff]   ;;  %v15735_v6 = vld [vmem:[#allocation7 + $0x19f4] ss:$48 sps:$4 sm:$0xff]   ;;  %v15733_v61 = vld [vmem:[#allocation7 + $0x19f0] ss:$48 sps:$4 sm:$0xff]  }
 0x2dd   :  { %v11587_v39 = vmul.f32 %v11523_v5, %v11523_v5  ;;  %v11524_v20 = vsub.f32 %v11460_v62, %v13611_v53  ;;  %9827 = vmatprep.subr.bf16.mxu1 %v15726_v19  ;;  %v13612_v60 = vadd.f32 %v8008_v3, %v17148_v55  ;;  %v13644_v38 = vadd.f32 %v8686_v27, %v17152_v30  ;;  %v15738_v55 = vld [vmem:[#allocation7 + $0x19fc] ss:$48 sps:$4 sm:$0xff]  }
 0x2de   :  { %v11585_v33 = vmul.f32 %v11521_v47, %v11521_v47  ;;  %v11586_v40 = vmul.f32 %v11522_v49, %v11522_v49  ;;  %11653 = vadd.xlane.f32.xlu1 %v11652_v44  ;;  %9150 = vmatpush1.bf16.msra.mxu0 %v15721_v63  ;;  %v13613_v12 = vadd.f32 %v8010_v58, %v17156_v21  ;;  %v18229_v3 = vld [vmem:[#allocation53_spill] sm:$0xff]  ;;  %v18230_v18 = vld [vmem:[#allocation54_spill] sm:$0xff] }
 0x2df   :  { %v11588_v9 = vmul.f32 %v11524_v20, %v11524_v20  ;;  %v11526_v29 = vsub.f32 %v11462_v32, %v13643_v13  ;;  %v11527_v54 = vsub.f32 %v11463_v1, %v13612_v60  ;;  %9828 = vmatpush1.bf16.msra.mxu1 %v15724_v41  ;;  %v13645_v19 = vadd.f32 %v8688_v26, %v17160_v48  ;;  %v15741_v41 = vld [vmem:[#allocation7 + $0x1a54] ss:$48 sps:$4 sm:$0xff]   ;;  %v15739_v1 = vld [vmem:[#allocation7 + $0x1a50] ss:$48 sps:$4 sm:$0xff]  }
 0x2e0   :  { %v11529_v62 = vsub.f32 %v11465_v31, %v13644_v38  ;;  %v11528_v30 = vsub.f32 %v11464_v56, %v13613_v12  ;;  %9082 = vmatprep.mubr.bf16.mxu0 %v18229_v3  ;;  %9760 = vmatprep.mubr.bf16.mxu1 %v18229_v3  ;;  %v11656_v49 = vadd.f32 %v11655_v14, %v17289_v45  ;;  %v15736_v14 = vld [vmem:[#allocation7 + $0x19f8] ss:$48 sps:$4 sm:$0xff]   ;;  %v15747_v56 = vld [vmem:[#allocation7 + $0x1ab4] ss:$48 sps:$4 sm:$0xff]   ;;  %v15745_v60 = vld [vmem:[#allocation7 + $0x1ab0] ss:$48 sps:$4 sm:$0xff]  }
 0x2e1   :  { %v11589_v47 = vmul.f32 %v11525_v11, %v11525_v11  ;;  %v11665_v63 = vadd.f32 %v11588_v9, %v11587_v39  ;;  %v11591_v21 = vmul.f32 %v11527_v54, %v11527_v54  ;;  %v11530_v27 = vsub.f32 %v11466_v35, %v13645_v19  ;;  %9083 = vmatmul.mubr.bf16.gmra.mrb[40].mxu0 %v18230_v18  ;;  %v15744_v11 = vld [vmem:[#allocation7 + $0x1a5c] ss:$48 sps:$4 sm:$0xff]   ;;  %v15748_v38 = vld [vmem:[#allocation7 + $0x1ab8] ss:$48 sps:$4 sm:$0xff]   ;;  %v15759_v12 = vld [vmem:[#allocation7 + $0x1b74] ss:$48 sps:$4 sm:$0xff]  }
 0x2e2   :  { %v11592_v58 = vmul.f32 %v11528_v30, %v11528_v30  ;;  %9151 = vmatprep.subr.bf16.mxu0 %v15729_v22  ;;  %9761 = vmatmul.mubr.bf16.gmra.mrb[40].mxu1 %v18230_v18  ;;  %v11657_v26 = vadd.f32 %v11656_v49, %v11582_v4  ;;  %v11661_v48 = vadd.f32 %v11660_v42, %v11585_v33  ;;  %v18231_v4 = vld [vmem:[#allocation55_spill] sm:$0xff]  ;;  %v15742_v42 = vld [vmem:[#allocation7 + $0x1a58] ss:$48 sps:$4 sm:$0xff]   ;;  %v18233_v22 = vld [vmem:[#allocation57_spill] sm:$0xff] }
 0x2e3   :  { %v11590_v16 = vmul.f32 %v11526_v29, %v11526_v29  ;;  %9829 = vmatprep.subr.bf16.mxu1 %v15732_v46  ;;  %9152 = vmatpush1.bf16.msra.mxu0 %v15727_v36  ;;  %v11666_v5 = vadd.f32 %v11665_v63, %v11589_v47  ;;  %v11593_v53 = vmul.f32 %v11529_v62, %v11529_v62  ;;  %v15750_v35 = vld [vmem:[#allocation7 + $0x1abc] ss:$48 sps:$4 sm:$0xff]   ;;  %v15753_v36 = vld [vmem:[#allocation7 + $0x1b14] ss:$48 sps:$4 sm:$0xff]   ;;  %v15751_v46 = vld [vmem:[#allocation7 + $0x1b10] ss:$48 sps:$4 sm:$0xff]  }
 0x2e4   :  { %v11670_v32 = vadd.f32 %v11592_v58, %v11591_v21  ;;  %9830 = vmatpush1.bf16.msra.mxu1 %v15730_v24  ;;  %11658 = vadd.xlane.f32.xlu0 %v11657_v26  ;;  %v11662_v45 = vadd.f32 %v11661_v48, %v11586_v40  ;;  %v11594_v13 = vmul.f32 %v11530_v27, %v11530_v27  ;;  %v18232_v20 = vld [vmem:[#allocation56_spill] sm:$0xff]  ;;  %v18234_v9 = vld [vmem:[#allocation58_spill] sm:$0xff]  ;;  %v18235_v29 = vld [vmem:[#allocation59_spill] sm:$0xff] }
 0x2e5   :  { %9153 = vmatprep.subr.bf16.mxu0 %v15735_v6  ;;  %9831 = vmatprep.subr.bf16.mxu1 %v15738_v55  ;;  %v11667_v44 = vadd.f32 %v11666_v5, %v11590_v16  ;;  %v15756_v33 = vld [vmem:[#allocation7 + $0x1b1c] ss:$48 sps:$4 sm:$0xff]   ;;  %v15754_v40 = vld [vmem:[#allocation7 + $0x1b18] ss:$48 sps:$4 sm:$0xff]   ;;  %v15757_v54 = vld [vmem:[#allocation7 + $0x1b70] ss:$48 sps:$4 sm:$0xff]  }
 0x2e6   :  { %11663 = vadd.xlane.f32.xlu1 %v11662_v45  ;;  %9092 = vmatprep.mubr.bf16.mxu0 %v18231_v4  ;;  %v11671_v31 = vadd.f32 %v11670_v32, %v11593_v53  ;;  %v15762_v24 = vld [vmem:[#allocation7 + $0x1b7c] ss:$48 sps:$4 sm:$0xff]   ;;  %v15760_v19 = vld [vmem:[#allocation7 + $0x1b78] ss:$48 sps:$4 sm:$0xff]   ;;  %v15765_v6 = vld [vmem:[#allocation7 + $0x1bd4] ss:$48 sps:$4 sm:$0xff]  }
 0x2e7   :  { %9154 = vmatpush1.bf16.msra.mxu0 %v15733_v61  ;;  %9770 = vmatprep.mubr.bf16.mxu1 %v18231_v4  ;;  %v15763_v55 = vld [vmem:[#allocation7 + $0x1bd0] ss:$48 sps:$4 sm:$0xff]   ;;  %v15768_v62 = vld [vmem:[#allocation7 + $0x1bdc] ss:$48 sps:$4 sm:$0xff]   ;;  %v15766_v30 = vld [vmem:[#allocation7 + $0x1bd8] ss:$48 sps:$4 sm:$0xff]  }
 0x2e8   :  { %9832 = vmatpush1.bf16.msra.mxu1 %v15736_v14  ;;  %9155 = vmatprep.subr.bf16.mxu0 %v15741_v41  ;;  %v11672_v39 = vadd.f32 %v11671_v31, %v11594_v13  ;;  %v15771_v49 = vld [vmem:[#allocation7 + $0x1c34] ss:$48 sps:$4 sm:$0xff]   ;;  %v15774_v47 = vld [vmem:[#allocation7 + $0x1c3c] ss:$48 sps:$4 sm:$0xff]   ;;  %v15769_v27 = vld [vmem:[#allocation7 + $0x1c30] ss:$48 sps:$4 sm:$0xff]  }
 0x2e9   :  { %9093 = vmatmul.mubr.bf16.gmra.mrb[44].mxu0 %v18232_v20  ;;  %9833 = vmatprep.subr.bf16.mxu1 %v15744_v11  ;;  %v18236_v63 = vld [vmem:[#allocation60_spill] sm:$0xff]  ;;  %v18237_v21 = vld [vmem:[#allocation61_spill] sm:$0xff]  ;;  %v18238_v32 = vld [vmem:[#allocation62_spill] sm:$0xff] }
 0x2ea   :  { %9771 = vmatmul.mubr.bf16.gmra.mrb[44].mxu1 %v18232_v20  ;;  %11668 = vadd.xlane.f32.xlu0 %v11667_v44  ;;  %v15772_v58 = vld [vmem:[#allocation7 + $0x1c38] ss:$48 sps:$4 sm:$0xff]   ;;  %v15777_v26 = vld [vmem:[#allocation7 + $0x1c94] ss:$48 sps:$4 sm:$0xff]   ;;  %v15775_v48 = vld [vmem:[#allocation7 + $0x1c90] ss:$48 sps:$4 sm:$0xff]  }
 0x2eb   :  { %9156 = vmatpush1.bf16.msra.mxu0 %v15739_v1  ;;  %11673 = vadd.xlane.f32.xlu1 %v11672_v39  ;;  %v15780_v16 = vld [vmem:[#allocation7 + $0x1c9c] ss:$48 sps:$4 sm:$0xff]   ;;  %v15778_v61 = vld [vmem:[#allocation7 + $0x1c98] ss:$48 sps:$4 sm:$0xff]   ;;  %v15783_v5 = vld [vmem:[#allocation7 + $0x1cf4] ss:$48 sps:$4 sm:$0xff]  }
 0x2ec   :  { %9834 = vmatpush1.bf16.msra.mxu1 %v15742_v42  ;;  %9157 = vmatprep.subr.bf16.mxu0 %v15747_v56  ;;  %v15786_v53 = vld [vmem:[#allocation7 + $0x1cfc] ss:$48 sps:$4 sm:$0xff]   ;;  %v15781_v14 = vld [vmem:[#allocation7 + $0x1cf0] ss:$48 sps:$4 sm:$0xff]   ;;  %v15784_v41 = vld [vmem:[#allocation7 + $0x1cf8] ss:$48 sps:$4 sm:$0xff]  }
 0x2ed   :  { %9835 = vmatprep.subr.bf16.mxu1 %v15750_v35  ;;  %9102 = vmatprep.mubr.bf16.mxu0 %v18233_v22  ;;  %v18239_v45 = vld [vmem:[#allocation63_spill] sm:$0xff]  ;;  %v15790_v13 = vld [vmem:[#allocation7 + $0x1d58] ss:$48 sps:$4 sm:$0xff]   ;;  %v18241_v35 = vld [vmem:[#allocation65_spill] sm:$0xff] }
 0x2ee   :  { %9780 = vmatprep.mubr.bf16.mxu1 %v18233_v22  ;;  %v15789_v1 = vld [vmem:[#allocation7 + $0x1d54] ss:$48 sps:$4 sm:$0xff]   ;;  %v15787_v11 = vld [vmem:[#allocation7 + $0x1d50] ss:$48 sps:$4 sm:$0xff]   ;;  %v15792_v44 = vld [vmem:[#allocation7 + $0x1d5c] ss:$48 sps:$4 sm:$0xff]  }
 0x2ef   :  { %9158 = vmatpush1.bf16.msra.mxu0 %v15745_v60  ;;  %v15795_v42 = vld [vmem:[#allocation7 + $0x1db4] ss:$48 sps:$4 sm:$0xff]   ;;  %v15798_v31 = vld [vmem:[#allocation7 + $0x1dbc] ss:$48 sps:$4 sm:$0xff]   ;;  %v15793_v39 = vld [vmem:[#allocation7 + $0x1db0] ss:$48 sps:$4 sm:$0xff]  }
 0x2f0   :  { %9836 = vmatpush1.bf16.msra.mxu1 %v15748_v38  ;;  %9159 = vmatprep.subr.bf16.mxu0 %v15753_v36  ;;  %v18240_v56 = vld [vmem:[#allocation64_spill] sm:$0xff]  ;;  %v15799_v36 = vld [vmem:[#allocation7 + $0x1e10] ss:$48 sps:$4 sm:$0xff]  }
 0x2f1   :  { %9103 = vmatmul.mubr.bf16.gmra.mrb[48].mxu0 %v18234_v9  ;;  %9837 = vmatprep.subr.bf16.mxu1 %v15756_v33  ;;  %v15796_v60 = vld [vmem:[#allocation7 + $0x1db8] ss:$48 sps:$4 sm:$0xff]   ;;  %v15801_v38 = vld [vmem:[#allocation7 + $0x1e14] ss:$48 sps:$4 sm:$0xff]  }
 0x2f2   :  { %9781 = vmatmul.mubr.bf16.gmra.mrb[48].mxu1 %v18234_v9  ;;  %9112 = vmatprep.mubr.bf16.mxu0 %v18235_v29  ;;  %v15802_v33 = vld [vmem:[#allocation7 + $0x1e18] ss:$48 sps:$4 sm:$0xff]  }
 0x2f3   :  { %9160 = vmatpush1.bf16.msra.mxu0 %v15751_v46  ;;  %9790 = vmatprep.mubr.bf16.mxu1 %v18235_v29  ;;  %v15804_v46 = vld [vmem:[#allocation7 + $0x1e1c] ss:$48 sps:$4 sm:$0xff]  }
 0x2f4   :  { %9838 = vmatpush1.bf16.msra.mxu1 %v15754_v40  ;;  %9161 = vmatprep.subr.bf16.mxu0 %v15759_v12  ;;  %v15807_v40 = vld [vmem:[#allocation7 + $0x1e74] ss:$48 sps:$4 sm:$0xff]   ;;  %v15810_v12 = vld [vmem:[#allocation7 + $0x1e7c] ss:$48 sps:$4 sm:$0xff]  }
 0x2f5   :  { %9839 = vmatprep.subr.bf16.mxu1 %v15762_v24  ;;  %v18242_v24 = vld [vmem:[#allocation66_spill] sm:$0xff] }
 0x2f7   :  { %9162 = vmatpush1.bf16.msra.mxu0 %v15757_v54  ;;  %v15805_v54 = vld [vmem:[#allocation7 + $0x1e70] ss:$48 sps:$4 sm:$0xff]  }
 0x2f8   :  { %9840 = vmatpush1.bf16.msra.mxu1 %v15760_v19  ;;  %9163 = vmatprep.subr.bf16.mxu0 %v15765_v6  ;;  %v15808_v19 = vld [vmem:[#allocation7 + $0x1e78] ss:$48 sps:$4 sm:$0xff]   ;;  %v15813_v6 = vld [vmem:[#allocation7 + $0x1ed4] ss:$48 sps:$4 sm:$0xff]  }
 0x2f9   :  { %9113 = vmatmul.mubr.bf16.gmra.mrb[52].mxu0 %v18236_v63  ;;  %9841 = vmatprep.subr.bf16.mxu1 %v15768_v62  ;;  %v15811_v62 = vld [vmem:[#allocation7 + $0x1ed0] ss:$48 sps:$4 sm:$0xff]  }
 0x2fa   :  { %9791 = vmatmul.mubr.bf16.gmra.mrb[52].mxu1 %v18236_v63  ;;  %9122 = vmatprep.mubr.bf16.mxu0 %v18237_v21 }
 0x2fb   :  { %9164 = vmatpush1.bf16.msra.mxu0 %v15763_v55  ;;  %9800 = vmatprep.mubr.bf16.mxu1 %v18237_v21  ;;  %v18243_v55 = vld [vmem:[#allocation67_spill] sm:$0xff] }
 0x2fc   :  { %9842 = vmatpush1.bf16.msra.mxu1 %v15766_v30  ;;  %9165 = vmatprep.subr.bf16.mxu0 %v15771_v49  ;;  %v15816_v30 = vld [vmem:[#allocation7 + $0x1edc] ss:$48 sps:$4 sm:$0xff]   ;;  %v15814_v49 = vld [vmem:[#allocation7 + $0x1ed8] ss:$48 sps:$4 sm:$0xff]  }
 0x2fd   :  { %9843 = vmatprep.subr.bf16.mxu1 %v15774_v47  ;;  %v15819_v47 = vld [vmem:[#allocation7 + $0x1f34] ss:$48 sps:$4 sm:$0xff]  }
 0x2ff   :  { %9166 = vmatpush1.bf16.msra.mxu0 %v15769_v27  ;;  %v15822_v27 = vld [vmem:[#allocation7 + $0x1f3c] ss:$48 sps:$4 sm:$0xff]  }
 0x300   :  { %9844 = vmatpush1.bf16.msra.mxu1 %v15772_v58  ;;  %9167 = vmatprep.subr.bf16.mxu0 %v15777_v26  ;;  %v18244_v58 = vld [vmem:[#allocation68_spill] sm:$0xff]  ;;  %v15817_v26 = vld [vmem:[#allocation7 + $0x1f30] ss:$48 sps:$4 sm:$0xff]  }
 0x301   :  { %9123 = vmatmul.mubr.bf16.gmra.mrb[56].mxu0 %v18238_v32  ;;  %9845 = vmatprep.subr.bf16.mxu1 %v15780_v16  ;;  %v15825_v16 = vld [vmem:[#allocation7 + $0x1f94] ss:$48 sps:$4 sm:$0xff]  }
 0x302   :  { %9801 = vmatmul.mubr.bf16.gmra.mrb[56].mxu1 %v18238_v32  ;;  %9132 = vmatprep.mubr.bf16.mxu0 %v18239_v45 }
 0x303   :  { %9168 = vmatpush1.bf16.msra.mxu0 %v15775_v48  ;;  %9810 = vmatprep.mubr.bf16.mxu1 %v18239_v45  ;;  %v15820_v48 = vld [vmem:[#allocation7 + $0x1f38] ss:$48 sps:$4 sm:$0xff]  }
 0x304   :  { %9846 = vmatpush1.bf16.msra.mxu1 %v15778_v61  ;;  %9169 = vmatprep.subr.bf16.mxu0 %v15783_v5  ;;  %v18245_v61 = vld [vmem:[#allocation69_spill] sm:$0xff] }
 0x305   :  { %9847 = vmatprep.subr.bf16.mxu1 %v15786_v53  ;;  %v15823_v5 = vld [vmem:[#allocation7 + $0x1f90] ss:$48 sps:$4 sm:$0xff]   ;;  %v15828_v53 = vld [vmem:[#allocation7 + $0x1f9c] ss:$48 sps:$4 sm:$0xff]  }
 0x307   :  { %9170 = vmatpush1.bf16.msra.mxu0 %v15781_v14  ;;  %v15826_v14 = vld [vmem:[#allocation7 + $0x1f98] ss:$48 sps:$4 sm:$0xff]  }
 0x308   :  { %9848 = vmatpush1.bf16.msra.mxu1 %v15784_v41  ;;  %9171 = vmatprep.subr.bf16.mxu0 %v15789_v1  ;;  %v15831_v41 = vld [vmem:[#allocation7 + $0x1ff4] ss:$48 sps:$4 sm:$0xff]   ;;  %v15834_v1 = vld [vmem:[#allocation7 + $0x1ffc] ss:$48 sps:$4 sm:$0xff]  }
 0x309   :  { %9133 = vmatmul.mubr.bf16.gmra.mrb[60].mxu0 %v18240_v56  ;;  %9849 = vmatprep.subr.bf16.mxu1 %v15792_v44  ;;  %v15829_v44 = vld [vmem:[#allocation7 + $0x1ff0] ss:$48 sps:$4 sm:$0xff]  }
 0x30a   :  { %9811 = vmatmul.mubr.bf16.gmra.mrb[60].mxu1 %v18240_v56  ;;  %9175 = vmatprep.mubr.bf16.mxu0 %v18241_v35 }
 0x30b   :  { %9172 = vmatpush1.bf16.msra.mxu0 %v15787_v11  ;;  %9853 = vmatprep.mubr.bf16.mxu1 %v18241_v35  ;;  %v18246_v11 = vld [vmem:[#allocation70_spill] sm:$0xff] }
 0x30c   :  { %9850 = vmatpush1.bf16.msra.mxu1 %v15790_v13  ;;  %9173 = vmatprep.subr.bf16.mxu0 %v15795_v42  ;;  %v15832_v13 = vld [vmem:[#allocation7 + $0x1ff8] ss:$48 sps:$4 sm:$0xff]   ;;  %v15837_v42 = vld [vmem:[#allocation7 + $0x2054] ss:$48 sps:$4 sm:$0xff]  }
 0x30d   :  { %9851 = vmatprep.subr.bf16.mxu1 %v15798_v31  ;;  %v18247_v31 = vld [vmem:[#allocation71_spill] sm:$0xff] }
 0x30f   :  { %9174 = vmatpush1.bf16.msra.mxu0 %v15793_v39  ;;  %v15835_v39 = vld [vmem:[#allocation7 + $0x2050] ss:$48 sps:$4 sm:$0xff]  }
 0x310   :  { %9852 = vmatpush1.bf16.msra.mxu1 %v15796_v60  ;;  %9256 = vmatprep.subr.bf16.mxu0 %v15801_v38  ;;  %v15840_v60 = vld [vmem:[#allocation7 + $0x205c] ss:$48 sps:$4 sm:$0xff]   ;;  %v15838_v38 = vld [vmem:[#allocation7 + $0x2058] ss:$48 sps:$4 sm:$0xff]  }
 0x311   :  { %9934 = vmatprep.subr.bf16.mxu1 %v15804_v46  ;;  %v15846_v46 = vld [vmem:[#allocation7 + $0x20bc] ss:$48 sps:$4 sm:$0xff]  }
 0x312   :  { %9176 = vmatmul.mubr.bf16.vlgmr.msra.gmra.mrb[32].mxu0 %v18242_v24 }
 0x313   :  { %9854 = vmatmul.mubr.bf16.vlgmr.msra.gmra.mrb[32].mxu1 %v18242_v24  ;;  %9257 = vmatpush1.bf16.msra.mxu0 %v15799_v36  ;;  %v15843_v36 = vld [vmem:[#allocation7 + $0x20b4] ss:$48 sps:$4 sm:$0xff]  }
 0x314   :  { %9935 = vmatpush1.bf16.msra.mxu1 %v15802_v33  ;;  %9258 = vmatprep.subr.bf16.mxu0 %v15807_v40  ;;  %v18248_v33 = vld [vmem:[#allocation72_spill] sm:$0xff]  ;;  %v15841_v40 = vld [vmem:[#allocation7 + $0x20b0] ss:$48 sps:$4 sm:$0xff]  }
 0x315   :  { %9936 = vmatprep.subr.bf16.mxu1 %v15810_v12  ;;  %9185 = vmatprep.mubr.bf16.mxu0 %v18243_v55  ;;  %v15844_v12 = vld [vmem:[#allocation7 + $0x20b8] ss:$48 sps:$4 sm:$0xff]  }
 0x316   :  { %9863 = vmatprep.mubr.bf16.mxu1 %v18243_v55 }
 0x317   :  { %9259 = vmatpush1.bf16.msra.mxu0 %v15805_v54  ;;  %v15849_v54 = vld [vmem:[#allocation7 + $0x2114] ss:$48 sps:$4 sm:$0xff]  }
 0x318   :  { %9937 = vmatpush1.bf16.msra.mxu1 %v15808_v19  ;;  %9260 = vmatprep.subr.bf16.mxu0 %v15813_v6  ;;  %v18249_v19 = vld [vmem:[#allocation73_spill] sm:$0xff] }
 0x319   :  { %9938 = vmatprep.subr.bf16.mxu1 %v15816_v30  ;;  %v15847_v6 = vld [vmem:[#allocation7 + $0x2110] ss:$48 sps:$4 sm:$0xff]   ;;  %v15850_v30 = vld [vmem:[#allocation7 + $0x2118] ss:$48 sps:$4 sm:$0xff]  }
 0x31a   :  { %9186 = vmatmul.mubr.bf16.gmra.mrb[36].mxu0 %v18244_v58 }
 0x31b   :  { %9864 = vmatmul.mubr.bf16.gmra.mrb[36].mxu1 %v18244_v58  ;;  %9261 = vmatpush1.bf16.msra.mxu0 %v15811_v62  ;;  %v15852_v62 = vld [vmem:[#allocation7 + $0x211c] ss:$48 sps:$4 sm:$0xff]  }
 0x31c   :  { %9939 = vmatpush1.bf16.msra.mxu1 %v15814_v49  ;;  %9262 = vmatprep.subr.bf16.mxu0 %v15819_v47  ;;  %v15855_v49 = vld [vmem:[#allocation7 + $0x2174] ss:$48 sps:$4 sm:$0xff]   ;;  %v15858_v47 = vld [vmem:[#allocation7 + $0x217c] ss:$48 sps:$4 sm:$0xff]  }
 0x31d   :  { %9940 = vmatprep.subr.bf16.mxu1 %v15822_v27  ;;  %9195 = vmatprep.mubr.bf16.mxu0 %v18245_v61  ;;  %v18250_v27 = vld [vmem:[#allocation74_spill] sm:$0xff] }
 0x31e   :  { %9873 = vmatprep.mubr.bf16.mxu1 %v18245_v61 }
 0x31f   :  { %9263 = vmatpush1.bf16.msra.mxu0 %v15817_v26  ;;  %v15853_v26 = vld [vmem:[#allocation7 + $0x2170] ss:$48 sps:$4 sm:$0xff]  }
 0x320   :  { %9941 = vmatpush1.bf16.msra.mxu1 %v15820_v48  ;;  %9264 = vmatprep.subr.bf16.mxu0 %v15825_v16  ;;  %v15856_v48 = vld [vmem:[#allocation7 + $0x2178] ss:$48 sps:$4 sm:$0xff]   ;;  %v15861_v16 = vld [vmem:[#allocation7 + $0x21d4] ss:$48 sps:$4 sm:$0xff]  }
 0x321   :  { %9942 = vmatprep.subr.bf16.mxu1 %v15828_v53  ;;  %v15859_v53 = vld [vmem:[#allocation7 + $0x21d0] ss:$48 sps:$4 sm:$0xff]  }
 0x322   :  { %9196 = vmatmul.mubr.bf16.gmra.mrb[40].mxu0 %v18246_v11 }
 0x323   :  { %9874 = vmatmul.mubr.bf16.gmra.mrb[40].mxu1 %v18246_v11  ;;  %9265 = vmatpush1.bf16.msra.mxu0 %v15823_v5  ;;  %v18251_v5 = vld [vmem:[#allocation75_spill] sm:$0xff] }
 0x324   :  { %9943 = vmatpush1.bf16.msra.mxu1 %v15826_v14  ;;  %9266 = vmatprep.subr.bf16.mxu0 %v15831_v41  ;;  %v15864_v14 = vld [vmem:[#allocation7 + $0x21dc] ss:$48 sps:$4 sm:$0xff]   ;;  %v15862_v41 = vld [vmem:[#allocation7 + $0x21d8] ss:$48 sps:$4 sm:$0xff]  }
 0x325   :  { %9944 = vmatprep.subr.bf16.mxu1 %v15834_v1  ;;  %9205 = vmatprep.mubr.bf16.mxu0 %v18247_v31  ;;  %v15867_v1 = vld [vmem:[#allocation7 + $0x2234] ss:$48 sps:$4 sm:$0xff]  }
 0x326   :  { %9883 = vmatprep.mubr.bf16.mxu1 %v18247_v31 }
 0x327   :  { %9267 = vmatpush1.bf16.msra.mxu0 %v15829_v44  ;;  %v15870_v44 = vld [vmem:[#allocation7 + $0x223c] ss:$48 sps:$4 sm:$0xff]  }
 0x328   :  { %9945 = vmatpush1.bf16.msra.mxu1 %v15832_v13  ;;  %9268 = vmatprep.subr.bf16.mxu0 %v15837_v42  ;;  %v18252_v13 = vld [vmem:[#allocation76_spill] sm:$0xff]  ;;  %v15865_v42 = vld [vmem:[#allocation7 + $0x2230] ss:$48 sps:$4 sm:$0xff]  }
 0x329   :  { %9946 = vmatprep.subr.bf16.mxu1 %v15840_v60  ;;  %v15873_v60 = vld [vmem:[#allocation7 + $0x2294] ss:$48 sps:$4 sm:$0xff]  }
 0x32a   :  { %9206 = vmatmul.mubr.bf16.gmra.mrb[44].mxu0 %v18248_v33 }
 0x32b   :  { %9884 = vmatmul.mubr.bf16.gmra.mrb[44].mxu1 %v18248_v33  ;;  %9269 = vmatpush1.bf16.msra.mxu0 %v15835_v39  ;;  %v15868_v39 = vld [vmem:[#allocation7 + $0x2238] ss:$48 sps:$4 sm:$0xff]  }
 0x32c   :  { %9947 = vmatpush1.bf16.msra.mxu1 %v15838_v38  ;;  %9270 = vmatprep.subr.bf16.mxu0 %v15843_v36  ;;  %v18253_v38 = vld [vmem:[#allocation77_spill] sm:$0xff] }
 0x32d   :  { %9948 = vmatprep.subr.bf16.mxu1 %v15846_v46  ;;  %9215 = vmatprep.mubr.bf16.mxu0 %v18249_v19  ;;  %v15871_v36 = vld [vmem:[#allocation7 + $0x2290] ss:$48 sps:$4 sm:$0xff]   ;;  %v15876_v46 = vld [vmem:[#allocation7 + $0x229c] ss:$48 sps:$4 sm:$0xff]  }
 0x32e   :  { %9893 = vmatprep.mubr.bf16.mxu1 %v18249_v19 }
 0x32f   :  { %9271 = vmatpush1.bf16.msra.mxu0 %v15841_v40  ;;  %v15874_v40 = vld [vmem:[#allocation7 + $0x2298] ss:$48 sps:$4 sm:$0xff]  }
 0x330   :  { %9949 = vmatpush1.bf16.msra.mxu1 %v15844_v12  ;;  %9272 = vmatprep.subr.bf16.mxu0 %v15849_v54  ;;  %v15879_v12 = vld [vmem:[#allocation7 + $0x22f4] ss:$48 sps:$4 sm:$0xff]   ;;  %v15882_v54 = vld [vmem:[#allocation7 + $0x22fc] ss:$48 sps:$4 sm:$0xff]  }
 0x331   :  { %9950 = vmatprep.subr.bf16.mxu1 %v15852_v62  ;;  %v15877_v62 = vld [vmem:[#allocation7 + $0x22f0] ss:$48 sps:$4 sm:$0xff]  }
 0x332   :  { %9216 = vmatmul.mubr.bf16.gmra.mrb[48].mxu0 %v18250_v27 }
 0x333   :  { %9894 = vmatmul.mubr.bf16.gmra.mrb[48].mxu1 %v18250_v27  ;;  %9273 = vmatpush1.bf16.msra.mxu0 %v15847_v6  ;;  %v18254_v6 = vld [vmem:[#allocation78_spill] sm:$0xff] }
 0x334   :  { %9951 = vmatpush1.bf16.msra.mxu1 %v15850_v30  ;;  %9274 = vmatprep.subr.bf16.mxu0 %v15855_v49  ;;  %v15880_v30 = vld [vmem:[#allocation7 + $0x22f8] ss:$48 sps:$4 sm:$0xff]   ;;  %v15885_v49 = vld [vmem:[#allocation7 + $0x2354] ss:$48 sps:$4 sm:$0xff]  }
 0x335   :  { %9952 = vmatprep.subr.bf16.mxu1 %v15858_v47  ;;  %9225 = vmatprep.mubr.bf16.mxu0 %v18251_v5  ;;  %v18255_v47 = vld [vmem:[#allocation79_spill] sm:$0xff] }
 0x336   :  { %9903 = vmatprep.mubr.bf16.mxu1 %v18251_v5  ;;  %v11714_v5 = vld [vmem:[#allocation2 + $0x218] sm:$0xff] }
 0x337   :  { %9275 = vmatpush1.bf16.msra.mxu0 %v15853_v26  ;;  %v15888_v26 = vld [vmem:[#allocation7 + $0x235c] ss:$48 sps:$4 sm:$0xff]  }
 0x338   :  { %9953 = vmatpush1.bf16.msra.mxu1 %v15856_v48  ;;  %9276 = vmatprep.subr.bf16.mxu0 %v15861_v16  ;;  %v15883_v48 = vld [vmem:[#allocation7 + $0x2350] ss:$48 sps:$4 sm:$0xff]   ;;  %v15886_v16 = vld [vmem:[#allocation7 + $0x2358] ss:$48 sps:$4 sm:$0xff]  }
 0x339   :  { %9954 = vmatprep.subr.bf16.mxu1 %v15864_v14  ;;  %v15894_v14 = vld [vmem:[#allocation7 + $0x23bc] ss:$48 sps:$4 sm:$0xff]  }
 0x33a   :  { %9226 = vmatmul.mubr.bf16.gmra.mrb[52].mxu0 %v18252_v13 }
 0x33b   :  { %9904 = vmatmul.mubr.bf16.gmra.mrb[52].mxu1 %v18252_v13  ;;  %9277 = vmatpush1.bf16.msra.mxu0 %v15859_v53  ;;  %v15891_v53 = vld [vmem:[#allocation7 + $0x23b4] ss:$48 sps:$4 sm:$0xff]  }
 0x33c   :  { %9955 = vmatpush1.bf16.msra.mxu1 %v15862_v41  ;;  %9278 = vmatprep.subr.bf16.mxu0 %v15867_v1  ;;  %v18256_v41 = vld [vmem:[#allocation80_spill] sm:$0xff]  ;;  %v15889_v1 = vld [vmem:[#allocation7 + $0x23b0] ss:$48 sps:$4 sm:$0xff]  }
 0x33d   :  { %9956 = vmatprep.subr.bf16.mxu1 %v15870_v44  ;;  %9235 = vmatprep.mubr.bf16.mxu0 %v18253_v38  ;;  %v15892_v44 = vld [vmem:[#allocation7 + $0x23b8] ss:$48 sps:$4 sm:$0xff]  }
 0x33e   :  { %9913 = vmatprep.mubr.bf16.mxu1 %v18253_v38  ;;  %v16242_v38 = vld [vmem:[#allocation7 + $0x158c] ss:$48 sps:$4 sm:$0xff]  }
 0x33f   :  { %9279 = vmatpush1.bf16.msra.mxu0 %v15865_v42  ;;  %v15897_v42 = vld [vmem:[#allocation7 + $0x24] ss:$48 sps:$4 sm:$0xff]  }
 0x340   :  { %9957 = vmatpush1.bf16.msra.mxu1 %v15868_v39  ;;  %9280 = vmatprep.subr.bf16.mxu0 %v15873_v60  ;;  %v18257_v39 = vld [vmem:[#allocation81_spill] sm:$0xff] }
 0x341   :  { %9958 = vmatprep.subr.bf16.mxu1 %v15876_v46  ;;  %v15900_v60 = vld [vmem:[#allocation7 + $0x2c] ss:$48 sps:$4 sm:$0xff]   ;;  %v15898_v46 = vld [vmem:[#allocation7 + $0x28] ss:$48 sps:$4 sm:$0xff]  }
 0x342   :  { %9236 = vmatmul.mubr.bf16.gmra.mrb[56].mxu0 %v18254_v6 }
 0x343   :  { %9914 = vmatmul.mubr.bf16.gmra.mrb[56].mxu1 %v18254_v6  ;;  %9281 = vmatpush1.bf16.msra.mxu0 %v15871_v36  ;;  %v15895_v36 = vld [vmem:[#allocation7 + $0x20] ss:$48 sps:$4 sm:$0xff]  }
 0x344   :  { %9959 = vmatpush1.bf16.msra.mxu1 %v15874_v40  ;;  %9282 = vmatprep.subr.bf16.mxu0 %v15879_v12  ;;  %v15903_v40 = vld [vmem:[#allocation7 + $0x84] ss:$48 sps:$4 sm:$0xff]   ;;  %v15906_v12 = vld [vmem:[#allocation7 + $0x8c] ss:$48 sps:$4 sm:$0xff]  }
 0x345   :  { %9960 = vmatprep.subr.bf16.mxu1 %v15882_v54  ;;  %9245 = vmatprep.mubr.bf16.mxu0 %v18255_v47  ;;  %v18258_v54 = vld [vmem:[#allocation82_spill] sm:$0xff] }
 0x346   :  { %9923 = vmatprep.mubr.bf16.mxu1 %v18255_v47 }
 0x347   :  { %9283 = vmatpush1.bf16.msra.mxu0 %v15877_v62  ;;  %v15901_v62 = vld [vmem:[#allocation7 + $0x80] ss:$48 sps:$4 sm:$0xff]  }
 0x348   :  { %9961 = vmatpush1.bf16.msra.mxu1 %v15880_v30  ;;  %9284 = vmatprep.subr.bf16.mxu0 %v15885_v49  ;;  %v15904_v30 = vld [vmem:[#allocation7 + $0x88] ss:$48 sps:$4 sm:$0xff]   ;;  %v15909_v49 = vld [vmem:[#allocation7 + $0xe4] ss:$48 sps:$4 sm:$0xff]  }
 0x349   :  { %9962 = vmatprep.subr.bf16.mxu1 %v15888_v26  ;;  %v18259_v26 = vld [vmem:[#allocation83_spill] sm:$0xff] }
 0x34a   :  { %9246 = vmatmul.mubr.bf16.gmra.mrb[60].mxu0 %v18256_v41 }
 0x34b   :  { %9924 = vmatmul.mubr.bf16.gmra.mrb[60].mxu1 %v18256_v41  ;;  %9285 = vmatpush1.bf16.msra.mxu0 %v15883_v48  ;;  %v15912_v48 = vld [vmem:[#allocation7 + $0xec] ss:$48 sps:$4 sm:$0xff]  }
 0x34c   :  { %9963 = vmatpush1.bf16.msra.mxu1 %v15886_v16  ;;  %9286 = vmatprep.subr.bf16.mxu0 %v15891_v53  ;;  %v15907_v16 = vld [vmem:[#allocation7 + $0xe0] ss:$48 sps:$4 sm:$0xff]   ;;  %v15910_v53 = vld [vmem:[#allocation7 + $0xe8] ss:$48 sps:$4 sm:$0xff]  }
 0x34d   :  { %9964 = vmatprep.subr.bf16.mxu1 %v15894_v14  ;;  %9288 = vmatprep.mubr.bf16.mxu0 %v18257_v39  ;;  %v15915_v14 = vld [vmem:[#allocation7 + $0x144] ss:$48 sps:$4 sm:$0xff]  }
 0x34e   :  { %9966 = vmatprep.mubr.bf16.mxu1 %v18257_v39 }
 0x34f   :  { %9287 = vmatpush1.bf16.msra.mxu0 %v15889_v1  ;;  %v15918_v1 = vld [vmem:[#allocation7 + $0x14c] ss:$48 sps:$4 sm:$0xff]  }
 0x350   :  { %9965 = vmatpush1.bf16.msra.mxu1 %v15892_v44  ;;  %10047 = vmatprep.subr.bf16.mxu0 %v15897_v42  ;;  %v18260_v44 = vld [vmem:[#allocation84_spill] sm:$0xff]  ;;  %v15913_v42 = vld [vmem:[#allocation7 + $0x140] ss:$48 sps:$4 sm:$0xff]  }
 0x351   :  { %10725 = vmatprep.subr.bf16.mxu1 %v15900_v60  ;;  %v15916_v60 = vld [vmem:[#allocation7 + $0x148] ss:$48 sps:$4 sm:$0xff]  }
 0x352   :  { %9289 = vmatmul.mubr.bf16.vlgmr.msra.gmra.mrb[32].mxu0 %v18258_v54 }
 0x353   :  { %9967 = vmatmul.mubr.bf16.vlgmr.msra.gmra.mrb[32].mxu1 %v18258_v54  ;;  %10048 = vmatpush1.bf16.msra.mxu0 %v15895_v36  ;;  %v15921_v36 = vld [vmem:[#allocation7 + $0x1a4] ss:$48 sps:$4 sm:$0xff]  }
 0x354   :  { %10726 = vmatpush1.bf16.msra.mxu1 %v15898_v46  ;;  %10049 = vmatprep.subr.bf16.mxu0 %v15903_v40  ;;  %v18261_v46 = vld [vmem:[#allocation85_spill] sm:$0xff] }
 0x355   :  { %10727 = vmatprep.subr.bf16.mxu1 %v15906_v12  ;;  %9298 = vmatprep.mubr.bf16.mxu0 %v18259_v26  ;;  %v15924_v40 = vld [vmem:[#allocation7 + $0x1ac] ss:$48 sps:$4 sm:$0xff]   ;;  %v15919_v12 = vld [vmem:[#allocation7 + $0x1a0] ss:$48 sps:$4 sm:$0xff]  }
 0x356   :  { %9976 = vmatprep.mubr.bf16.mxu1 %v18259_v26 }
 0x357   :  { %10050 = vmatpush1.bf16.msra.mxu0 %v15901_v62  ;;  %v15922_v62 = vld [vmem:[#allocation7 + $0x1a8] ss:$48 sps:$4 sm:$0xff]  }
 0x358   :  { %10728 = vmatpush1.bf16.msra.mxu1 %v15904_v30  ;;  %10051 = vmatprep.subr.bf16.mxu0 %v15909_v49  ;;  %v15927_v30 = vld [vmem:[#allocation7 + $0x204] ss:$48 sps:$4 sm:$0xff]   ;;  %v15930_v49 = vld [vmem:[#allocation7 + $0x20c] ss:$48 sps:$4 sm:$0xff]  }
 0x359   :  { %10729 = vmatprep.subr.bf16.mxu1 %v15912_v48  ;;  %v18262_v48 = vld [vmem:[#allocation86_spill] sm:$0xff] }
 0x35a   :  { %9299 = vmatmul.mubr.bf16.gmra.mrb[36].mxu0 %v18260_v44 }
 0x35b   :  { %9977 = vmatmul.mubr.bf16.gmra.mrb[36].mxu1 %v18260_v44  ;;  %10052 = vmatpush1.bf16.msra.mxu0 %v15907_v16  ;;  %v15925_v16 = vld [vmem:[#allocation7 + $0x200] ss:$48 sps:$4 sm:$0xff]  }
 0x35c   :  { %10730 = vmatpush1.bf16.msra.mxu1 %v15910_v53  ;;  %10053 = vmatprep.subr.bf16.mxu0 %v15915_v14  ;;  %v15928_v53 = vld [vmem:[#allocation7 + $0x208] ss:$48 sps:$4 sm:$0xff]   ;;  %v15933_v14 = vld [vmem:[#allocation7 + $0x264] ss:$48 sps:$4 sm:$0xff]  }
 0x35d   :  { %10731 = vmatprep.subr.bf16.mxu1 %v15918_v1  ;;  %9308 = vmatprep.mubr.bf16.mxu0 %v18261_v46  ;;  %v18263_v1 = vld [vmem:[#allocation87_spill] sm:$0xff] }
 0x35e   :  { %9986 = vmatprep.mubr.bf16.mxu1 %v18261_v46 }
 0x35f   :  { %10054 = vmatpush1.bf16.msra.mxu0 %v15913_v42  ;;  %v15936_v42 = vld [vmem:[#allocation7 + $0x26c] ss:$48 sps:$4 sm:$0xff]  }
 0x360   :  { %10732 = vmatpush1.bf16.msra.mxu1 %v15916_v60  ;;  %10055 = vmatprep.subr.bf16.mxu0 %v15921_v36  ;;  %v15931_v60 = vld [vmem:[#allocation7 + $0x260] ss:$48 sps:$4 sm:$0xff]   ;;  %v15934_v36 = vld [vmem:[#allocation7 + $0x268] ss:$48 sps:$4 sm:$0xff]  }
 0x361   :  { %10733 = vmatprep.subr.bf16.mxu1 %v15924_v40  ;;  %v15939_v40 = vld [vmem:[#allocation7 + $0x2c4] ss:$48 sps:$4 sm:$0xff]  }
 0x362   :  { %9309 = vmatmul.mubr.bf16.gmra.mrb[40].mxu0 %v18262_v48 }
 0x363   :  { %9987 = vmatmul.mubr.bf16.gmra.mrb[40].mxu1 %v18262_v48  ;;  %10056 = vmatpush1.bf16.msra.mxu0 %v15919_v12  ;;  %v15942_v48 = vld [vmem:[#allocation7 + $0x2cc] ss:$48 sps:$4 sm:$0xff]  }
 0x364   :  { %10734 = vmatpush1.bf16.msra.mxu1 %v15922_v62  ;;  %10057 = vmatprep.subr.bf16.mxu0 %v15927_v30  ;;  %v18264_v12 = vld [vmem:[#allocation88_spill] sm:$0xff]  ;;  %v15937_v62 = vld [vmem:[#allocation7 + $0x2c0] ss:$48 sps:$4 sm:$0xff]  }
 0x365   :  { %10735 = vmatprep.subr.bf16.mxu1 %v15930_v49  ;;  %9318 = vmatprep.mubr.bf16.mxu0 %v18263_v1  ;;  %v15940_v30 = vld [vmem:[#allocation7 + $0x2c8] ss:$48 sps:$4 sm:$0xff]   ;;  %v15945_v49 = vld [vmem:[#allocation7 + $0x324] ss:$48 sps:$4 sm:$0xff]  }
 0x366   :  { %9996 = vmatprep.mubr.bf16.mxu1 %v18263_v1  ;;  %v18265_v1 = vld [vmem:[#allocation89_spill] sm:$0xff] }
 0x367   :  { %10058 = vmatpush1.bf16.msra.mxu0 %v15925_v16  ;;  %v15948_v16 = vld [vmem:[#allocation7 + $0x32c] ss:$48 sps:$4 sm:$0xff]  }
 0x368   :  { %10736 = vmatpush1.bf16.msra.mxu1 %v15928_v53  ;;  %10059 = vmatprep.subr.bf16.mxu0 %v15933_v14  ;;  %v15943_v53 = vld [vmem:[#allocation7 + $0x320] ss:$48 sps:$4 sm:$0xff]   ;;  %v15946_v14 = vld [vmem:[#allocation7 + $0x328] ss:$48 sps:$4 sm:$0xff]  }
 0x369   :  { %10737 = vmatprep.subr.bf16.mxu1 %v15936_v42  ;;  %v15951_v42 = vld [vmem:[#allocation7 + $0x384] ss:$48 sps:$4 sm:$0xff]  }
 0x36a   :  { %9319 = vmatmul.mubr.bf16.gmra.mrb[44].mxu0 %v18264_v12 }
 0x36b   :  { %9997 = vmatmul.mubr.bf16.gmra.mrb[44].mxu1 %v18264_v12  ;;  %10060 = vmatpush1.bf16.msra.mxu0 %v15931_v60  ;;  %v15954_v12 = vld [vmem:[#allocation7 + $0x38c] ss:$48 sps:$4 sm:$0xff]  }
 0x36c   :  { %10738 = vmatpush1.bf16.msra.mxu1 %v15934_v36  ;;  %10061 = vmatprep.subr.bf16.mxu0 %v15939_v40  ;;  %v18266_v60 = vld [vmem:[#allocation90_spill] sm:$0xff]  ;;  %v15949_v36 = vld [vmem:[#allocation7 + $0x380] ss:$48 sps:$4 sm:$0xff]  }
 0x36d   :  { %10739 = vmatprep.subr.bf16.mxu1 %v15942_v48  ;;  %9328 = vmatprep.mubr.bf16.mxu0 %v18265_v1  ;;  %v15952_v48 = vld [vmem:[#allocation7 + $0x388] ss:$48 sps:$4 sm:$0xff]   ;;  %v15957_v40 = vld [vmem:[#allocation7 + $0x3e4] ss:$48 sps:$4 sm:$0xff]  }
 0x36e   :  { %10006 = vmatprep.mubr.bf16.mxu1 %v18265_v1  ;;  %v18267_v1 = vld [vmem:[#allocation91_spill] sm:$0xff] }
 0x36f   :  { %10062 = vmatpush1.bf16.msra.mxu0 %v15937_v62  ;;  %v15960_v62 = vld [vmem:[#allocation7 + $0x3ec] ss:$48 sps:$4 sm:$0xff]  }
 0x370   :  { %10740 = vmatpush1.bf16.msra.mxu1 %v15940_v30  ;;  %10063 = vmatprep.subr.bf16.mxu0 %v15945_v49  ;;  %v15955_v30 = vld [vmem:[#allocation7 + $0x3e0] ss:$48 sps:$4 sm:$0xff]   ;;  %v15958_v49 = vld [vmem:[#allocation7 + $0x3e8] ss:$48 sps:$4 sm:$0xff]  }
 0x371   :  { %10741 = vmatprep.subr.bf16.mxu1 %v15948_v16  ;;  %v15963_v16 = vld [vmem:[#allocation7 + $0x444] ss:$48 sps:$4 sm:$0xff]  }
 0x372   :  { %9329 = vmatmul.mubr.bf16.gmra.mrb[48].mxu0 %v18266_v60 }
 0x373   :  { %10007 = vmatmul.mubr.bf16.gmra.mrb[48].mxu1 %v18266_v60  ;;  %10064 = vmatpush1.bf16.msra.mxu0 %v15943_v53  ;;  %v15966_v60 = vld [vmem:[#allocation7 + $0x44c] ss:$48 sps:$4 sm:$0xff]  }
 0x374   :  { %10742 = vmatpush1.bf16.msra.mxu1 %v15946_v14  ;;  %10065 = vmatprep.subr.bf16.mxu0 %v15951_v42  ;;  %v18268_v53 = vld [vmem:[#allocation92_spill] sm:$0xff]  ;;  %v15961_v14 = vld [vmem:[#allocation7 + $0x440] ss:$48 sps:$4 sm:$0xff]  }
 0x375   :  { %10743 = vmatprep.subr.bf16.mxu1 %v15954_v12  ;;  %9338 = vmatprep.mubr.bf16.mxu0 %v18267_v1  ;;  %v15964_v12 = vld [vmem:[#allocation7 + $0x448] ss:$48 sps:$4 sm:$0xff]   ;;  %v15969_v42 = vld [vmem:[#allocation7 + $0x4a4] ss:$48 sps:$4 sm:$0xff]  }
 0x376   :  { %10016 = vmatprep.mubr.bf16.mxu1 %v18267_v1  ;;  %v18269_v1 = vld [vmem:[#allocation93_spill] sm:$0xff] }
 0x377   :  { %10066 = vmatpush1.bf16.msra.mxu0 %v15949_v36  ;;  %v15972_v36 = vld [vmem:[#allocation7 + $0x4ac] ss:$48 sps:$4 sm:$0xff]  }
 0x378   :  { %10744 = vmatpush1.bf16.msra.mxu1 %v15952_v48  ;;  %10067 = vmatprep.subr.bf16.mxu0 %v15957_v40  ;;  %v15967_v48 = vld [vmem:[#allocation7 + $0x4a0] ss:$48 sps:$4 sm:$0xff]   ;;  %v15970_v40 = vld [vmem:[#allocation7 + $0x4a8] ss:$48 sps:$4 sm:$0xff]  }
 0x379   :  { %10745 = vmatprep.subr.bf16.mxu1 %v15960_v62  ;;  %v15975_v62 = vld [vmem:[#allocation7 + $0x504] ss:$48 sps:$4 sm:$0xff]  }
 0x37a   :  { %9339 = vmatmul.mubr.bf16.gmra.mrb[52].mxu0 %v18268_v53 }
 0x37b   :  { %10017 = vmatmul.mubr.bf16.gmra.mrb[52].mxu1 %v18268_v53  ;;  %10068 = vmatpush1.bf16.msra.mxu0 %v15955_v30  ;;  %v15978_v53 = vld [vmem:[#allocation7 + $0x50c] ss:$48 sps:$4 sm:$0xff]   ;;  %v15973_v30 = vld [vmem:[#allocation7 + $0x500] ss:$48 sps:$4 sm:$0xff]  }
 0x37c   :  { %10746 = vmatpush1.bf16.msra.mxu1 %v15958_v49  ;;  %10069 = vmatprep.subr.bf16.mxu0 %v15963_v16  ;;  %v15981_v49 = vld [vmem:[#allocation7 + $0x564] ss:$48 sps:$4 sm:$0xff]   ;;  %v15984_v16 = vld [vmem:[#allocation7 + $0x56c] ss:$48 sps:$4 sm:$0xff]  }
 0x37d   :  { %10747 = vmatprep.subr.bf16.mxu1 %v15966_v60  ;;  %9348 = vmatprep.mubr.bf16.mxu0 %v18269_v1  ;;  %v15976_v60 = vld [vmem:[#allocation7 + $0x508] ss:$48 sps:$4 sm:$0xff]  }
 0x37e   :  { %10026 = vmatprep.mubr.bf16.mxu1 %v18269_v1 }
 0x37f   :  { %10070 = vmatpush1.bf16.msra.mxu0 %v15961_v14  ;;  %v15979_v14 = vld [vmem:[#allocation7 + $0x560] ss:$48 sps:$4 sm:$0xff]  }
 0x380   :  { %10748 = vmatpush1.bf16.msra.mxu1 %v15964_v12  ;;  %10071 = vmatprep.subr.bf16.mxu0 %v15969_v42  ;;  %v15982_v12 = vld [vmem:[#allocation7 + $0x568] ss:$48 sps:$4 sm:$0xff]   ;;  %v15987_v42 = vld [vmem:[#allocation7 + $0x5c4] ss:$48 sps:$4 sm:$0xff]  }
 0x381   :  { %10749 = vmatprep.subr.bf16.mxu1 %v15972_v36  ;;  %v15990_v36 = vld [vmem:[#allocation7 + $0x5cc] ss:$48 sps:$4 sm:$0xff]  }
 0x382   :  { %9349 = vmatmul.mubr.bf16.gmra.mrb[56].mxu0 %v17051_v7 }
 0x383   :  { %10027 = vmatmul.mubr.bf16.gmra.mrb[56].mxu1 %v17051_v7  ;;  %10072 = vmatpush1.bf16.msra.mxu0 %v15967_v48  ;;  %v15985_v48 = vld [vmem:[#allocation7 + $0x5c0] ss:$48 sps:$4 sm:$0xff]  }
 0x384   :  { %10750 = vmatpush1.bf16.msra.mxu1 %v15970_v40  ;;  %10073 = vmatprep.subr.bf16.mxu0 %v15975_v62  ;;  %v15993_v40 = vld [vmem:[#allocation7 + $0x624] ss:$48 sps:$4 sm:$0xff]   ;;  %v15996_v62 = vld [vmem:[#allocation7 + $0x62c] ss:$48 sps:$4 sm:$0xff]   ;;  %v16219_v7 = vld [vmem:[#allocation7 + $0x1460] ss:$48 sps:$4 sm:$0xff]  }
 0x385   :  { %10751 = vmatprep.subr.bf16.mxu1 %v15978_v53  ;;  %9358 = vmatprep.mubr.bf16.mxu0 %v17053_v2  ;;  %v15988_v53 = vld [vmem:[#allocation7 + $0x5c8] ss:$48 sps:$4 sm:$0xff]  }
 0x386   :  { %10036 = vmatprep.mubr.bf16.mxu1 %v17053_v2 }
 0x387   :  { %10074 = vmatpush1.bf16.msra.mxu0 %v15973_v30  ;;  %v15991_v30 = vld [vmem:[#allocation7 + $0x620] ss:$48 sps:$4 sm:$0xff]  }
 0x388   :  { %10752 = vmatpush1.bf16.msra.mxu1 %v15976_v60  ;;  %10075 = vmatprep.subr.bf16.mxu0 %v15981_v49  ;;  %v15994_v60 = vld [vmem:[#allocation7 + $0x628] ss:$48 sps:$4 sm:$0xff]   ;;  %v15999_v49 = vld [vmem:[#allocation7 + $0x684] ss:$48 sps:$4 sm:$0xff]  }
 0x389   :  { %10753 = vmatprep.subr.bf16.mxu1 %v15984_v16  ;;  %v16002_v16 = vld [vmem:[#allocation7 + $0x68c] ss:$48 sps:$4 sm:$0xff]  }
 0x38a   :  { %9359 = vmatmul.mubr.bf16.gmra.mrb[60].mxu0 %v17059_v57 }
 0x38b   :  { %10037 = vmatmul.mubr.bf16.gmra.mrb[60].mxu1 %v17059_v57  ;;  %10076 = vmatpush1.bf16.msra.mxu0 %v15979_v14  ;;  %v15997_v14 = vld [vmem:[#allocation7 + $0x680] ss:$48 sps:$4 sm:$0xff]  }
 0x38c   :  { %10754 = vmatpush1.bf16.msra.mxu1 %v15982_v12  ;;  %10077 = vmatprep.subr.bf16.mxu0 %v15987_v42  ;;  %v16000_v12 = vld [vmem:[#allocation7 + $0x688] ss:$48 sps:$4 sm:$0xff]   ;;  %v16005_v42 = vld [vmem:[#allocation7 + $0x6e4] ss:$48 sps:$4 sm:$0xff]  }
 0x38d   :  { %10755 = vmatprep.subr.bf16.mxu1 %v15990_v36  ;;  %10079 = vmatprep.mubr.bf16.mxu0 %v16679_v51  ;;  %v16003_v36 = vld [vmem:[#allocation7 + $0x6e0] ss:$48 sps:$4 sm:$0xff]  }
 0x38e   :  { %10757 = vmatprep.mubr.bf16.mxu1 %v16679_v51  ;;  %v16008_v51 = vld [vmem:[#allocation7 + $0x6ec] ss:$48 sps:$4 sm:$0xff]  }
 0x38f   :  { %10078 = vmatpush1.bf16.msra.mxu0 %v15985_v48  ;;  %v16006_v48 = vld [vmem:[#allocation7 + $0x6e8] ss:$48 sps:$4 sm:$0xff]  }
 0x390   :  { %10756 = vmatpush1.bf16.msra.mxu1 %v15988_v53  ;;  %10160 = vmatprep.subr.bf16.mxu0 %v15993_v40  ;;  %v16011_v53 = vld [vmem:[#allocation7 + $0x744] ss:$48 sps:$4 sm:$0xff]   ;;  %v16009_v40 = vld [vmem:[#allocation7 + $0x740] ss:$48 sps:$4 sm:$0xff]  }
 0x391   :  { %10838 = vmatprep.subr.bf16.mxu1 %v15996_v62  ;;  %v16012_v62 = vld [vmem:[#allocation7 + $0x748] ss:$48 sps:$4 sm:$0xff]  }
 0x392   :  { %10080 = vmatmul.mubr.bf16.vlgmr.msra.gmra.mrb[64].mxu0 %v16683_v8 }
 0x393   :  { %10758 = vmatmul.mubr.bf16.vlgmr.msra.gmra.mrb[64].mxu1 %v16683_v8  ;;  %10161 = vmatpush1.bf16.msra.mxu0 %v15991_v30  ;;  %v16014_v8 = vld [vmem:[#allocation7 + $0x74c] ss:$48 sps:$4 sm:$0xff]   ;;  %v16017_v30 = vld [vmem:[#allocation7 + $0x7a4] ss:$48 sps:$4 sm:$0xff]  }
 0x394   :  { %10839 = vmatpush1.bf16.msra.mxu1 %v15994_v60  ;;  %10162 = vmatprep.subr.bf16.mxu0 %v15999_v49  ;;  %v16015_v60 = vld [vmem:[#allocation7 + $0x7a0] ss:$48 sps:$4 sm:$0xff]   ;;  %v16018_v49 = vld [vmem:[#allocation7 + $0x7a8] ss:$48 sps:$4 sm:$0xff]  }
 0x395   :  { %10840 = vmatprep.subr.bf16.mxu1 %v16002_v16  ;;  %10089 = vmatprep.mubr.bf16.mxu0 %v16685_v15  ;;  %v16023_v16 = vld [vmem:[#allocation7 + $0x804] ss:$48 sps:$4 sm:$0xff]  }
 0x396   :  { %10767 = vmatprep.mubr.bf16.mxu1 %v16685_v15  ;;  %v16020_v15 = vld [vmem:[#allocation7 + $0x7ac] ss:$48 sps:$4 sm:$0xff]  }
 0x397   :  { %10163 = vmatpush1.bf16.msra.mxu0 %v15997_v14  ;;  %v16021_v14 = vld [vmem:[#allocation7 + $0x800] ss:$48 sps:$4 sm:$0xff]  }
 0x398   :  { %10841 = vmatpush1.bf16.msra.mxu1 %v16000_v12  ;;  %10164 = vmatprep.subr.bf16.mxu0 %v16005_v42  ;;  %v16024_v12 = vld [vmem:[#allocation7 + $0x808] ss:$48 sps:$4 sm:$0xff]   ;;  %v16029_v42 = vld [vmem:[#allocation7 + $0x864] ss:$48 sps:$4 sm:$0xff]  }
 0x399   :  { %10842 = vmatprep.subr.bf16.mxu1 %v16008_v51  ;;  %v16027_v51 = vld [vmem:[#allocation7 + $0x860] ss:$48 sps:$4 sm:$0xff]  }
 0x39a   :  { %10090 = vmatmul.mubr.bf16.gmra.mrb[68].mxu0 %v16691_v23 }
 0x39b   :  { %10768 = vmatmul.mubr.bf16.gmra.mrb[68].mxu1 %v16691_v23  ;;  %10165 = vmatpush1.bf16.msra.mxu0 %v16003_v36  ;;  %v16026_v23 = vld [vmem:[#allocation7 + $0x80c] ss:$48 sps:$4 sm:$0xff]   ;;  %v16030_v36 = vld [vmem:[#allocation7 + $0x868] ss:$48 sps:$4 sm:$0xff]  }
 0x39c   :  { %10843 = vmatpush1.bf16.msra.mxu1 %v16006_v48  ;;  %10166 = vmatprep.subr.bf16.mxu0 %v16011_v53  ;;  %v16035_v48 = vld [vmem:[#allocation7 + $0x8c4] ss:$48 sps:$4 sm:$0xff]   ;;  %v16033_v53 = vld [vmem:[#allocation7 + $0x8c0] ss:$48 sps:$4 sm:$0xff]  }
 0x39d   :  { %10844 = vmatprep.subr.bf16.mxu1 %v16014_v8  ;;  %10099 = vmatprep.mubr.bf16.mxu0 %v16693_v28  ;;  %v16036_v8 = vld [vmem:[#allocation7 + $0x8c8] ss:$48 sps:$4 sm:$0xff]  }
 0x39e   :  { %10777 = vmatprep.mubr.bf16.mxu1 %v16693_v28  ;;  %v16032_v28 = vld [vmem:[#allocation7 + $0x86c] ss:$48 sps:$4 sm:$0xff]  }
 0x39f   :  { %10167 = vmatpush1.bf16.msra.mxu0 %v16009_v40  ;;  %v16041_v40 = vld [vmem:[#allocation7 + $0x924] ss:$48 sps:$4 sm:$0xff]  }
 0x3a0   :  { %10845 = vmatpush1.bf16.msra.mxu1 %v16012_v62  ;;  %10168 = vmatprep.subr.bf16.mxu0 %v16017_v30  ;;  %v16039_v62 = vld [vmem:[#allocation7 + $0x920] ss:$48 sps:$4 sm:$0xff]   ;;  %v16042_v30 = vld [vmem:[#allocation7 + $0x928] ss:$48 sps:$4 sm:$0xff]  }
 0x3a1   :  { %10846 = vmatprep.subr.bf16.mxu1 %v16020_v15  ;;  %v16047_v15 = vld [vmem:[#allocation7 + $0x984] ss:$48 sps:$4 sm:$0xff]  }
 0x3a2   :  { %10100 = vmatmul.mubr.bf16.gmra.mrb[72].mxu0 %v16699_v37 }
 0x3a3   :  { %10778 = vmatmul.mubr.bf16.gmra.mrb[72].mxu1 %v16699_v37  ;;  %10169 = vmatpush1.bf16.msra.mxu0 %v16015_v60  ;;  %v16038_v37 = vld [vmem:[#allocation7 + $0x8cc] ss:$48 sps:$4 sm:$0xff]   ;;  %v16045_v60 = vld [vmem:[#allocation7 + $0x980] ss:$48 sps:$4 sm:$0xff]  }
 0x3a4   :  { %10847 = vmatpush1.bf16.msra.mxu1 %v16018_v49  ;;  %10170 = vmatprep.subr.bf16.mxu0 %v16023_v16  ;;  %v16048_v49 = vld [vmem:[#allocation7 + $0x988] ss:$48 sps:$4 sm:$0xff]   ;;  %v16053_v16 = vld [vmem:[#allocation7 + $0x9e4] ss:$48 sps:$4 sm:$0xff]  }
 0x3a5   :  { %10848 = vmatprep.subr.bf16.mxu1 %v16026_v23  ;;  %10109 = vmatprep.mubr.bf16.mxu0 %v16701_v43  ;;  %v16051_v23 = vld [vmem:[#allocation7 + $0x9e0] ss:$48 sps:$4 sm:$0xff]  }
 0x3a6   :  { %10787 = vmatprep.mubr.bf16.mxu1 %v16701_v43  ;;  %v16044_v43 = vld [vmem:[#allocation7 + $0x92c] ss:$48 sps:$4 sm:$0xff]  }
 0x3a7   :  { %10171 = vmatpush1.bf16.msra.mxu0 %v16021_v14  ;;  %v16054_v14 = vld [vmem:[#allocation7 + $0x9e8] ss:$48 sps:$4 sm:$0xff]  }
 0x3a8   :  { %10849 = vmatpush1.bf16.msra.mxu1 %v16024_v12  ;;  %10172 = vmatprep.subr.bf16.mxu0 %v16029_v42  ;;  %v16059_v12 = vld [vmem:[#allocation7 + $0xa44] ss:$48 sps:$4 sm:$0xff]   ;;  %v16057_v42 = vld [vmem:[#allocation7 + $0xa40] ss:$48 sps:$4 sm:$0xff]  }
 0x3a9   :  { %10850 = vmatprep.subr.bf16.mxu1 %v16032_v28  ;;  %v16060_v28 = vld [vmem:[#allocation7 + $0xa48] ss:$48 sps:$4 sm:$0xff]  }
 0x3aa   :  { %10110 = vmatmul.mubr.bf16.gmra.mrb[76].mxu0 %v16707_v50 }
 0x3ab   :  { %10788 = vmatmul.mubr.bf16.gmra.mrb[76].mxu1 %v16707_v50  ;;  %10173 = vmatpush1.bf16.msra.mxu0 %v16027_v51  ;;  %v16050_v50 = vld [vmem:[#allocation7 + $0x98c] ss:$48 sps:$4 sm:$0xff]   ;;  %v16065_v51 = vld [vmem:[#allocation7 + $0xaa4] ss:$48 sps:$4 sm:$0xff]  }
 0x3ac   :  { %10851 = vmatpush1.bf16.msra.mxu1 %v16030_v36  ;;  %10174 = vmatprep.subr.bf16.mxu0 %v16035_v48  ;;  %v16063_v36 = vld [vmem:[#allocation7 + $0xaa0] ss:$48 sps:$4 sm:$0xff]   ;;  %v16066_v48 = vld [vmem:[#allocation7 + $0xaa8] ss:$48 sps:$4 sm:$0xff]  }
 0x3ad   :  { %10852 = vmatprep.subr.bf16.mxu1 %v16038_v37  ;;  %10119 = vmatprep.mubr.bf16.mxu0 %v16709_v59  ;;  %v16071_v37 = vld [vmem:[#allocation7 + $0xb04] ss:$48 sps:$4 sm:$0xff]  }
 0x3ae   :  { %10797 = vmatprep.mubr.bf16.mxu1 %v16709_v59  ;;  %v16056_v59 = vld [vmem:[#allocation7 + $0x9ec] ss:$48 sps:$4 sm:$0xff]  }
 0x3af   :  { %10175 = vmatpush1.bf16.msra.mxu0 %v16033_v53  ;;  %v16069_v53 = vld [vmem:[#allocation7 + $0xb00] ss:$48 sps:$4 sm:$0xff]  }
 0x3b0   :  { %10853 = vmatpush1.bf16.msra.mxu1 %v16036_v8  ;;  %10176 = vmatprep.subr.bf16.mxu0 %v16041_v40  ;;  %v16072_v8 = vld [vmem:[#allocation7 + $0xb08] ss:$48 sps:$4 sm:$0xff]   ;;  %v16077_v40 = vld [vmem:[#allocation7 + $0xb64] ss:$48 sps:$4 sm:$0xff]  }
 0x3b1   :  { %10854 = vmatprep.subr.bf16.mxu1 %v16044_v43  ;;  %v16080_v43 = vld [vmem:[#allocation7 + $0xb6c] ss:$48 sps:$4 sm:$0xff]  }
 0x3b2   :  { %10120 = vmatmul.mubr.bf16.gmra.mrb[80].mxu0 %v16715_v0 }
 0x3b3   :  { %10798 = vmatmul.mubr.bf16.gmra.mrb[80].mxu1 %v16715_v0  ;;  %10177 = vmatpush1.bf16.msra.mxu0 %v16039_v62  ;;  %v16062_v0 = vld [vmem:[#allocation7 + $0xa4c] ss:$48 sps:$4 sm:$0xff]   ;;  %v16075_v62 = vld [vmem:[#allocation7 + $0xb60] ss:$48 sps:$4 sm:$0xff]  }
 0x3b4   :  { %10855 = vmatpush1.bf16.msra.mxu1 %v16042_v30  ;;  %10178 = vmatprep.subr.bf16.mxu0 %v16047_v15  ;;  %v16078_v30 = vld [vmem:[#allocation7 + $0xb68] ss:$48 sps:$4 sm:$0xff]   ;;  %v16083_v15 = vld [vmem:[#allocation7 + $0xbc4] ss:$48 sps:$4 sm:$0xff]  }
 0x3b5   :  { %10856 = vmatprep.subr.bf16.mxu1 %v16050_v50  ;;  %10129 = vmatprep.mubr.bf16.mxu0 %v16717_v10  ;;  %v18271_v50 = vld [vmem:[#allocation16_spill] sm:$0xff] }
 0x3b6   :  { %10807 = vmatprep.mubr.bf16.mxu1 %v16717_v10  ;;  %v16068_v10 = vld [vmem:[#allocation7 + $0xaac] ss:$48 sps:$4 sm:$0xff]  }
 0x3b7   :  { %10179 = vmatpush1.bf16.msra.mxu0 %v16045_v60  ;;  %v16081_v60 = vld [vmem:[#allocation7 + $0xbc0] ss:$48 sps:$4 sm:$0xff]  }
 0x3b8   :  { %10857 = vmatpush1.bf16.msra.mxu1 %v16048_v49  ;;  %10180 = vmatprep.subr.bf16.mxu0 %v16053_v16  ;;  %v16084_v49 = vld [vmem:[#allocation7 + $0xbc8] ss:$48 sps:$4 sm:$0xff]   ;;  %v16089_v16 = vld [vmem:[#allocation7 + $0xc24] ss:$48 sps:$4 sm:$0xff]  }
 0x3b9   :  { %10858 = vmatprep.subr.bf16.mxu1 %v16056_v59  ;;  %v18272_v59 = vld [vmem:[#allocation17_spill] sm:$0xff] }
 0x3ba   :  { %10130 = vmatmul.mubr.bf16.gmra.mrb[84].mxu0 %v16723_v17 }
 0x3bb   :  { %10808 = vmatmul.mubr.bf16.gmra.mrb[84].mxu1 %v16723_v17  ;;  %10181 = vmatpush1.bf16.msra.mxu0 %v16051_v23  ;;  %v16074_v17 = vld [vmem:[#allocation7 + $0xb0c] ss:$48 sps:$4 sm:$0xff]  }
 0x3bc   :  { %10859 = vmatpush1.bf16.msra.mxu1 %v16054_v14  ;;  %10182 = vmatprep.subr.bf16.mxu0 %v16059_v12  ;;  %v16092_v23 = vld [vmem:[#allocation7 + $0xc2c] ss:$48 sps:$4 sm:$0xff]   ;;  %v16087_v14 = vld [vmem:[#allocation7 + $0xc20] ss:$48 sps:$4 sm:$0xff]   ;;  %v16090_v12 = vld [vmem:[#allocation7 + $0xc28] ss:$48 sps:$4 sm:$0xff]  }
 0x3bd   :  { %10860 = vmatprep.subr.bf16.mxu1 %v16062_v0  ;;  %10139 = vmatprep.mubr.bf16.mxu0 %v16725_v25  ;;  %v16095_v0 = vld [vmem:[#allocation7 + $0xc84] ss:$48 sps:$4 sm:$0xff]  }
 0x3be   :  { %10817 = vmatprep.mubr.bf16.mxu1 %v16725_v25  ;;  %v18270_v25 = vld [vmem:[#allocation15_spill] sm:$0xff] }
 0x3bf   :  { %10183 = vmatpush1.bf16.msra.mxu0 %v16057_v42  ;;  %v16098_v42 = vld [vmem:[#allocation7 + $0xc8c] ss:$48 sps:$4 sm:$0xff]  }
 0x3c0   :  { %10861 = vmatpush1.bf16.msra.mxu1 %v16060_v28  ;;  %10184 = vmatprep.subr.bf16.mxu0 %v16065_v51  ;;  %v18273_v28 = vld [vmem:[#allocation18_spill] sm:$0xff]  ;;  %v16093_v51 = vld [vmem:[#allocation7 + $0xc80] ss:$48 sps:$4 sm:$0xff]  }
 0x3c1   :  { %10862 = vmatprep.subr.bf16.mxu1 %v16068_v10  ;;  %v16096_v10 = vld [vmem:[#allocation7 + $0xc88] ss:$48 sps:$4 sm:$0xff]  }
 0x3c2   :  { %10140 = vmatmul.mubr.bf16.gmra.mrb[88].mxu0 %v16731_v34 }
 0x3c3   :  { %10818 = vmatmul.mubr.bf16.gmra.mrb[88].mxu1 %v16731_v34  ;;  %10185 = vmatpush1.bf16.msra.mxu0 %v16063_v36  ;;  %v16086_v34 = vld [vmem:[#allocation7 + $0xbcc] ss:$48 sps:$4 sm:$0xff]   ;;  %v16101_v36 = vld [vmem:[#allocation7 + $0xce4] ss:$48 sps:$4 sm:$0xff]  }
 0x3c4   :  { %10863 = vmatpush1.bf16.msra.mxu1 %v16066_v48  ;;  %10186 = vmatprep.subr.bf16.mxu0 %v16071_v37  ;;  %v18274_v48 = vld [vmem:[#allocation19_spill] sm:$0xff] }
 0x3c5   :  { %10864 = vmatprep.subr.bf16.mxu1 %v16074_v17  ;;  %10149 = vmatprep.mubr.bf16.mxu0 %v18270_v25  ;;  %v16104_v37 = vld [vmem:[#allocation7 + $0xcec] ss:$48 sps:$4 sm:$0xff]   ;;  %v16099_v17 = vld [vmem:[#allocation7 + $0xce0] ss:$48 sps:$4 sm:$0xff]  }
 0x3c6   :  { %10827 = vmatprep.mubr.bf16.mxu1 %v18270_v25  ;;  %v18275_v25 = vld [vmem:[#allocation20_spill] sm:$0xff] }
 0x3c7   :  { %10187 = vmatpush1.bf16.msra.mxu0 %v16069_v53  ;;  %v16102_v53 = vld [vmem:[#allocation7 + $0xce8] ss:$48 sps:$4 sm:$0xff]  }
 0x3c8   :  { %10865 = vmatpush1.bf16.msra.mxu1 %v16072_v8  ;;  %10188 = vmatprep.subr.bf16.mxu0 %v16077_v40  ;;  %v16107_v8 = vld [vmem:[#allocation7 + $0xd44] ss:$48 sps:$4 sm:$0xff]   ;;  %v16110_v40 = vld [vmem:[#allocation7 + $0xd4c] ss:$48 sps:$4 sm:$0xff]  }
 0x3c9   :  { %10866 = vmatprep.subr.bf16.mxu1 %v16080_v43  ;;  %v16105_v43 = vld [vmem:[#allocation7 + $0xd40] ss:$48 sps:$4 sm:$0xff]  }
 0x3ca   :  { %10150 = vmatmul.mubr.bf16.gmra.mrb[92].mxu0 %v18271_v50 }
 0x3cb   :  { %10828 = vmatmul.mubr.bf16.gmra.mrb[92].mxu1 %v18271_v50  ;;  %10189 = vmatpush1.bf16.msra.mxu0 %v16075_v62  ;;  %v16108_v62 = vld [vmem:[#allocation7 + $0xd48] ss:$48 sps:$4 sm:$0xff]   ;;  %v16111_v50 = vld [vmem:[#allocation7 + $0xda0] ss:$48 sps:$4 sm:$0xff]  }
 0x3cc   :  { %10867 = vmatpush1.bf16.msra.mxu1 %v16078_v30  ;;  %10190 = vmatprep.subr.bf16.mxu0 %v16083_v15  ;;  %v16113_v30 = vld [vmem:[#allocation7 + $0xda4] ss:$48 sps:$4 sm:$0xff]  }
 0x3cd   :  { %10868 = vmatprep.subr.bf16.mxu1 %v16086_v34  ;;  %10192 = vmatprep.mubr.bf16.mxu0 %v18272_v59  ;;  %v18276_v15 = vld [vmem:[#allocation21_spill] sm:$0xff] }
 0x3ce   :  { %10870 = vmatprep.mubr.bf16.mxu1 %v18272_v59  ;;  %v16116_v34 = vld [vmem:[#allocation7 + $0xdac] ss:$48 sps:$4 sm:$0xff]  }
 0x3cf   :  { %10191 = vmatpush1.bf16.msra.mxu0 %v16081_v60  ;;  %v16114_v60 = vld [vmem:[#allocation7 + $0xda8] ss:$48 sps:$4 sm:$0xff]  }
 0x3d0   :  { %10869 = vmatpush1.bf16.msra.mxu1 %v16084_v49  ;;  %10273 = vmatprep.subr.bf16.mxu0 %v16089_v16  ;;  %v16119_v49 = vld [vmem:[#allocation7 + $0xe04] ss:$48 sps:$4 sm:$0xff]   ;;  %v16122_v16 = vld [vmem:[#allocation7 + $0xe0c] ss:$48 sps:$4 sm:$0xff]  }
 0x3d1   :  { %10951 = vmatprep.subr.bf16.mxu1 %v16092_v23  ;;  %v18277_v59 = vld [vmem:[#allocation22_spill] sm:$0xff]  ;;  %v16117_v23 = vld [vmem:[#allocation7 + $0xe00] ss:$48 sps:$4 sm:$0xff]  }
 0x3d2   :  { %10193 = vmatmul.mubr.bf16.vlgmr.msra.gmra.mrb[64].mxu0 %v18273_v28 }
 0x3d3   :  { %10871 = vmatmul.mubr.bf16.vlgmr.msra.gmra.mrb[64].mxu1 %v18273_v28  ;;  %10274 = vmatpush1.bf16.msra.mxu0 %v16087_v14  ;;  %v16120_v14 = vld [vmem:[#allocation7 + $0xe08] ss:$48 sps:$4 sm:$0xff]   ;;  %v16123_v28 = vld [vmem:[#allocation7 + $0xe60] ss:$48 sps:$4 sm:$0xff]  }
 0x3d4   :  { %10952 = vmatpush1.bf16.msra.mxu1 %v16090_v12  ;;  %10275 = vmatprep.subr.bf16.mxu0 %v16095_v0  ;;  %v16125_v12 = vld [vmem:[#allocation7 + $0xe64] ss:$48 sps:$4 sm:$0xff]  }
 0x3d5   :  { %10953 = vmatprep.subr.bf16.mxu1 %v16098_v42  ;;  %10202 = vmatprep.mubr.bf16.mxu0 %v18274_v48  ;;  %v18278_v0 = vld [vmem:[#allocation23_spill] sm:$0xff] }
 0x3d6   :  { %10880 = vmatprep.mubr.bf16.mxu1 %v18274_v48  ;;  %v16128_v42 = vld [vmem:[#allocation7 + $0xe6c] ss:$48 sps:$4 sm:$0xff]  }
 0x3d7   :  { %10276 = vmatpush1.bf16.msra.mxu0 %v16093_v51  ;;  %v16126_v51 = vld [vmem:[#allocation7 + $0xe68] ss:$48 sps:$4 sm:$0xff]  }
 0x3d8   :  { %10954 = vmatpush1.bf16.msra.mxu1 %v16096_v10  ;;  %10277 = vmatprep.subr.bf16.mxu0 %v16101_v36  ;;  %v16131_v10 = vld [vmem:[#allocation7 + $0xec4] ss:$48 sps:$4 sm:$0xff]   ;;  %v16134_v36 = vld [vmem:[#allocation7 + $0xecc] ss:$48 sps:$4 sm:$0xff]  }
 0x3d9   :  { %10955 = vmatprep.subr.bf16.mxu1 %v16104_v37  ;;  %v18279_v48 = vld [vmem:[#allocation24_spill] sm:$0xff]  ;;  %v16129_v37 = vld [vmem:[#allocation7 + $0xec0] ss:$48 sps:$4 sm:$0xff]  }
 0x3da   :  { %10203 = vmatmul.mubr.bf16.gmra.mrb[68].mxu0 %v18275_v25 }
 0x3db   :  { %10881 = vmatmul.mubr.bf16.gmra.mrb[68].mxu1 %v18275_v25  ;;  %10278 = vmatpush1.bf16.msra.mxu0 %v16099_v17  ;;  %v16132_v17 = vld [vmem:[#allocation7 + $0xec8] ss:$48 sps:$4 sm:$0xff]   ;;  %v16135_v25 = vld [vmem:[#allocation7 + $0xf20] ss:$48 sps:$4 sm:$0xff]  }
 0x3dc   :  { %10956 = vmatpush1.bf16.msra.mxu1 %v16102_v53  ;;  %10279 = vmatprep.subr.bf16.mxu0 %v16107_v8  ;;  %v16137_v53 = vld [vmem:[#allocation7 + $0xf24] ss:$48 sps:$4 sm:$0xff]  }
 0x3dd   :  { %10957 = vmatprep.subr.bf16.mxu1 %v16110_v40  ;;  %10212 = vmatprep.mubr.bf16.mxu0 %v18276_v15  ;;  %v18280_v8 = vld [vmem:[#allocation25_spill] sm:$0xff] }
 0x3de   :  { %10890 = vmatprep.mubr.bf16.mxu1 %v18276_v15  ;;  %v16140_v40 = vld [vmem:[#allocation7 + $0xf2c] ss:$48 sps:$4 sm:$0xff]  }
 0x3df   :  { %10280 = vmatpush1.bf16.msra.mxu0 %v16105_v43  ;;  %v16138_v43 = vld [vmem:[#allocation7 + $0xf28] ss:$48 sps:$4 sm:$0xff]  }
 0x3e0   :  { %10958 = vmatpush1.bf16.msra.mxu1 %v16108_v62  ;;  %10281 = vmatprep.subr.bf16.mxu0 %v16113_v30  ;;  %v16143_v62 = vld [vmem:[#allocation7 + $0xf84] ss:$48 sps:$4 sm:$0xff]   ;;  %v16146_v30 = vld [vmem:[#allocation7 + $0xf8c] ss:$48 sps:$4 sm:$0xff]  }
 0x3e1   :  { %10959 = vmatprep.subr.bf16.mxu1 %v16116_v34  ;;  %v18281_v15 = vld [vmem:[#allocation26_spill] sm:$0xff]  ;;  %v16141_v34 = vld [vmem:[#allocation7 + $0xf80] ss:$48 sps:$4 sm:$0xff]  }
 0x3e2   :  { %10213 = vmatmul.mubr.bf16.gmra.mrb[72].mxu0 %v18277_v59 }
 0x3e3   :  { %10891 = vmatmul.mubr.bf16.gmra.mrb[72].mxu1 %v18277_v59  ;;  %10282 = vmatpush1.bf16.msra.mxu0 %v16111_v50  ;;  %v16144_v50 = vld [vmem:[#allocation7 + $0xf88] ss:$48 sps:$4 sm:$0xff]   ;;  %v16147_v59 = vld [vmem:[#allocation7 + $0xfe0] ss:$48 sps:$4 sm:$0xff]  }
 0x3e4   :  { %10960 = vmatpush1.bf16.msra.mxu1 %v16114_v60  ;;  %10283 = vmatprep.subr.bf16.mxu0 %v16119_v49  ;;  %v16149_v60 = vld [vmem:[#allocation7 + $0xfe4] ss:$48 sps:$4 sm:$0xff]  }
 0x3e5   :  { %10961 = vmatprep.subr.bf16.mxu1 %v16122_v16  ;;  %10222 = vmatprep.mubr.bf16.mxu0 %v18278_v0  ;;  %v18282_v49 = vld [vmem:[#allocation27_spill] sm:$0xff] }
 0x3e6   :  { %10900 = vmatprep.mubr.bf16.mxu1 %v18278_v0  ;;  %v16152_v16 = vld [vmem:[#allocation7 + $0xfec] ss:$48 sps:$4 sm:$0xff]  }
 0x3e7   :  { %10284 = vmatpush1.bf16.msra.mxu0 %v16117_v23  ;;  %v16150_v23 = vld [vmem:[#allocation7 + $0xfe8] ss:$48 sps:$4 sm:$0xff]  }
 0x3e8   :  { %10962 = vmatpush1.bf16.msra.mxu1 %v16120_v14  ;;  %10285 = vmatprep.subr.bf16.mxu0 %v16125_v12  ;;  %v16155_v14 = vld [vmem:[#allocation7 + $0x1044] ss:$48 sps:$4 sm:$0xff]   ;;  %v16158_v12 = vld [vmem:[#allocation7 + $0x104c] ss:$48 sps:$4 sm:$0xff]  }
 0x3e9   :  { %10963 = vmatprep.subr.bf16.mxu1 %v16128_v42  ;;  %v18283_v0 = vld [vmem:[#allocation28_spill] sm:$0xff]  ;;  %v16153_v42 = vld [vmem:[#allocation7 + $0x1040] ss:$48 sps:$4 sm:$0xff]  }
 0x3ea   :  { %10223 = vmatmul.mubr.bf16.gmra.mrb[76].mxu0 %v18279_v48 }
 0x3eb   :  { %10901 = vmatmul.mubr.bf16.gmra.mrb[76].mxu1 %v18279_v48  ;;  %10286 = vmatpush1.bf16.msra.mxu0 %v16123_v28  ;;  %v16156_v28 = vld [vmem:[#allocation7 + $0x1048] ss:$48 sps:$4 sm:$0xff]   ;;  %v16159_v48 = vld [vmem:[#allocation7 + $0x10a0] ss:$48 sps:$4 sm:$0xff]  }
 0x3ec   :  { %10964 = vmatpush1.bf16.msra.mxu1 %v16126_v51  ;;  %10287 = vmatprep.subr.bf16.mxu0 %v16131_v10  ;;  %v16161_v51 = vld [vmem:[#allocation7 + $0x10a4] ss:$48 sps:$4 sm:$0xff]  }
 0x3ed   :  { %10965 = vmatprep.subr.bf16.mxu1 %v16134_v36  ;;  %10232 = vmatprep.mubr.bf16.mxu0 %v18280_v8  ;;  %v18284_v10 = vld [vmem:[#allocation29_spill] sm:$0xff] }
 0x3ee   :  { %10910 = vmatprep.mubr.bf16.mxu1 %v18280_v8  ;;  %v16164_v36 = vld [vmem:[#allocation7 + $0x10ac] ss:$48 sps:$4 sm:$0xff]  }
 0x3ef   :  { %10288 = vmatpush1.bf16.msra.mxu0 %v16129_v37  ;;  %v16162_v37 = vld [vmem:[#allocation7 + $0x10a8] ss:$48 sps:$4 sm:$0xff]  }
 0x3f0   :  { %10966 = vmatpush1.bf16.msra.mxu1 %v16132_v17  ;;  %10289 = vmatprep.subr.bf16.mxu0 %v16137_v53  ;;  %v16167_v17 = vld [vmem:[#allocation7 + $0x1104] ss:$48 sps:$4 sm:$0xff]   ;;  %v16170_v53 = vld [vmem:[#allocation7 + $0x110c] ss:$48 sps:$4 sm:$0xff]  }
 0x3f1   :  { %10967 = vmatprep.subr.bf16.mxu1 %v16140_v40  ;;  %v18285_v8 = vld [vmem:[#allocation30_spill] sm:$0xff]  ;;  %v16165_v40 = vld [vmem:[#allocation7 + $0x1100] ss:$48 sps:$4 sm:$0xff]  }
 0x3f2   :  { %10233 = vmatmul.mubr.bf16.gmra.mrb[80].mxu0 %v18281_v15 }
 0x3f3   :  { %10911 = vmatmul.mubr.bf16.gmra.mrb[80].mxu1 %v18281_v15  ;;  %10290 = vmatpush1.bf16.msra.mxu0 %v16135_v25  ;;  %v16168_v25 = vld [vmem:[#allocation7 + $0x1108] ss:$48 sps:$4 sm:$0xff]   ;;  %v16171_v15 = vld [vmem:[#allocation7 + $0x1160] ss:$48 sps:$4 sm:$0xff]  }
 0x3f4   :  { %10968 = vmatpush1.bf16.msra.mxu1 %v16138_v43  ;;  %10291 = vmatprep.subr.bf16.mxu0 %v16143_v62  ;;  %v16173_v43 = vld [vmem:[#allocation7 + $0x1164] ss:$48 sps:$4 sm:$0xff]  }
 0x3f5   :  { %10969 = vmatprep.subr.bf16.mxu1 %v16146_v30  ;;  %10242 = vmatprep.mubr.bf16.mxu0 %v18282_v49  ;;  %v18286_v62 = vld [vmem:[#allocation31_spill] sm:$0xff] }
 0x3f6   :  { %10920 = vmatprep.mubr.bf16.mxu1 %v18282_v49  ;;  %v16176_v30 = vld [vmem:[#allocation7 + $0x116c] ss:$48 sps:$4 sm:$0xff]  }
 0x3f7   :  { %10292 = vmatpush1.bf16.msra.mxu0 %v16141_v34  ;;  %v16174_v34 = vld [vmem:[#allocation7 + $0x1168] ss:$48 sps:$4 sm:$0xff]  }
 0x3f8   :  { %10970 = vmatpush1.bf16.msra.mxu1 %v16144_v50  ;;  %10293 = vmatprep.subr.bf16.mxu0 %v16149_v60  ;;  %v16179_v50 = vld [vmem:[#allocation7 + $0x11c4] ss:$48 sps:$4 sm:$0xff]   ;;  %v16182_v60 = vld [vmem:[#allocation7 + $0x11cc] ss:$48 sps:$4 sm:$0xff]  }
 0x3f9   :  { %10971 = vmatprep.subr.bf16.mxu1 %v16152_v16  ;;  %v18287_v49 = vld [vmem:[#allocation32_spill] sm:$0xff]  ;;  %v16177_v16 = vld [vmem:[#allocation7 + $0x11c0] ss:$48 sps:$4 sm:$0xff]  }
 0x3fa   :  { %10243 = vmatmul.mubr.bf16.gmra.mrb[84].mxu0 %v18283_v0 }
 0x3fb   :  { %10921 = vmatmul.mubr.bf16.gmra.mrb[84].mxu1 %v18283_v0  ;;  %10294 = vmatpush1.bf16.msra.mxu0 %v16147_v59  ;;  %v16180_v59 = vld [vmem:[#allocation7 + $0x11c8] ss:$48 sps:$4 sm:$0xff]   ;;  %v16183_v0 = vld [vmem:[#allocation7 + $0x1220] ss:$48 sps:$4 sm:$0xff]  }
 0x3fc   :  { %10972 = vmatpush1.bf16.msra.mxu1 %v16150_v23  ;;  %10295 = vmatprep.subr.bf16.mxu0 %v16155_v14  ;;  %v16185_v23 = vld [vmem:[#allocation7 + $0x1224] ss:$48 sps:$4 sm:$0xff]  }
 0x3fd   :  { %10973 = vmatprep.subr.bf16.mxu1 %v16158_v12  ;;  %10252 = vmatprep.mubr.bf16.mxu0 %v18284_v10  ;;  %v18288_v14 = vld [vmem:[#allocation33_spill] sm:$0xff] }
 0x3fe   :  { %10930 = vmatprep.mubr.bf16.mxu1 %v18284_v10  ;;  %v16188_v12 = vld [vmem:[#allocation7 + $0x122c] ss:$48 sps:$4 sm:$0xff]  }
 0x3ff   :  { %10296 = vmatpush1.bf16.msra.mxu0 %v16153_v42  ;;  %v16186_v42 = vld [vmem:[#allocation7 + $0x1228] ss:$48 sps:$4 sm:$0xff]  }
 0x400   :  { %10974 = vmatpush1.bf16.msra.mxu1 %v16156_v28  ;;  %10297 = vmatprep.subr.bf16.mxu0 %v16161_v51  ;;  %v16191_v28 = vld [vmem:[#allocation7 + $0x1284] ss:$48 sps:$4 sm:$0xff]   ;;  %v16194_v51 = vld [vmem:[#allocation7 + $0x128c] ss:$48 sps:$4 sm:$0xff]  }
 0x401   :  { %10975 = vmatprep.subr.bf16.mxu1 %v16164_v36  ;;  %v18289_v10 = vld [vmem:[#allocation34_spill] sm:$0xff]  ;;  %v16189_v36 = vld [vmem:[#allocation7 + $0x1280] ss:$48 sps:$4 sm:$0xff]  }
 0x402   :  { %10253 = vmatmul.mubr.bf16.gmra.mrb[88].mxu0 %v18285_v8 }
 0x403   :  { %10931 = vmatmul.mubr.bf16.gmra.mrb[88].mxu1 %v18285_v8  ;;  %10298 = vmatpush1.bf16.msra.mxu0 %v16159_v48  ;;  %v16192_v48 = vld [vmem:[#allocation7 + $0x1288] ss:$48 sps:$4 sm:$0xff]   ;;  %v16195_v8 = vld [vmem:[#allocation7 + $0x12e0] ss:$48 sps:$4 sm:$0xff]  }
 0x404   :  { %10976 = vmatpush1.bf16.msra.mxu1 %v16162_v37  ;;  %10299 = vmatprep.subr.bf16.mxu0 %v16167_v17  ;;  %v16197_v37 = vld [vmem:[#allocation7 + $0x12e4] ss:$48 sps:$4 sm:$0xff]  }
 0x405   :  { %10977 = vmatprep.subr.bf16.mxu1 %v16170_v53  ;;  %10262 = vmatprep.mubr.bf16.mxu0 %v18286_v62  ;;  %v18290_v17 = vld [vmem:[#allocation35_spill] sm:$0xff] }
 0x406   :  { %10940 = vmatprep.mubr.bf16.mxu1 %v18286_v62  ;;  %v16200_v53 = vld [vmem:[#allocation7 + $0x12ec] ss:$48 sps:$4 sm:$0xff]  }
 0x407   :  { %10300 = vmatpush1.bf16.msra.mxu0 %v16165_v40  ;;  %v16198_v40 = vld [vmem:[#allocation7 + $0x12e8] ss:$48 sps:$4 sm:$0xff]  }
 0x408   :  { %10978 = vmatpush1.bf16.msra.mxu1 %v16168_v25  ;;  %10301 = vmatprep.subr.bf16.mxu0 %v16173_v43  ;;  %v16203_v25 = vld [vmem:[#allocation7 + $0x1344] ss:$48 sps:$4 sm:$0xff]   ;;  %v16206_v43 = vld [vmem:[#allocation7 + $0x134c] ss:$48 sps:$4 sm:$0xff]  }
 0x409   :  { %10979 = vmatprep.subr.bf16.mxu1 %v16176_v30  ;;  %v18291_v62 = vld [vmem:[#allocation36_spill] sm:$0xff]  ;;  %v16201_v30 = vld [vmem:[#allocation7 + $0x1340] ss:$48 sps:$4 sm:$0xff]  }
 0x40a   :  { %10263 = vmatmul.mubr.bf16.gmra.mrb[92].mxu0 %v18287_v49 }
 0x40b   :  { %10941 = vmatmul.mubr.bf16.gmra.mrb[92].mxu1 %v18287_v49  ;;  %10302 = vmatpush1.bf16.msra.mxu0 %v16171_v15  ;;  %v16204_v15 = vld [vmem:[#allocation7 + $0x1348] ss:$48 sps:$4 sm:$0xff]   ;;  %v18293_v49 = vld [vmem:[#allocation97_spill] sm:$0xff] }
 0x40c   :  { %10980 = vmatpush1.bf16.msra.mxu1 %v16174_v34  ;;  %10303 = vmatprep.subr.bf16.mxu0 %v16179_v50  ;;  %v16209_v34 = vld [vmem:[#allocation7 + $0x13a4] ss:$48 sps:$4 sm:$0xff]  }
 0x40d   :  { %10981 = vmatprep.subr.bf16.mxu1 %v16182_v60  ;;  %10305 = vmatprep.mubr.bf16.mxu0 %v18288_v14  ;;  %v18292_v50 = vld [vmem:[#allocation37_spill] sm:$0xff] }
 0x40e   :  { %10983 = vmatprep.mubr.bf16.mxu1 %v18288_v14  ;;  %v16212_v60 = vld [vmem:[#allocation7 + $0x13ac] ss:$48 sps:$4 sm:$0xff]   ;;  %v1537_v14 = vsub.s32 5, %v18293_v49 }
 0x40f   :  { %10304 = vmatpush1.bf16.msra.mxu0 %v16177_v16  ;;  %v1533_v16 = vsub.s32 4, %v18293_v49 }
 0x410   :  { %10982 = vmatpush1.bf16.msra.mxu1 %v16180_v59  ;;  %10386 = vmatprep.subr.bf16.mxu0 %v16185_v23  ;;  %v16207_v59 = vld [vmem:[#allocation7 + $0x13a0] ss:$48 sps:$4 sm:$0xff]   ;;  %v1541_v23 = vsub.s32 6, %v18293_v49 }
 0x411   :  { %11064 = vmatprep.subr.bf16.mxu1 %v16188_v12  ;;  %v16210_v12 = vld [vmem:[#allocation7 + $0x13a8] ss:$48 sps:$4 sm:$0xff]  }
 0x412   :  { %10306 = vmatmul.mubr.bf16.vlgmr.msra.gmra.mrb[64].mxu0 %v18289_v10 }
 0x413   :  { %10984 = vmatmul.mubr.bf16.vlgmr.msra.gmra.mrb[64].mxu1 %v18289_v10  ;;  %10387 = vmatpush1.bf16.msra.mxu0 %v16183_v0  ;;  %v1545_v0 = vsub.s32 7, %v18293_v49  ;;  %v16471_v10 = vld [vmem:[#allocation8] sm:$0xff] }
 0x414   :  { %11065 = vmatpush1.bf16.msra.mxu1 %v16186_v42  ;;  %10388 = vmatprep.subr.bf16.mxu0 %v16191_v28  ;;  %v16215_v42 = vld [vmem:[#allocation7 + $0x1404] ss:$48 sps:$4 sm:$0xff]   ;;  %v16218_v28 = vld [vmem:[#allocation7 + $0x140c] ss:$48 sps:$4 sm:$0xff]  }
 0x415   :  { %11066 = vmatprep.subr.bf16.mxu1 %v16194_v51  ;;  %10315 = vmatprep.mubr.bf16.mxu0 %v18290_v17  ;;  %v18294_v51 = vld [vmem:[#allocation38_spill] sm:$0xff] }
 0x416   :  { %10993 = vmatprep.mubr.bf16.mxu1 %v18290_v17  ;;  %v16213_v17 = vld [vmem:[#allocation7 + $0x1400] ss:$48 sps:$4 sm:$0xff]  }
 0x417   :  { %10389 = vmatpush1.bf16.msra.mxu0 %v16189_v36  ;;  %v17475_v36 = vrot.slane %v16471_v10, %v1533_v16  ;;  %v11692_v16 = vld [vmem:[#allocation2 + $0x28] sm:$0xff] }
 0x418   :  { %11067 = vmatpush1.bf16.msra.mxu1 %v16192_v48  ;;  %10390 = vmatprep.subr.bf16.mxu0 %v16197_v37  ;;  %v17478_v48 = vrot.slane %v16471_v10, %v1541_v23  ;;  %v17480_v37 = vrot.slane %v16471_v10, %v1537_v14 }
 0x419   :  { %11068 = vmatprep.subr.bf16.mxu1 %v16200_v53  ;;  %v17482_v53 = vrot.slane %v16471_v10, %v1545_v0 }
 0x41a   :  { %10316 = vmatmul.mubr.bf16.gmra.mrb[68].mxu0 %v18291_v62 }
 0x41b   :  { %10994 = vmatmul.mubr.bf16.gmra.mrb[68].mxu1 %v18291_v62  ;;  %10391 = vmatpush1.bf16.msra.mxu0 %v16195_v8  ;;  %v16216_v8 = vld [vmem:[#allocation7 + $0x1408] ss:$48 sps:$4 sm:$0xff]   ;;  %v18295_v62 = vld [vmem:[#allocation39_spill] sm:$0xff] }
 0x41c   :  { %11069 = vmatpush1.bf16.msra.mxu1 %v16198_v40  ;;  %10392 = vmatprep.subr.bf16.mxu0 %v16203_v25  ;;  %v16221_v40 = vld [vmem:[#allocation7 + $0x1464] ss:$48 sps:$4 sm:$0xff]  }
 0x41d   :  { %11070 = vmatprep.subr.bf16.mxu1 %v16206_v43  ;;  %10325 = vmatprep.mubr.bf16.mxu0 %v18292_v50  ;;  %v11691_v43 = vld [vmem:[#allocation2 + $0x20] sm:$0xff] }
 0x41e   :  { %11003 = vmatprep.mubr.bf16.mxu1 %v18292_v50  ;;  %v11693_v50 = vld [vmem:[#allocation2 + $0x30] sm:$0xff] }
 0x41f   :  { %10393 = vmatpush1.bf16.msra.mxu0 %v16201_v30  ;;  %v16224_v30 = vld [vmem:[#allocation7 + $0x146c] ss:$48 sps:$4 sm:$0xff]  }
 0x420   :  { %11071 = vmatpush1.bf16.msra.mxu1 %v16204_v15  ;;  %10394 = vmatprep.subr.bf16.mxu0 %v16209_v34 }
 0x421   :  { %11072 = vmatprep.subr.bf16.mxu1 %v16212_v60 }
 0x422   :  { %10326 = vmatmul.mubr.bf16.gmra.mrb[72].mxu0 %v18294_v51 }
 0x423   :  { %11004 = vmatmul.mubr.bf16.gmra.mrb[72].mxu1 %v18294_v51  ;;  %10395 = vmatpush1.bf16.msra.mxu0 %v16207_v59  ;;  %v11694_v59 = vld [vmem:[#allocation2 + $0x38] sm:$0xff]  ;;  %v11696_v51 = vld [vmem:[#allocation2 + $0x88] sm:$0xff] }
 0x424   :  { %11073 = vmatpush1.bf16.msra.mxu1 %v16210_v12  ;;  %10396 = vmatprep.subr.bf16.mxu0 %v16215_v42  ;;  %v11695_v42 = vld [vmem:[#allocation2 + $0x80] sm:$0xff] }
 0x425   :  { %v9290_v25 = vpop.f32.mrb[32].mxu0  ;;  %11074 = vmatprep.subr.bf16.mxu1 %v16218_v28  ;;  %10335 = vmatprep.mubr.bf16.mxu0 %v18295_v62  ;;  %v11697_v28 = vld [vmem:[#allocation2 + $0x90] sm:$0xff] }
 0x426   :  { %v13646_v15 = vadd.f32 %v9290_v25, %v17475_v36  ;;  %v9968_v34 = vpop.f32.mrb[32].mxu1  ;;  %v9292_v60 = vpop.f32.mrb[33].mxu0  ;;  %11013 = vmatprep.mubr.bf16.mxu1 %v18295_v62  ;;  %v16222_v62 = vld [vmem:[#allocation7 + $0x1468] ss:$48 sps:$4 sm:$0xff]  }
 0x427   :  { %v13678_v23 = vadd.f32 %v9968_v34, %v17478_v48  ;;  %v13647_v14 = vadd.f32 %v9292_v60, %v17480_v37  ;;  %v9970_v12 = vpop.f32.mrb[33].mxu1  ;;  %v9294_v0 = vpop.f32.mrb[34].mxu0  ;;  %10397 = vmatpush1.bf16.msra.mxu0 %v16213_v17  ;;  %v16227_v17 = vld [vmem:[#allocation7 + $0x14c4] ss:$48 sps:$4 sm:$0xff]  }
 0x428   :  { %v11755_v10 = vsub.f32 %v11691_v43, %v13646_v15  ;;  %v13679_v25 = vadd.f32 %v9970_v12, %v17482_v53  ;;  %v13648_v49 = vadd.f32 %v9294_v0, %v17475_v36  ;;  %v9972_v57 = vpop.f32.mrb[34].mxu1  ;;  %11075 = vmatpush1.bf16.msra.mxu1 %v16216_v8  ;;  %v9296_v2 = vpop.f32.mrb[35].mxu0  ;;  %10398 = vmatprep.subr.bf16.mxu0 %v16221_v40  ;;  %v16230_v43 = vld [vmem:[#allocation7 + $0x14cc] ss:$48 sps:$4 sm:$0xff]  }
 0x429   :  { %v11757_v34 = vsub.f32 %v11693_v50, %v13678_v23  ;;  %v11756_v1 = vsub.f32 %v11692_v16, %v13647_v14  ;;  %v13680_v60 = vadd.f32 %v9972_v57, %v17478_v48  ;;  %v13649_v46 = vadd.f32 %v9296_v2, %v17480_v37  ;;  %v9974_v44 = vpop.f32.mrb[35].mxu1  ;;  %11076 = vmatprep.subr.bf16.mxu1 %v16224_v30  ;;  %v18296_v8 = vld [vmem:[#allocation40_spill] sm:$0xff]  ;;  %v16225_v2 = vld [vmem:[#allocation7 + $0x14c0] ss:$48 sps:$4 sm:$0xff]  }
 0x42a   :  { %v11819_v15 = vmul.f32 %v11755_v10, %v11755_v10  ;;  %v11758_v12 = vsub.f32 %v11694_v59, %v13679_v25  ;;  %v11759_v26 = vsub.f32 %v11695_v42, %v13648_v49  ;;  %v13681_v0 = vadd.f32 %v9974_v44, %v17482_v53  ;;  %10336 = vmatmul.mubr.bf16.gmra.mrb[76].mxu0 %v18296_v8  ;;  %v11698_v50 = vld [vmem:[#allocation2 + $0x98] sm:$0xff]  ;;  %v11699_v44 = vld [vmem:[#allocation2 + $0xe0] sm:$0xff]  ;;  %v11700_v10 = vld [vmem:[#allocation2 + $0xe8] sm:$0xff] }
 0x42b   :  { %v11820_v54 = vmul.f32 %v11756_v1, %v11756_v1  ;;  %v11761_v40 = vsub.f32 %v11697_v28, %v13680_v60  ;;  %v11760_v39 = vsub.f32 %v11696_v51, %v13649_v46  ;;  %11014 = vmatmul.mubr.bf16.gmra.mrb[76].mxu1 %v18296_v8  ;;  %v11821_v57 = vmul.f32 %v11757_v34, %v11757_v34  ;;  %v16228_v30 = vld [vmem:[#allocation7 + $0x14c8] ss:$48 sps:$4 sm:$0xff]   ;;  %v16233_v1 = vld [vmem:[#allocation7 + $0x1524] ss:$48 sps:$4 sm:$0xff]  }
 0x42c   :  { %v11823_v16 = vmul.f32 %v11759_v26, %v11759_v26  ;;  %10399 = vmatpush1.bf16.msra.mxu0 %v16219_v7  ;;  %11077 = vmatpush1.bf16.msra.mxu1 %v16222_v62  ;;  %v17496_v14 = vmul.f32 %v11758_v12, %v11758_v12  ;;  %v11762_v46 = vsub.f32 %v11698_v50, %v13681_v0  ;;  %v11701_v26 = vld [vmem:[#allocation2 + $0xf0] sm:$0xff]  ;;  %v11702_v25 = vld [vmem:[#allocation2 + $0xf8] sm:$0xff]  ;;  %v11704_v12 = vld [vmem:[#allocation2 + $0x148] sm:$0xff] }
 0x42d   :  { %v11883_v23 = vadd.f32 %v11820_v54, %v11819_v15  ;;  %v11824_v49 = vmul.f32 %v11760_v39, %v11760_v39  ;;  %v9300_v59 = vpop.f32.mrb[36].mxu0  ;;  %10400 = vmatprep.subr.bf16.mxu0 %v16227_v17  ;;  %11078 = vmatprep.subr.bf16.mxu1 %v16230_v43  ;;  %v17498_v42 = vmul.f32 %v11761_v40, %v11761_v40  ;;  %v18297_v62 = vld [vmem:[#allocation41_spill] sm:$0xff]  ;;  %v11705_v15 = vld [vmem:[#allocation2 + $0x150] sm:$0xff] }
 0x42e   :  { %v13650_v28 = vadd.f32 %v9300_v59, %v17475_v36  ;;  %v9978_v51 = vpop.f32.mrb[36].mxu1  ;;  %v9302_v7 = vpop.f32.mrb[37].mxu0  ;;  %10345 = vmatprep.mubr.bf16.mxu0 %v18297_v62  ;;  %11023 = vmatprep.mubr.bf16.mxu1 %v18297_v62  ;;  %v11703_v43 = vld [vmem:[#allocation2 + $0x140] sm:$0xff]  ;;  %v11826_v13 = vmul.f32 %v11762_v46, %v11762_v46 }
 0x42f   :  { %v11888_v39 = vadd.f32 %v11824_v49, %v11823_v16  ;;  %v13682_v54 = vadd.f32 %v9978_v51, %v17478_v48  ;;  %v13651_v34 = vadd.f32 %v9302_v7, %v17480_v37  ;;  %v9980_v60 = vpop.f32.mrb[37].mxu1  ;;  %v9304_v17 = vpop.f32.mrb[38].mxu0  ;;  %v11884_v0 = vadd.f32 %v11883_v23, %v11821_v57  ;;  %v16231_v16 = vld [vmem:[#allocation7 + $0x1520] ss:$48 sps:$4 sm:$0xff]   ;;  %v16236_v49 = vld [vmem:[#allocation7 + $0x152c] ss:$48 sps:$4 sm:$0xff]  }
 0x430   :  { %v11763_v8 = vsub.f32 %v11699_v44, %v13650_v28  ;;  %v13683_v40 = vadd.f32 %v9980_v60, %v17482_v53  ;;  %v13652_v50 = vadd.f32 %v9304_v17, %v17475_v36  ;;  %v9982_v59 = vpop.f32.mrb[38].mxu1  ;;  %10401 = vmatpush1.bf16.msra.mxu0 %v16225_v2  ;;  %11079 = vmatpush1.bf16.msra.mxu1 %v16228_v30  ;;  %v9306_v62 = vpop.f32.mrb[39].mxu0  ;;  %v16234_v57 = vld [vmem:[#allocation7 + $0x1528] ss:$48 sps:$4 sm:$0xff]   ;;  %v16239_v30 = vld [vmem:[#allocation7 + $0x1584] ss:$48 sps:$4 sm:$0xff]  }
 0x431   :  { %v11765_v51 = vsub.f32 %v11701_v26, %v13682_v54  ;;  %v11764_v41 = vsub.f32 %v11700_v10, %v13651_v34  ;;  %v13684_v7 = vadd.f32 %v9982_v59, %v17478_v48  ;;  %v13653_v47 = vadd.f32 %v9306_v62, %v17480_v37  ;;  %v9984_v6 = vpop.f32.mrb[39].mxu1  ;;  %10402 = vmatprep.subr.bf16.mxu0 %v16233_v1  ;;  %v11706_v17 = vld [vmem:[#allocation2 + $0x158] sm:$0xff]  ;;  %v18298_v2 = vld [vmem:[#allocation42_spill] sm:$0xff]  ;;  %v11709_v62 = vld [vmem:[#allocation2 + $0x1b0] sm:$0xff] }
 0x432   :  { %v11827_v23 = vmul.f32 %v11763_v8, %v11763_v8  ;;  %v11766_v44 = vsub.f32 %v11702_v25, %v13683_v40  ;;  %v11767_v28 = vsub.f32 %v11703_v43, %v13652_v50  ;;  %v13685_v60 = vadd.f32 %v9984_v6, %v17482_v53  ;;  %10346 = vmatmul.mubr.bf16.gmra.mrb[80].mxu0 %v18298_v2  ;;  %v16237_v25 = vld [vmem:[#allocation7 + $0x1580] ss:$48 sps:$4 sm:$0xff]  }
 0x433   :  { %v11828_v26 = vmul.f32 %v11764_v41, %v11764_v41  ;;  %v11769_v10 = vsub.f32 %v11705_v15, %v13684_v7  ;;  %v11768_v54 = vsub.f32 %v11704_v12, %v13653_v47  ;;  %11024 = vmatmul.mubr.bf16.gmra.mrb[80].mxu1 %v18298_v2  ;;  %v17512_v34 = vmul.f32 %v11765_v51, %v11765_v51  ;;  %v11707_v15 = vld [vmem:[#allocation2 + $0x1a0] sm:$0xff]  ;;  %v16240_v47 = vld [vmem:[#allocation7 + $0x1588] ss:$48 sps:$4 sm:$0xff]  }
 0x434   :  { %v17514_v1 = vmul.f32 %v11766_v44, %v11766_v44  ;;  %v11831_v8 = vmul.f32 %v11767_v28, %v11767_v28  ;;  %11080 = vmatprep.subr.bf16.mxu1 %v16236_v49  ;;  %10403 = vmatpush1.bf16.msra.mxu0 %v16231_v16  ;;  %v11770_v40 = vsub.f32 %v11706_v17, %v13685_v60  ;;  %v11708_v49 = vld [vmem:[#allocation2 + $0x1a8] sm:$0xff]  ;;  %v11711_v28 = vld [vmem:[#allocation2 + $0x200] sm:$0xff] }
 0x435   :  { %v17516_v6 = vadd.f32 %v11828_v26, %v11827_v23  ;;  %v11832_v43 = vmul.f32 %v11768_v54, %v11768_v54  ;;  %11081 = vmatpush1.bf16.msra.mxu1 %v16234_v57  ;;  %v11885_v46 = vadd.f32 %v11884_v0, %v17496_v14  ;;  %v9310_v41 = vpop.f32.mrb[40].mxu0  ;;  %v17519_v12 = vmul.f32 %v11769_v10, %v11769_v10  ;;  %v11710_v23 = vld [vmem:[#allocation2 + $0x1b8] sm:$0xff]  ;;  %v18299_v60 = vld [vmem:[#allocation43_spill] sm:$0xff] }
 0x436   :  { %v13654_v50 = vadd.f32 %v9310_v41, %v17475_v36  ;;  %v9988_v59 = vpop.f32.mrb[40].mxu1  ;;  %v9312_v51 = vpop.f32.mrb[41].mxu0  ;;  %10404 = vmatprep.subr.bf16.mxu0 %v16239_v30  ;;  %11082 = vmatprep.subr.bf16.mxu1 %v16242_v38  ;;  %v11889_v16 = vadd.f32 %v11888_v39, %v17498_v42  ;;  %v11713_v42 = vld [vmem:[#allocation2 + $0x210] sm:$0xff]  ;;  %v11712_v10 = vld [vmem:[#allocation2 + $0x208] sm:$0xff] }
 0x437   :  { %v17523_v7 = vadd.f32 %v11832_v43, %v11831_v8  ;;  %11886 = vadd.xlane.f32.xlu1 %v11885_v46  ;;  %v13686_v14 = vadd.f32 %v9988_v59, %v17478_v48  ;;  %v13655_v0 = vadd.f32 %v9312_v51, %v17480_v37  ;;  %v9990_v57 = vpop.f32.mrb[41].mxu1  ;;  %v9314_v44 = vpop.f32.mrb[42].mxu0  ;;  %10355 = vmatprep.mubr.bf16.mxu0 %v18299_v60  ;;  %v16245_v54 = vld [vmem:[#allocation7 + $0x15e4] ss:$48 sps:$4 sm:$0xff]  }
 0x438   :  { %v11771_v17 = vsub.f32 %v11707_v15, %v13654_v50  ;;  %v13687_v2 = vadd.f32 %v9990_v57, %v17482_v53  ;;  %v13656_v38 = vadd.f32 %v9314_v44, %v17475_v36  ;;  %v9992_v30 = vpop.f32.mrb[42].mxu1  ;;  %10405 = vmatpush1.bf16.msra.mxu0 %v16237_v25  ;;  %v11890_v39 = vadd.f32 %v11889_v16, %v11826_v13  ;;  %v9316_v26 = vpop.f32.mrb[43].mxu0  ;;  %v16248_v15 = vld [vmem:[#allocation7 + $0x15ec] ss:$48 sps:$4 sm:$0xff]   ;;  %v16243_v13 = vld [vmem:[#allocation7 + $0x15e0] ss:$48 sps:$4 sm:$0xff]  }
 0x439   :  { %v11773_v8 = vsub.f32 %v11709_v62, %v13686_v14  ;;  %v11772_v43 = vsub.f32 %v11708_v49, %v13655_v0  ;;  %v13688_v46 = vadd.f32 %v9992_v30, %v17478_v48  ;;  %11083 = vmatpush1.bf16.msra.mxu1 %v16240_v47  ;;  %v13657_v41 = vadd.f32 %v9316_v26, %v17480_v37  ;;  %v9994_v59 = vpop.f32.mrb[43].mxu1  ;;  %v16246_v25 = vld [vmem:[#allocation7 + $0x15e8] ss:$48 sps:$4 sm:$0xff]   ;;  %v16251_v14 = vld [vmem:[#allocation7 + $0x1644] ss:$48 sps:$4 sm:$0xff]  }
 0x43a   :  { %v11835_v50 = vmul.f32 %v11771_v17, %v11771_v17  ;;  %v11774_v51 = vsub.f32 %v11710_v23, %v13687_v2  ;;  %v11775_v57 = vsub.f32 %v11711_v28, %v13656_v38  ;;  %v13689_v44 = vadd.f32 %v9994_v59, %v17482_v53  ;;  %11033 = vmatprep.mubr.bf16.mxu1 %v18299_v60  ;;  %v16254_v0 = vld [vmem:[#allocation7 + $0x164c] ss:$48 sps:$4 sm:$0xff]  }
 0x43b   :  { %v17534_v16 = vmul.f32 %v11770_v40, %v11770_v40  ;;  %v11836_v62 = vmul.f32 %v11772_v43, %v11772_v43  ;;  %v11777_v49 = vsub.f32 %v11713_v42, %v13688_v46  ;;  %11891 = vadd.xlane.f32.xlu1 %v11890_v39  ;;  %v11776_v47 = vsub.f32 %v11712_v10, %v13657_v41  ;;  %v18300_v28 = vld [vmem:[#allocation44_spill] sm:$0xff]  ;;  %v11715_v42 = vld [vmem:[#allocation2 + $0x260] sm:$0xff]  ;;  %v11716_v46 = vld [vmem:[#allocation2 + $0x268] sm:$0xff] }
 0x43c   :  { %v17536_v30 = vmul.f32 %v11773_v8, %v11773_v8  ;;  %v17538_v17 = vmul.f32 %v11774_v51, %v11774_v51  ;;  %v11839_v23 = vmul.f32 %v11775_v57, %v11775_v57  ;;  %10356 = vmatmul.mubr.bf16.gmra.mrb[84].mxu0 %v18300_v28  ;;  %10406 = vmatprep.subr.bf16.mxu0 %v16245_v54  ;;  %v11717_v54 = vld [vmem:[#allocation2 + $0x270] sm:$0xff]  ;;  %v11718_v51 = vld [vmem:[#allocation2 + $0x278] sm:$0xff] }
 0x43d   :  { %v17541_v2 = vadd.f32 %v11836_v62, %v11835_v50  ;;  %v11840_v60 = vmul.f32 %v11776_v47, %v11776_v47  ;;  %v11778_v38 = vsub.f32 %v11714_v5, %v13689_v44  ;;  %11034 = vmatmul.mubr.bf16.gmra.mrb[84].mxu1 %v18300_v28  ;;  %11084 = vmatprep.subr.bf16.mxu1 %v16248_v15  ;;  %v9320_v40 = vpop.f32.mrb[44].mxu0  ;;  %v16249_v41 = vld [vmem:[#allocation7 + $0x1640] ss:$48 sps:$4 sm:$0xff]   ;;  %v16252_v57 = vld [vmem:[#allocation7 + $0x1648] ss:$48 sps:$4 sm:$0xff]  }
 0x43e   :  { %v17544_v39 = vmul.f32 %v11777_v49, %v11777_v49  ;;  %10407 = vmatpush1.bf16.msra.mxu0 %v16243_v13  ;;  %11085 = vmatpush1.bf16.msra.mxu1 %v16246_v25  ;;  %v11894_v26 = vadd.f32 %v17516_v6, %v17512_v34  ;;  %v13658_v10 = vadd.f32 %v9320_v40, %v17475_v36  ;;  %v9998_v8 = vpop.f32.mrb[44].mxu1  ;;  %v9322_v43 = vpop.f32.mrb[45].mxu0  ;;  %v11719_v34 = vld [vmem:[#allocation2 + $0x2c0] sm:$0xff] }
 0x43f   :  { %v17549_v5 = vadd.f32 %v11840_v60, %v11839_v23  ;;  %v13690_v59 = vadd.f32 %v9998_v8, %v17478_v48  ;;  %v13659_v15 = vadd.f32 %v9322_v43, %v17480_v37  ;;  %v10000_v50 = vpop.f32.mrb[45].mxu1  ;;  %10408 = vmatprep.subr.bf16.mxu0 %v16251_v14  ;;  %11086 = vmatprep.subr.bf16.mxu1 %v16254_v0  ;;  %v9324_v44 = vpop.f32.mrb[46].mxu0  ;;  %v18301_v23 = vld [vmem:[#allocation45_spill] sm:$0xff]  ;;  %v11721_v14 = vld [vmem:[#allocation2 + $0x2d0] sm:$0xff]  ;;  %v11720_v43 = vld [vmem:[#allocation2 + $0x2c8] sm:$0xff] }
 0x440   :  { %v11895_v6 = vadd.f32 %v11894_v26, %v17514_v1  ;;  %v11779_v13 = vsub.f32 %v11715_v42, %v13658_v10  ;;  %v13691_v25 = vadd.f32 %v10000_v50, %v17482_v53  ;;  %v13660_v62 = vadd.f32 %v9324_v44, %v17475_v36  ;;  %v10002_v49 = vpop.f32.mrb[46].mxu1  ;;  %v9326_v47 = vpop.f32.mrb[47].mxu0  ;;  %10365 = vmatprep.mubr.bf16.mxu0 %v18301_v23  ;;  %v16257_v1 = vld [vmem:[#allocation7 + $0x16a4] ss:$48 sps:$4 sm:$0xff]   ;;  %v16260_v50 = vld [vmem:[#allocation7 + $0x16ac] ss:$48 sps:$4 sm:$0xff]  }
 0x441   :  { %v11781_v28 = vsub.f32 %v11717_v54, %v13690_v59  ;;  %v11780_v60 = vsub.f32 %v11716_v46, %v13659_v15  ;;  %v13692_v40 = vadd.f32 %v10002_v49, %v17478_v48  ;;  %v11899_v0 = vadd.f32 %v17523_v7, %v17519_v12  ;;  %v10004_v8 = vpop.f32.mrb[47].mxu1  ;;  %11043 = vmatprep.mubr.bf16.mxu1 %v18301_v23  ;;  %v11722_v15 = vld [vmem:[#allocation2 + $0x2d8] sm:$0xff]  ;;  %v16255_v12 = vld [vmem:[#allocation7 + $0x16a0] ss:$48 sps:$4 sm:$0xff]  }
 0x442   :  { %11896 = vadd.xlane.f32.xlu1 %v11895_v6  ;;  %v11843_v42 = vmul.f32 %v11779_v13, %v11779_v13  ;;  %v11782_v26 = vsub.f32 %v11718_v51, %v13691_v25  ;;  %v11783_v10 = vsub.f32 %v11719_v34, %v13660_v62  ;;  %10409 = vmatpush1.bf16.msra.mxu0 %v16249_v41  ;;  %v16258_v7 = vld [vmem:[#allocation7 + $0x16a8] ss:$48 sps:$4 sm:$0xff]   ;;  %v16263_v34 = vld [vmem:[#allocation7 + $0x1704] ss:$48 sps:$4 sm:$0xff]   ;;  %v16266_v62 = vld [vmem:[#allocation7 + $0x170c] ss:$48 sps:$4 sm:$0xff]  }
 0x443   :  { %v11842_v44 = vmul.f32 %v11778_v38, %v11778_v38  ;;  %v17561_v54 = vmul.f32 %v11781_v28, %v11781_v28  ;;  %v11844_v46 = vmul.f32 %v11780_v60, %v11780_v60  ;;  %11087 = vmatpush1.bf16.msra.mxu1 %v16252_v57  ;;  %v11900_v59 = vadd.f32 %v11899_v0, %v17534_v16  ;;  %v18302_v41 = vld [vmem:[#allocation46_spill] sm:$0xff] }
 0x444   :  { %v17564_v49 = vmul.f32 %v11782_v26, %v11782_v26  ;;  %v11785_v23 = vsub.f32 %v11721_v14, %v13692_v40  ;;  %v13661_v6 = vadd.f32 %v9326_v47, %v17480_v37  ;;  %v13693_v51 = vadd.f32 %v10004_v8, %v17482_v53  ;;  %10366 = vmatmul.mubr.bf16.gmra.mrb[88].mxu0 %v18302_v41  ;;  %v11723_v25 = vld [vmem:[#allocation2 + $0x320] sm:$0xff]  ;;  %v11725_v14 = vld [vmem:[#allocation2 + $0x330] sm:$0xff] }
 0x445   :  { %v17569_v38 = vadd.f32 %v11844_v46, %v11843_v42  ;;  %v11847_v13 = vmul.f32 %v11783_v10, %v11783_v10  ;;  %10410 = vmatprep.subr.bf16.mxu0 %v16257_v1  ;;  %11044 = vmatmul.mubr.bf16.gmra.mrb[88].mxu1 %v18302_v41  ;;  %v11904_v16 = vadd.f32 %v17541_v2, %v17536_v30  ;;  %v9330_v57 = vpop.f32.mrb[48].mxu0  ;;  %v11724_v2 = vld [vmem:[#allocation2 + $0x328] sm:$0xff]  ;;  %v16261_v26 = vld [vmem:[#allocation7 + $0x1700] ss:$48 sps:$4 sm:$0xff]  }
 0x446   :  { %11901 = vadd.xlane.f32.xlu1 %v11900_v59  ;;  %v11784_v28 = vsub.f32 %v11720_v43, %v13661_v6  ;;  %v11786_v47 = vsub.f32 %v11722_v15, %v13693_v51  ;;  %11088 = vmatprep.subr.bf16.mxu1 %v16260_v50  ;;  %v13662_v60 = vadd.f32 %v9330_v57, %v17475_v36  ;;  %v10008_v40 = vpop.f32.mrb[48].mxu1  ;;  %v9332_v0 = vpop.f32.mrb[49].mxu0  ;;  %v11726_v15 = vld [vmem:[#allocation2 + $0x338] sm:$0xff] }
 0x447   :  { %10411 = vmatpush1.bf16.msra.mxu0 %v16255_v12  ;;  %11089 = vmatpush1.bf16.msra.mxu1 %v16258_v7  ;;  %v11905_v8 = vadd.f32 %v11904_v16, %v17538_v17  ;;  %v13694_v1 = vadd.f32 %v10008_v40, %v17478_v48  ;;  %v11909_v30 = vadd.f32 %v17549_v5, %v17544_v39  ;;  %v10010_v42 = vpop.f32.mrb[49].mxu1  ;;  %v9334_v10 = vpop.f32.mrb[50].mxu0  ;;  %v16264_v12 = vld [vmem:[#allocation7 + $0x1708] ss:$48 sps:$4 sm:$0xff]   ;;  %v11727_v7 = vld [vmem:[#allocation2 + $0x380] sm:$0xff]  ;;  %v11729_v16 = vld [vmem:[#allocation2 + $0x390] sm:$0xff] }
 0x448   :  { %v17579_v43 = vmul.f32 %v11785_v23, %v11785_v23  ;;  %v11848_v50 = vmul.f32 %v11784_v28, %v11784_v28  ;;  %v11787_v46 = vsub.f32 %v11723_v25, %v13662_v60  ;;  %v13663_v59 = vadd.f32 %v9332_v0, %v17480_v37  ;;  %10412 = vmatprep.subr.bf16.mxu0 %v16263_v34  ;;  %v10012_v17 = vpop.f32.mrb[50].mxu1  ;;  %v9336_v6 = vpop.f32.mrb[51].mxu0 }
 0x449   :  { %v11789_v51 = vsub.f32 %v11725_v14, %v13694_v1  ;;  %v11910_v41 = vadd.f32 %v11909_v30, %v11842_v44  ;;  %v13695_v39 = vadd.f32 %v10010_v42, %v17482_v53  ;;  %11090 = vmatprep.subr.bf16.mxu1 %v16266_v62  ;;  %v13664_v5 = vadd.f32 %v9334_v10, %v17475_v36  ;;  %v10014_v23 = vpop.f32.mrb[51].mxu1  ;;  %v11728_v14 = vld [vmem:[#allocation2 + $0x388] sm:$0xff]  ;;  %v11730_v44 = vld [vmem:[#allocation2 + $0x398] sm:$0xff]  ;;  %v16269_v1 = vld [vmem:[#allocation7 + $0x1764] ss:$48 sps:$4 sm:$0xff]  }
 0x44a   :  { %v11918_v57 = vadd.f32 %v11848_v50, %v11847_v13  ;;  %11906 = vadd.xlane.f32.xlu1 %v11905_v8  ;;  %v11851_v25 = vmul.f32 %v11787_v46, %v11787_v46  ;;  %v11788_v28 = vsub.f32 %v11724_v2, %v13663_v59  ;;  %v13696_v60 = vadd.f32 %v10012_v17, %v17478_v48  ;;  %v16267_v8 = vld [vmem:[#allocation7 + $0x1760] ss:$48 sps:$4 sm:$0xff]   ;;  %v16272_v10 = vld [vmem:[#allocation7 + $0x176c] ss:$48 sps:$4 sm:$0xff]  }
 0x44b   :  { %v11850_v34 = vmul.f32 %v11786_v47, %v11786_v47  ;;  %11911 = vadd.xlane.f32.xlu0 %v11910_v41  ;;  %v11790_v40 = vsub.f32 %v11726_v15, %v13695_v39  ;;  %v11791_v0 = vsub.f32 %v11727_v7, %v13664_v5  ;;  %10413 = vmatpush1.bf16.msra.mxu0 %v16261_v26  ;;  %v18303_v47 = vld [vmem:[#allocation47_spill] sm:$0xff]  ;;  %v16270_v26 = vld [vmem:[#allocation7 + $0x1768] ss:$48 sps:$4 sm:$0xff]   ;;  %v11731_v15 = vld [vmem:[#allocation2 + $0x3e0] sm:$0xff] }
 0x44c   :  { %v11852_v30 = vmul.f32 %v11788_v28, %v11788_v28  ;;  %v11793_v62 = vsub.f32 %v11729_v16, %v13696_v60  ;;  %11091 = vmatpush1.bf16.msra.mxu1 %v16264_v12  ;;  %v13665_v42 = vadd.f32 %v9336_v6, %v17480_v37  ;;  %v13697_v13 = vadd.f32 %v10014_v23, %v17482_v53  ;;  %v11733_v12 = vld [vmem:[#allocation2 + $0x3f0] sm:$0xff]  ;;  %v16278_v23 = vld [vmem:[#allocation7 + $0x17cc] ss:$48 sps:$4 sm:$0xff]  }
 0x44d   :  { %v17587_v2 = vmul.f32 %v11789_v51, %v11789_v51  ;;  %v17589_v50 = vmul.f32 %v11790_v40, %v11790_v40  ;;  %10375 = vmatprep.mubr.bf16.mxu0 %v18303_v47  ;;  %11053 = vmatprep.mubr.bf16.mxu1 %v18303_v47  ;;  %v11914_v46 = vadd.f32 %v17569_v38, %v17561_v54  ;;  %v9340_v59 = vpop.f32.mrb[52].mxu0  ;;  %v18304_v51 = vld [vmem:[#allocation48_spill] sm:$0xff] }
 0x44e   :  { %v17595_v7 = vadd.f32 %v11852_v30, %v11851_v25  ;;  %v11855_v17 = vmul.f32 %v11791_v0, %v11791_v0  ;;  %v11792_v6 = vsub.f32 %v11728_v14, %v13665_v42  ;;  %v11794_v41 = vsub.f32 %v11730_v44, %v13697_v13  ;;  %10376 = vmatmul.mubr.bf16.gmra.mrb[92].mxu0 %v18304_v51  ;;  %v10018_v39 = vpop.f32.mrb[52].mxu1  ;;  %v9342_v5 = vpop.f32.mrb[53].mxu0  ;;  %v16275_v16 = vld [vmem:[#allocation7 + $0x17c4] ss:$48 sps:$4 sm:$0xff]   ;;  %v11732_v44 = vld [vmem:[#allocation2 + $0x3e8] sm:$0xff] }
 0x44f   :  { %10414 = vmatprep.subr.bf16.mxu0 %v16269_v1  ;;  %11054 = vmatmul.mubr.bf16.gmra.mrb[92].mxu1 %v18304_v51  ;;  %v11915_v28 = vadd.f32 %v11914_v46, %v17564_v49  ;;  %v13666_v54 = vadd.f32 %v9340_v59, %v17475_v36  ;;  %v13698_v38 = vadd.f32 %v10018_v39, %v17478_v48  ;;  %v10020_v25 = vpop.f32.mrb[53].mxu1  ;;  %v9344_v60 = vpop.f32.mrb[54].mxu0  ;;  %v16273_v30 = vld [vmem:[#allocation7 + $0x17c0] ss:$48 sps:$4 sm:$0xff]   ;;  %v11734_v46 = vld [vmem:[#allocation2 + $0x3f8] sm:$0xff] }
 0x450   :  { %v17602_v40 = vmul.f32 %v11793_v62, %v11793_v62  ;;  %v11856_v0 = vmul.f32 %v11792_v6, %v11792_v6  ;;  %11092 = vmatprep.subr.bf16.mxu1 %v16272_v10  ;;  %10415 = vmatpush1.bf16.msra.mxu0 %v16267_v8  ;;  %v11919_v14 = vadd.f32 %v11918_v57, %v17579_v43  ;;  %v10022_v1 = vpop.f32.mrb[54].mxu1  ;;  %v9346_v42 = vpop.f32.mrb[55].mxu0  ;;  %v16276_v59 = vld [vmem:[#allocation7 + $0x17c8] ss:$48 sps:$4 sm:$0xff]   ;;  %v11735_v43 = vld [vmem:[#allocation2 + $0x440] sm:$0xff] }
 0x451   :  { %11093 = vmatpush1.bf16.msra.mxu1 %v16270_v26  ;;  %11916 = vadd.xlane.f32.xlu1 %v11915_v28  ;;  %v11795_v49 = vsub.f32 %v11731_v15, %v13666_v54  ;;  %v11797_v13 = vsub.f32 %v11733_v12, %v13698_v38  ;;  %v13667_v47 = vadd.f32 %v9342_v5, %v17480_v37  ;;  %v10024_v51 = vpop.f32.mrb[55].mxu1  ;;  %v16281_v57 = vld [vmem:[#allocation7 + $0x1824] ss:$48 sps:$4 sm:$0xff]   ;;  %v16284_v8 = vld [vmem:[#allocation7 + $0x182c] ss:$48 sps:$4 sm:$0xff]  }
 0x452   :  { %v11928_v62 = vadd.f32 %v11856_v0, %v11855_v17  ;;  %v11920_v39 = vadd.f32 %v11919_v14, %v11850_v34  ;;  %v13699_v10 = vadd.f32 %v10020_v25, %v17482_v53  ;;  %10416 = vmatprep.subr.bf16.mxu0 %v16275_v16  ;;  %11094 = vmatprep.subr.bf16.mxu1 %v16278_v23  ;;  %v11737_v12 = vld [vmem:[#allocation2 + $0x450] sm:$0xff]  ;;  %v11736_v5 = vld [vmem:[#allocation2 + $0x448] sm:$0xff]  ;;  %v18305_v54 = vld [vmem:[#allocation49_spill] sm:$0xff] }
 0x453   :  { %v17607_v6 = vmul.f32 %v11794_v41, %v11794_v41  ;;  %v11859_v26 = vmul.f32 %v11795_v49, %v11795_v49  ;;  %v11796_v28 = vsub.f32 %v11732_v44, %v13667_v47  ;;  %v13668_v15 = vadd.f32 %v9344_v60, %v17475_v36  ;;  %10418 = vmatprep.mubr.bf16.mxu0 %v18305_v54  ;;  %v16279_v23 = vld [vmem:[#allocation7 + $0x1820] ss:$48 sps:$4 sm:$0xff]   ;;  %v11738_v0 = vld [vmem:[#allocation2 + $0x458] sm:$0xff] }
 0x454   :  { %11921 = vadd.xlane.f32.xlu0 %v11920_v39  ;;  %v11798_v17 = vsub.f32 %v11734_v46, %v13699_v10  ;;  %v13700_v34 = vadd.f32 %v10022_v1, %v17478_v48  ;;  %10417 = vmatpush1.bf16.msra.mxu0 %v16273_v30  ;;  %v13669_v16 = vadd.f32 %v9346_v42, %v17480_v37  ;;  %v16282_v60 = vld [vmem:[#allocation7 + $0x1828] ss:$48 sps:$4 sm:$0xff]   ;;  %v16287_v42 = vld [vmem:[#allocation7 + $0x1884] ss:$48 sps:$4 sm:$0xff]  }
 0x455   :  { %v11860_v38 = vmul.f32 %v11796_v28, %v11796_v28  ;;  %v11799_v25 = vsub.f32 %v11735_v43, %v13668_v15  ;;  %11095 = vmatpush1.bf16.msra.mxu1 %v16276_v59  ;;  %v13701_v41 = vadd.f32 %v10024_v51, %v17482_v53  ;;  %11096 = vmatprep.mubr.bf16.mxu1 %v18305_v54  ;;  %v9350_v14 = vpop.f32.mrb[56].mxu0  ;;  %v18306_v51 = vld [vmem:[#allocation50_spill] sm:$0xff] }
 0x456   :  { %v17615_v44 = vmul.f32 %v11797_v13, %v11797_v13  ;;  %v11801_v49 = vsub.f32 %v11737_v12, %v13700_v34  ;;  %v11800_v47 = vsub.f32 %v11736_v5, %v13669_v16  ;;  %10499 = vmatprep.subr.bf16.mxu0 %v16281_v57  ;;  %11177 = vmatprep.subr.bf16.mxu1 %v16284_v8  ;;  %v10028_v30 = vpop.f32.mrb[56].mxu1  ;;  %v9352_v1 = vpop.f32.mrb[57].mxu0  ;;  %v11739_v43 = vld [vmem:[#allocation2 + $0x4a0] sm:$0xff]  ;;  %v16290_v28 = vld [vmem:[#allocation7 + $0x188c] ss:$48 sps:$4 sm:$0xff]  }
 0x457   :  { %v17617_v46 = vadd.f32 %v11860_v38, %v11859_v26  ;;  %v17619_v39 = vmul.f32 %v11798_v17, %v11798_v17  ;;  %v11863_v59 = vmul.f32 %v11799_v25, %v11799_v25  ;;  %10419 = vmatmul.mubr.bf16.vlgmr.msra.gmra.mrb[64].mxu0 %v18306_v51  ;;  %v11924_v10 = vadd.f32 %v17595_v7, %v17587_v2  ;;  %v10030_v13 = vpop.f32.mrb[57].mxu1  ;;  %v9354_v15 = vpop.f32.mrb[58].mxu0  ;;  %v11741_v26 = vld [vmem:[#allocation2 + $0x4b0] sm:$0xff]  ;;  %v11740_v38 = vld [vmem:[#allocation2 + $0x4a8] sm:$0xff]  ;;  %v11742_v25 = vld [vmem:[#allocation2 + $0x4b8] sm:$0xff] }
 0x458   :  { %v11864_v12 = vmul.f32 %v11800_v47, %v11800_v47  ;;  %v11802_v57 = vsub.f32 %v11738_v0, %v13701_v41  ;;  %11097 = vmatmul.mubr.bf16.vlgmr.msra.gmra.mrb[64].mxu1 %v18306_v51  ;;  %10500 = vmatpush1.bf16.msra.mxu0 %v16279_v23  ;;  %v13670_v8 = vadd.f32 %v9350_v14, %v17475_v36  ;;  %v16285_v5 = vld [vmem:[#allocation7 + $0x1880] ss:$48 sps:$4 sm:$0xff]   ;;  %v10032_v54 = vpop.f32.mrb[58].mxu1  ;;  %v9356_v17 = vpop.f32.mrb[59].mxu0  ;;  %v16288_v41 = vld [vmem:[#allocation7 + $0x1888] ss:$48 sps:$4 sm:$0xff]  }
 0x459   :  { %v17626_v34 = vmul.f32 %v11801_v49, %v11801_v49  ;;  %11178 = vmatpush1.bf16.msra.mxu1 %v16282_v60  ;;  %v11925_v2 = vadd.f32 %v11924_v10, %v17589_v50  ;;  %v13702_v7 = vadd.f32 %v10028_v30, %v17478_v48  ;;  %v11929_v16 = vadd.f32 %v11928_v62, %v17602_v40  ;;  %v10034_v0 = vpop.f32.mrb[59].mxu1  ;;  %v11743_v49 = vld [vmem:[#allocation2 + $0x500] sm:$0xff]  ;;  %v11745_v62 = vld [vmem:[#allocation2 + $0x510] sm:$0xff] }
 0x45a   :  { %v17631_v23 = vadd.f32 %v11864_v12, %v11863_v59  ;;  %v11803_v14 = vsub.f32 %v11739_v43, %v13670_v8  ;;  %v13671_v47 = vadd.f32 %v9352_v1, %v17480_v37  ;;  %v13703_v51 = vadd.f32 %v10030_v13, %v17482_v53  ;;  %10501 = vmatprep.subr.bf16.mxu0 %v16287_v42  ;;  %v11744_v43 = vld [vmem:[#allocation2 + $0x508] sm:$0xff]  ;;  %v16293_v1 = vld [vmem:[#allocation7 + $0x18e4] ss:$48 sps:$4 sm:$0xff]   ;;  %v16291_v8 = vld [vmem:[#allocation7 + $0x18e0] ss:$48 sps:$4 sm:$0xff]  }
 0x45b   :  { %11926 = vadd.xlane.f32.xlu1 %v11925_v2  ;;  %v11805_v60 = vsub.f32 %v11741_v26, %v13702_v7  ;;  %v11930_v50 = vadd.f32 %v11929_v16, %v17607_v6  ;;  %11179 = vmatprep.subr.bf16.mxu1 %v16290_v28  ;;  %v13672_v40 = vadd.f32 %v9354_v15, %v17475_v36  ;;  %v16296_v6 = vld [vmem:[#allocation7 + $0x18ec] ss:$48 sps:$4 sm:$0xff]  }
 0x45c   :  { %v11867_v30 = vmul.f32 %v11803_v14, %v11803_v14  ;;  %v11804_v10 = vsub.f32 %v11740_v38, %v13671_v47  ;;  %v11806_v27 = vsub.f32 %v11742_v25, %v13703_v51  ;;  %v13704_v59 = vadd.f32 %v10032_v54, %v17478_v48  ;;  %10502 = vmatpush1.bf16.msra.mxu0 %v16285_v5  ;;  %v18307_v16 = vld [vmem:[#allocation51_spill] sm:$0xff]  ;;  %v16294_v5 = vld [vmem:[#allocation7 + $0x18e8] ss:$48 sps:$4 sm:$0xff]  }
 0x45d   :  { %v11866_v12 = vmul.f32 %v11802_v57, %v11802_v57  ;;  %11931 = vadd.xlane.f32.xlu0 %v11930_v50  ;;  %v11807_v42 = vsub.f32 %v11743_v49, %v13672_v40  ;;  %11180 = vmatpush1.bf16.msra.mxu1 %v16288_v41  ;;  %v13673_v13 = vadd.f32 %v9356_v17, %v17480_v37  ;;  %v9360_v28 = vpop.f32.mrb[60].mxu0  ;;  %v11746_v14 = vld [vmem:[#allocation2 + $0x518] sm:$0xff]  ;;  %v16299_v47 = vld [vmem:[#allocation7 + $0x1944] ss:$48 sps:$4 sm:$0xff]  }
 0x45e   :  { %v17639_v26 = vmul.f32 %v11805_v60, %v11805_v60  ;;  %v11868_v15 = vmul.f32 %v11804_v10, %v11804_v10  ;;  %v11809_v2 = vsub.f32 %v11745_v62, %v13704_v59  ;;  %v13705_v7 = vadd.f32 %v10034_v0, %v17482_v53  ;;  %10428 = vmatprep.mubr.bf16.mxu0 %v18307_v16  ;;  %v10038_v54 = vpop.f32.mrb[60].mxu1  ;;  %v9362_v38 = vpop.f32.mrb[61].mxu0  ;;  %v11747_v50 = vld [vmem:[#allocation2 + $0x560] sm:$0xff]  ;;  %v16302_v40 = vld [vmem:[#allocation7 + $0x194c] ss:$48 sps:$4 sm:$0xff]  }
 0x45f   :  { %v11871_v57 = vmul.f32 %v11807_v42, %v11807_v42  ;;  %v11808_v25 = vsub.f32 %v11744_v43, %v13673_v13  ;;  %11106 = vmatprep.mubr.bf16.mxu1 %v18307_v16  ;;  %10429 = vmatmul.mubr.bf16.gmra.mrb[68].mxu0 %v18228_v52  ;;  %v11934_v17 = vadd.f32 %v17617_v46, %v17615_v44  ;;  %v10040_v41 = vpop.f32.mrb[61].mxu1  ;;  %v9364_v51 = vpop.f32.mrb[62].mxu0  ;;  %v11748_v43 = vld [vmem:[#allocation2 + $0x568] sm:$0xff]  ;;  %v11751_v16 = vld [vmem:[#allocation2 + $0x5c0] sm:$0xff] }
 0x460   :  { %v17647_v49 = vadd.f32 %v11868_v15, %v11867_v30  ;;  %v17649_v0 = vmul.f32 %v11806_v27, %v11806_v27  ;;  %v17651_v60 = vmul.f32 %v11809_v2, %v11809_v2  ;;  %10503 = vmatprep.subr.bf16.mxu0 %v16293_v1  ;;  %11107 = vmatmul.mubr.bf16.gmra.mrb[68].mxu1 %v18228_v52  ;;  %v10042_v62 = vpop.f32.mrb[62].mxu1  ;;  %v9366_v10 = vpop.f32.mrb[63].mxu0  ;;  %v11749_v30 = vld [vmem:[#allocation2 + $0x570] sm:$0xff]  ;;  %v11750_v2 = vld [vmem:[#allocation2 + $0x578] sm:$0xff] }
 0x461   :  { %v11872_v59 = vmul.f32 %v11808_v25, %v11808_v25  ;;  %11181 = vmatprep.subr.bf16.mxu1 %v16296_v6  ;;  %10504 = vmatpush1.bf16.msra.mxu0 %v16291_v8  ;;  %v11935_v44 = vadd.f32 %v11934_v17, %v17619_v39  ;;  %v13674_v46 = vadd.f32 %v9360_v28, %v17475_v36  ;;  %v16297_v27 = vld [vmem:[#allocation7 + $0x1940] ss:$48 sps:$4 sm:$0xff]   ;;  %v10044_v42 = vpop.f32.mrb[63].mxu1  ;;  %v16300_v6 = vld [vmem:[#allocation7 + $0x1948] ss:$48 sps:$4 sm:$0xff]  }
 0x462   :  { %v11810_v13 = vsub.f32 %v11746_v14, %v13705_v7  ;;  %11182 = vmatpush1.bf16.msra.mxu1 %v16294_v5  ;;  %v13706_v1 = vadd.f32 %v10038_v54, %v17478_v48  ;;  %v11939_v52 = vadd.f32 %v17631_v23, %v17626_v34  ;;  %v13675_v15 = vadd.f32 %v9362_v38, %v17480_v37  ;;  %v11753_v54 = vld [vmem:[#allocation2 + $0x5d0] sm:$0xff]  ;;  %v11752_v14 = vld [vmem:[#allocation2 + $0x5c8] sm:$0xff] }
 0x463   :  { %v11948_v8 = vadd.f32 %v11872_v59, %v11871_v57  ;;  %11936 = vadd.xlane.f32.xlu1 %v11935_v44  ;;  %v11811_v39 = vsub.f32 %v11747_v50, %v13674_v46  ;;  %v13707_v28 = vadd.f32 %v10040_v41, %v17482_v53  ;;  %10505 = vmatprep.subr.bf16.mxu0 %v16299_v47  ;;  %v16305_v50 = vld [vmem:[#allocation7 + $0x19a4] ss:$48 sps:$4 sm:$0xff]   ;;  %v16303_v44 = vld [vmem:[#allocation7 + $0x19a0] ss:$48 sps:$4 sm:$0xff]  }
 0x464   :  { %v11813_v25 = vsub.f32 %v11749_v30, %v13706_v1  ;;  %v11940_v17 = vadd.f32 %v11939_v52, %v11866_v12  ;;  %v11812_v7 = vsub.f32 %v11748_v43, %v13675_v15  ;;  %11183 = vmatprep.subr.bf16.mxu1 %v16302_v40  ;;  %v13676_v5 = vadd.f32 %v9364_v51, %v17475_v36  ;;  %v11754_v12 = vld [vmem:[#allocation2 + $0x5d8] sm:$0xff]  ;;  %v16309_v15 = vld [vmem:[#allocation7 + $0x1a00] ss:$48 sps:$4 sm:$0xff]  }
 0x465   :  { %v11875_v34 = vmul.f32 %v11811_v39, %v11811_v39  ;;  %v11814_v23 = vsub.f32 %v11750_v2, %v13707_v28  ;;  %v13708_v38 = vadd.f32 %v10042_v62, %v17478_v48  ;;  %10506 = vmatpush1.bf16.msra.mxu0 %v16297_v27  ;;  %v13677_v57 = vadd.f32 %v9366_v10, %v17480_v37  ;;  %v16308_v40 = vld [vmem:[#allocation7 + $0x19ac] ss:$48 sps:$4 sm:$0xff]   ;;  %v16306_v48 = vld [vmem:[#allocation7 + $0x19a8] ss:$48 sps:$4 sm:$0xff]   ;;  %v16311_v62 = vld [vmem:[#allocation7 + $0x1a04] ss:$48 sps:$4 sm:$0xff]  }
 0x466   :  { %v11874_v59 = vmul.f32 %v11810_v13, %v11810_v13  ;;  %11941 = vadd.xlane.f32.xlu0 %v11940_v17  ;;  %v11876_v41 = vmul.f32 %v11812_v7, %v11812_v7  ;;  %v11815_v47 = vsub.f32 %v11751_v16, %v13676_v5  ;;  %11184 = vmatpush1.bf16.msra.mxu1 %v16300_v6  ;;  %v16314_v27 = vld [vmem:[#allocation7 + $0x1a0c] ss:$48 sps:$4 sm:$0xff]   ;;  %v16323_v17 = vld [vmem:[#allocation7 + $0x1ac4] ss:$48 sps:$4 sm:$0xff]   ;;  %v16321_v5 = vld [vmem:[#allocation7 + $0x1ac0] ss:$48 sps:$4 sm:$0xff]  }
 0x467   :  { %v11877_v46 = vmul.f32 %v11813_v25, %v11813_v25  ;;  %v11817_v36 = vsub.f32 %v11753_v54, %v13708_v38  ;;  %v11816_v51 = vsub.f32 %v11752_v14, %v13677_v57  ;;  %v13709_v30 = vadd.f32 %v10044_v42, %v17482_v53  ;;  %10438 = vmatprep.mubr.bf16.mxu0 %v18229_v3  ;;  %v16320_v28 = vld [vmem:[#allocation7 + $0x1a6c] ss:$48 sps:$4 sm:$0xff]   ;;  %v16329_v54 = vld [vmem:[#allocation7 + $0x1b24] ss:$48 sps:$4 sm:$0xff]   ;;  %v16333_v57 = vld [vmem:[#allocation7 + $0x1b80] ss:$48 sps:$4 sm:$0xff]  }
 0x468   :  { %v11953_v43 = vadd.f32 %v11876_v41, %v11875_v34  ;;  %v11879_v37 = vmul.f32 %v11815_v47, %v11815_v47  ;;  %11116 = vmatprep.mubr.bf16.mxu1 %v18229_v3  ;;  %10439 = vmatmul.mubr.bf16.gmra.mrb[72].mxu0 %v18230_v18  ;;  %v11944_v10 = vadd.f32 %v17647_v49, %v17639_v26  ;;  %v16312_v26 = vld [vmem:[#allocation7 + $0x1a08] ss:$48 sps:$4 sm:$0xff]   ;;  %v16317_v49 = vld [vmem:[#allocation7 + $0x1a64] ss:$48 sps:$4 sm:$0xff]   ;;  %v16326_v7 = vld [vmem:[#allocation7 + $0x1acc] ss:$48 sps:$4 sm:$0xff]  }
 0x469   :  { %v11878_v13 = vmul.f32 %v11814_v23, %v11814_v23  ;;  %v11880_v1 = vmul.f32 %v11816_v51, %v11816_v51  ;;  %v11818_v52 = vsub.f32 %v11754_v12, %v13709_v30  ;;  %10507 = vmatprep.subr.bf16.mxu0 %v16305_v50  ;;  %11117 = vmatmul.mubr.bf16.gmra.mrb[72].mxu1 %v18230_v18  ;;  %v16332_v14 = vld [vmem:[#allocation7 + $0x1b2c] ss:$48 sps:$4 sm:$0xff]   ;;  %v16327_v34 = vld [vmem:[#allocation7 + $0x1b20] ss:$48 sps:$4 sm:$0xff]   ;;  %v16330_v23 = vld [vmem:[#allocation7 + $0x1b28] ss:$48 sps:$4 sm:$0xff]  }
 0x46a   :  { %11185 = vmatprep.subr.bf16.mxu1 %v16308_v40  ;;  %10508 = vmatpush1.bf16.msra.mxu0 %v16303_v44  ;;  %v11945_v53 = vadd.f32 %v11944_v10, %v17649_v0  ;;  %v11949_v42 = vadd.f32 %v11948_v8, %v17651_v60  ;;  %v11954_v3 = vadd.f32 %v11953_v43, %v11877_v46  ;;  %v16315_v60 = vld [vmem:[#allocation7 + $0x1a60] ss:$48 sps:$4 sm:$0xff]   ;;  %v16318_v8 = vld [vmem:[#allocation7 + $0x1a68] ss:$48 sps:$4 sm:$0xff]   ;;  %v16338_v38 = vld [vmem:[#allocation7 + $0x1b8c] ss:$48 sps:$4 sm:$0xff]  }
 0x46b   :  { %v11881_v2 = vmul.f32 %v11817_v36, %v11817_v36  ;;  %v11958_v6 = vadd.f32 %v11880_v1, %v11879_v37  ;;  %11186 = vmatpush1.bf16.msra.mxu1 %v16306_v48  ;;  %10509 = vmatprep.subr.bf16.mxu0 %v16311_v62  ;;  %v11882_v18 = vmul.f32 %v11818_v52, %v11818_v52  ;;  %v16341_v50 = vld [vmem:[#allocation7 + $0x1be4] ss:$48 sps:$4 sm:$0xff]   ;;  %v16339_v41 = vld [vmem:[#allocation7 + $0x1be0] ss:$48 sps:$4 sm:$0xff]   ;;  %v16342_v47 = vld [vmem:[#allocation7 + $0x1be8] ss:$48 sps:$4 sm:$0xff]  }
 0x46c   :  { %11946 = vadd.xlane.f32.xlu1 %v11945_v53  ;;  %v11950_v39 = vadd.f32 %v11949_v42, %v11874_v59  ;;  %11187 = vmatprep.subr.bf16.mxu1 %v16314_v27  ;;  %v11955_v16 = vadd.f32 %v11954_v3, %v11878_v13  ;;  %v16344_v59 = vld [vmem:[#allocation7 + $0x1bec] ss:$48 sps:$4 sm:$0xff]   ;;  %v16347_v12 = vld [vmem:[#allocation7 + $0x1c44] ss:$48 sps:$4 sm:$0xff]   ;;  %v16348_v44 = vld [vmem:[#allocation7 + $0x1c48] ss:$48 sps:$4 sm:$0xff]  }
 0x46d   :  { %10448 = vmatprep.mubr.bf16.mxu0 %v18231_v4  ;;  %11126 = vmatprep.mubr.bf16.mxu1 %v18231_v4  ;;  %v11959_v0 = vadd.f32 %v11958_v6, %v11881_v2  ;;  %v16324_v4 = vld [vmem:[#allocation7 + $0x1ac8] ss:$48 sps:$4 sm:$0xff]   ;;  %v16353_v40 = vld [vmem:[#allocation7 + $0x1ca4] ss:$48 sps:$4 sm:$0xff]   ;;  %v16356_v46 = vld [vmem:[#allocation7 + $0x1cac] ss:$48 sps:$4 sm:$0xff]  }
 0x46e   :  { %11951 = vadd.xlane.f32.xlu0 %v11950_v39  ;;  %10510 = vmatpush1.bf16.msra.mxu0 %v16309_v15  ;;  %v16351_v36 = vld [vmem:[#allocation7 + $0x1ca0] ss:$48 sps:$4 sm:$0xff]   ;;  %v16354_v51 = vld [vmem:[#allocation7 + $0x1ca8] ss:$48 sps:$4 sm:$0xff]   ;;  %v16359_v30 = vld [vmem:[#allocation7 + $0x1d04] ss:$48 sps:$4 sm:$0xff]  }
 0x46f   :  { %11188 = vmatpush1.bf16.msra.mxu1 %v16312_v26  ;;  %10511 = vmatprep.subr.bf16.mxu0 %v16317_v49  ;;  %v11960_v25 = vadd.f32 %v11959_v0, %v11882_v18  ;;  %v16360_v48 = vld [vmem:[#allocation7 + $0x1d08] ss:$48 sps:$4 sm:$0xff]   ;;  %v16365_v62 = vld [vmem:[#allocation7 + $0x1d64] ss:$48 sps:$4 sm:$0xff]   ;;  %v16368_v43 = vld [vmem:[#allocation7 + $0x1d6c] ss:$48 sps:$4 sm:$0xff]  }
 0x470   :  { %10449 = vmatmul.mubr.bf16.gmra.mrb[76].mxu0 %v18232_v20  ;;  %11189 = vmatprep.subr.bf16.mxu1 %v16320_v28  ;;  %v16363_v37 = vld [vmem:[#allocation7 + $0x1d60] ss:$48 sps:$4 sm:$0xff]   ;;  %v16366_v10 = vld [vmem:[#allocation7 + $0x1d68] ss:$48 sps:$4 sm:$0xff]   ;;  %v16371_v27 = vld [vmem:[#allocation7 + $0x1dc4] ss:$48 sps:$4 sm:$0xff]  }
 0x471   :  { %11127 = vmatmul.mubr.bf16.gmra.mrb[76].mxu1 %v18232_v20  ;;  %11956 = vadd.xlane.f32.xlu1 %v11955_v16  ;;  %v16335_v20 = vld [vmem:[#allocation7 + $0x1b84] ss:$48 sps:$4 sm:$0xff]   ;;  %v16372_v13 = vld [vmem:[#allocation7 + $0x1dc8] ss:$48 sps:$4 sm:$0xff]   ;;  %v16380_v52 = vld [vmem:[#allocation7 + $0x1e2c] ss:$48 sps:$4 sm:$0xff]  }
 0x472   :  { %10512 = vmatpush1.bf16.msra.mxu0 %v16315_v60  ;;  %11961 = vadd.xlane.f32.xlu0 %v11960_v25  ;;  %v16377_v1 = vld [vmem:[#allocation7 + $0x1e24] ss:$48 sps:$4 sm:$0xff]   ;;  %v16375_v53 = vld [vmem:[#allocation7 + $0x1e20] ss:$48 sps:$4 sm:$0xff]   ;;  %v16378_v42 = vld [vmem:[#allocation7 + $0x1e28] ss:$48 sps:$4 sm:$0xff]  }
 0x473   :  { %11190 = vmatpush1.bf16.msra.mxu1 %v16318_v8  ;;  %10513 = vmatprep.subr.bf16.mxu0 %v16323_v17  ;;  %v16383_v15 = vld [vmem:[#allocation7 + $0x1e84] ss:$48 sps:$4 sm:$0xff]   ;;  %v16384_v3 = vld [vmem:[#allocation7 + $0x1e88] ss:$48 sps:$4 sm:$0xff]   ;;  %v16392_v6 = vld [vmem:[#allocation7 + $0x1eec] ss:$48 sps:$4 sm:$0xff]  }
 0x474   :  { %11191 = vmatprep.subr.bf16.mxu1 %v16326_v7  ;;  %10458 = vmatprep.mubr.bf16.mxu0 %v18233_v22  ;;  %v16389_v2 = vld [vmem:[#allocation7 + $0x1ee4] ss:$48 sps:$4 sm:$0xff]   ;;  %v16387_v26 = vld [vmem:[#allocation7 + $0x1ee0] ss:$48 sps:$4 sm:$0xff]   ;;  %v16390_v49 = vld [vmem:[#allocation7 + $0x1ee8] ss:$48 sps:$4 sm:$0xff]  }
 0x475   :  { %11136 = vmatprep.mubr.bf16.mxu1 %v18233_v22  ;;  %v16336_v22 = vld [vmem:[#allocation7 + $0x1b88] ss:$48 sps:$4 sm:$0xff]   ;;  %v16395_v39 = vld [vmem:[#allocation7 + $0x1f44] ss:$48 sps:$4 sm:$0xff]   ;;  %v16393_v28 = vld [vmem:[#allocation7 + $0x1f40] ss:$48 sps:$4 sm:$0xff]  }
 0x476   :  { %10514 = vmatpush1.bf16.msra.mxu0 %v16321_v5  ;;  %v16396_v16 = vld [vmem:[#allocation7 + $0x1f48] ss:$48 sps:$4 sm:$0xff]   ;;  %v16401_v18 = vld [vmem:[#allocation7 + $0x1fa4] ss:$48 sps:$4 sm:$0xff]   ;;  %v16399_v0 = vld [vmem:[#allocation7 + $0x1fa0] ss:$48 sps:$4 sm:$0xff]  }
 0x477   :  { %11192 = vmatpush1.bf16.msra.mxu1 %v16324_v4  ;;  %10515 = vmatprep.subr.bf16.mxu0 %v16329_v54  ;;  %v16402_v60 = vld [vmem:[#allocation7 + $0x1fa8] ss:$48 sps:$4 sm:$0xff]   ;;  %v16407_v8 = vld [vmem:[#allocation7 + $0x2004] ss:$48 sps:$4 sm:$0xff]   ;;  %v16405_v25 = vld [vmem:[#allocation7 + $0x2000] ss:$48 sps:$4 sm:$0xff]  }
 0x478   :  { %10459 = vmatmul.mubr.bf16.gmra.mrb[80].mxu0 %v18234_v9  ;;  %11193 = vmatprep.subr.bf16.mxu1 %v16332_v14  ;;  %v16408_v17 = vld [vmem:[#allocation7 + $0x2008] ss:$48 sps:$4 sm:$0xff]   ;;  %v16413_v7 = vld [vmem:[#allocation7 + $0x2064] ss:$48 sps:$4 sm:$0xff]   ;;  %v16411_v5 = vld [vmem:[#allocation7 + $0x2060] ss:$48 sps:$4 sm:$0xff]  }
 0x479   :  { %11137 = vmatmul.mubr.bf16.gmra.mrb[80].mxu1 %v18234_v9  ;;  %10468 = vmatprep.mubr.bf16.mxu0 %v18235_v29  ;;  %v16350_v9 = vld [vmem:[#allocation7 + $0x1c4c] ss:$48 sps:$4 sm:$0xff]   ;;  %v16414_v4 = vld [vmem:[#allocation7 + $0x2068] ss:$48 sps:$4 sm:$0xff]   ;;  %v16419_v54 = vld [vmem:[#allocation7 + $0x20c4] ss:$48 sps:$4 sm:$0xff]  }
 0x47a   :  { %10516 = vmatpush1.bf16.msra.mxu0 %v16327_v34  ;;  %11146 = vmatprep.mubr.bf16.mxu1 %v18235_v29  ;;  %v16345_v29 = vld [vmem:[#allocation7 + $0x1c40] ss:$48 sps:$4 sm:$0xff]   ;;  %v16420_v34 = vld [vmem:[#allocation7 + $0x20c8] ss:$48 sps:$4 sm:$0xff]  }
 0x47b   :  { %11194 = vmatpush1.bf16.msra.mxu1 %v16330_v23  ;;  %10517 = vmatprep.subr.bf16.mxu0 %v16335_v20  ;;  %v16417_v14 = vld [vmem:[#allocation7 + $0x20c0] ss:$48 sps:$4 sm:$0xff]   ;;  %v16425_v23 = vld [vmem:[#allocation7 + $0x2124] ss:$48 sps:$4 sm:$0xff]  }
 0x47c   :  { %11195 = vmatprep.subr.bf16.mxu1 %v16338_v38  ;;  %v16423_v20 = vld [vmem:[#allocation7 + $0x2120] ss:$48 sps:$4 sm:$0xff]   ;;  %v16426_v38 = vld [vmem:[#allocation7 + $0x2128] ss:$48 sps:$4 sm:$0xff]  }
 0x47e   :  { %10518 = vmatpush1.bf16.msra.mxu0 %v16333_v57  ;;  %v16431_v57 = vld [vmem:[#allocation7 + $0x2184] ss:$48 sps:$4 sm:$0xff]  }
 0x47f   :  { %11196 = vmatpush1.bf16.msra.mxu1 %v16336_v22  ;;  %10519 = vmatprep.subr.bf16.mxu0 %v16341_v50  ;;  %v18308_v22 = vld [vmem:[#allocation74_spill] sm:$0xff]  ;;  %v16429_v50 = vld [vmem:[#allocation7 + $0x2180] ss:$48 sps:$4 sm:$0xff]  }
 0x480   :  { %10469 = vmatmul.mubr.bf16.gmra.mrb[84].mxu0 %v18236_v63  ;;  %11197 = vmatprep.subr.bf16.mxu1 %v16344_v59  ;;  %v16432_v59 = vld [vmem:[#allocation7 + $0x2188] ss:$48 sps:$4 sm:$0xff]  }
 0x481   :  { %11147 = vmatmul.mubr.bf16.gmra.mrb[84].mxu1 %v18236_v63  ;;  %10478 = vmatprep.mubr.bf16.mxu0 %v18237_v21  ;;  %v16362_v63 = vld [vmem:[#allocation7 + $0x1d0c] ss:$48 sps:$4 sm:$0xff]  }
 0x482   :  { %10520 = vmatpush1.bf16.msra.mxu0 %v16339_v41  ;;  %11156 = vmatprep.mubr.bf16.mxu1 %v18237_v21  ;;  %v16357_v21 = vld [vmem:[#allocation7 + $0x1d00] ss:$48 sps:$4 sm:$0xff]   ;;  %v16437_v41 = vld [vmem:[#allocation7 + $0x21e4] ss:$48 sps:$4 sm:$0xff]  }
 0x483   :  { %11198 = vmatpush1.bf16.msra.mxu1 %v16342_v47  ;;  %10521 = vmatprep.subr.bf16.mxu0 %v16347_v12  ;;  %v16440_v47 = vld [vmem:[#allocation7 + $0x21ec] ss:$48 sps:$4 sm:$0xff]   ;;  %v16435_v12 = vld [vmem:[#allocation7 + $0x21e0] ss:$48 sps:$4 sm:$0xff]  }
 0x484   :  { %11199 = vmatprep.subr.bf16.mxu1 %v16350_v9  ;;  %v16438_v9 = vld [vmem:[#allocation7 + $0x21e8] ss:$48 sps:$4 sm:$0xff]  }
 0x486   :  { %10522 = vmatpush1.bf16.msra.mxu0 %v16345_v29  ;;  %v16443_v29 = vld [vmem:[#allocation7 + $0x2244] ss:$48 sps:$4 sm:$0xff]  }
 0x487   :  { %11200 = vmatpush1.bf16.msra.mxu1 %v16348_v44  ;;  %10523 = vmatprep.subr.bf16.mxu0 %v16353_v40  ;;  %v16446_v44 = vld [vmem:[#allocation7 + $0x224c] ss:$48 sps:$4 sm:$0xff]  }
 0x488   :  { %10479 = vmatmul.mubr.bf16.gmra.mrb[88].mxu0 %v18238_v32  ;;  %11201 = vmatprep.subr.bf16.mxu1 %v16356_v46  ;;  %v18310_v40 = vld [vmem:[#allocation76_spill] sm:$0xff]  ;;  %v16441_v46 = vld [vmem:[#allocation7 + $0x2240] ss:$48 sps:$4 sm:$0xff]  }
 0x489   :  { %11157 = vmatmul.mubr.bf16.gmra.mrb[88].mxu1 %v18238_v32  ;;  %10488 = vmatprep.mubr.bf16.mxu0 %v18239_v45  ;;  %v16374_v32 = vld [vmem:[#allocation7 + $0x1dcc] ss:$48 sps:$4 sm:$0xff]  }
 0x48a   :  { %10524 = vmatpush1.bf16.msra.mxu0 %v16351_v36  ;;  %11166 = vmatprep.mubr.bf16.mxu1 %v18239_v45  ;;  %v16369_v45 = vld [vmem:[#allocation7 + $0x1dc0] ss:$48 sps:$4 sm:$0xff]   ;;  %v16444_v36 = vld [vmem:[#allocation7 + $0x2248] ss:$48 sps:$4 sm:$0xff]  }
 0x48b   :  { %11202 = vmatpush1.bf16.msra.mxu1 %v16354_v51  ;;  %10525 = vmatprep.subr.bf16.mxu0 %v16359_v30  ;;  %v16449_v51 = vld [vmem:[#allocation7 + $0x22a4] ss:$48 sps:$4 sm:$0xff]  }
 0x48c   :  { %11203 = vmatprep.subr.bf16.mxu1 %v16362_v63  ;;  %v18311_v30 = vld [vmem:[#allocation77_spill] sm:$0xff] }
 0x48d   :  { %v16452_v63 = vld [vmem:[#allocation7 + $0x22ac] ss:$48 sps:$4 sm:$0xff]  }
 0x48e   :  { %10526 = vmatpush1.bf16.msra.mxu0 %v16357_v21  ;;  %v16447_v21 = vld [vmem:[#allocation7 + $0x22a0] ss:$48 sps:$4 sm:$0xff]  }
 0x48f   :  { %11204 = vmatpush1.bf16.msra.mxu1 %v16360_v48  ;;  %10527 = vmatprep.subr.bf16.mxu0 %v16365_v62  ;;  %v16450_v48 = vld [vmem:[#allocation7 + $0x22a8] ss:$48 sps:$4 sm:$0xff]   ;;  %v16455_v62 = vld [vmem:[#allocation7 + $0x2304] ss:$48 sps:$4 sm:$0xff]  }
 0x490   :  { %10489 = vmatmul.mubr.bf16.gmra.mrb[92].mxu0 %v18240_v56  ;;  %11205 = vmatprep.subr.bf16.mxu1 %v16368_v43  ;;  %v16458_v43 = vld [vmem:[#allocation7 + $0x230c] ss:$48 sps:$4 sm:$0xff]  }
 0x491   :  { %11167 = vmatmul.mubr.bf16.gmra.mrb[92].mxu1 %v18240_v56  ;;  %10531 = vmatprep.mubr.bf16.mxu0 %v18241_v35  ;;  %v16386_v56 = vld [vmem:[#allocation7 + $0x1e8c] ss:$48 sps:$4 sm:$0xff]  }
 0x492   :  { %10528 = vmatpush1.bf16.msra.mxu0 %v16363_v37  ;;  %11209 = vmatprep.mubr.bf16.mxu1 %v18241_v35  ;;  %v16381_v35 = vld [vmem:[#allocation7 + $0x1e80] ss:$48 sps:$4 sm:$0xff]   ;;  %v18312_v37 = vld [vmem:[#allocation78_spill] sm:$0xff] }
 0x493   :  { %11206 = vmatpush1.bf16.msra.mxu1 %v16366_v10  ;;  %10529 = vmatprep.subr.bf16.mxu0 %v16371_v27  ;;  %v16453_v10 = vld [vmem:[#allocation7 + $0x2300] ss:$48 sps:$4 sm:$0xff]   ;;  %v16456_v27 = vld [vmem:[#allocation7 + $0x2308] ss:$48 sps:$4 sm:$0xff]  }
 0x494   :  { %11207 = vmatprep.subr.bf16.mxu1 %v16374_v32  ;;  %v16461_v32 = vld [vmem:[#allocation7 + $0x2364] ss:$48 sps:$4 sm:$0xff]  }
 0x496   :  { %10530 = vmatpush1.bf16.msra.mxu0 %v16369_v45  ;;  %v18313_v45 = vld [vmem:[#allocation79_spill] sm:$0xff] }
 0x497   :  { %11208 = vmatpush1.bf16.msra.mxu1 %v16372_v13  ;;  %10612 = vmatprep.subr.bf16.mxu0 %v16377_v1  ;;  %v16464_v13 = vld [vmem:[#allocation7 + $0x236c] ss:$48 sps:$4 sm:$0xff]   ;;  %v16459_v1 = vld [vmem:[#allocation7 + $0x2360] ss:$48 sps:$4 sm:$0xff]  }
 0x498   :  { %11290 = vmatprep.subr.bf16.mxu1 %v16380_v52  ;;  %v16462_v52 = vld [vmem:[#allocation7 + $0x2368] ss:$48 sps:$4 sm:$0xff]  }
 0x499   :  { %10532 = vmatmul.mubr.bf16.vlgmr.msra.gmra.mrb[64].mxu0 %v18242_v24 }
 0x49a   :  { %11210 = vmatmul.mubr.bf16.vlgmr.msra.gmra.mrb[64].mxu1 %v18242_v24  ;;  %10613 = vmatpush1.bf16.msra.mxu0 %v16375_v53  ;;  %v16398_v24 = vld [vmem:[#allocation7 + $0x1f4c] ss:$48 sps:$4 sm:$0xff]   ;;  %v16467_v53 = vld [vmem:[#allocation7 + $0x23c4] ss:$48 sps:$4 sm:$0xff]  }
 0x49b   :  { %11291 = vmatpush1.bf16.msra.mxu1 %v16378_v42  ;;  %10614 = vmatprep.subr.bf16.mxu0 %v16383_v15  ;;  %v16470_v42 = vld [vmem:[#allocation7 + $0x23cc] ss:$48 sps:$4 sm:$0xff]  }
 0x49c   :  { %11292 = vmatprep.subr.bf16.mxu1 %v16386_v56  ;;  %10541 = vmatprep.mubr.bf16.mxu0 %v18243_v55  ;;  %v18314_v15 = vld [vmem:[#allocation80_spill] sm:$0xff]  ;;  %v16465_v56 = vld [vmem:[#allocation7 + $0x23c0] ss:$48 sps:$4 sm:$0xff]  }
 0x49d   :  { %11219 = vmatprep.mubr.bf16.mxu1 %v18243_v55  ;;  %v16404_v55 = vld [vmem:[#allocation7 + $0x1fac] ss:$48 sps:$4 sm:$0xff]  }
 0x49e   :  { %10615 = vmatpush1.bf16.msra.mxu0 %v16381_v35  ;;  %v16468_v35 = vld [vmem:[#allocation7 + $0x23c8] ss:$48 sps:$4 sm:$0xff]  }
 0x49f   :  { %11293 = vmatpush1.bf16.msra.mxu1 %v16384_v3  ;;  %10616 = vmatprep.subr.bf16.mxu0 %v16389_v2  ;;  %v18315_v3 = vld [vmem:[#allocation81_spill] sm:$0xff]  ;;  %v18316_v2 = vld [vmem:[#allocation82_spill] sm:$0xff] }
 0x4a0   :  { %11294 = vmatprep.subr.bf16.mxu1 %v16392_v6  ;;  %v18317_v6 = vld [vmem:[#allocation83_spill] sm:$0xff] }
 0x4a1   :  { %10542 = vmatmul.mubr.bf16.gmra.mrb[68].mxu0 %v18244_v58 }
 0x4a2   :  { %11220 = vmatmul.mubr.bf16.gmra.mrb[68].mxu1 %v18244_v58  ;;  %10617 = vmatpush1.bf16.msra.mxu0 %v16387_v26  ;;  %v16410_v58 = vld [vmem:[#allocation7 + $0x200c] ss:$48 sps:$4 sm:$0xff]  }
 0x4a3   :  { %11295 = vmatpush1.bf16.msra.mxu1 %v16390_v49  ;;  %10618 = vmatprep.subr.bf16.mxu0 %v16395_v39  ;;  %v18318_v26 = vld [vmem:[#allocation84_spill] sm:$0xff]  ;;  %v18319_v49 = vld [vmem:[#allocation85_spill] sm:$0xff]  ;;  %v18320_v39 = vld [vmem:[#allocation86_spill] sm:$0xff] }
 0x4a4   :  { %11296 = vmatprep.subr.bf16.mxu1 %v16398_v24  ;;  %10551 = vmatprep.mubr.bf16.mxu0 %v18245_v61  ;;  %v18321_v24 = vld [vmem:[#allocation87_spill] sm:$0xff] }
 0x4a5   :  { %11229 = vmatprep.mubr.bf16.mxu1 %v18245_v61  ;;  %v16416_v61 = vld [vmem:[#allocation7 + $0x206c] ss:$48 sps:$4 sm:$0xff]  }
 0x4a6   :  { %10619 = vmatpush1.bf16.msra.mxu0 %v16393_v28  ;;  %v18322_v28 = vld [vmem:[#allocation88_spill] sm:$0xff] }
 0x4a7   :  { %11297 = vmatpush1.bf16.msra.mxu1 %v16396_v16  ;;  %10620 = vmatprep.subr.bf16.mxu0 %v16401_v18  ;;  %v18323_v16 = vld [vmem:[#allocation89_spill] sm:$0xff]  ;;  %v18324_v18 = vld [vmem:[#allocation90_spill] sm:$0xff] }
 0x4a8   :  { %11298 = vmatprep.subr.bf16.mxu1 %v16404_v55  ;;  %v18325_v55 = vld [vmem:[#allocation91_spill] sm:$0xff] }
 0x4a9   :  { %10552 = vmatmul.mubr.bf16.gmra.mrb[72].mxu0 %v18246_v11 }
 0x4aa   :  { %11230 = vmatmul.mubr.bf16.gmra.mrb[72].mxu1 %v18246_v11  ;;  %10621 = vmatpush1.bf16.msra.mxu0 %v16399_v0  ;;  %v16422_v11 = vld [vmem:[#allocation7 + $0x20cc] ss:$48 sps:$4 sm:$0xff]  }
 0x4ab   :  { %11299 = vmatpush1.bf16.msra.mxu1 %v16402_v60  ;;  %10622 = vmatprep.subr.bf16.mxu0 %v16407_v8  ;;  %v18326_v0 = vld [vmem:[#allocation92_spill] sm:$0xff]  ;;  %v18327_v60 = vld [vmem:[#allocation93_spill] sm:$0xff]  ;;  %v18328_v8 = vld [vmem:[#allocation94_spill] sm:$0xff] }
 0x4ac   :  { %11300 = vmatprep.subr.bf16.mxu1 %v16410_v58  ;;  %10561 = vmatprep.mubr.bf16.mxu0 %v18247_v31  ;;  %v18329_v58 = vld [vmem:[#allocation95_spill] sm:$0xff] }
 0x4ad   :  { %11239 = vmatprep.mubr.bf16.mxu1 %v18247_v31  ;;  %v16428_v31 = vld [vmem:[#allocation7 + $0x212c] ss:$48 sps:$4 sm:$0xff]  }
 0x4ae   :  { %10623 = vmatpush1.bf16.msra.mxu0 %v16405_v25  ;;  %v18330_v25 = vld [vmem:[#allocation96_spill] sm:$0xff] }
 0x4af   :  { %11301 = vmatpush1.bf16.msra.mxu1 %v16408_v17  ;;  %10624 = vmatprep.subr.bf16.mxu0 %v16413_v7  ;;  %v1512_v17 = vld [vmem:[#allocation8 + $0x8] sm:$0xf]  ;;  %v18331_v7 = vld [vmem:[#allocation97_spill] sm:$0xff] }
 0x4b0   :  { %11302 = vmatprep.subr.bf16.mxu1 %v16416_v61  ;;  %v18332_v61 = vsub.s32 0, %v18331_v7 }
 0x4b1   :  { %10562 = vmatmul.mubr.bf16.gmra.mrb[76].mxu0 %v18248_v33 }
 0x4b2   :  { %11240 = vmatmul.mubr.bf16.gmra.mrb[76].mxu1 %v18248_v33  ;;  %10625 = vmatpush1.bf16.msra.mxu0 %v16411_v5  ;;  %v16434_v33 = vld [vmem:[#allocation7 + $0x218c] ss:$48 sps:$4 sm:$0xff]   ;;  %v17759_v5 = vrot.slane %v1512_v17, %v18332_v61 }
 0x4b3   :  { %11303 = vmatpush1.bf16.msra.mxu1 %v16414_v4  ;;  %10626 = vmatprep.subr.bf16.mxu0 %v16419_v54  ;;  %v18333_v4 = vsub.s32 2, %v18331_v7 }
 0x4b4   :  { %11304 = vmatprep.subr.bf16.mxu1 %v16422_v11  ;;  %10571 = vmatprep.mubr.bf16.mxu0 %v18249_v19  ;;  %v18334_v11 = vsub.s32 1, %v18331_v7 }
 0x4b5   :  { %11249 = vmatprep.mubr.bf16.mxu1 %v18249_v19  ;;  %v18309_v19 = vld [vmem:[#allocation75_spill] sm:$0xff]  ;;  %v17763_v54 = vrot.slane %v1512_v17, %v18333_v4 }
 0x4b6   :  { %10627 = vmatpush1.bf16.msra.mxu0 %v16417_v14  ;;  %v17767_v14 = vrot.slane %v1512_v17, %v18334_v11 }
 0x4b7   :  { %11305 = vmatpush1.bf16.msra.mxu1 %v16420_v34  ;;  %10628 = vmatprep.subr.bf16.mxu0 %v16425_v23  ;;  %v18335_v34 = vsub.s32 3, %v18331_v7 }
 0x4b8   :  { %11306 = vmatprep.subr.bf16.mxu1 %v16428_v31 }
 0x4b9   :  { %10572 = vmatmul.mubr.bf16.gmra.mrb[80].mxu0 %v18308_v22  ;;  %v17771_v23 = vrot.slane %v1512_v17, %v18335_v34 }
 0x4ba   :  { %11250 = vmatmul.mubr.bf16.gmra.mrb[80].mxu1 %v18308_v22  ;;  %10629 = vmatpush1.bf16.msra.mxu0 %v16423_v20  ;;  %v11979_v20 = vld [vmem:[#allocation2 + $0x40] sm:$0xff] }
 0x4bb   :  { %11307 = vmatpush1.bf16.msra.mxu1 %v16426_v38  ;;  %10630 = vmatprep.subr.bf16.mxu0 %v16431_v57 }
 0x4bc   :  { %11308 = vmatprep.subr.bf16.mxu1 %v16434_v33  ;;  %10581 = vmatprep.mubr.bf16.mxu0 %v18309_v19  ;;  %v11981_v33 = vld [vmem:[#allocation2 + $0x50] sm:$0xff] }
 0x4bd   :  { %11259 = vmatprep.mubr.bf16.mxu1 %v18309_v19 }
 0x4be   :  { %10631 = vmatpush1.bf16.msra.mxu0 %v16429_v50  ;;  %v11980_v50 = vld [vmem:[#allocation2 + $0x48] sm:$0xff] }
 0x4bf   :  { %11309 = vmatpush1.bf16.msra.mxu1 %v16432_v59  ;;  %10632 = vmatprep.subr.bf16.mxu0 %v16437_v41 }
 0x4c0   :  { %11310 = vmatprep.subr.bf16.mxu1 %v16440_v47  ;;  %v11982_v47 = vld [vmem:[#allocation2 + $0x58] sm:$0xff] }
 0x4c1   :  { %10582 = vmatmul.mubr.bf16.gmra.mrb[84].mxu0 %v18310_v40 }
 0x4c2   :  { %11260 = vmatmul.mubr.bf16.gmra.mrb[84].mxu1 %v18310_v40  ;;  %10633 = vmatpush1.bf16.msra.mxu0 %v16435_v12 }
 0x4c3   :  { %11311 = vmatpush1.bf16.msra.mxu1 %v16438_v9  ;;  %10634 = vmatprep.subr.bf16.mxu0 %v16443_v29  ;;  %v11983_v9 = vld [vmem:[#allocation2 + $0xa0] sm:$0xff] }
 0x4c4   :  { %11312 = vmatprep.subr.bf16.mxu1 %v16446_v44  ;;  %10591 = vmatprep.mubr.bf16.mxu0 %v18311_v30 }
 0x4c5   :  { %11269 = vmatprep.mubr.bf16.mxu1 %v18311_v30 }
 0x4c6   :  { %10635 = vmatpush1.bf16.msra.mxu0 %v16441_v46 }
 0x4c7   :  { %11313 = vmatpush1.bf16.msra.mxu1 %v16444_v36  ;;  %10636 = vmatprep.subr.bf16.mxu0 %v16449_v51  ;;  %v11984_v51 = vld [vmem:[#allocation2 + $0xa8] sm:$0xff] }
 0x4c8   :  { %11314 = vmatprep.subr.bf16.mxu1 %v16452_v63 }
 0x4c9   :  { %10592 = vmatmul.mubr.bf16.gmra.mrb[88].mxu0 %v18312_v37 }
 0x4ca   :  { %11270 = vmatmul.mubr.bf16.gmra.mrb[88].mxu1 %v18312_v37  ;;  %10637 = vmatpush1.bf16.msra.mxu0 %v16447_v21 }
 0x4cb   :  { %11315 = vmatpush1.bf16.msra.mxu1 %v16450_v48  ;;  %10638 = vmatprep.subr.bf16.mxu0 %v16455_v62 }
 0x4cc   :  { %11316 = vmatprep.subr.bf16.mxu1 %v16458_v43  ;;  %10601 = vmatprep.mubr.bf16.mxu0 %v18313_v45 }
 0x4cd   :  { %11279 = vmatprep.mubr.bf16.mxu1 %v18313_v45 }
 0x4ce   :  { %10639 = vmatpush1.bf16.msra.mxu0 %v16453_v10 }
 0x4cf   :  { %11317 = vmatpush1.bf16.msra.mxu1 %v16456_v27  ;;  %10640 = vmatprep.subr.bf16.mxu0 %v16461_v32  ;;  %v11985_v32 = vld [vmem:[#allocation2 + $0xb0] sm:$0xff] }
 0x4d0   :  { %11318 = vmatprep.subr.bf16.mxu1 %v16464_v13 }
 0x4d1   :  { %10602 = vmatmul.mubr.bf16.gmra.mrb[92].mxu0 %v18314_v15 }
 0x4d2   :  { %11280 = vmatmul.mubr.bf16.gmra.mrb[92].mxu1 %v18314_v15  ;;  %10641 = vmatpush1.bf16.msra.mxu0 %v16459_v1  ;;  %v11986_v15 = vld [vmem:[#allocation2 + $0xb8] sm:$0xff] }
 0x4d3   :  { %11319 = vmatpush1.bf16.msra.mxu1 %v16462_v52  ;;  %10642 = vmatprep.subr.bf16.mxu0 %v16467_v53 }
 0x4d4   :  { %11320 = vmatprep.subr.bf16.mxu1 %v16470_v42  ;;  %10644 = vmatprep.mubr.bf16.mxu0 %v18315_v3 }
 0x4d5   :  { %11322 = vmatprep.mubr.bf16.mxu1 %v18315_v3 }
 0x4d6   :  { %10643 = vmatpush1.bf16.msra.mxu0 %v16465_v56 }
 0x4d7   :  { %11321 = vmatpush1.bf16.msra.mxu1 %v16468_v35  ;;  %v11987_v35 = vld [vmem:[#allocation2 + $0x100] sm:$0xff] }
 0x4d9   :  { %10645 = vmatmul.mubr.bf16.vlgmr.msra.gmra.mrb[64].mxu0 %v18316_v2 }
 0x4da   :  { %11323 = vmatmul.mubr.bf16.vlgmr.msra.gmra.mrb[64].mxu1 %v18316_v2  ;;  %10654 = vmatprep.mubr.bf16.mxu0 %v18317_v6 }
 0x4db   :  { %11332 = vmatprep.mubr.bf16.mxu1 %v18317_v6 }
 0x4e1   :  { %10655 = vmatmul.mubr.bf16.gmra.mrb[68].mxu0 %v18318_v26 }
 0x4e2   :  { %11333 = vmatmul.mubr.bf16.gmra.mrb[68].mxu1 %v18318_v26  ;;  %10664 = vmatprep.mubr.bf16.mxu0 %v18319_v49 }
 0x4e3   :  { %11342 = vmatprep.mubr.bf16.mxu1 %v18319_v49  ;;  %v11989_v49 = vld [vmem:[#allocation2 + $0x110] sm:$0xff] }
 0x4e9   :  { %10665 = vmatmul.mubr.bf16.gmra.mrb[72].mxu0 %v18320_v39 }
 0x4ea   :  { %11343 = vmatmul.mubr.bf16.gmra.mrb[72].mxu1 %v18320_v39  ;;  %10674 = vmatprep.mubr.bf16.mxu0 %v18321_v24 }
 0x4eb   :  { %11352 = vmatprep.mubr.bf16.mxu1 %v18321_v24  ;;  %v11988_v24 = vld [vmem:[#allocation2 + $0x108] sm:$0xff] }
 0x4f1   :  { %10675 = vmatmul.mubr.bf16.gmra.mrb[76].mxu0 %v18322_v28 }
 0x4f2   :  { %11353 = vmatmul.mubr.bf16.gmra.mrb[76].mxu1 %v18322_v28  ;;  %10684 = vmatprep.mubr.bf16.mxu0 %v18323_v16 }
 0x4f3   :  { %11362 = vmatprep.mubr.bf16.mxu1 %v18323_v16 }
 0x4f9   :  { %10685 = vmatmul.mubr.bf16.gmra.mrb[80].mxu0 %v18324_v18 }
 0x4fa   :  { %11363 = vmatmul.mubr.bf16.gmra.mrb[80].mxu1 %v18324_v18  ;;  %10694 = vmatprep.mubr.bf16.mxu0 %v18325_v55 }
 0x4fb   :  { %11372 = vmatprep.mubr.bf16.mxu1 %v18325_v55 }
 0x501   :  { %10695 = vmatmul.mubr.bf16.gmra.mrb[84].mxu0 %v18326_v0 }
 0x502   :  { %11373 = vmatmul.mubr.bf16.gmra.mrb[84].mxu1 %v18326_v0  ;;  %10704 = vmatprep.mubr.bf16.mxu0 %v18327_v60  ;;  %v11990_v0 = vld [vmem:[#allocation2 + $0x118] sm:$0xff] }
 0x503   :  { %11382 = vmatprep.mubr.bf16.mxu1 %v18327_v60 }
 0x509   :  { %10705 = vmatmul.mubr.bf16.gmra.mrb[88].mxu0 %v18328_v8 }
 0x50a   :  { %11383 = vmatmul.mubr.bf16.gmra.mrb[88].mxu1 %v18328_v8  ;;  %10714 = vmatprep.mubr.bf16.mxu0 %v18329_v58  ;;  %v11991_v8 = vld [vmem:[#allocation2 + $0x160] sm:$0xff] }
 0x50b   :  { %11392 = vmatprep.mubr.bf16.mxu1 %v18329_v58 }
 0x511   :  { %10715 = vmatmul.mubr.bf16.gmra.mrb[92].mxu0 %v18330_v25 }
 0x512   :  { %11393 = vmatmul.mubr.bf16.gmra.mrb[92].mxu1 %v18330_v25 }
 0x5ac   :  { %v10646_v31 = vpop.f32.mrb[64].mxu0 }
 0x5ad   :  { %v13710_v38 = vadd.f32 %v10646_v31, %v17759_v5  ;;  %v11324_v57 = vpop.f32.mrb[64].mxu1  ;;  %v10648_v22 = vpop.f32.mrb[65].mxu0  ;;  %v11992_v31 = vld [vmem:[#allocation2 + $0x168] sm:$0xff] }
 0x5ae   :  { %v13742_v59 = vadd.f32 %v11324_v57, %v17763_v54  ;;  %v13711_v41 = vadd.f32 %v10648_v22, %v17767_v14  ;;  %v11326_v19 = vpop.f32.mrb[65].mxu1  ;;  %v10650_v12 = vpop.f32.mrb[66].mxu0 }
 0x5af   :  { %v12043_v29 = vsub.f32 %v11979_v20, %v13710_v38  ;;  %v13743_v44 = vadd.f32 %v11326_v19, %v17771_v23  ;;  %v13712_v40 = vadd.f32 %v10650_v12, %v17759_v5  ;;  %v11328_v46 = vpop.f32.mrb[66].mxu1  ;;  %v10652_v36 = vpop.f32.mrb[67].mxu0 }
 0x5b0   :  { %v12045_v30 = vsub.f32 %v11981_v33, %v13742_v59  ;;  %v12044_v63 = vsub.f32 %v11980_v50, %v13711_v41  ;;  %v13713_v21 = vadd.f32 %v10652_v36, %v17767_v14  ;;  %v11330_v48 = vpop.f32.mrb[67].mxu1  ;;  %v13744_v10 = vadd.f32 %v11328_v46, %v17763_v54 }
 0x5b1   :  { %v12107_v62 = vmul.f32 %v12043_v29, %v12043_v29  ;;  %v12046_v43 = vsub.f32 %v11982_v47, %v13743_v44  ;;  %v12047_v37 = vsub.f32 %v11983_v9, %v13712_v40  ;;  %v13745_v1 = vadd.f32 %v11330_v48, %v17771_v23  ;;  %v11993_v9 = vld [vmem:[#allocation2 + $0x170] sm:$0xff]  ;;  %v11994_v44 = vld [vmem:[#allocation2 + $0x178] sm:$0xff]  ;;  %v11995_v48 = vld [vmem:[#allocation2 + $0x1c0] sm:$0xff] }
 0x5b2   :  { %v12108_v27 = vmul.f32 %v12044_v63, %v12044_v63  ;;  %v12048_v45 = vsub.f32 %v11984_v51, %v13713_v21  ;;  %v12109_v52 = vmul.f32 %v12045_v30, %v12045_v30  ;;  %v12049_v2 = vsub.f32 %v11985_v32, %v13744_v10 }
 0x5b3   :  { %v12111_v13 = vmul.f32 %v12047_v37, %v12047_v37  ;;  %v12110_v3 = vmul.f32 %v12046_v43, %v12046_v43  ;;  %v12050_v25 = vsub.f32 %v11986_v15, %v13745_v1  ;;  %v11996_v1 = vld [vmem:[#allocation2 + $0x1c8] sm:$0xff] }
 0x5b4   :  { %v12171_v53 = vadd.f32 %v12108_v27, %v12107_v62  ;;  %v12112_v42 = vmul.f32 %v12048_v45, %v12048_v45  ;;  %v10656_v56 = vpop.f32.mrb[68].mxu0  ;;  %v12113_v47 = vmul.f32 %v12049_v2, %v12049_v2  ;;  %v11997_v45 = vld [vmem:[#allocation2 + $0x1d0] sm:$0xff]  ;;  %v11999_v2 = vld [vmem:[#allocation2 + $0x220] sm:$0xff] }
 0x5b5   :  { %v13714_v6 = vadd.f32 %v10656_v56, %v17759_v5  ;;  %v11334_v26 = vpop.f32.mrb[68].mxu1  ;;  %v10658_v39 = vpop.f32.mrb[69].mxu0  ;;  %v12114_v40 = vmul.f32 %v12050_v25, %v12050_v25 }
 0x5b6   :  { %v12176_v28 = vadd.f32 %v12112_v42, %v12111_v13  ;;  %v13746_v16 = vadd.f32 %v11334_v26, %v17763_v54  ;;  %v13715_v18 = vadd.f32 %v10658_v39, %v17767_v14  ;;  %v11336_v55 = vpop.f32.mrb[69].mxu1  ;;  %v10660_v60 = vpop.f32.mrb[70].mxu0  ;;  %v12172_v58 = vadd.f32 %v12171_v53, %v12109_v52 }
 0x5b7   :  { %v12051_v17 = vsub.f32 %v11987_v35, %v13714_v6  ;;  %v13747_v61 = vadd.f32 %v11336_v55, %v17771_v23  ;;  %v13716_v4 = vadd.f32 %v10660_v60, %v17759_v5  ;;  %v11338_v11 = vpop.f32.mrb[70].mxu1  ;;  %v10662_v34 = vpop.f32.mrb[71].mxu0  ;;  %v11998_v35 = vld [vmem:[#allocation2 + $0x1d8] sm:$0xff] }
 0x5b8   :  { %v12053_v20 = vsub.f32 %v11989_v49, %v13746_v16  ;;  %v12052_v38 = vsub.f32 %v11988_v24, %v13715_v18  ;;  %v13748_v57 = vadd.f32 %v11338_v11, %v17763_v54  ;;  %v13717_v33 = vadd.f32 %v10662_v34, %v17767_v14  ;;  %v11340_v22 = vpop.f32.mrb[71].mxu1  ;;  %v12001_v34 = vld [vmem:[#allocation2 + $0x230] sm:$0xff] }
 0x5b9   :  { %v12115_v50 = vmul.f32 %v12051_v17, %v12051_v17  ;;  %v12054_v59 = vsub.f32 %v11990_v0, %v13747_v61  ;;  %v12055_v41 = vsub.f32 %v11991_v8, %v13716_v4  ;;  %v13749_v19 = vadd.f32 %v11340_v22, %v17771_v23 }
 0x5ba   :  { %v12116_v12 = vmul.f32 %v12052_v38, %v12052_v38  ;;  %v12056_v29 = vsub.f32 %v11992_v31, %v13717_v33  ;;  %v12173_v36 = vadd.f32 %v12172_v58, %v12110_v3  ;;  %v12117_v51 = vmul.f32 %v12053_v20, %v12053_v20  ;;  %v12002_v20 = vld [vmem:[#allocation2 + $0x238] sm:$0xff] }
 0x5bb   :  { %v12119_v46 = vmul.f32 %v12055_v41, %v12055_v41  ;;  %v12177_v62 = vadd.f32 %v12176_v28, %v12113_v47  ;;  %v12118_v43 = vmul.f32 %v12054_v59, %v12054_v59  ;;  %v12057_v37 = vsub.f32 %v11993_v9, %v13748_v57  ;;  %v12000_v28 = vld [vmem:[#allocation2 + $0x228] sm:$0xff] }
 0x5bc   :  { %v12181_v30 = vadd.f32 %v12116_v12, %v12115_v50  ;;  %v12120_v63 = vmul.f32 %v12056_v29, %v12056_v29  ;;  %v10666_v21 = vpop.f32.mrb[72].mxu0  ;;  %v12058_v10 = vsub.f32 %v11994_v44, %v13749_v19  ;;  %12174 = vadd.xlane.f32.xlu0 %v12173_v36  ;;  %v12003_v19 = vld [vmem:[#allocation2 + $0x280] sm:$0xff] }
 0x5bd   :  { %v13718_v27 = vadd.f32 %v10666_v21, %v17759_v5  ;;  %v11344_v32 = vpop.f32.mrb[72].mxu1  ;;  %v10668_v13 = vpop.f32.mrb[73].mxu0  ;;  %v12178_v42 = vadd.f32 %v12177_v62, %v12114_v40  ;;  %v12121_v4 = vmul.f32 %v12057_v37, %v12057_v37 }
 0x5be   :  { %v12186_v52 = vadd.f32 %v12120_v63, %v12119_v46  ;;  %v13750_v53 = vadd.f32 %v11344_v32, %v17763_v54  ;;  %v13719_v15 = vadd.f32 %v10668_v13, %v17767_v14  ;;  %v11346_v56 = vpop.f32.mrb[73].mxu1  ;;  %v10670_v3 = vpop.f32.mrb[74].mxu0  ;;  %v12182_v16 = vadd.f32 %v12181_v30, %v12117_v51  ;;  %v12005_v46 = vld [vmem:[#allocation2 + $0x290] sm:$0xff]  ;;  %v12004_v51 = vld [vmem:[#allocation2 + $0x288] sm:$0xff] }
 0x5bf   :  { %v12059_v6 = vsub.f32 %v11995_v48, %v13718_v27  ;;  %v13751_v26 = vadd.f32 %v11346_v56, %v17771_v23  ;;  %v13720_v49 = vadd.f32 %v10670_v3, %v17759_v5  ;;  %v11348_v39 = vpop.f32.mrb[74].mxu1  ;;  %v10672_v24 = vpop.f32.mrb[75].mxu0  ;;  %12179 = vadd.xlane.f32.xlu1 %v12178_v42  ;;  %v12122_v38 = vmul.f32 %v12058_v10, %v12058_v10  ;;  %v12007_v10 = vld [vmem:[#allocation2 + $0x2e0] sm:$0xff] }
 0x5c0   :  { %v12061_v18 = vsub.f32 %v11997_v45, %v13750_v53  ;;  %v12060_v55 = vsub.f32 %v11996_v1, %v13719_v15  ;;  %v13752_v0 = vadd.f32 %v11348_v39, %v17763_v54  ;;  %v13721_v60 = vadd.f32 %v10672_v24, %v17767_v14  ;;  %v11350_v8 = vpop.f32.mrb[75].mxu1 }
 0x5c1   :  { %v12123_v58 = vmul.f32 %v12059_v6, %v12059_v6  ;;  %v12062_v25 = vsub.f32 %v11998_v35, %v13751_v26  ;;  %v12063_v17 = vsub.f32 %v11999_v2, %v13720_v49  ;;  %v13753_v61 = vadd.f32 %v11350_v8, %v17771_v23 }
 0x5c2   :  { %v12124_v11 = vmul.f32 %v12060_v55, %v12060_v55  ;;  %v12064_v31 = vsub.f32 %v12000_v28, %v13721_v60  ;;  %v12183_v33 = vadd.f32 %v12182_v16, %v12118_v43  ;;  %v12125_v22 = vmul.f32 %v12061_v18, %v12061_v18  ;;  %v12006_v43 = vld [vmem:[#allocation2 + $0x298] sm:$0xff]  ;;  %v12009_v28 = vld [vmem:[#allocation2 + $0x2f0] sm:$0xff] }
 0x5c3   :  { %v12127_v57 = vmul.f32 %v12063_v17, %v12063_v17  ;;  %v12187_v47 = vadd.f32 %v12186_v52, %v12121_v4  ;;  %v12126_v12 = vmul.f32 %v12062_v25, %v12062_v25  ;;  %v12065_v9 = vsub.f32 %v12001_v34, %v13752_v0  ;;  %v12008_v52 = vld [vmem:[#allocation2 + $0x2e8] sm:$0xff]  ;;  %v12010_v18 = vld [vmem:[#allocation2 + $0x2f8] sm:$0xff] }
 0x5c4   :  { %v12191_v50 = vadd.f32 %v12124_v11, %v12123_v58  ;;  %v12128_v59 = vmul.f32 %v12064_v31, %v12064_v31  ;;  %v10676_v41 = vpop.f32.mrb[76].mxu0  ;;  %v12066_v29 = vsub.f32 %v12002_v20, %v13753_v61  ;;  %12184 = vadd.xlane.f32.xlu0 %v12183_v33  ;;  %v12011_v61 = vld [vmem:[#allocation2 + $0x340] sm:$0xff] }
 0x5c5   :  { %v13722_v44 = vadd.f32 %v10676_v41, %v17759_v5  ;;  %v11354_v40 = vpop.f32.mrb[76].mxu1  ;;  %v10678_v36 = vpop.f32.mrb[77].mxu0  ;;  %v12188_v21 = vadd.f32 %v12187_v47, %v12122_v38  ;;  %v12129_v39 = vmul.f32 %v12065_v9, %v12065_v9 }
 0x5c6   :  { %v12196_v30 = vadd.f32 %v12128_v59, %v12127_v57  ;;  %v13754_v63 = vadd.f32 %v11354_v40, %v17763_v54  ;;  %v13723_v48 = vadd.f32 %v10678_v36, %v17767_v14  ;;  %v11356_v62 = vpop.f32.mrb[77].mxu1  ;;  %v10680_v37 = vpop.f32.mrb[78].mxu0  ;;  %v12192_v53 = vadd.f32 %v12191_v50, %v12125_v22  ;;  %v12013_v57 = vld [vmem:[#allocation2 + $0x350] sm:$0xff]  ;;  %v12012_v22 = vld [vmem:[#allocation2 + $0x348] sm:$0xff] }
 0x5c7   :  { %v12067_v27 = vsub.f32 %v12003_v19, %v13722_v44  ;;  %v13755_v32 = vadd.f32 %v11356_v62, %v17771_v23  ;;  %v13724_v45 = vadd.f32 %v10680_v37, %v17759_v5  ;;  %v11358_v13 = vpop.f32.mrb[78].mxu1  ;;  %v10682_v1 = vpop.f32.mrb[79].mxu0  ;;  %12189 = vadd.xlane.f32.xlu1 %v12188_v21  ;;  %v12130_v55 = vmul.f32 %v12066_v29, %v12066_v29  ;;  %v12015_v29 = vld [vmem:[#allocation2 + $0x3a0] sm:$0xff] }
 0x5c8   :  { %v12069_v42 = vsub.f32 %v12005_v46, %v13754_v63  ;;  %v12068_v15 = vsub.f32 %v12004_v51, %v13723_v48  ;;  %v13756_v56 = vadd.f32 %v11358_v13, %v17763_v54  ;;  %v13725_v35 = vadd.f32 %v10682_v1, %v17767_v14  ;;  %v11360_v3 = vpop.f32.mrb[79].mxu1 }
 0x5c9   :  { %v12131_v2 = vmul.f32 %v12067_v27, %v12067_v27  ;;  %v12070_v6 = vsub.f32 %v12006_v43, %v13755_v32  ;;  %v12071_v26 = vsub.f32 %v12007_v10, %v13724_v45  ;;  %v13757_v49 = vadd.f32 %v11360_v3, %v17771_v23 }
 0x5ca   :  { %v12132_v24 = vmul.f32 %v12068_v15, %v12068_v15  ;;  %v12072_v16 = vsub.f32 %v12008_v52, %v13725_v35  ;;  %v12193_v60 = vadd.f32 %v12192_v53, %v12126_v12  ;;  %v12133_v8 = vmul.f32 %v12069_v42, %v12069_v42  ;;  %v12014_v12 = vld [vmem:[#allocation2 + $0x358] sm:$0xff]  ;;  %v12017_v52 = vld [vmem:[#allocation2 + $0x3b0] sm:$0xff] }
 0x5cb   :  { %v12135_v0 = vmul.f32 %v12071_v26, %v12071_v26  ;;  %v12197_v4 = vadd.f32 %v12196_v30, %v12129_v39  ;;  %v12134_v11 = vmul.f32 %v12070_v6, %v12070_v6  ;;  %v12073_v34 = vsub.f32 %v12009_v28, %v13756_v56  ;;  %v12016_v30 = vld [vmem:[#allocation2 + $0x3a8] sm:$0xff]  ;;  %v12018_v42 = vld [vmem:[#allocation2 + $0x3b8] sm:$0xff] }
 0x5cc   :  { %v12201_v58 = vadd.f32 %v12132_v24, %v12131_v2  ;;  %v12136_v25 = vmul.f32 %v12072_v16, %v12072_v16  ;;  %v10686_v17 = vpop.f32.mrb[80].mxu0  ;;  %v12074_v31 = vsub.f32 %v12010_v18, %v13757_v49  ;;  %12194 = vadd.xlane.f32.xlu0 %v12193_v60  ;;  %v12019_v49 = vld [vmem:[#allocation2 + $0x400] sm:$0xff] }
 0x5cd   :  { %v13726_v20 = vadd.f32 %v10686_v17, %v17759_v5  ;;  %v11364_v38 = vpop.f32.mrb[80].mxu1  ;;  %v10688_v33 = vpop.f32.mrb[81].mxu0  ;;  %v12198_v41 = vadd.f32 %v12197_v4, %v12130_v55  ;;  %v12137_v13 = vmul.f32 %v12073_v34, %v12073_v34 }
 0x5ce   :  { %v12206_v50 = vadd.f32 %v12136_v25, %v12135_v0  ;;  %v13758_v59 = vadd.f32 %v11364_v38, %v17763_v54  ;;  %v13727_v19 = vadd.f32 %v10688_v33, %v17767_v14  ;;  %v11366_v47 = vpop.f32.mrb[81].mxu1  ;;  %v10690_v9 = vpop.f32.mrb[82].mxu0  ;;  %v12202_v63 = vadd.f32 %v12201_v58, %v12133_v8  ;;  %v12021_v0 = vld [vmem:[#allocation2 + $0x410] sm:$0xff]  ;;  %v12020_v8 = vld [vmem:[#allocation2 + $0x408] sm:$0xff] }
 0x5cf   :  { %v12075_v44 = vsub.f32 %v12011_v61, %v13726_v20  ;;  %v13759_v40 = vadd.f32 %v11366_v47, %v17771_v23  ;;  %v13728_v46 = vadd.f32 %v10690_v9, %v17759_v5  ;;  %v11368_v36 = vpop.f32.mrb[82].mxu1  ;;  %v10692_v51 = vpop.f32.mrb[83].mxu0  ;;  %12199 = vadd.xlane.f32.xlu1 %v12198_v41  ;;  %v12138_v15 = vmul.f32 %v12074_v31, %v12074_v31  ;;  %v12023_v31 = vld [vmem:[#allocation2 + $0x460] sm:$0xff] }
 0x5d0   :  { %v12077_v21 = vsub.f32 %v12013_v57, %v13758_v59  ;;  %v12076_v48 = vsub.f32 %v12012_v22, %v13727_v19  ;;  %v13760_v62 = vadd.f32 %v11368_v36, %v17763_v54  ;;  %v13729_v43 = vadd.f32 %v10692_v51, %v17767_v14  ;;  %v11370_v37 = vpop.f32.mrb[83].mxu1 }
 0x5d1   :  { %v12139_v10 = vmul.f32 %v12075_v44, %v12075_v44  ;;  %v12078_v27 = vsub.f32 %v12014_v12, %v13759_v40  ;;  %v12079_v32 = vsub.f32 %v12015_v29, %v13728_v46  ;;  %v13761_v45 = vadd.f32 %v11370_v37, %v17771_v23 }
 0x5d2   :  { %v12140_v1 = vmul.f32 %v12076_v48, %v12076_v48  ;;  %v12080_v53 = vsub.f32 %v12016_v30, %v13729_v43  ;;  %v12203_v35 = vadd.f32 %v12202_v63, %v12134_v11  ;;  %v12141_v3 = vmul.f32 %v12077_v21, %v12077_v21  ;;  %v12022_v11 = vld [vmem:[#allocation2 + $0x418] sm:$0xff]  ;;  %v12025_v30 = vld [vmem:[#allocation2 + $0x470] sm:$0xff] }
 0x5d3   :  { %v12143_v56 = vmul.f32 %v12079_v32, %v12079_v32  ;;  %v12207_v39 = vadd.f32 %v12206_v50, %v12137_v13  ;;  %v12142_v24 = vmul.f32 %v12078_v27, %v12078_v27  ;;  %v12081_v28 = vsub.f32 %v12017_v52, %v13760_v62  ;;  %v12024_v50 = vld [vmem:[#allocation2 + $0x468] sm:$0xff]  ;;  %v12026_v21 = vld [vmem:[#allocation2 + $0x478] sm:$0xff] }
 0x5d4   :  { %v12211_v2 = vadd.f32 %v12140_v1, %v12139_v10  ;;  %v12144_v6 = vmul.f32 %v12080_v53, %v12080_v53  ;;  %v10696_v26 = vpop.f32.mrb[84].mxu0  ;;  %v12082_v16 = vsub.f32 %v12018_v42, %v13761_v45  ;;  %12204 = vadd.xlane.f32.xlu0 %v12203_v35  ;;  %v12027_v45 = vld [vmem:[#allocation2 + $0x4c0] sm:$0xff] }
 0x5d5   :  { %v13730_v18 = vadd.f32 %v10696_v26, %v17759_v5  ;;  %v11374_v55 = vpop.f32.mrb[84].mxu1  ;;  %v10698_v60 = vpop.f32.mrb[85].mxu0  ;;  %v12208_v17 = vadd.f32 %v12207_v39, %v12138_v15  ;;  %v12145_v36 = vmul.f32 %v12081_v28, %v12081_v28 }
 0x5d6   :  { %v12216_v58 = vadd.f32 %v12144_v6, %v12143_v56  ;;  %v13762_v25 = vadd.f32 %v11374_v55, %v17763_v54  ;;  %v13731_v61 = vadd.f32 %v10698_v60, %v17767_v14  ;;  %v11376_v4 = vpop.f32.mrb[85].mxu1  ;;  %v10700_v34 = vpop.f32.mrb[86].mxu0  ;;  %v12212_v59 = vadd.f32 %v12211_v2, %v12141_v3  ;;  %v12029_v56 = vld [vmem:[#allocation2 + $0x4d0] sm:$0xff]  ;;  %v12028_v3 = vld [vmem:[#allocation2 + $0x4c8] sm:$0xff] }
 0x5d7   :  { %v12083_v20 = vsub.f32 %v12019_v49, %v13730_v18  ;;  %v13763_v38 = vadd.f32 %v11376_v4, %v17771_v23  ;;  %v13732_v57 = vadd.f32 %v10700_v34, %v17759_v5  ;;  %v11378_v33 = vpop.f32.mrb[86].mxu1  ;;  %v10702_v22 = vpop.f32.mrb[87].mxu0  ;;  %12209 = vadd.xlane.f32.xlu1 %v12208_v17  ;;  %v12146_v48 = vmul.f32 %v12082_v16, %v12082_v16  ;;  %v12031_v16 = vld [vmem:[#allocation2 + $0x520] sm:$0xff] }
 0x5d8   :  { %v12085_v41 = vsub.f32 %v12021_v0, %v13762_v25  ;;  %v12084_v19 = vsub.f32 %v12020_v8, %v13731_v61  ;;  %v13764_v47 = vadd.f32 %v11378_v33, %v17763_v54  ;;  %v13733_v12 = vadd.f32 %v10702_v22, %v17767_v14  ;;  %v11380_v9 = vpop.f32.mrb[87].mxu1 }
 0x5d9   :  { %v12147_v29 = vmul.f32 %v12083_v20, %v12083_v20  ;;  %v12086_v44 = vsub.f32 %v12022_v11, %v13763_v38  ;;  %v12087_v40 = vsub.f32 %v12023_v31, %v13732_v57  ;;  %v13765_v46 = vadd.f32 %v11380_v9, %v17771_v23 }
 0x5da   :  { %v12148_v51 = vmul.f32 %v12084_v19, %v12084_v19  ;;  %v12088_v63 = vsub.f32 %v12024_v50, %v13733_v12  ;;  %v12213_v43 = vadd.f32 %v12212_v59, %v12142_v24  ;;  %v12149_v37 = vmul.f32 %v12085_v41, %v12085_v41  ;;  %v12030_v24 = vld [vmem:[#allocation2 + $0x4d8] sm:$0xff]  ;;  %v12033_v50 = vld [vmem:[#allocation2 + $0x530] sm:$0xff] }
 0x5db   :  { %v12151_v62 = vmul.f32 %v12087_v40, %v12087_v40  ;;  %v12217_v13 = vadd.f32 %v12216_v58, %v12145_v36  ;;  %v12150_v1 = vmul.f32 %v12086_v44, %v12086_v44  ;;  %v12089_v52 = vsub.f32 %v12025_v30, %v13764_v47  ;;  %v12032_v58 = vld [vmem:[#allocation2 + $0x528] sm:$0xff]  ;;  %v12034_v41 = vld [vmem:[#allocation2 + $0x538] sm:$0xff] }
 0x5dc   :  { %v12221_v10 = vadd.f32 %v12148_v51, %v12147_v29  ;;  %v12152_v27 = vmul.f32 %v12088_v63, %v12088_v63  ;;  %v10706_v32 = vpop.f32.mrb[88].mxu0  ;;  %v12090_v53 = vsub.f32 %v12026_v21, %v13765_v46  ;;  %12214 = vadd.xlane.f32.xlu0 %v12213_v43  ;;  %v12035_v46 = vld [vmem:[#allocation2 + $0x580] sm:$0xff] }
 0x5dd   :  { %v13734_v42 = vadd.f32 %v10706_v32, %v17759_v5  ;;  %v11384_v15 = vpop.f32.mrb[88].mxu1  ;;  %v10708_v35 = vpop.f32.mrb[89].mxu0  ;;  %v12218_v26 = vadd.f32 %v12217_v13, %v12146_v48  ;;  %v12153_v33 = vmul.f32 %v12089_v52, %v12089_v52 }
 0x5de   :  { %v12226_v2 = vadd.f32 %v12152_v27, %v12151_v62  ;;  %v13766_v6 = vadd.f32 %v11384_v15, %v17763_v54  ;;  %v13735_v49 = vadd.f32 %v10708_v35, %v17767_v14  ;;  %v11386_v39 = vpop.f32.mrb[89].mxu1  ;;  %v10710_v28 = vpop.f32.mrb[90].mxu0  ;;  %v12222_v25 = vadd.f32 %v12221_v10, %v12149_v37  ;;  %v12037_v62 = vld [vmem:[#allocation2 + $0x590] sm:$0xff]  ;;  %v12036_v37 = vld [vmem:[#allocation2 + $0x588] sm:$0xff] }
 0x5df   :  { %v12091_v18 = vsub.f32 %v12027_v45, %v13734_v42  ;;  %v13767_v55 = vadd.f32 %v11386_v39, %v17771_v23  ;;  %v13736_v0 = vadd.f32 %v10710_v28, %v17759_v5  ;;  %v11388_v60 = vpop.f32.mrb[90].mxu1  ;;  %v10712_v8 = vpop.f32.mrb[91].mxu0  ;;  %12219 = vadd.xlane.f32.xlu1 %v12218_v26  ;;  %v12154_v19 = vmul.f32 %v12090_v53, %v12090_v53  ;;  %v12039_v53 = vld [vmem:[#allocation2 + $0x5e0] sm:$0xff] }
 0x5e0   :  { %v12093_v17 = vsub.f32 %v12029_v56, %v13766_v6  ;;  %v12092_v61 = vsub.f32 %v12028_v3, %v13735_v49  ;;  %v13768_v4 = vadd.f32 %v11388_v60, %v17763_v54  ;;  %v13737_v11 = vadd.f32 %v10712_v8, %v17767_v14  ;;  %v11390_v34 = vpop.f32.mrb[91].mxu1  ;;  %v12041_v3 = vld [vmem:[#allocation2 + $0x5f0] sm:$0xff]  ;;  %v12040_v6 = vld [vmem:[#allocation2 + $0x5e8] sm:$0xff]  ;;  %v12042_v8 = vld [vmem:[#allocation2 + $0x5f8] sm:$0xff] }
 0x5e1   :  { %v12155_v31 = vmul.f32 %v12091_v18, %v12091_v18  ;;  %v12094_v20 = vsub.f32 %v12030_v24, %v13767_v55  ;;  %v12095_v38 = vsub.f32 %v12031_v16, %v13736_v0  ;;  %v13769_v57 = vadd.f32 %v11390_v34, %v17771_v23 }
 0x5e2   :  { %v12156_v22 = vmul.f32 %v12092_v61, %v12092_v61  ;;  %v12096_v59 = vsub.f32 %v12032_v58, %v13737_v11  ;;  %v12223_v12 = vadd.f32 %v12222_v25, %v12150_v1  ;;  %v12157_v9 = vmul.f32 %v12093_v17, %v12093_v17  ;;  %v12038_v1 = vld [vmem:[#allocation2 + $0x598] sm:$0xff] }
 0x5e3   :  { %v12159_v47 = vmul.f32 %v12095_v38, %v12095_v38  ;;  %v12227_v36 = vadd.f32 %v12226_v2, %v12153_v33  ;;  %v12158_v51 = vmul.f32 %v12094_v20, %v12094_v20  ;;  %v12097_v30 = vsub.f32 %v12033_v50, %v13768_v4 }
 0x5e4   :  { %v12231_v29 = vadd.f32 %v12156_v22, %v12155_v31  ;;  %v12160_v44 = vmul.f32 %v12096_v59, %v12096_v59  ;;  %v10716_v40 = vpop.f32.mrb[92].mxu0  ;;  %v12098_v63 = vsub.f32 %v12034_v41, %v13769_v57  ;;  %12224 = vadd.xlane.f32.xlu0 %v12223_v12  ;;  %v11599_v12 = vpop.xlane.xlu0 %11598 }
 0x5e5   :  { %v13738_v21 = vadd.f32 %v10716_v40, %v17759_v5  ;;  %v11394_v48 = vpop.f32.mrb[92].mxu1  ;;  %v10718_v43 = vpop.f32.mrb[93].mxu0  ;;  %v12228_v32 = vadd.f32 %v12227_v36, %v12154_v19 }
 0x5e6   :  { %v12236_v10 = vadd.f32 %v12160_v44, %v12159_v47  ;;  %v13770_v27 = vadd.f32 %v11394_v48, %v17763_v54  ;;  %v13739_v45 = vadd.f32 %v10718_v43, %v17767_v14  ;;  %v11396_v13 = vpop.f32.mrb[93].mxu1  ;;  %v10720_v52 = vpop.f32.mrb[94].mxu0  ;;  %v12232_v26 = vadd.f32 %v12231_v29, %v12157_v9 }
 0x5e7   :  { %v12099_v42 = vsub.f32 %v12035_v46, %v13738_v21  ;;  %v13771_v15 = vadd.f32 %v11396_v13, %v17771_v23  ;;  %v13740_v56 = vadd.f32 %v10720_v52, %v17759_v5  ;;  %v11398_v35 = vpop.f32.mrb[94].mxu1  ;;  %v10722_v2 = vpop.f32.mrb[95].mxu0  ;;  %12229 = vadd.xlane.f32.xlu1 %v12228_v32  ;;  %v12161_v5 = vmul.f32 %v12097_v30, %v12097_v30 }
 0x5e8   :  { %v12101_v49 = vsub.f32 %v12037_v62, %v13770_v27  ;;  %v12100_v39 = vsub.f32 %v12036_v37, %v13739_v45  ;;  %v13772_v24 = vadd.f32 %v11398_v35, %v17763_v54  ;;  %v13741_v28 = vadd.f32 %v10722_v2, %v17767_v14  ;;  %v11400_v16 = vpop.f32.mrb[95].mxu1  ;;  %v17837_v47 = vpop.xlane.xlu1 %11623 }
 0x5e9   :  { %v12163_v18 = vmul.f32 %v12099_v42, %v12099_v42  ;;  %v12102_v55 = vsub.f32 %v12038_v1, %v13771_v15  ;;  %v12103_v0 = vsub.f32 %v12039_v53, %v13740_v56  ;;  %v13773_v60 = vadd.f32 %v11400_v16, %v17771_v23  ;;  %v11604_v29 = vpop.xlane.xlu0 %11603 }
 0x5ea   :  { %v12164_v58 = vmul.f32 %v12100_v39, %v12100_v39  ;;  %v12105_v25 = vsub.f32 %v12041_v3, %v13772_v24  ;;  %v12104_v17 = vsub.f32 %v12040_v6, %v13741_v28  ;;  %v12162_v61 = vmul.f32 %v12098_v63, %v12098_v63 }
 0x5eb   :  { %v12165_v4 = vmul.f32 %v12101_v49, %v12101_v49  ;;  %v12167_v11 = vmul.f32 %v12103_v0, %v12103_v0  ;;  %v12233_v34 = vadd.f32 %v12232_v26, %v12158_v51  ;;  %v12106_v54 = vsub.f32 %v12042_v8, %v13773_v60 }
 0x5ec   :  { %v12241_v31 = vadd.f32 %v12164_v58, %v12163_v18  ;;  %v12168_v20 = vmul.f32 %v12104_v17, %v12104_v17  ;;  %v12237_v38 = vadd.f32 %v12236_v10, %v12161_v5  ;;  %v12166_v14 = vmul.f32 %v12102_v55, %v12102_v55  ;;  %v17839_v9 = vpop.xlane.xlu1 %11633 }
 0x5ed   :  { %12234 = vadd.xlane.f32.xlu0 %v12233_v34  ;;  %v12169_v57 = vmul.f32 %v12105_v25, %v12105_v25  ;;  %v12170_v23 = vmul.f32 %v12106_v54, %v12106_v54  ;;  %v11609_v46 = vpop.xlane.xlu0 %11608  ;;  %v18336_v49 = vlaneseq }
 0x5ee   :  { %v12246_v33 = vadd.f32 %v12168_v20, %v12167_v11  ;;  %v12238_v22 = vadd.f32 %v12237_v38, %v12162_v61  ;;  %v12242_v50 = vadd.f32 %v12241_v31, %v12165_v4 }
 0x5ef   :  { %v17874_v39 = vand.u32 127, %v18336_v49 }
 0x5f0   :  { %12239 = vadd.xlane.f32.xlu1 %v12238_v22  ;;  %v12243_v59 = vadd.f32 %v12242_v50, %v12166_v14  ;;  %v12247_v41 = vadd.f32 %v12246_v33, %v12169_v57  ;;  %v17841_v44 = vpop.xlane.xlu1 %11643 }
 0x5f1   :  { %v11614_v51 = vpop.xlane.xlu0 %11613  ;;  %v12306_v55 = vadd.s32 4294967288, %v17874_v39  ;;  %v12313_v8 = vadd.s32 4294967280, %v17874_v39  ;;  %v12320_v11 = vadd.s32 4294967272, %v17874_v39  ;;  %v12304_v54 = vsub.s32 %v17874_v39, %v18331_v7 }
 0x5f2   :  { %12244 = vadd.xlane.f32.xlu0 %v12243_v59  ;;  %v12248_v19 = vadd.f32 %v12247_v41, %v12170_v23  ;;  %v12327_v57 = vadd.s32 4294967264, %v17874_v39 }
 0x5f3   :  { %v12309_v61 = vsub.s32 %v12306_v55, %v18331_v7  ;;  %v12316_v34 = vsub.s32 %v12313_v8, %v18331_v7  ;;  %v12323_v22 = vsub.s32 %v12320_v11, %v18331_v7  ;;  %v12341_v55 = vadd.s32 4294967248, %v17874_v39 }
 0x5f4   :  { %12249 = vadd.xlane.f32.xlu1 %v12248_v19  ;;  %v17843_v40 = vpop.xlane.xlu1 %11653 }
 0x5f5   :  { %v11619_v21 = vpop.xlane.xlu0 %11618 }
 0x5f8   :  { %v17845_v36 = vpop.xlane.xlu1 %11663 }
 0x5f9   :  { %v17849_v48 = vpop.xlane.xlu0 %11628 }
 0x5fc   :  { %v17847_v30 = vpop.xlane.xlu1 %11673 }
 0x5fd   :  { %v17851_v43 = vpop.xlane.xlu0 %11638 }
 0x600   :  { %v11887_v63 = vpop.xlane.xlu1 %11886 }
 0x601   :  { %v17853_v10 = vpop.xlane.xlu0 %11648  ;;  %v11963_v18 = vadd.f32 %v11887_v63, %v11599_v12  ;;  %v12330_v12 = vsub.s32 %v12327_v57, %v18331_v7 }
 0x604   :  { %v11892_v62 = vpop.xlane.xlu1 %11891 }
 0x605   :  { %v17855_v27 = vpop.xlane.xlu0 %11658  ;;  %v11964_v28 = vadd.f32 %v11892_v62, %v11604_v29 }
 0x608   :  { %v11897_v37 = vpop.xlane.xlu1 %11896 }
 0x609   :  { %v17857_v45 = vpop.xlane.xlu0 %11668  ;;  %v11965_v60 = vadd.f32 %v11897_v37, %v11609_v46 }
 0x60c   :  { %v11902_v32 = vpop.xlane.xlu1 %11901 }
 0x60d   :  { %v11912_v1 = vpop.xlane.xlu0 %11911  ;;  %v11966_v17 = vadd.f32 %v11902_v32, %v11614_v51 }
 0x610   :  { %v11907_v13 = vpop.xlane.xlu1 %11906 }
 0x611   :  { %v11922_v53 = vpop.xlane.xlu0 %11921  ;;  %v11967_v23 = vadd.f32 %v11907_v13, %v11619_v21  ;;  %v11968_v21 = vadd.f32 %v11912_v1, %v17837_v47  ;;  %v12348_v47 = vadd.s32 4294967240, %v17874_v39 }
 0x612   :  { %v11970_v8 = vadd.f32 %v11922_v53, %v17839_v9  ;;  %v12369_v53 = vadd.s32 4294967216, %v17874_v39 }
 0x614   :  { %v11917_v52 = vpop.xlane.xlu1 %11916 }
 0x615   :  { %v17859_v15 = vpop.xlane.xlu0 %11931 }
 0x618   :  { %v11927_v42 = vpop.xlane.xlu1 %11926 }
 0x619   :  { %v17863_v35 = vpop.xlane.xlu0 %11941 }
 0x61c   :  { %v17861_v56 = vpop.xlane.xlu1 %11936 }
 0x61d   :  { %v17867_v2 = vpop.xlane.xlu0 %11951  ;;  %v11973_v9 = vadd.f32 %v17861_v56, %v17853_v10  ;;  %v11974_v10 = vadd.f32 %v17863_v35, %v17843_v40  ;;  %v12372_v56 = vsub.s32 %v12369_v53, %v18331_v7 }
 0x620   :  { %v17865_v3 = vpop.xlane.xlu1 %11946 }
 0x621   :  { %v17871_v26 = vpop.xlane.xlu0 %11961  ;;  %v11975_v40 = vadd.f32 %v17865_v3, %v17855_v27  ;;  %v12397_v3 = vadd.s32 4294967184, %v17874_v39 }
 0x624   :  { %v17869_v6 = vpop.xlane.xlu1 %11956 }
 0x625   :  { %v11977_v27 = vadd.f32 %v17869_v6, %v17857_v45 }
 0x649   :  { %v12175_v16 = vpop.xlane.xlu0 %12174 }
 0x64a   :  { %v12251_v5 = vadd.f32 %v12175_v16, %v11963_v18  ;;  %v12334_v16 = vadd.s32 4294967256, %v17874_v39 }
 0x64c   :  { %v12180_v24 = vpop.xlane.xlu1 %12179  ;;  %v12268_v38 = vmul.f32 0.0006510417, %v12251_v5 }
 0x64d   :  { %v12252_v0 = vadd.f32 %v12180_v24, %v11964_v28  ;;  %v11969_v28 = vadd.f32 %v11917_v52, %v17849_v48  ;;  %v12344_v48 = vsub.s32 %v12341_v55, %v18331_v7 }
 0x64e   :  { %v12305_v41 = vrot.slane %v12268_v38, %v12304_v54 }
 0x64f   :  { %v12269_v4 = vmul.f32 0.0006510417, %v12252_v0 }
 0x651   :  { %v12185_v58 = vpop.xlane.xlu0 %12184  ;;  %v12310_v33 = vrot.slane %v12269_v4, %v12309_v61  ;;  %v12355_v61 = vadd.s32 4294967232, %v17874_v39 }
 0x652   :  { %v12253_v25 = vadd.f32 %v12185_v58, %v11965_v60  ;;  %v11971_v58 = vadd.f32 %v11927_v42, %v17851_v43  ;;  %v12362_v43 = vadd.s32 4294967224, %v17874_v39 }
 0x653   :  { %v12312_v46 = vsel %vm12311_vm0, %v12310_v33, %v12305_v41 }
 0x654   :  { %v12270_v31 = vmul.f32 0.0006510417, %v12253_v25  ;;  %v12190_v20 = vpop.xlane.xlu1 %12189  ;;  %v12337_v25 = vsub.s32 %v12334_v16, %v18331_v7  ;;  %v11976_v16 = vadd.f32 %v17867_v2, %v17845_v36  ;;  %v11978_v36 = vadd.f32 %v17871_v26, %v17847_v30 }
 0x655   :  { %v12254_v14 = vadd.f32 %v12190_v20, %v11966_v17  ;;  %v12400_v2 = vsub.s32 %v12397_v3, %v18331_v7 }
 0x656   :  { %v12317_v59 = vrot.slane %v12270_v31, %v12316_v34  ;;  %v11972_v34 = vadd.f32 %v17859_v15, %v17841_v44  ;;  %v12351_v31 = vsub.s32 %v12348_v47, %v18331_v7  ;;  %v12365_v15 = vsub.s32 %v12362_v43, %v18331_v7 }
 0x657   :  { %v12271_v50 = vmul.f32 0.0006510417, %v12254_v14  ;;  %v12358_v14 = vsub.s32 %v12355_v61, %v18331_v7 }
 0x658   :  { %v12319_v63 = vsel %vm12318_vm1, %v12317_v59, %v12312_v46  ;;  %v12376_v59 = vadd.s32 4294967208, %v17874_v39 }
 0x659   :  { %v12195_v19 = vpop.xlane.xlu0 %12194  ;;  %v12324_v51 = vrot.slane %v12271_v50, %v12323_v22 }
 0x65a   :  { %v12255_v29 = vadd.f32 %v12195_v19, %v11967_v23 }
 0x65b   :  { %v12326_v32 = vsel %vm12325_vm2, %v12324_v51, %v12319_v63  ;;  %v12383_v51 = vadd.s32 4294967200, %v17874_v39 }
 0x65c   :  { %v12272_v62 = vmul.f32 0.0006510417, %v12255_v29  ;;  %v12200_v24 = vpop.xlane.xlu1 %12199 }
 0x65d   :  { %v12256_v18 = vadd.f32 %v12200_v24, %v11968_v21  ;;  %v12390_v21 = vadd.s32 4294967192, %v17874_v39 }
 0x65e   :  { %v12331_v37 = vrot.slane %v12272_v62, %v12330_v12  ;;  %v12379_v62 = vsub.s32 %v12376_v59, %v18331_v7 }
 0x65f   :  { %v12273_v17 = vmul.f32 0.0006510417, %v12256_v18 }
 0x660   :  { %v12333_v49 = vsel %vm12332_vm3, %v12331_v37, %v12326_v32 }
 0x661   :  { %v12205_v13 = vpop.xlane.xlu0 %12204  ;;  %v12338_v42 = vrot.slane %v12273_v17, %v12337_v25 }
 0x662   :  { %v12257_v0 = vadd.f32 %v12205_v13, %v11969_v28  ;;  %v12386_v13 = vsub.s32 %v12383_v51, %v18331_v7 }
 0x663   :  { %v12340_v22 = vsel %vm12339_vm4, %v12338_v42, %v12333_v49 }
 0x664   :  { %v12210_v60 = vpop.xlane.xlu1 %12209  ;;  %v12274_v52 = vmul.f32 0.0006510417, %v12257_v0 }
 0x665   :  { %v12258_v1 = vadd.f32 %v12210_v60, %v11970_v8  ;;  %v12404_v8 = vadd.s32 4294967176, %v17874_v39 }
 0x666   :  { %v12345_v38 = vrot.slane %v12274_v52, %v12344_v48 }
 0x667   :  { %v12275_v20 = vmul.f32 0.0006510417, %v12258_v1  ;;  %v12407_v48 = vsub.s32 %v12404_v8, %v18331_v7 }
 0x668   :  { %v12347_v19 = vsel %vm12346_vm5, %v12345_v38, %v12340_v22 }
 0x669   :  { %v12215_v5 = vpop.xlane.xlu0 %12214  ;;  %v12352_v50 = vrot.slane %v12275_v20, %v12351_v31 }
 0x66a   :  { %v12259_v4 = vadd.f32 %v12215_v5, %v11971_v58  ;;  %v12393_v58 = vsub.s32 %v12390_v21, %v18331_v7 }
 0x66b   :  { %v12354_v35 = vsel %vm12353_vm6, %v12352_v50, %v12347_v19 }
 0x66c   :  { %v12220_v11 = vpop.xlane.xlu1 %12219  ;;  %v12276_v57 = vmul.f32 0.0006510417, %v12259_v4 }
 0x66d   :  { %v12260_v54 = vadd.f32 %v12220_v11, %v11972_v34 }
 0x66e   :  { %v12359_v12 = vrot.slane %v12276_v57, %v12358_v14 }
 0x66f   :  { %v12277_v23 = vmul.f32 0.0006510417, %v12260_v54 }
 0x670   :  { %v12361_v32 = vsel %vm12360_vm7, %v12359_v12, %v12354_v35 }
 0x671   :  { %v12225_v33 = vpop.xlane.xlu0 %12224  ;;  %v12366_v63 = vrot.slane %v12277_v23, %v12365_v15 }
 0x672   :  { %v12261_v44 = vadd.f32 %v12225_v33, %v11973_v9 }
 0x673   :  { %v12368_v18 = vsel %vm12367_vm8, %v12366_v63, %v12361_v32 }
 0x674   :  { %v12230_v41 = vpop.xlane.xlu1 %12229  ;;  %v12278_v29 = vmul.f32 0.0006510417, %v12261_v44 }
 0x675   :  { %v12262_v46 = vadd.f32 %v12230_v41, %v11974_v10 }
 0x676   :  { %v12373_v49 = vrot.slane %v12278_v29, %v12372_v56 }
 0x677   :  { %v12279_v37 = vmul.f32 0.0006510417, %v12262_v46 }
 0x678   :  { %v12375_v5 = vsel %vm12374_vm9, %v12373_v49, %v12368_v18 }
 0x679   :  { %v12380_v55 = vrot.slane %v12279_v37, %v12379_v62 }
 0x67a   :  { %v12235_v24 = vpop.xlane.xlu0 %12234 }
 0x67b   :  { %v12263_v28 = vadd.f32 %v12235_v24, %v11975_v40  ;;  %v12382_v1 = vsel %vm12381_vm10, %v12380_v55, %v12375_v5 }
 0x67d   :  { %v12280_v0 = vmul.f32 0.0006510417, %v12263_v28  ;;  %v12240_v60 = vpop.xlane.xlu1 %12239 }
 0x67e   :  { %v12264_v25 = vadd.f32 %v12240_v60, %v11976_v16 }
 0x67f   :  { %v12387_v17 = vrot.slane %v12280_v0, %v12386_v13  ;;  %v12245_v47 = vpop.xlane.xlu0 %12244 }
 0x680   :  { %v12281_v45 = vmul.f32 0.0006510417, %v12264_v25  ;;  %v12265_v6 = vadd.f32 %v12245_v47, %v11977_v27 }
 0x681   :  { %v12250_v52 = vpop.xlane.xlu1 %12249  ;;  %v12389_v39 = vsel %vm12388_vm11, %v12387_v17, %v12382_v1 }
 0x682   :  { %v12394_v61 = vrot.slane %v12281_v45, %v12393_v58  ;;  %v12282_v4 = vmul.f32 0.0006510417, %v12265_v6  ;;  %v12266_v11 = vadd.f32 %v12250_v52, %v11978_v36 }
 0x684   :  { %v12401_v34 = vrot.slane %v12282_v4, %v12400_v2  ;;  %v12283_v9 = vmul.f32 0.0006510417, %v12266_v11  ;;  %v12396_v43 = vsel %vm12395_vm12, %v12394_v61, %v12389_v39 }
 0x686   :  { %v12408_v30 = vrot.slane %v12283_v9, %v12407_v48  ;;  %v12403_v26 = vsel %vm12402_vm13, %v12401_v34, %v12396_v43 }
 0x688   :  { %v12410_v53 = vsel %vm12409_vm14, %v12408_v30, %v12403_v26 }
 0x689   :  { %12412 = vst [vmem:[#allocation10] sm:$0x1] %v12410_v53 }
 0x68a   :  { %16571 = shalt.err (!%p16568_p8)
}
 0x68b   :  { %s16572_s16 = scalar_lea.hbm %s17942_s4, 16 }
 0x68c   :  { %p16573_p9 = scmp.ne.s32.totalorder %s17942_s4, %s16572_s16  ;;  %p16576_p10 = scmp.lt.u32.totalorder %s16572_s16, %s17942_s4 }
 0x68e   :  { %p16578_p11 = pnand %p16576_p10, %p16573_p9 }
 0x690   :  { %16581 = shalt.err (!%p16578_p11)
}
 0x691   :  { %12422 = dma.vmem_to_hbm [thread:$0]  %s12420_s12, 16, %s17942_s4, [#allocation4]  }
 0x692   :  { %16588 = dma.done.wait [#allocation4], 16  }
 0x693   :  { %16589 = vsyncadd [#allocation4], 4294967280 }
 0x694   :  { %12426 = vsyncpa [#allocation3], 1 }
 0x695   :  { %12427 = vsyncpa [#allocation6], 1 }
 0x696   :  { %12428 = vsyncpa [#allocation9], 1 }
 0x697   :  { %12429 = vsyncpa [#allocation4], 1 }

</bundles_post_ra>
